<compile_context>
chip_gen: v7x
topology: tpu7x:2x2x1
jax: 0.10.0
libtpu: 0.0.40
codegen_flags: <defaults>
</compile_context>

<pallas_src>
import jax
import jax.numpy as jnp
import numpy as np
from jax.experimental import pallas as pl
from jax.experimental.pallas import tpu as pltpu

# ---- model dims (from the PyTorch module; vocab sizes shrunk for a small run) ----
HIDDEN_LSTM = 125
HIDDEN_MLP = 100
POS_EMB_DIM = 25
WORD_EMB_DIM = 100
WORD_VOCAB = 64          # module uses 15948; shrunk (embedding lookup is glue)
POS_VOCAB = 47
SEQ_LEN = 8
TOGETHER = WORD_EMB_DIM + POS_EMB_DIM    # 125

# 128-lane padded sizes used inside the kernel
H_PAD = 128
MLP_PAD = 128
TOGETHER_PAD = 128


# ======================================================================
# Fused kernel: 2-layer biLSTM (batch=1) + pairwise tanh scorer
# ======================================================================
def parser_kernel(x_ref, wih0_ref, whh0_ref, b0_ref,
                  wih1_ref, whh1_ref, b1_ref,
                  mw1_ref, mb1_ref, mw2_ref, mb2_ref, w3_ref, b3_ref,
                  out_ref,
                  l0f_scr, l0b_scr, h1f_scr, h1b_scr):
    f32 = jnp.float32
    bf16 = jnp.bfloat16
    T = x_ref.shape[0]
    H = l0f_scr.shape[1]                      # padded hidden = 128

    def mxu(a, b):
        # bf16 operands, f32 accumulate
        return jnp.dot(a, b, preferred_element_type=f32)

    def lstm_cell(pre, c):
        # pre: (1, 4H) fused gate preactivations, PyTorch gate order (i, f, g, o)
        i = jax.nn.sigmoid(pre[:, 0 * H:1 * H])
        f = jax.nn.sigmoid(pre[:, 1 * H:2 * H])
        g = jnp.tanh(pre[:, 2 * H:3 * H])
        o = jax.nn.sigmoid(pre[:, 3 * H:4 * H])
        c_new = f * c + i * g
        h_new = o * jnp.tanh(c_new)
        return h_new, c_new

    def run_bilstm_layer(xp_f, xp_b, whh_ref, outf_scr, outb_scr):
        # xp_*: (T, 4H) hoisted input projections (bias already folded in).
        # Both directions are interleaved in one fully unrolled loop so their
        # independent matmul->sigmoid/tanh chains can overlap.
        h_f = jnp.zeros((1, H), f32)
        c_f = jnp.zeros((1, H), f32)
        h_b = jnp.zeros((1, H), f32)
        c_b = jnp.zeros((1, H), f32)
        for s in range(T):                    # static trip count -> fully unrolled
            tb = T - 1 - s
            pre_f = xp_f[s:s + 1, :] + mxu(h_f.astype(bf16), whh_ref[0])
            pre_b = xp_b[tb:tb + 1, :] + mxu(h_b.astype(bf16), whh_ref[1])
            h_f, c_f = lstm_cell(pre_f, c_f)
            h_b, c_b = lstm_cell(pre_b, c_b)
            outf_scr[s:s + 1, :] = h_f
            outb_scr[tb:tb + 1, :] = h_b

    # ---- layer 0: one fused (T,128)x(128,512) input projection per direction ----
    x = x_ref[...].astype(bf16)                                   # (T, 128)
    xp0_f = mxu(x, wih0_ref[0]) + b0_ref[0]                       # (T, 512)
    xp0_b = mxu(x, wih0_ref[1]) + b0_ref[1]
    run_bilstm_layer(xp0_f, xp0_b, whh0_ref, l0f_scr, l0b_scr)

    # ---- layer 1: input = lane-concat of layer-0 fwd/bwd outputs (T, 256) ----
    l0 = jnp.concatenate([l0f_scr[...], l0b_scr[...]], axis=1).astype(bf16)
    xp1_f = mxu(l0, wih1_ref[0]) + b1_ref[0]                      # (T, 512)
    xp1_b = mxu(l0, wih1_ref[1]) + b1_ref[1]
    run_bilstm_layer(xp1_f, xp1_b, whh1_ref, h1f_scr, h1b_scr)

    # ---- biaffine-style MLP scorer (padded hidden_MLP = 128 lanes) ----
    h1 = jnp.concatenate([h1f_scr[...], h1b_scr[...]], axis=1).astype(bf16)
    heads = mxu(h1, mw1_ref[...]) + mb1_ref[...]                  # (T, 128)
    mods = mxu(h1, mw2_ref[...]) + mb2_ref[...]                   # (T, 128)
    s3 = jnp.tanh(heads[:, None, :] + mods[None, :, :])           # (T, T, 128) clean tiles
    w3 = w3_ref[...].reshape(1, 1, H)
    scores = jnp.sum(s3 * w3, axis=-1) + b3_ref[0, 0]             # (T, T)
    rows = jax.lax.broadcasted_iota(jnp.int32, (T, T), 0)
    cols = jax.lax.broadcasted_iota(jnp.int32, (T, T), 1)
    out_ref[...] = jnp.where(rows == cols, -jnp.inf, scores)


# ======================================================================
# Wrappers (glue)
# ======================================================================
def parser_pallas_call(embeds_pad, kp):
    T = embeds_pad.shape[0]
    vm = pl.BlockSpec(memory_space=pltpu.MemorySpace.VMEM)
    sm = pl.BlockSpec(memory_space=pltpu.MemorySpace.SMEM)
    return pl.pallas_call(
        parser_kernel,
        out_shape=jax.ShapeDtypeStruct((T, T), jnp.float32),
        in_specs=[vm] * 12 + [sm],
        out_specs=vm,
        scratch_shapes=[pltpu.VMEM((T, H_PAD), jnp.float32) for _ in range(4)],
    )(embeds_pad,
      kp['wih0'], kp['whh0'], kp['b0'],
      kp['wih1'], kp['whh1'], kp['b1'],
      kp['mw1'], kp['mb1'], kp['mw2'], kp['mb2'],
      kp['w3'], kp['b3'])


@jax.jit
def dependency_parser_forward(word_idx, pos_idx, kparams):
    # TODO(synk): embedding gathers kept as JAX glue (table lookup, not the hot path)
    w_emb = jnp.take(kparams['word_emb'], word_idx[0], axis=0)    # (T, 100)
    p_emb = jnp.take(kparams['pos_emb'], pos_idx[0], axis=0)      # (T, 25)
    embeds = jnp.concatenate([w_emb, p_emb], axis=1)              # (T, 125)
    embeds = jnp.pad(embeds, ((0, 0), (0, TOGETHER_PAD - TOGETHER)))
    return parser_pallas_call(embeds, kparams)


# ======================================================================
# Parameter init (logical, unpadded) and kernel-layout preparation
# ======================================================================
def init_params(key):
    ks = jax.random.split(key, 14)

    def u(k, shape, scale=0.1):
        return jax.random.uniform(k, shape, jnp.float32, -scale, scale)

    H = HIDDEN_LSTM
    G = 4 * H
    return dict(
        word_emb=u(ks[0], (WORD_VOCAB, WORD_EMB_DIM), 0.5),
        pos_emb=u(ks[1], (POS_VOCAB, POS_EMB_DIM), 0.5),
        # nn.LSTM params, pre-transposed to (in, 4H), gate order (i, f, g, o);
        # biases are b_ih + b_hh summed.  Index 0 = forward dir, 1 = backward.
        wih0=u(ks[2], (2, TOGETHER, G)),
        whh0=u(ks[3], (2, H, G)),
        b0=u(ks[4], (2, 1, G)),
        wih1=u(ks[5], (2, 2 * H, G)),
        whh1=u(ks[6], (2, H, G)),
        b1=u(ks[7], (2, 1, G)),
        # layer1 / layer2: Linear(2H -> hidden_MLP), pre-transposed
        mw1=u(ks[8], (2 * H, HIDDEN_MLP)),
        mb1=u(ks[9], (1, HIDDEN_MLP)),
        mw2=u(ks[10], (2 * H, HIDDEN_MLP)),
        mb2=u(ks[11], (1, HIDDEN_MLP)),
        # layer3: Linear(hidden_MLP -> 1)
        w3=u(ks[12], (1, HIDDEN_MLP)),
        b3=u(ks[13], (1, 1)),
    )


def prepare_kernel_params(p):
    """Zero-pad every feature dim to 128 lanes, keep gates fused along 4*128,
    and pre-cast matmul weight operands to bf16 (f32 accumulate in-kernel)."""
    bf16 = jnp.bfloat16
    H, HP = HIDDEN_LSTM, H_PAD
    K, KP = HIDDEN_MLP, MLP_PAD

    def pad_axis(w, axis, new_size):
        pad = [(0, 0)] * w.ndim
        pad[axis] = (0, new_size - w.shape[axis])
        return jnp.pad(w, pad)

    def pad_gate_cols(w):
        # (..., rows, 4*H) -> (..., rows, 4*HP); zero-pad each gate block
        *lead, r, _ = w.shape
        w = w.reshape(*lead, r, 4, H)
        w = pad_axis(w, -1, HP)
        return w.reshape(*lead, r, 4 * HP)

    def split_pad_rows(w):
        # (..., 2H, cols) -> (..., 2*HP, cols); pad fwd/bwd halves separately
        wf = pad_axis(w[..., :H, :], -2, HP)
        wb = pad_axis(w[..., H:, :], -2, HP)
        return jnp.concatenate([wf, wb], axis=-2)

    return dict(
        word_emb=p['word_emb'],
        pos_emb=p['pos_emb'],
        wih0=pad_gate_cols(pad_axis(p['wih0'], -2, TOGETHER_PAD)).astype(bf16),  # (2,128,512)
        whh0=pad_gate_cols(pad_axis(p['whh0'], -2, HP)).astype(bf16),            # (2,128,512)
        b0=pad_gate_cols(p['b0']),                                               # (2,1,512) f32
        wih1=pad_gate_cols(split_pad_rows(p['wih1'])).astype(bf16),              # (2,256,512)
        whh1=pad_gate_cols(pad_axis(p['whh1'], -2, HP)).astype(bf16),            # (2,128,512)
        b1=pad_gate_cols(p['b1']),                                               # (2,1,512) f32
        mw1=pad_axis(split_pad_rows(p['mw1']), -1, KP).astype(bf16),             # (256,128)
        mb1=pad_axis(p['mb1'], -1, KP),                                          # (1,128) f32
        mw2=pad_axis(split_pad_rows(p['mw2']), -1, KP).astype(bf16),             # (256,128)
        mb2=pad_axis(p['mb2'], -1, KP),                                          # (1,128) f32
        w3=pad_axis(p['w3'], -1, KP),                                            # (1,128) f32
        b3=p['b3'],                                                              # (1,1)  f32
    )


# ======================================================================
# Pure-JAX reference (same math & matmul precision policy, no Pallas)
# ======================================================================
def _bdot(a, b):
    # Mixed-precision matmul policy shared with the kernel: bf16 operands, f32 accumulate.
    return jnp.dot(a.astype(jnp.bfloat16), b.astype(jnp.bfloat16),
                   preferred_element_type=jnp.float32)


def reference_forward(word_idx, pos_idx, p):
    H = HIDDEN_LSTM
    w_emb = p['word_emb'][word_idx[0]]
    p_emb = p['pos_emb'][pos_idx[0]]
    embeds = jnp.concatenate([w_emb, p_emb], axis=1)              # (T, 125)
    T = embeds.shape[0]

    def run_dir(xp, whh, reverse):
        h = jnp.zeros((1, H), jnp.float32)
        c = jnp.zeros((1, H), jnp.float32)
        outs = [None] * T
        order = range(T - 1, -1, -1) if reverse else range(T)
        for t in order:
            pre = xp[t:t + 1, :] + _bdot(h, whh)
            i = jax.nn.sigmoid(pre[:, 0:H])
            f = jax.nn.sigmoid(pre[:, H:2 * H])
            g = jnp.tanh(pre[:, 2 * H:3 * H])
            o = jax.nn.sigmoid(pre[:, 3 * H:4 * H])
            c = f * c + i * g
            h = o * jnp.tanh(c)
            outs[t] = h
        return jnp.concatenate(outs, axis=0)

    l0f = run_dir(_bdot(embeds, p['wih0'][0]) + p['b0'][0], p['whh0'][0], False)
    l0b = run_dir(_bdot(embeds, p['wih0'][1]) + p['b0'][1], p['whh0'][1], True)
    l0 = jnp.concatenate([l0f, l0b], axis=1)
    h1f = run_dir(_bdot(l0, p['wih1'][0]) + p['b1'][0], p['whh1'][0], False)
    h1b = run_dir(_bdot(l0, p['wih1'][1]) + p['b1'][1], p['whh1'][1], True)
    h1 = jnp.concatenate([h1f, h1b], axis=1)

    heads = _bdot(h1, p['mw1']) + p['mb1']
    mods = _bdot(h1, p['mw2']) + p['mb2']
    s = jnp.tanh(heads[:, None, :] + mods[None, :, :])
    scores = jnp.sum(s * p['w3'].reshape(1, 1, -1), axis=-1) + p['b3'][0, 0]
    return jnp.where(jnp.eye(T, dtype=bool), -jnp.inf, scores)


if __name__ == "__main__":
    key = jax.random.PRNGKey(0)
    kp_key, kw, kpos = jax.random.split(key, 3)
    params = init_params(kp_key)
    kparams = prepare_kernel_params(params)

    word_idx = jax.random.randint(kw, (1, SEQ_LEN), 0, WORD_VOCAB, dtype=jnp.int32)
    pos_idx = jax.random.randint(kpos, (1, SEQ_LEN), 0, POS_VOCAB, dtype=jnp.int32)

    scores = dependency_parser_forward(word_idx, pos_idx, kparams)
    scores = jax.block_until_ready(scores)

    ref = jax.block_until_ready(reference_forward(word_idx, pos_idx, params))
    s_np = np.asarray(scores)
    r_np = np.asarray(ref)
    assert s_np.shape == (SEQ_LEN, SEQ_LEN)
    assert np.all(np.isneginf(np.diag(s_np)))
    offdiag = ~np.eye(SEQ_LEN, dtype=bool)
    np.testing.assert_allclose(s_np[offdiag], r_np[offdiag], rtol=1e-3, atol=1e-3)

    print("KERNEL_OK")
</pallas_src>

<mosaic_0001>
module attributes {stable_mosaic.version = 11 : i64} {
  func.func @parser_kernel(%arg0: memref<8x128xf32, #tpu.memory_space<vmem>>, %arg1: memref<2x128x512xbf16, #tpu.memory_space<vmem>>, %arg2: memref<2x128x512xbf16, #tpu.memory_space<vmem>>, %arg3: memref<2x1x512xf32, #tpu.memory_space<vmem>>, %arg4: memref<2x256x512xbf16, #tpu.memory_space<vmem>>, %arg5: memref<2x128x512xbf16, #tpu.memory_space<vmem>>, %arg6: memref<2x1x512xf32, #tpu.memory_space<vmem>>, %arg7: memref<256x128xbf16, #tpu.memory_space<vmem>>, %arg8: memref<1x128xf32, #tpu.memory_space<vmem>>, %arg9: memref<256x128xbf16, #tpu.memory_space<vmem>>, %arg10: memref<1x128xf32, #tpu.memory_space<vmem>>, %arg11: memref<1x128xf32, #tpu.memory_space<vmem>>, %arg12: memref<1x1xf32, #tpu.memory_space<smem>>, %arg13: memref<8x8xf32, #tpu.memory_space<vmem>>, %arg14: memref<8x128xf32, #tpu.memory_space<vmem>>, %arg15: memref<8x128xf32, #tpu.memory_space<vmem>>, %arg16: memref<8x128xf32, #tpu.memory_space<vmem>>, %arg17: memref<8x128xf32, #tpu.memory_space<vmem>>) attributes {dimension_semantics = [], scalar_prefetch = 0 : i64, scratch_operands = 4 : i64, tpu.core_type = #tpu.core_type<tc>} {
    %c0 = arith.constant 0 : index
    %c0_0 = arith.constant 0 : index
    %0 = vector.load %arg0[%c0, %c0_0] : memref<8x128xf32, #tpu.memory_space<vmem>>, vector<8x128xf32>
    %1 = arith.truncf %0 : vector<8x128xf32> to vector<8x128xbf16>
    %c0_1 = arith.constant 0 : index
    %c0_2 = arith.constant 0 : index
    %c0_3 = arith.constant 0 : index
    %2 = vector.load %arg1[%c0_1, %c0_2, %c0_3] : memref<2x128x512xbf16, #tpu.memory_space<vmem>>, vector<1x128x512xbf16>
    %3 = vector.shape_cast %2 : vector<1x128x512xbf16> to vector<128x512xbf16>
    %cst = arith.constant dense<0.000000e+00> : vector<8x512xf32>
    %4 = tpu.matmul %1, %3, %cst {dimension_numbers = #tpu.dot_dimension_numbers<[1], [0], [0], [1], [0, 0, 1, 1], [], []>} : vector<8x128xbf16>, vector<128x512xbf16>, vector<8x512xf32> -> vector<8x512xf32>
    %c0_4 = arith.constant 0 : index
    %c0_5 = arith.constant 0 : index
    %c0_6 = arith.constant 0 : index
    %5 = vector.load %arg3[%c0_4, %c0_5, %c0_6] : memref<2x1x512xf32, #tpu.memory_space<vmem>>, vector<1x1x512xf32>
    %6 = vector.shape_cast %5 : vector<1x1x512xf32> to vector<1x512xf32>
    %7 = vector.broadcast %6 : vector<1x512xf32> to vector<8x512xf32>
    %8 = arith.addf %4, %7 : vector<8x512xf32>
    %c1 = arith.constant 1 : index
    %c0_7 = arith.constant 0 : index
    %c0_8 = arith.constant 0 : index
    %9 = vector.load %arg1[%c1, %c0_7, %c0_8] : memref<2x128x512xbf16, #tpu.memory_space<vmem>>, vector<1x128x512xbf16>
    %10 = vector.shape_cast %9 : vector<1x128x512xbf16> to vector<128x512xbf16>
    %cst_9 = arith.constant dense<0.000000e+00> : vector<8x512xf32>
    %11 = tpu.matmul %1, %10, %cst_9 {dimension_numbers = #tpu.dot_dimension_numbers<[1], [0], [0], [1], [0, 0, 1, 1], [], []>} : vector<8x128xbf16>, vector<128x512xbf16>, vector<8x512xf32> -> vector<8x512xf32>
    %c1_10 = arith.constant 1 : index
    %c0_11 = arith.constant 0 : index
    %c0_12 = arith.constant 0 : index
    %12 = vector.load %arg3[%c1_10, %c0_11, %c0_12] : memref<2x1x512xf32, #tpu.memory_space<vmem>>, vector<1x1x512xf32>
    %13 = vector.shape_cast %12 : vector<1x1x512xf32> to vector<1x512xf32>
    %14 = vector.broadcast %13 : vector<1x512xf32> to vector<8x512xf32>
    %15 = arith.addf %11, %14 : vector<8x512xf32>
    %cst_13 = arith.constant 0.000000e+00 : f32
    %16 = vector.broadcast %cst_13 : f32 to vector<1x128xf32>
    %cst_14 = arith.constant 0.000000e+00 : f32
    %17 = vector.broadcast %cst_14 : f32 to vector<1x128xf32>
    %cst_15 = arith.constant 0.000000e+00 : f32
    %18 = vector.broadcast %cst_15 : f32 to vector<1x128xf32>
    %cst_16 = arith.constant 0.000000e+00 : f32
    %19 = vector.broadcast %cst_16 : f32 to vector<1x128xf32>
    %20 = vector.extract_strided_slice %8 {offsets = [0, 0], sizes = [1, 512], strides = [1, 1]} : vector<8x512xf32> to vector<1x512xf32>
    %21 = arith.truncf %16 : vector<1x128xf32> to vector<1x128xbf16>
    %c0_17 = arith.constant 0 : index
    %c0_18 = arith.constant 0 : index
    %c0_19 = arith.constant 0 : index
    %22 = vector.load %arg2[%c0_17, %c0_18, %c0_19] : memref<2x128x512xbf16, #tpu.memory_space<vmem>>, vector<1x128x512xbf16>
    %23 = vector.shape_cast %22 : vector<1x128x512xbf16> to vector<128x512xbf16>
    %cst_20 = arith.constant dense<0.000000e+00> : vector<1x512xf32>
    %24 = tpu.matmul %21, %23, %cst_20 {dimension_numbers = #tpu.dot_dimension_numbers<[1], [0], [0], [1], [0, 0, 1, 1], [], []>} : vector<1x128xbf16>, vector<128x512xbf16>, vector<1x512xf32> -> vector<1x512xf32>
    %25 = arith.addf %20, %24 : vector<1x512xf32>
    %26 = vector.extract_strided_slice %15 {offsets = [7, 0], sizes = [1, 512], strides = [1, 1]} : vector<8x512xf32> to vector<1x512xf32>
    %27 = arith.truncf %18 : vector<1x128xf32> to vector<1x128xbf16>
    %c1_21 = arith.constant 1 : index
    %c0_22 = arith.constant 0 : index
    %c0_23 = arith.constant 0 : index
    %28 = vector.load %arg2[%c1_21, %c0_22, %c0_23] : memref<2x128x512xbf16, #tpu.memory_space<vmem>>, vector<1x128x512xbf16>
    %29 = vector.shape_cast %28 : vector<1x128x512xbf16> to vector<128x512xbf16>
    %cst_24 = arith.constant dense<0.000000e+00> : vector<1x512xf32>
    %30 = tpu.matmul %27, %29, %cst_24 {dimension_numbers = #tpu.dot_dimension_numbers<[1], [0], [0], [1], [0, 0, 1, 1], [], []>} : vector<1x128xbf16>, vector<128x512xbf16>, vector<1x512xf32> -> vector<1x512xf32>
    %31 = arith.addf %26, %30 : vector<1x512xf32>
    %32 = vector.extract_strided_slice %25 {offsets = [0, 0], sizes = [1, 128], strides = [1, 1]} : vector<1x512xf32> to vector<1x128xf32>
    %33 = arith.negf %32 : vector<1x128xf32>
    %34 = math.exp %33 : vector<1x128xf32>
    %cst_25 = arith.constant 1.000000e+00 : f32
    %35 = vector.broadcast %cst_25 : f32 to vector<1x128xf32>
    %36 = arith.addf %35, %34 : vector<1x128xf32>
    %37 = arith.divf %35, %36 : vector<1x128xf32>
    %38 = vector.extract_strided_slice %25 {offsets = [0, 128], sizes = [1, 128], strides = [1, 1]} : vector<1x512xf32> to vector<1x128xf32>
    %39 = arith.negf %38 : vector<1x128xf32>
    %40 = math.exp %39 : vector<1x128xf32>
    %cst_26 = arith.constant 1.000000e+00 : f32
    %41 = vector.broadcast %cst_26 : f32 to vector<1x128xf32>
    %42 = arith.addf %41, %40 : vector<1x128xf32>
    %43 = arith.divf %41, %42 : vector<1x128xf32>
    %44 = vector.extract_strided_slice %25 {offsets = [0, 256], sizes = [1, 128], strides = [1, 1]} : vector<1x512xf32> to vector<1x128xf32>
    %45 = math.tanh %44 : vector<1x128xf32>
    %46 = vector.extract_strided_slice %25 {offsets = [0, 384], sizes = [1, 128], strides = [1, 1]} : vector<1x512xf32> to vector<1x128xf32>
    %47 = arith.negf %46 : vector<1x128xf32>
    %48 = math.exp %47 : vector<1x128xf32>
    %cst_27 = arith.constant 1.000000e+00 : f32
    %49 = vector.broadcast %cst_27 : f32 to vector<1x128xf32>
    %50 = arith.addf %49, %48 : vector<1x128xf32>
    %51 = arith.divf %49, %50 : vector<1x128xf32>
    %52 = arith.mulf %43, %17 : vector<1x128xf32>
    %53 = arith.mulf %37, %45 : vector<1x128xf32>
    %54 = arith.addf %52, %53 : vector<1x128xf32>
    %55 = math.tanh %54 : vector<1x128xf32>
    %56 = arith.mulf %51, %55 : vector<1x128xf32>
    %57 = vector.extract_strided_slice %31 {offsets = [0, 0], sizes = [1, 128], strides = [1, 1]} : vector<1x512xf32> to vector<1x128xf32>
    %58 = arith.negf %57 : vector<1x128xf32>
    %59 = math.exp %58 : vector<1x128xf32>
    %cst_28 = arith.constant 1.000000e+00 : f32
    %60 = vector.broadcast %cst_28 : f32 to vector<1x128xf32>
    %61 = arith.addf %60, %59 : vector<1x128xf32>
    %62 = arith.divf %60, %61 : vector<1x128xf32>
    %63 = vector.extract_strided_slice %31 {offsets = [0, 128], sizes = [1, 128], strides = [1, 1]} : vector<1x512xf32> to vector<1x128xf32>
    %64 = arith.negf %63 : vector<1x128xf32>
    %65 = math.exp %64 : vector<1x128xf32>
    %cst_29 = arith.constant 1.000000e+00 : f32
    %66 = vector.broadcast %cst_29 : f32 to vector<1x128xf32>
    %67 = arith.addf %66, %65 : vector<1x128xf32>
    %68 = arith.divf %66, %67 : vector<1x128xf32>
    %69 = vector.extract_strided_slice %31 {offsets = [0, 256], sizes = [1, 128], strides = [1, 1]} : vector<1x512xf32> to vector<1x128xf32>
    %70 = math.tanh %69 : vector<1x128xf32>
    %71 = vector.extract_strided_slice %31 {offsets = [0, 384], sizes = [1, 128], strides = [1, 1]} : vector<1x512xf32> to vector<1x128xf32>
    %72 = arith.negf %71 : vector<1x128xf32>
    %73 = math.exp %72 : vector<1x128xf32>
    %cst_30 = arith.constant 1.000000e+00 : f32
    %74 = vector.broadcast %cst_30 : f32 to vector<1x128xf32>
    %75 = arith.addf %74, %73 : vector<1x128xf32>
    %76 = arith.divf %74, %75 : vector<1x128xf32>
    %77 = arith.mulf %68, %19 : vector<1x128xf32>
    %78 = arith.mulf %62, %70 : vector<1x128xf32>
    %79 = arith.addf %77, %78 : vector<1x128xf32>
    %80 = math.tanh %79 : vector<1x128xf32>
    %81 = arith.mulf %76, %80 : vector<1x128xf32>
    %c0_31 = arith.constant 0 : index
    %c0_32 = arith.constant 0 : index
    %82 = vector.load %arg14[%c0_31, %c0_32] : memref<8x128xf32, #tpu.memory_space<vmem>>, vector<1x128xf32>
    tpu.vector_store %arg14[%c0_31, %c0_32], %56 {strides = array<i32>} : memref<8x128xf32, #tpu.memory_space<vmem>>, vector<1x128xf32>,
    %c7 = arith.constant 7 : index
    %c0_33 = arith.constant 0 : index
    %83 = vector.load %arg15[%c7, %c0_33] : memref<8x128xf32, #tpu.memory_space<vmem>>, vector<1x128xf32>
    tpu.vector_store %arg15[%c7, %c0_33], %81 {strides = array<i32>} : memref<8x128xf32, #tpu.memory_space<vmem>>, vector<1x128xf32>,
    %84 = vector.extract_strided_slice %8 {offsets = [1, 0], sizes = [1, 512], strides = [1, 1]} : vector<8x512xf32> to vector<1x512xf32>
    %85 = arith.truncf %56 : vector<1x128xf32> to vector<1x128xbf16>
    %c0_34 = arith.constant 0 : index
    %c0_35 = arith.constant 0 : index
    %c0_36 = arith.constant 0 : index
    %86 = vector.load %arg2[%c0_34, %c0_35, %c0_36] : memref<2x128x512xbf16, #tpu.memory_space<vmem>>, vector<1x128x512xbf16>
    %87 = vector.shape_cast %86 : vector<1x128x512xbf16> to vector<128x512xbf16>
    %cst_37 = arith.constant dense<0.000000e+00> : vector<1x512xf32>
    %88 = tpu.matmul %85, %87, %cst_37 {dimension_numbers = #tpu.dot_dimension_numbers<[1], [0], [0], [1], [0, 0, 1, 1], [], []>} : vector<1x128xbf16>, vector<128x512xbf16>, vector<1x512xf32> -> vector<1x512xf32>
    %89 = arith.addf %84, %88 : vector<1x512xf32>
    %90 = vector.extract_strided_slice %15 {offsets = [6, 0], sizes = [1, 512], strides = [1, 1]} : vector<8x512xf32> to vector<1x512xf32>
    %91 = arith.truncf %81 : vector<1x128xf32> to vector<1x128xbf16>
    %c1_38 = arith.constant 1 : index
    %c0_39 = arith.constant 0 : index
    %c0_40 = arith.constant 0 : index
    %92 = vector.load %arg2[%c1_38, %c0_39, %c0_40] : memref<2x128x512xbf16, #tpu.memory_space<vmem>>, vector<1x128x512xbf16>
    %93 = vector.shape_cast %92 : vector<1x128x512xbf16> to vector<128x512xbf16>
    %cst_41 = arith.constant dense<0.000000e+00> : vector<1x512xf32>
    %94 = tpu.matmul %91, %93, %cst_41 {dimension_numbers = #tpu.dot_dimension_numbers<[1], [0], [0], [1], [0, 0, 1, 1], [], []>} : vector<1x128xbf16>, vector<128x512xbf16>, vector<1x512xf32> -> vector<1x512xf32>
    %95 = arith.addf %90, %94 : vector<1x512xf32>
    %96 = vector.extract_strided_slice %89 {offsets = [0, 0], sizes = [1, 128], strides = [1, 1]} : vector<1x512xf32> to vector<1x128xf32>
    %97 = arith.negf %96 : vector<1x128xf32>
    %98 = math.exp %97 : vector<1x128xf32>
    %cst_42 = arith.constant 1.000000e+00 : f32
    %99 = vector.broadcast %cst_42 : f32 to vector<1x128xf32>
    %100 = arith.addf %99, %98 : vector<1x128xf32>
    %101 = arith.divf %99, %100 : vector<1x128xf32>
    %102 = vector.extract_strided_slice %89 {offsets = [0, 128], sizes = [1, 128], strides = [1, 1]} : vector<1x512xf32> to vector<1x128xf32>
    %103 = arith.negf %102 : vector<1x128xf32>
    %104 = math.exp %103 : vector<1x128xf32>
    %cst_43 = arith.constant 1.000000e+00 : f32
    %105 = vector.broadcast %cst_43 : f32 to vector<1x128xf32>
    %106 = arith.addf %105, %104 : vector<1x128xf32>
    %107 = arith.divf %105, %106 : vector<1x128xf32>
    %108 = vector.extract_strided_slice %89 {offsets = [0, 256], sizes = [1, 128], strides = [1, 1]} : vector<1x512xf32> to vector<1x128xf32>
    %109 = math.tanh %108 : vector<1x128xf32>
    %110 = vector.extract_strided_slice %89 {offsets = [0, 384], sizes = [1, 128], strides = [1, 1]} : vector<1x512xf32> to vector<1x128xf32>
    %111 = arith.negf %110 : vector<1x128xf32>
    %112 = math.exp %111 : vector<1x128xf32>
    %cst_44 = arith.constant 1.000000e+00 : f32
    %113 = vector.broadcast %cst_44 : f32 to vector<1x128xf32>
    %114 = arith.addf %113, %112 : vector<1x128xf32>
    %115 = arith.divf %113, %114 : vector<1x128xf32>
    %116 = arith.mulf %107, %54 : vector<1x128xf32>
    %117 = arith.mulf %101, %109 : vector<1x128xf32>
    %118 = arith.addf %116, %117 : vector<1x128xf32>
    %119 = math.tanh %118 : vector<1x128xf32>
    %120 = arith.mulf %115, %119 : vector<1x128xf32>
    %121 = vector.extract_strided_slice %95 {offsets = [0, 0], sizes = [1, 128], strides = [1, 1]} : vector<1x512xf32> to vector<1x128xf32>
    %122 = arith.negf %121 : vector<1x128xf32>
    %123 = math.exp %122 : vector<1x128xf32>
    %cst_45 = arith.constant 1.000000e+00 : f32
    %124 = vector.broadcast %cst_45 : f32 to vector<1x128xf32>
    %125 = arith.addf %124, %123 : vector<1x128xf32>
    %126 = arith.divf %124, %125 : vector<1x128xf32>
    %127 = vector.extract_strided_slice %95 {offsets = [0, 128], sizes = [1, 128], strides = [1, 1]} : vector<1x512xf32> to vector<1x128xf32>
    %128 = arith.negf %127 : vector<1x128xf32>
    %129 = math.exp %128 : vector<1x128xf32>
    %cst_46 = arith.constant 1.000000e+00 : f32
    %130 = vector.broadcast %cst_46 : f32 to vector<1x128xf32>
    %131 = arith.addf %130, %129 : vector<1x128xf32>
    %132 = arith.divf %130, %131 : vector<1x128xf32>
    %133 = vector.extract_strided_slice %95 {offsets = [0, 256], sizes = [1, 128], strides = [1, 1]} : vector<1x512xf32> to vector<1x128xf32>
    %134 = math.tanh %133 : vector<1x128xf32>
    %135 = vector.extract_strided_slice %95 {offsets = [0, 384], sizes = [1, 128], strides = [1, 1]} : vector<1x512xf32> to vector<1x128xf32>
    %136 = arith.negf %135 : vector<1x128xf32>
    %137 = math.exp %136 : vector<1x128xf32>
    %cst_47 = arith.constant 1.000000e+00 : f32
    %138 = vector.broadcast %cst_47 : f32 to vector<1x128xf32>
    %139 = arith.addf %138, %137 : vector<1x128xf32>
    %140 = arith.divf %138, %139 : vector<1x128xf32>
    %141 = arith.mulf %132, %79 : vector<1x128xf32>
    %142 = arith.mulf %126, %134 : vector<1x128xf32>
    %143 = arith.addf %141, %142 : vector<1x128xf32>
    %144 = math.tanh %143 : vector<1x128xf32>
    %145 = arith.mulf %140, %144 : vector<1x128xf32>
    %c1_48 = arith.constant 1 : index
    %c0_49 = arith.constant 0 : index
    %146 = vector.load %arg14[%c1_48, %c0_49] : memref<8x128xf32, #tpu.memory_space<vmem>>, vector<1x128xf32>
    tpu.vector_store %arg14[%c1_48, %c0_49], %120 {strides = array<i32>} : memref<8x128xf32, #tpu.memory_space<vmem>>, vector<1x128xf32>,
    %c6 = arith.constant 6 : index
    %c0_50 = arith.constant 0 : index
    %147 = vector.load %arg15[%c6, %c0_50] : memref<8x128xf32, #tpu.memory_space<vmem>>, vector<1x128xf32>
    tpu.vector_store %arg15[%c6, %c0_50], %145 {strides = array<i32>} : memref<8x128xf32, #tpu.memory_space<vmem>>, vector<1x128xf32>,
    %148 = vector.extract_strided_slice %8 {offsets = [2, 0], sizes = [1, 512], strides = [1, 1]} : vector<8x512xf32> to vector<1x512xf32>
    %149 = arith.truncf %120 : vector<1x128xf32> to vector<1x128xbf16>
    %c0_51 = arith.constant 0 : index
    %c0_52 = arith.constant 0 : index
    %c0_53 = arith.constant 0 : index
    %150 = vector.load %arg2[%c0_51, %c0_52, %c0_53] : memref<2x128x512xbf16, #tpu.memory_space<vmem>>, vector<1x128x512xbf16>
    %151 = vector.shape_cast %150 : vector<1x128x512xbf16> to vector<128x512xbf16>
    %cst_54 = arith.constant dense<0.000000e+00> : vector<1x512xf32>
    %152 = tpu.matmul %149, %151, %cst_54 {dimension_numbers = #tpu.dot_dimension_numbers<[1], [0], [0], [1], [0, 0, 1, 1], [], []>} : vector<1x128xbf16>, vector<128x512xbf16>, vector<1x512xf32> -> vector<1x512xf32>
    %153 = arith.addf %148, %152 : vector<1x512xf32>
    %154 = vector.extract_strided_slice %15 {offsets = [5, 0], sizes = [1, 512], strides = [1, 1]} : vector<8x512xf32> to vector<1x512xf32>
    %155 = arith.truncf %145 : vector<1x128xf32> to vector<1x128xbf16>
    %c1_55 = arith.constant 1 : index
    %c0_56 = arith.constant 0 : index
    %c0_57 = arith.constant 0 : index
    %156 = vector.load %arg2[%c1_55, %c0_56, %c0_57] : memref<2x128x512xbf16, #tpu.memory_space<vmem>>, vector<1x128x512xbf16>
    %157 = vector.shape_cast %156 : vector<1x128x512xbf16> to vector<128x512xbf16>
    %cst_58 = arith.constant dense<0.000000e+00> : vector<1x512xf32>
    %158 = tpu.matmul %155, %157, %cst_58 {dimension_numbers = #tpu.dot_dimension_numbers<[1], [0], [0], [1], [0, 0, 1, 1], [], []>} : vector<1x128xbf16>, vector<128x512xbf16>, vector<1x512xf32> -> vector<1x512xf32>
    %159 = arith.addf %154, %158 : vector<1x512xf32>
    %160 = vector.extract_strided_slice %153 {offsets = [0, 0], sizes = [1, 128], strides = [1, 1]} : vector<1x512xf32> to vector<1x128xf32>
    %161 = arith.negf %160 : vector<1x128xf32>
    %162 = math.exp %161 : vector<1x128xf32>
    %cst_59 = arith.constant 1.000000e+00 : f32
    %163 = vector.broadcast %cst_59 : f32 to vector<1x128xf32>
    %164 = arith.addf %163, %162 : vector<1x128xf32>
    %165 = arith.divf %163, %164 : vector<1x128xf32>
    %166 = vector.extract_strided_slice %153 {offsets = [0, 128], sizes = [1, 128], strides = [1, 1]} : vector<1x512xf32> to vector<1x128xf32>
    %167 = arith.negf %166 : vector<1x128xf32>
    %168 = math.exp %167 : vector<1x128xf32>
    %cst_60 = arith.constant 1.000000e+00 : f32
    %169 = vector.broadcast %cst_60 : f32 to vector<1x128xf32>
    %170 = arith.addf %169, %168 : vector<1x128xf32>
    %171 = arith.divf %169, %170 : vector<1x128xf32>
    %172 = vector.extract_strided_slice %153 {offsets = [0, 256], sizes = [1, 128], strides = [1, 1]} : vector<1x512xf32> to vector<1x128xf32>
    %173 = math.tanh %172 : vector<1x128xf32>
    %174 = vector.extract_strided_slice %153 {offsets = [0, 384], sizes = [1, 128], strides = [1, 1]} : vector<1x512xf32> to vector<1x128xf32>
    %175 = arith.negf %174 : vector<1x128xf32>
    %176 = math.exp %175 : vector<1x128xf32>
    %cst_61 = arith.constant 1.000000e+00 : f32
    %177 = vector.broadcast %cst_61 : f32 to vector<1x128xf32>
    %178 = arith.addf %177, %176 : vector<1x128xf32>
    %179 = arith.divf %177, %178 : vector<1x128xf32>
    %180 = arith.mulf %171, %118 : vector<1x128xf32>
    %181 = arith.mulf %165, %173 : vector<1x128xf32>
    %182 = arith.addf %180, %181 : vector<1x128xf32>
    %183 = math.tanh %182 : vector<1x128xf32>
    %184 = arith.mulf %179, %183 : vector<1x128xf32>
    %185 = vector.extract_strided_slice %159 {offsets = [0, 0], sizes = [1, 128], strides = [1, 1]} : vector<1x512xf32> to vector<1x128xf32>
    %186 = arith.negf %185 : vector<1x128xf32>
    %187 = math.exp %186 : vector<1x128xf32>
    %cst_62 = arith.constant 1.000000e+00 : f32
    %188 = vector.broadcast %cst_62 : f32 to vector<1x128xf32>
    %189 = arith.addf %188, %187 : vector<1x128xf32>
    %190 = arith.divf %188, %189 : vector<1x128xf32>
    %191 = vector.extract_strided_slice %159 {offsets = [0, 128], sizes = [1, 128], strides = [1, 1]} : vector<1x512xf32> to vector<1x128xf32>
    %192 = arith.negf %191 : vector<1x128xf32>
    %193 = math.exp %192 : vector<1x128xf32>
    %cst_63 = arith.constant 1.000000e+00 : f32
    %194 = vector.broadcast %cst_63 : f32 to vector<1x128xf32>
    %195 = arith.addf %194, %193 : vector<1x128xf32>
    %196 = arith.divf %194, %195 : vector<1x128xf32>
    %197 = vector.extract_strided_slice %159 {offsets = [0, 256], sizes = [1, 128], strides = [1, 1]} : vector<1x512xf32> to vector<1x128xf32>
    %198 = math.tanh %197 : vector<1x128xf32>
    %199 = vector.extract_strided_slice %159 {offsets = [0, 384], sizes = [1, 128], strides = [1, 1]} : vector<1x512xf32> to vector<1x128xf32>
    %200 = arith.negf %199 : vector<1x128xf32>
    %201 = math.exp %200 : vector<1x128xf32>
    %cst_64 = arith.constant 1.000000e+00 : f32
    %202 = vector.broadcast %cst_64 : f32 to vector<1x128xf32>
    %203 = arith.addf %202, %201 : vector<1x128xf32>
    %204 = arith.divf %202, %203 : vector<1x128xf32>
    %205 = arith.mulf %196, %143 : vector<1x128xf32>
    %206 = arith.mulf %190, %198 : vector<1x128xf32>
    %207 = arith.addf %205, %206 : vector<1x128xf32>
    %208 = math.tanh %207 : vector<1x128xf32>
    %209 = arith.mulf %204, %208 : vector<1x128xf32>
    %c2 = arith.constant 2 : index
    %c0_65 = arith.constant 0 : index
    %210 = vector.load %arg14[%c2, %c0_65] : memref<8x128xf32, #tpu.memory_space<vmem>>, vector<1x128xf32>
    tpu.vector_store %arg14[%c2, %c0_65], %184 {strides = array<i32>} : memref<8x128xf32, #tpu.memory_space<vmem>>, vector<1x128xf32>,
    %c5 = arith.constant 5 : index
    %c0_66 = arith.constant 0 : index
    %211 = vector.load %arg15[%c5, %c0_66] : memref<8x128xf32, #tpu.memory_space<vmem>>, vector<1x128xf32>
    tpu.vector_store %arg15[%c5, %c0_66], %209 {strides = array<i32>} : memref<8x128xf32, #tpu.memory_space<vmem>>, vector<1x128xf32>,
    %212 = vector.extract_strided_slice %8 {offsets = [3, 0], sizes = [1, 512], strides = [1, 1]} : vector<8x512xf32> to vector<1x512xf32>
    %213 = arith.truncf %184 : vector<1x128xf32> to vector<1x128xbf16>
    %c0_67 = arith.constant 0 : index
    %c0_68 = arith.constant 0 : index
    %c0_69 = arith.constant 0 : index
    %214 = vector.load %arg2[%c0_67, %c0_68, %c0_69] : memref<2x128x512xbf16, #tpu.memory_space<vmem>>, vector<1x128x512xbf16>
    %215 = vector.shape_cast %214 : vector<1x128x512xbf16> to vector<128x512xbf16>
    %cst_70 = arith.constant dense<0.000000e+00> : vector<1x512xf32>
    %216 = tpu.matmul %213, %215, %cst_70 {dimension_numbers = #tpu.dot_dimension_numbers<[1], [0], [0], [1], [0, 0, 1, 1], [], []>} : vector<1x128xbf16>, vector<128x512xbf16>, vector<1x512xf32> -> vector<1x512xf32>
    %217 = arith.addf %212, %216 : vector<1x512xf32>
    %218 = vector.extract_strided_slice %15 {offsets = [4, 0], sizes = [1, 512], strides = [1, 1]} : vector<8x512xf32> to vector<1x512xf32>
    %219 = arith.truncf %209 : vector<1x128xf32> to vector<1x128xbf16>
    %c1_71 = arith.constant 1 : index
    %c0_72 = arith.constant 0 : index
    %c0_73 = arith.constant 0 : index
    %220 = vector.load %arg2[%c1_71, %c0_72, %c0_73] : memref<2x128x512xbf16, #tpu.memory_space<vmem>>, vector<1x128x512xbf16>
    %221 = vector.shape_cast %220 : vector<1x128x512xbf16> to vector<128x512xbf16>
    %cst_74 = arith.constant dense<0.000000e+00> : vector<1x512xf32>
    %222 = tpu.matmul %219, %221, %cst_74 {dimension_numbers = #tpu.dot_dimension_numbers<[1], [0], [0], [1], [0, 0, 1, 1], [], []>} : vector<1x128xbf16>, vector<128x512xbf16>, vector<1x512xf32> -> vector<1x512xf32>
    %223 = arith.addf %218, %222 : vector<1x512xf32>
    %224 = vector.extract_strided_slice %217 {offsets = [0, 0], sizes = [1, 128], strides = [1, 1]} : vector<1x512xf32> to vector<1x128xf32>
    %225 = arith.negf %224 : vector<1x128xf32>
    %226 = math.exp %225 : vector<1x128xf32>
    %cst_75 = arith.constant 1.000000e+00 : f32
    %227 = vector.broadcast %cst_75 : f32 to vector<1x128xf32>
    %228 = arith.addf %227, %226 : vector<1x128xf32>
    %229 = arith.divf %227, %228 : vector<1x128xf32>
    %230 = vector.extract_strided_slice %217 {offsets = [0, 128], sizes = [1, 128], strides = [1, 1]} : vector<1x512xf32> to vector<1x128xf32>
    %231 = arith.negf %230 : vector<1x128xf32>
    %232 = math.exp %231 : vector<1x128xf32>
    %cst_76 = arith.constant 1.000000e+00 : f32
    %233 = vector.broadcast %cst_76 : f32 to vector<1x128xf32>
    %234 = arith.addf %233, %232 : vector<1x128xf32>
    %235 = arith.divf %233, %234 : vector<1x128xf32>
    %236 = vector.extract_strided_slice %217 {offsets = [0, 256], sizes = [1, 128], strides = [1, 1]} : vector<1x512xf32> to vector<1x128xf32>
    %237 = math.tanh %236 : vector<1x128xf32>
    %238 = vector.extract_strided_slice %217 {offsets = [0, 384], sizes = [1, 128], strides = [1, 1]} : vector<1x512xf32> to vector<1x128xf32>
    %239 = arith.negf %238 : vector<1x128xf32>
    %240 = math.exp %239 : vector<1x128xf32>
    %cst_77 = arith.constant 1.000000e+00 : f32
    %241 = vector.broadcast %cst_77 : f32 to vector<1x128xf32>
    %242 = arith.addf %241, %240 : vector<1x128xf32>
    %243 = arith.divf %241, %242 : vector<1x128xf32>
    %244 = arith.mulf %235, %182 : vector<1x128xf32>
    %245 = arith.mulf %229, %237 : vector<1x128xf32>
    %246 = arith.addf %244, %245 : vector<1x128xf32>
    %247 = math.tanh %246 : vector<1x128xf32>
    %248 = arith.mulf %243, %247 : vector<1x128xf32>
    %249 = vector.extract_strided_slice %223 {offsets = [0, 0], sizes = [1, 128], strides = [1, 1]} : vector<1x512xf32> to vector<1x128xf32>
    %250 = arith.negf %249 : vector<1x128xf32>
    %251 = math.exp %250 : vector<1x128xf32>
    %cst_78 = arith.constant 1.000000e+00 : f32
    %252 = vector.broadcast %cst_78 : f32 to vector<1x128xf32>
    %253 = arith.addf %252, %251 : vector<1x128xf32>
    %254 = arith.divf %252, %253 : vector<1x128xf32>
    %255 = vector.extract_strided_slice %223 {offsets = [0, 128], sizes = [1, 128], strides = [1, 1]} : vector<1x512xf32> to vector<1x128xf32>
    %256 = arith.negf %255 : vector<1x128xf32>
    %257 = math.exp %256 : vector<1x128xf32>
    %cst_79 = arith.constant 1.000000e+00 : f32
    %258 = vector.broadcast %cst_79 : f32 to vector<1x128xf32>
    %259 = arith.addf %258, %257 : vector<1x128xf32>
    %260 = arith.divf %258, %259 : vector<1x128xf32>
    %261 = vector.extract_strided_slice %223 {offsets = [0, 256], sizes = [1, 128], strides = [1, 1]} : vector<1x512xf32> to vector<1x128xf32>
    %262 = math.tanh %261 : vector<1x128xf32>
    %263 = vector.extract_strided_slice %223 {offsets = [0, 384], sizes = [1, 128], strides = [1, 1]} : vector<1x512xf32> to vector<1x128xf32>
    %264 = arith.negf %263 : vector<1x128xf32>
    %265 = math.exp %264 : vector<1x128xf32>
    %cst_80 = arith.constant 1.000000e+00 : f32
    %266 = vector.broadcast %cst_80 : f32 to vector<1x128xf32>
    %267 = arith.addf %266, %265 : vector<1x128xf32>
    %268 = arith.divf %266, %267 : vector<1x128xf32>
    %269 = arith.mulf %260, %207 : vector<1x128xf32>
    %270 = arith.mulf %254, %262 : vector<1x128xf32>
    %271 = arith.addf %269, %270 : vector<1x128xf32>
    %272 = math.tanh %271 : vector<1x128xf32>
    %273 = arith.mulf %268, %272 : vector<1x128xf32>
    %c3 = arith.constant 3 : index
    %c0_81 = arith.constant 0 : index
    %274 = vector.load %arg14[%c3, %c0_81] : memref<8x128xf32, #tpu.memory_space<vmem>>, vector<1x128xf32>
    tpu.vector_store %arg14[%c3, %c0_81], %248 {strides = array<i32>} : memref<8x128xf32, #tpu.memory_space<vmem>>, vector<1x128xf32>,
    %c4 = arith.constant 4 : index
    %c0_82 = arith.constant 0 : index
    %275 = vector.load %arg15[%c4, %c0_82] : memref<8x128xf32, #tpu.memory_space<vmem>>, vector<1x128xf32>
    tpu.vector_store %arg15[%c4, %c0_82], %273 {strides = array<i32>} : memref<8x128xf32, #tpu.memory_space<vmem>>, vector<1x128xf32>,
    %276 = vector.extract_strided_slice %8 {offsets = [4, 0], sizes = [1, 512], strides = [1, 1]} : vector<8x512xf32> to vector<1x512xf32>
    %277 = arith.truncf %248 : vector<1x128xf32> to vector<1x128xbf16>
    %c0_83 = arith.constant 0 : index
    %c0_84 = arith.constant 0 : index
    %c0_85 = arith.constant 0 : index
    %278 = vector.load %arg2[%c0_83, %c0_84, %c0_85] : memref<2x128x512xbf16, #tpu.memory_space<vmem>>, vector<1x128x512xbf16>
    %279 = vector.shape_cast %278 : vector<1x128x512xbf16> to vector<128x512xbf16>
    %cst_86 = arith.constant dense<0.000000e+00> : vector<1x512xf32>
    %280 = tpu.matmul %277, %279, %cst_86 {dimension_numbers = #tpu.dot_dimension_numbers<[1], [0], [0], [1], [0, 0, 1, 1], [], []>} : vector<1x128xbf16>, vector<128x512xbf16>, vector<1x512xf32> -> vector<1x512xf32>
    %281 = arith.addf %276, %280 : vector<1x512xf32>
    %282 = vector.extract_strided_slice %15 {offsets = [3, 0], sizes = [1, 512], strides = [1, 1]} : vector<8x512xf32> to vector<1x512xf32>
    %283 = arith.truncf %273 : vector<1x128xf32> to vector<1x128xbf16>
    %c1_87 = arith.constant 1 : index
    %c0_88 = arith.constant 0 : index
    %c0_89 = arith.constant 0 : index
    %284 = vector.load %arg2[%c1_87, %c0_88, %c0_89] : memref<2x128x512xbf16, #tpu.memory_space<vmem>>, vector<1x128x512xbf16>
    %285 = vector.shape_cast %284 : vector<1x128x512xbf16> to vector<128x512xbf16>
    %cst_90 = arith.constant dense<0.000000e+00> : vector<1x512xf32>
    %286 = tpu.matmul %283, %285, %cst_90 {dimension_numbers = #tpu.dot_dimension_numbers<[1], [0], [0], [1], [0, 0, 1, 1], [], []>} : vector<1x128xbf16>, vector<128x512xbf16>, vector<1x512xf32> -> vector<1x512xf32>
    %287 = arith.addf %282, %286 : vector<1x512xf32>
    %288 = vector.extract_strided_slice %281 {offsets = [0, 0], sizes = [1, 128], strides = [1, 1]} : vector<1x512xf32> to vector<1x128xf32>
    %289 = arith.negf %288 : vector<1x128xf32>
    %290 = math.exp %289 : vector<1x128xf32>
    %cst_91 = arith.constant 1.000000e+00 : f32
    %291 = vector.broadcast %cst_91 : f32 to vector<1x128xf32>
    %292 = arith.addf %291, %290 : vector<1x128xf32>
    %293 = arith.divf %291, %292 : vector<1x128xf32>
    %294 = vector.extract_strided_slice %281 {offsets = [0, 128], sizes = [1, 128], strides = [1, 1]} : vector<1x512xf32> to vector<1x128xf32>
    %295 = arith.negf %294 : vector<1x128xf32>
    %296 = math.exp %295 : vector<1x128xf32>
    %cst_92 = arith.constant 1.000000e+00 : f32
    %297 = vector.broadcast %cst_92 : f32 to vector<1x128xf32>
    %298 = arith.addf %297, %296 : vector<1x128xf32>
    %299 = arith.divf %297, %298 : vector<1x128xf32>
    %300 = vector.extract_strided_slice %281 {offsets = [0, 256], sizes = [1, 128], strides = [1, 1]} : vector<1x512xf32> to vector<1x128xf32>
    %301 = math.tanh %300 : vector<1x128xf32>
    %302 = vector.extract_strided_slice %281 {offsets = [0, 384], sizes = [1, 128], strides = [1, 1]} : vector<1x512xf32> to vector<1x128xf32>
    %303 = arith.negf %302 : vector<1x128xf32>
    %304 = math.exp %303 : vector<1x128xf32>
    %cst_93 = arith.constant 1.000000e+00 : f32
    %305 = vector.broadcast %cst_93 : f32 to vector<1x128xf32>
    %306 = arith.addf %305, %304 : vector<1x128xf32>
    %307 = arith.divf %305, %306 : vector<1x128xf32>
    %308 = arith.mulf %299, %246 : vector<1x128xf32>
    %309 = arith.mulf %293, %301 : vector<1x128xf32>
    %310 = arith.addf %308, %309 : vector<1x128xf32>
    %311 = math.tanh %310 : vector<1x128xf32>
    %312 = arith.mulf %307, %311 : vector<1x128xf32>
    %313 = vector.extract_strided_slice %287 {offsets = [0, 0], sizes = [1, 128], strides = [1, 1]} : vector<1x512xf32> to vector<1x128xf32>
    %314 = arith.negf %313 : vector<1x128xf32>
    %315 = math.exp %314 : vector<1x128xf32>
    %cst_94 = arith.constant 1.000000e+00 : f32
    %316 = vector.broadcast %cst_94 : f32 to vector<1x128xf32>
    %317 = arith.addf %316, %315 : vector<1x128xf32>
    %318 = arith.divf %316, %317 : vector<1x128xf32>
    %319 = vector.extract_strided_slice %287 {offsets = [0, 128], sizes = [1, 128], strides = [1, 1]} : vector<1x512xf32> to vector<1x128xf32>
    %320 = arith.negf %319 : vector<1x128xf32>
    %321 = math.exp %320 : vector<1x128xf32>
    %cst_95 = arith.constant 1.000000e+00 : f32
    %322 = vector.broadcast %cst_95 : f32 to vector<1x128xf32>
    %323 = arith.addf %322, %321 : vector<1x128xf32>
    %324 = arith.divf %322, %323 : vector<1x128xf32>
    %325 = vector.extract_strided_slice %287 {offsets = [0, 256], sizes = [1, 128], strides = [1, 1]} : vector<1x512xf32> to vector<1x128xf32>
    %326 = math.tanh %325 : vector<1x128xf32>
    %327 = vector.extract_strided_slice %287 {offsets = [0, 384], sizes = [1, 128], strides = [1, 1]} : vector<1x512xf32> to vector<1x128xf32>
    %328 = arith.negf %327 : vector<1x128xf32>
    %329 = math.exp %328 : vector<1x128xf32>
    %cst_96 = arith.constant 1.000000e+00 : f32
    %330 = vector.broadcast %cst_96 : f32 to vector<1x128xf32>
    %331 = arith.addf %330, %329 : vector<1x128xf32>
    %332 = arith.divf %330, %331 : vector<1x128xf32>
    %333 = arith.mulf %324, %271 : vector<1x128xf32>
    %334 = arith.mulf %318, %326 : vector<1x128xf32>
    %335 = arith.addf %333, %334 : vector<1x128xf32>
    %336 = math.tanh %335 : vector<1x128xf32>
    %337 = arith.mulf %332, %336 : vector<1x128xf32>
    %c4_97 = arith.constant 4 : index
    %c0_98 = arith.constant 0 : index
    %338 = vector.load %arg14[%c4_97, %c0_98] : memref<8x128xf32, #tpu.memory_space<vmem>>, vector<1x128xf32>
    tpu.vector_store %arg14[%c4_97, %c0_98], %312 {strides = array<i32>} : memref<8x128xf32, #tpu.memory_space<vmem>>, vector<1x128xf32>,
    %c3_99 = arith.constant 3 : index
    %c0_100 = arith.constant 0 : index
    %339 = vector.load %arg15[%c3_99, %c0_100] : memref<8x128xf32, #tpu.memory_space<vmem>>, vector<1x128xf32>
    tpu.vector_store %arg15[%c3_99, %c0_100], %337 {strides = array<i32>} : memref<8x128xf32, #tpu.memory_space<vmem>>, vector<1x128xf32>,
    %340 = vector.extract_strided_slice %8 {offsets = [5, 0], sizes = [1, 512], strides = [1, 1]} : vector<8x512xf32> to vector<1x512xf32>
    %341 = arith.truncf %312 : vector<1x128xf32> to vector<1x128xbf16>
    %c0_101 = arith.constant 0 : index
    %c0_102 = arith.constant 0 : index
    %c0_103 = arith.constant 0 : index
    %342 = vector.load %arg2[%c0_101, %c0_102, %c0_103] : memref<2x128x512xbf16, #tpu.memory_space<vmem>>, vector<1x128x512xbf16>
    %343 = vector.shape_cast %342 : vector<1x128x512xbf16> to vector<128x512xbf16>
    %cst_104 = arith.constant dense<0.000000e+00> : vector<1x512xf32>
    %344 = tpu.matmul %341, %343, %cst_104 {dimension_numbers = #tpu.dot_dimension_numbers<[1], [0], [0], [1], [0, 0, 1, 1], [], []>} : vector<1x128xbf16>, vector<128x512xbf16>, vector<1x512xf32> -> vector<1x512xf32>
    %345 = arith.addf %340, %344 : vector<1x512xf32>
    %346 = vector.extract_strided_slice %15 {offsets = [2, 0], sizes = [1, 512], strides = [1, 1]} : vector<8x512xf32> to vector<1x512xf32>
    %347 = arith.truncf %337 : vector<1x128xf32> to vector<1x128xbf16>
    %c1_105 = arith.constant 1 : index
    %c0_106 = arith.constant 0 : index
    %c0_107 = arith.constant 0 : index
    %348 = vector.load %arg2[%c1_105, %c0_106, %c0_107] : memref<2x128x512xbf16, #tpu.memory_space<vmem>>, vector<1x128x512xbf16>
    %349 = vector.shape_cast %348 : vector<1x128x512xbf16> to vector<128x512xbf16>
    %cst_108 = arith.constant dense<0.000000e+00> : vector<1x512xf32>
    %350 = tpu.matmul %347, %349, %cst_108 {dimension_numbers = #tpu.dot_dimension_numbers<[1], [0], [0], [1], [0, 0, 1, 1], [], []>} : vector<1x128xbf16>, vector<128x512xbf16>, vector<1x512xf32> -> vector<1x512xf32>
    %351 = arith.addf %346, %350 : vector<1x512xf32>
    %352 = vector.extract_strided_slice %345 {offsets = [0, 0], sizes = [1, 128], strides = [1, 1]} : vector<1x512xf32> to vector<1x128xf32>
    %353 = arith.negf %352 : vector<1x128xf32>
    %354 = math.exp %353 : vector<1x128xf32>
    %cst_109 = arith.constant 1.000000e+00 : f32
    %355 = vector.broadcast %cst_109 : f32 to vector<1x128xf32>
    %356 = arith.addf %355, %354 : vector<1x128xf32>
    %357 = arith.divf %355, %356 : vector<1x128xf32>
    %358 = vector.extract_strided_slice %345 {offsets = [0, 128], sizes = [1, 128], strides = [1, 1]} : vector<1x512xf32> to vector<1x128xf32>
    %359 = arith.negf %358 : vector<1x128xf32>
    %360 = math.exp %359 : vector<1x128xf32>
    %cst_110 = arith.constant 1.000000e+00 : f32
    %361 = vector.broadcast %cst_110 : f32 to vector<1x128xf32>
    %362 = arith.addf %361, %360 : vector<1x128xf32>
    %363 = arith.divf %361, %362 : vector<1x128xf32>
    %364 = vector.extract_strided_slice %345 {offsets = [0, 256], sizes = [1, 128], strides = [1, 1]} : vector<1x512xf32> to vector<1x128xf32>
    %365 = math.tanh %364 : vector<1x128xf32>
    %366 = vector.extract_strided_slice %345 {offsets = [0, 384], sizes = [1, 128], strides = [1, 1]} : vector<1x512xf32> to vector<1x128xf32>
    %367 = arith.negf %366 : vector<1x128xf32>
    %368 = math.exp %367 : vector<1x128xf32>
    %cst_111 = arith.constant 1.000000e+00 : f32
    %369 = vector.broadcast %cst_111 : f32 to vector<1x128xf32>
    %370 = arith.addf %369, %368 : vector<1x128xf32>
    %371 = arith.divf %369, %370 : vector<1x128xf32>
    %372 = arith.mulf %363, %310 : vector<1x128xf32>
    %373 = arith.mulf %357, %365 : vector<1x128xf32>
    %374 = arith.addf %372, %373 : vector<1x128xf32>
    %375 = math.tanh %374 : vector<1x128xf32>
    %376 = arith.mulf %371, %375 : vector<1x128xf32>
    %377 = vector.extract_strided_slice %351 {offsets = [0, 0], sizes = [1, 128], strides = [1, 1]} : vector<1x512xf32> to vector<1x128xf32>
    %378 = arith.negf %377 : vector<1x128xf32>
    %379 = math.exp %378 : vector<1x128xf32>
    %cst_112 = arith.constant 1.000000e+00 : f32
    %380 = vector.broadcast %cst_112 : f32 to vector<1x128xf32>
    %381 = arith.addf %380, %379 : vector<1x128xf32>
    %382 = arith.divf %380, %381 : vector<1x128xf32>
    %383 = vector.extract_strided_slice %351 {offsets = [0, 128], sizes = [1, 128], strides = [1, 1]} : vector<1x512xf32> to vector<1x128xf32>
    %384 = arith.negf %383 : vector<1x128xf32>
    %385 = math.exp %384 : vector<1x128xf32>
    %cst_113 = arith.constant 1.000000e+00 : f32
    %386 = vector.broadcast %cst_113 : f32 to vector<1x128xf32>
    %387 = arith.addf %386, %385 : vector<1x128xf32>
    %388 = arith.divf %386, %387 : vector<1x128xf32>
    %389 = vector.extract_strided_slice %351 {offsets = [0, 256], sizes = [1, 128], strides = [1, 1]} : vector<1x512xf32> to vector<1x128xf32>
    %390 = math.tanh %389 : vector<1x128xf32>
    %391 = vector.extract_strided_slice %351 {offsets = [0, 384], sizes = [1, 128], strides = [1, 1]} : vector<1x512xf32> to vector<1x128xf32>
    %392 = arith.negf %391 : vector<1x128xf32>
    %393 = math.exp %392 : vector<1x128xf32>
    %cst_114 = arith.constant 1.000000e+00 : f32
    %394 = vector.broadcast %cst_114 : f32 to vector<1x128xf32>
    %395 = arith.addf %394, %393 : vector<1x128xf32>
    %396 = arith.divf %394, %395 : vector<1x128xf32>
    %397 = arith.mulf %388, %335 : vector<1x128xf32>
    %398 = arith.mulf %382, %390 : vector<1x128xf32>
    %399 = arith.addf %397, %398 : vector<1x128xf32>
    %400 = math.tanh %399 : vector<1x128xf32>
    %401 = arith.mulf %396, %400 : vector<1x128xf32>
    %c5_115 = arith.constant 5 : index
    %c0_116 = arith.constant 0 : index
    %402 = vector.load %arg14[%c5_115, %c0_116] : memref<8x128xf32, #tpu.memory_space<vmem>>, vector<1x128xf32>
    tpu.vector_store %arg14[%c5_115, %c0_116], %376 {strides = array<i32>} : memref<8x128xf32, #tpu.memory_space<vmem>>, vector<1x128xf32>,
    %c2_117 = arith.constant 2 : index
    %c0_118 = arith.constant 0 : index
    %403 = vector.load %arg15[%c2_117, %c0_118] : memref<8x128xf32, #tpu.memory_space<vmem>>, vector<1x128xf32>
    tpu.vector_store %arg15[%c2_117, %c0_118], %401 {strides = array<i32>} : memref<8x128xf32, #tpu.memory_space<vmem>>, vector<1x128xf32>,
    %404 = vector.extract_strided_slice %8 {offsets = [6, 0], sizes = [1, 512], strides = [1, 1]} : vector<8x512xf32> to vector<1x512xf32>
    %405 = arith.truncf %376 : vector<1x128xf32> to vector<1x128xbf16>
    %c0_119 = arith.constant 0 : index
    %c0_120 = arith.constant 0 : index
    %c0_121 = arith.constant 0 : index
    %406 = vector.load %arg2[%c0_119, %c0_120, %c0_121] : memref<2x128x512xbf16, #tpu.memory_space<vmem>>, vector<1x128x512xbf16>
    %407 = vector.shape_cast %406 : vector<1x128x512xbf16> to vector<128x512xbf16>
    %cst_122 = arith.constant dense<0.000000e+00> : vector<1x512xf32>
    %408 = tpu.matmul %405, %407, %cst_122 {dimension_numbers = #tpu.dot_dimension_numbers<[1], [0], [0], [1], [0, 0, 1, 1], [], []>} : vector<1x128xbf16>, vector<128x512xbf16>, vector<1x512xf32> -> vector<1x512xf32>
    %409 = arith.addf %404, %408 : vector<1x512xf32>
    %410 = vector.extract_strided_slice %15 {offsets = [1, 0], sizes = [1, 512], strides = [1, 1]} : vector<8x512xf32> to vector<1x512xf32>
    %411 = arith.truncf %401 : vector<1x128xf32> to vector<1x128xbf16>
    %c1_123 = arith.constant 1 : index
    %c0_124 = arith.constant 0 : index
    %c0_125 = arith.constant 0 : index
    %412 = vector.load %arg2[%c1_123, %c0_124, %c0_125] : memref<2x128x512xbf16, #tpu.memory_space<vmem>>, vector<1x128x512xbf16>
    %413 = vector.shape_cast %412 : vector<1x128x512xbf16> to vector<128x512xbf16>
    %cst_126 = arith.constant dense<0.000000e+00> : vector<1x512xf32>
    %414 = tpu.matmul %411, %413, %cst_126 {dimension_numbers = #tpu.dot_dimension_numbers<[1], [0], [0], [1], [0, 0, 1, 1], [], []>} : vector<1x128xbf16>, vector<128x512xbf16>, vector<1x512xf32> -> vector<1x512xf32>
    %415 = arith.addf %410, %414 : vector<1x512xf32>
    %416 = vector.extract_strided_slice %409 {offsets = [0, 0], sizes = [1, 128], strides = [1, 1]} : vector<1x512xf32> to vector<1x128xf32>
    %417 = arith.negf %416 : vector<1x128xf32>
    %418 = math.exp %417 : vector<1x128xf32>
    %cst_127 = arith.constant 1.000000e+00 : f32
    %419 = vector.broadcast %cst_127 : f32 to vector<1x128xf32>
    %420 = arith.addf %419, %418 : vector<1x128xf32>
    %421 = arith.divf %419, %420 : vector<1x128xf32>
    %422 = vector.extract_strided_slice %409 {offsets = [0, 128], sizes = [1, 128], strides = [1, 1]} : vector<1x512xf32> to vector<1x128xf32>
    %423 = arith.negf %422 : vector<1x128xf32>
    %424 = math.exp %423 : vector<1x128xf32>
    %cst_128 = arith.constant 1.000000e+00 : f32
    %425 = vector.broadcast %cst_128 : f32 to vector<1x128xf32>
    %426 = arith.addf %425, %424 : vector<1x128xf32>
    %427 = arith.divf %425, %426 : vector<1x128xf32>
    %428 = vector.extract_strided_slice %409 {offsets = [0, 256], sizes = [1, 128], strides = [1, 1]} : vector<1x512xf32> to vector<1x128xf32>
    %429 = math.tanh %428 : vector<1x128xf32>
    %430 = vector.extract_strided_slice %409 {offsets = [0, 384], sizes = [1, 128], strides = [1, 1]} : vector<1x512xf32> to vector<1x128xf32>
    %431 = arith.negf %430 : vector<1x128xf32>
    %432 = math.exp %431 : vector<1x128xf32>
    %cst_129 = arith.constant 1.000000e+00 : f32
    %433 = vector.broadcast %cst_129 : f32 to vector<1x128xf32>
    %434 = arith.addf %433, %432 : vector<1x128xf32>
    %435 = arith.divf %433, %434 : vector<1x128xf32>
    %436 = arith.mulf %427, %374 : vector<1x128xf32>
    %437 = arith.mulf %421, %429 : vector<1x128xf32>
    %438 = arith.addf %436, %437 : vector<1x128xf32>
    %439 = math.tanh %438 : vector<1x128xf32>
    %440 = arith.mulf %435, %439 : vector<1x128xf32>
    %441 = vector.extract_strided_slice %415 {offsets = [0, 0], sizes = [1, 128], strides = [1, 1]} : vector<1x512xf32> to vector<1x128xf32>
    %442 = arith.negf %441 : vector<1x128xf32>
    %443 = math.exp %442 : vector<1x128xf32>
    %cst_130 = arith.constant 1.000000e+00 : f32
    %444 = vector.broadcast %cst_130 : f32 to vector<1x128xf32>
    %445 = arith.addf %444, %443 : vector<1x128xf32>
    %446 = arith.divf %444, %445 : vector<1x128xf32>
    %447 = vector.extract_strided_slice %415 {offsets = [0, 128], sizes = [1, 128], strides = [1, 1]} : vector<1x512xf32> to vector<1x128xf32>
    %448 = arith.negf %447 : vector<1x128xf32>
    %449 = math.exp %448 : vector<1x128xf32>
    %cst_131 = arith.constant 1.000000e+00 : f32
    %450 = vector.broadcast %cst_131 : f32 to vector<1x128xf32>
    %451 = arith.addf %450, %449 : vector<1x128xf32>
    %452 = arith.divf %450, %451 : vector<1x128xf32>
    %453 = vector.extract_strided_slice %415 {offsets = [0, 256], sizes = [1, 128], strides = [1, 1]} : vector<1x512xf32> to vector<1x128xf32>
    %454 = math.tanh %453 : vector<1x128xf32>
    %455 = vector.extract_strided_slice %415 {offsets = [0, 384], sizes = [1, 128], strides = [1, 1]} : vector<1x512xf32> to vector<1x128xf32>
    %456 = arith.negf %455 : vector<1x128xf32>
    %457 = math.exp %456 : vector<1x128xf32>
    %cst_132 = arith.constant 1.000000e+00 : f32
    %458 = vector.broadcast %cst_132 : f32 to vector<1x128xf32>
    %459 = arith.addf %458, %457 : vector<1x128xf32>
    %460 = arith.divf %458, %459 : vector<1x128xf32>
    %461 = arith.mulf %452, %399 : vector<1x128xf32>
    %462 = arith.mulf %446, %454 : vector<1x128xf32>
    %463 = arith.addf %461, %462 : vector<1x128xf32>
    %464 = math.tanh %463 : vector<1x128xf32>
    %465 = arith.mulf %460, %464 : vector<1x128xf32>
    %c6_133 = arith.constant 6 : index
    %c0_134 = arith.constant 0 : index
    %466 = vector.load %arg14[%c6_133, %c0_134] : memref<8x128xf32, #tpu.memory_space<vmem>>, vector<1x128xf32>
    tpu.vector_store %arg14[%c6_133, %c0_134], %440 {strides = array<i32>} : memref<8x128xf32, #tpu.memory_space<vmem>>, vector<1x128xf32>,
    %c1_135 = arith.constant 1 : index
    %c0_136 = arith.constant 0 : index
    %467 = vector.load %arg15[%c1_135, %c0_136] : memref<8x128xf32, #tpu.memory_space<vmem>>, vector<1x128xf32>
    tpu.vector_store %arg15[%c1_135, %c0_136], %465 {strides = array<i32>} : memref<8x128xf32, #tpu.memory_space<vmem>>, vector<1x128xf32>,
    %468 = vector.extract_strided_slice %8 {offsets = [7, 0], sizes = [1, 512], strides = [1, 1]} : vector<8x512xf32> to vector<1x512xf32>
    %469 = arith.truncf %440 : vector<1x128xf32> to vector<1x128xbf16>
    %c0_137 = arith.constant 0 : index
    %c0_138 = arith.constant 0 : index
    %c0_139 = arith.constant 0 : index
    %470 = vector.load %arg2[%c0_137, %c0_138, %c0_139] : memref<2x128x512xbf16, #tpu.memory_space<vmem>>, vector<1x128x512xbf16>
    %471 = vector.shape_cast %470 : vector<1x128x512xbf16> to vector<128x512xbf16>
    %cst_140 = arith.constant dense<0.000000e+00> : vector<1x512xf32>
    %472 = tpu.matmul %469, %471, %cst_140 {dimension_numbers = #tpu.dot_dimension_numbers<[1], [0], [0], [1], [0, 0, 1, 1], [], []>} : vector<1x128xbf16>, vector<128x512xbf16>, vector<1x512xf32> -> vector<1x512xf32>
    %473 = arith.addf %468, %472 : vector<1x512xf32>
    %474 = vector.extract_strided_slice %15 {offsets = [0, 0], sizes = [1, 512], strides = [1, 1]} : vector<8x512xf32> to vector<1x512xf32>
    %475 = arith.truncf %465 : vector<1x128xf32> to vector<1x128xbf16>
    %c1_141 = arith.constant 1 : index
    %c0_142 = arith.constant 0 : index
    %c0_143 = arith.constant 0 : index
    %476 = vector.load %arg2[%c1_141, %c0_142, %c0_143] : memref<2x128x512xbf16, #tpu.memory_space<vmem>>, vector<1x128x512xbf16>
    %477 = vector.shape_cast %476 : vector<1x128x512xbf16> to vector<128x512xbf16>
    %cst_144 = arith.constant dense<0.000000e+00> : vector<1x512xf32>
    %478 = tpu.matmul %475, %477, %cst_144 {dimension_numbers = #tpu.dot_dimension_numbers<[1], [0], [0], [1], [0, 0, 1, 1], [], []>} : vector<1x128xbf16>, vector<128x512xbf16>, vector<1x512xf32> -> vector<1x512xf32>
    %479 = arith.addf %474, %478 : vector<1x512xf32>
    %480 = vector.extract_strided_slice %473 {offsets = [0, 0], sizes = [1, 128], strides = [1, 1]} : vector<1x512xf32> to vector<1x128xf32>
    %481 = arith.negf %480 : vector<1x128xf32>
    %482 = math.exp %481 : vector<1x128xf32>
    %cst_145 = arith.constant 1.000000e+00 : f32
    %483 = vector.broadcast %cst_145 : f32 to vector<1x128xf32>
    %484 = arith.addf %483, %482 : vector<1x128xf32>
    %485 = arith.divf %483, %484 : vector<1x128xf32>
    %486 = vector.extract_strided_slice %473 {offsets = [0, 128], sizes = [1, 128], strides = [1, 1]} : vector<1x512xf32> to vector<1x128xf32>
    %487 = arith.negf %486 : vector<1x128xf32>
    %488 = math.exp %487 : vector<1x128xf32>
    %cst_146 = arith.constant 1.000000e+00 : f32
    %489 = vector.broadcast %cst_146 : f32 to vector<1x128xf32>
    %490 = arith.addf %489, %488 : vector<1x128xf32>
    %491 = arith.divf %489, %490 : vector<1x128xf32>
    %492 = vector.extract_strided_slice %473 {offsets = [0, 256], sizes = [1, 128], strides = [1, 1]} : vector<1x512xf32> to vector<1x128xf32>
    %493 = math.tanh %492 : vector<1x128xf32>
    %494 = vector.extract_strided_slice %473 {offsets = [0, 384], sizes = [1, 128], strides = [1, 1]} : vector<1x512xf32> to vector<1x128xf32>
    %495 = arith.negf %494 : vector<1x128xf32>
    %496 = math.exp %495 : vector<1x128xf32>
    %cst_147 = arith.constant 1.000000e+00 : f32
    %497 = vector.broadcast %cst_147 : f32 to vector<1x128xf32>
    %498 = arith.addf %497, %496 : vector<1x128xf32>
    %499 = arith.divf %497, %498 : vector<1x128xf32>
    %500 = arith.mulf %491, %438 : vector<1x128xf32>
    %501 = arith.mulf %485, %493 : vector<1x128xf32>
    %502 = arith.addf %500, %501 : vector<1x128xf32>
    %503 = math.tanh %502 : vector<1x128xf32>
    %504 = arith.mulf %499, %503 : vector<1x128xf32>
    %505 = vector.extract_strided_slice %479 {offsets = [0, 0], sizes = [1, 128], strides = [1, 1]} : vector<1x512xf32> to vector<1x128xf32>
    %506 = arith.negf %505 : vector<1x128xf32>
    %507 = math.exp %506 : vector<1x128xf32>
    %cst_148 = arith.constant 1.000000e+00 : f32
    %508 = vector.broadcast %cst_148 : f32 to vector<1x128xf32>
    %509 = arith.addf %508, %507 : vector<1x128xf32>
    %510 = arith.divf %508, %509 : vector<1x128xf32>
    %511 = vector.extract_strided_slice %479 {offsets = [0, 128], sizes = [1, 128], strides = [1, 1]} : vector<1x512xf32> to vector<1x128xf32>
    %512 = arith.negf %511 : vector<1x128xf32>
    %513 = math.exp %512 : vector<1x128xf32>
    %cst_149 = arith.constant 1.000000e+00 : f32
    %514 = vector.broadcast %cst_149 : f32 to vector<1x128xf32>
    %515 = arith.addf %514, %513 : vector<1x128xf32>
    %516 = arith.divf %514, %515 : vector<1x128xf32>
    %517 = vector.extract_strided_slice %479 {offsets = [0, 256], sizes = [1, 128], strides = [1, 1]} : vector<1x512xf32> to vector<1x128xf32>
    %518 = math.tanh %517 : vector<1x128xf32>
    %519 = vector.extract_strided_slice %479 {offsets = [0, 384], sizes = [1, 128], strides = [1, 1]} : vector<1x512xf32> to vector<1x128xf32>
    %520 = arith.negf %519 : vector<1x128xf32>
    %521 = math.exp %520 : vector<1x128xf32>
    %cst_150 = arith.constant 1.000000e+00 : f32
    %522 = vector.broadcast %cst_150 : f32 to vector<1x128xf32>
    %523 = arith.addf %522, %521 : vector<1x128xf32>
    %524 = arith.divf %522, %523 : vector<1x128xf32>
    %525 = arith.mulf %516, %463 : vector<1x128xf32>
    %526 = arith.mulf %510, %518 : vector<1x128xf32>
    %527 = arith.addf %525, %526 : vector<1x128xf32>
    %528 = math.tanh %527 : vector<1x128xf32>
    %529 = arith.mulf %524, %528 : vector<1x128xf32>
    %c7_151 = arith.constant 7 : index
    %c0_152 = arith.constant 0 : index
    %530 = vector.load %arg14[%c7_151, %c0_152] : memref<8x128xf32, #tpu.memory_space<vmem>>, vector<1x128xf32>
    tpu.vector_store %arg14[%c7_151, %c0_152], %504 {strides = array<i32>} : memref<8x128xf32, #tpu.memory_space<vmem>>, vector<1x128xf32>,
    %c0_153 = arith.constant 0 : index
    %c0_154 = arith.constant 0 : index
    %531 = vector.load %arg15[%c0_153, %c0_154] : memref<8x128xf32, #tpu.memory_space<vmem>>, vector<1x128xf32>
    tpu.vector_store %arg15[%c0_153, %c0_154], %529 {strides = array<i32>} : memref<8x128xf32, #tpu.memory_space<vmem>>, vector<1x128xf32>,
    %c0_155 = arith.constant 0 : index
    %c0_156 = arith.constant 0 : index
    %532 = vector.load %arg14[%c0_155, %c0_156] : memref<8x128xf32, #tpu.memory_space<vmem>>, vector<8x128xf32>
    %c0_157 = arith.constant 0 : index
    %c0_158 = arith.constant 0 : index
    %533 = vector.load %arg15[%c0_157, %c0_158] : memref<8x128xf32, #tpu.memory_space<vmem>>, vector<8x128xf32>
    %534 = tpu.concatenate %532, %533 in 1 : vector<8x128xf32>, vector<8x128xf32> -> vector<8x256xf32>
    %535 = arith.truncf %534 : vector<8x256xf32> to vector<8x256xbf16>
    %c0_159 = arith.constant 0 : index
    %c0_160 = arith.constant 0 : index
    %c0_161 = arith.constant 0 : index
    %536 = vector.load %arg4[%c0_159, %c0_160, %c0_161] : memref<2x256x512xbf16, #tpu.memory_space<vmem>>, vector<1x256x512xbf16>
    %537 = vector.shape_cast %536 : vector<1x256x512xbf16> to vector<256x512xbf16>
    %cst_162 = arith.constant dense<0.000000e+00> : vector<8x512xf32>
    %538 = tpu.matmul %535, %537, %cst_162 {dimension_numbers = #tpu.dot_dimension_numbers<[1], [0], [0], [1], [0, 0, 1, 1], [], []>} : vector<8x256xbf16>, vector<256x512xbf16>, vector<8x512xf32> -> vector<8x512xf32>
    %c0_163 = arith.constant 0 : index
    %c0_164 = arith.constant 0 : index
    %c0_165 = arith.constant 0 : index
    %539 = vector.load %arg6[%c0_163, %c0_164, %c0_165] : memref<2x1x512xf32, #tpu.memory_space<vmem>>, vector<1x1x512xf32>
    %540 = vector.shape_cast %539 : vector<1x1x512xf32> to vector<1x512xf32>
    %541 = vector.broadcast %540 : vector<1x512xf32> to vector<8x512xf32>
    %542 = arith.addf %538, %541 : vector<8x512xf32>
    %c1_166 = arith.constant 1 : index
    %c0_167 = arith.constant 0 : index
    %c0_168 = arith.constant 0 : index
    %543 = vector.load %arg4[%c1_166, %c0_167, %c0_168] : memref<2x256x512xbf16, #tpu.memory_space<vmem>>, vector<1x256x512xbf16>
    %544 = vector.shape_cast %543 : vector<1x256x512xbf16> to vector<256x512xbf16>
    %cst_169 = arith.constant dense<0.000000e+00> : vector<8x512xf32>
    %545 = tpu.matmul %535, %544, %cst_169 {dimension_numbers = #tpu.dot_dimension_numbers<[1], [0], [0], [1], [0, 0, 1, 1], [], []>} : vector<8x256xbf16>, vector<256x512xbf16>, vector<8x512xf32> -> vector<8x512xf32>
    %c1_170 = arith.constant 1 : index
    %c0_171 = arith.constant 0 : index
    %c0_172 = arith.constant 0 : index
    %546 = vector.load %arg6[%c1_170, %c0_171, %c0_172] : memref<2x1x512xf32, #tpu.memory_space<vmem>>, vector<1x1x512xf32>
    %547 = vector.shape_cast %546 : vector<1x1x512xf32> to vector<1x512xf32>
    %548 = vector.broadcast %547 : vector<1x512xf32> to vector<8x512xf32>
    %549 = arith.addf %545, %548 : vector<8x512xf32>
    %cst_173 = arith.constant 0.000000e+00 : f32
    %550 = vector.broadcast %cst_173 : f32 to vector<1x128xf32>
    %cst_174 = arith.constant 0.000000e+00 : f32
    %551 = vector.broadcast %cst_174 : f32 to vector<1x128xf32>
    %cst_175 = arith.constant 0.000000e+00 : f32
    %552 = vector.broadcast %cst_175 : f32 to vector<1x128xf32>
    %cst_176 = arith.constant 0.000000e+00 : f32
    %553 = vector.broadcast %cst_176 : f32 to vector<1x128xf32>
    %554 = vector.extract_strided_slice %542 {offsets = [0, 0], sizes = [1, 512], strides = [1, 1]} : vector<8x512xf32> to vector<1x512xf32>
    %555 = arith.truncf %550 : vector<1x128xf32> to vector<1x128xbf16>
    %c0_177 = arith.constant 0 : index
    %c0_178 = arith.constant 0 : index
    %c0_179 = arith.constant 0 : index
    %556 = vector.load %arg5[%c0_177, %c0_178, %c0_179] : memref<2x128x512xbf16, #tpu.memory_space<vmem>>, vector<1x128x512xbf16>
    %557 = vector.shape_cast %556 : vector<1x128x512xbf16> to vector<128x512xbf16>
    %cst_180 = arith.constant dense<0.000000e+00> : vector<1x512xf32>
    %558 = tpu.matmul %555, %557, %cst_180 {dimension_numbers = #tpu.dot_dimension_numbers<[1], [0], [0], [1], [0, 0, 1, 1], [], []>} : vector<1x128xbf16>, vector<128x512xbf16>, vector<1x512xf32> -> vector<1x512xf32>
    %559 = arith.addf %554, %558 : vector<1x512xf32>
    %560 = vector.extract_strided_slice %549 {offsets = [7, 0], sizes = [1, 512], strides = [1, 1]} : vector<8x512xf32> to vector<1x512xf32>
    %561 = arith.truncf %552 : vector<1x128xf32> to vector<1x128xbf16>
    %c1_181 = arith.constant 1 : index
    %c0_182 = arith.constant 0 : index
    %c0_183 = arith.constant 0 : index
    %562 = vector.load %arg5[%c1_181, %c0_182, %c0_183] : memref<2x128x512xbf16, #tpu.memory_space<vmem>>, vector<1x128x512xbf16>
    %563 = vector.shape_cast %562 : vector<1x128x512xbf16> to vector<128x512xbf16>
    %cst_184 = arith.constant dense<0.000000e+00> : vector<1x512xf32>
    %564 = tpu.matmul %561, %563, %cst_184 {dimension_numbers = #tpu.dot_dimension_numbers<[1], [0], [0], [1], [0, 0, 1, 1], [], []>} : vector<1x128xbf16>, vector<128x512xbf16>, vector<1x512xf32> -> vector<1x512xf32>
    %565 = arith.addf %560, %564 : vector<1x512xf32>
    %566 = vector.extract_strided_slice %559 {offsets = [0, 0], sizes = [1, 128], strides = [1, 1]} : vector<1x512xf32> to vector<1x128xf32>
    %567 = arith.negf %566 : vector<1x128xf32>
    %568 = math.exp %567 : vector<1x128xf32>
    %cst_185 = arith.constant 1.000000e+00 : f32
    %569 = vector.broadcast %cst_185 : f32 to vector<1x128xf32>
    %570 = arith.addf %569, %568 : vector<1x128xf32>
    %571 = arith.divf %569, %570 : vector<1x128xf32>
    %572 = vector.extract_strided_slice %559 {offsets = [0, 128], sizes = [1, 128], strides = [1, 1]} : vector<1x512xf32> to vector<1x128xf32>
    %573 = arith.negf %572 : vector<1x128xf32>
    %574 = math.exp %573 : vector<1x128xf32>
    %cst_186 = arith.constant 1.000000e+00 : f32
    %575 = vector.broadcast %cst_186 : f32 to vector<1x128xf32>
    %576 = arith.addf %575, %574 : vector<1x128xf32>
    %577 = arith.divf %575, %576 : vector<1x128xf32>
    %578 = vector.extract_strided_slice %559 {offsets = [0, 256], sizes = [1, 128], strides = [1, 1]} : vector<1x512xf32> to vector<1x128xf32>
    %579 = math.tanh %578 : vector<1x128xf32>
    %580 = vector.extract_strided_slice %559 {offsets = [0, 384], sizes = [1, 128], strides = [1, 1]} : vector<1x512xf32> to vector<1x128xf32>
    %581 = arith.negf %580 : vector<1x128xf32>
    %582 = math.exp %581 : vector<1x128xf32>
    %cst_187 = arith.constant 1.000000e+00 : f32
    %583 = vector.broadcast %cst_187 : f32 to vector<1x128xf32>
    %584 = arith.addf %583, %582 : vector<1x128xf32>
    %585 = arith.divf %583, %584 : vector<1x128xf32>
    %586 = arith.mulf %577, %551 : vector<1x128xf32>
    %587 = arith.mulf %571, %579 : vector<1x128xf32>
    %588 = arith.addf %586, %587 : vector<1x128xf32>
    %589 = math.tanh %588 : vector<1x128xf32>
    %590 = arith.mulf %585, %589 : vector<1x128xf32>
    %591 = vector.extract_strided_slice %565 {offsets = [0, 0], sizes = [1, 128], strides = [1, 1]} : vector<1x512xf32> to vector<1x128xf32>
    %592 = arith.negf %591 : vector<1x128xf32>
    %593 = math.exp %592 : vector<1x128xf32>
    %cst_188 = arith.constant 1.000000e+00 : f32
    %594 = vector.broadcast %cst_188 : f32 to vector<1x128xf32>
    %595 = arith.addf %594, %593 : vector<1x128xf32>
    %596 = arith.divf %594, %595 : vector<1x128xf32>
    %597 = vector.extract_strided_slice %565 {offsets = [0, 128], sizes = [1, 128], strides = [1, 1]} : vector<1x512xf32> to vector<1x128xf32>
    %598 = arith.negf %597 : vector<1x128xf32>
    %599 = math.exp %598 : vector<1x128xf32>
    %cst_189 = arith.constant 1.000000e+00 : f32
    %600 = vector.broadcast %cst_189 : f32 to vector<1x128xf32>
    %601 = arith.addf %600, %599 : vector<1x128xf32>
    %602 = arith.divf %600, %601 : vector<1x128xf32>
    %603 = vector.extract_strided_slice %565 {offsets = [0, 256], sizes = [1, 128], strides = [1, 1]} : vector<1x512xf32> to vector<1x128xf32>
    %604 = math.tanh %603 : vector<1x128xf32>
    %605 = vector.extract_strided_slice %565 {offsets = [0, 384], sizes = [1, 128], strides = [1, 1]} : vector<1x512xf32> to vector<1x128xf32>
    %606 = arith.negf %605 : vector<1x128xf32>
    %607 = math.exp %606 : vector<1x128xf32>
    %cst_190 = arith.constant 1.000000e+00 : f32
    %608 = vector.broadcast %cst_190 : f32 to vector<1x128xf32>
    %609 = arith.addf %608, %607 : vector<1x128xf32>
    %610 = arith.divf %608, %609 : vector<1x128xf32>
    %611 = arith.mulf %602, %553 : vector<1x128xf32>
    %612 = arith.mulf %596, %604 : vector<1x128xf32>
    %613 = arith.addf %611, %612 : vector<1x128xf32>
    %614 = math.tanh %613 : vector<1x128xf32>
    %615 = arith.mulf %610, %614 : vector<1x128xf32>
    %c0_191 = arith.constant 0 : index
    %c0_192 = arith.constant 0 : index
    %616 = vector.load %arg16[%c0_191, %c0_192] : memref<8x128xf32, #tpu.memory_space<vmem>>, vector<1x128xf32>
    tpu.vector_store %arg16[%c0_191, %c0_192], %590 {strides = array<i32>} : memref<8x128xf32, #tpu.memory_space<vmem>>, vector<1x128xf32>,
    %c7_193 = arith.constant 7 : index
    %c0_194 = arith.constant 0 : index
    %617 = vector.load %arg17[%c7_193, %c0_194] : memref<8x128xf32, #tpu.memory_space<vmem>>, vector<1x128xf32>
    tpu.vector_store %arg17[%c7_193, %c0_194], %615 {strides = array<i32>} : memref<8x128xf32, #tpu.memory_space<vmem>>, vector<1x128xf32>,
    %618 = vector.extract_strided_slice %542 {offsets = [1, 0], sizes = [1, 512], strides = [1, 1]} : vector<8x512xf32> to vector<1x512xf32>
    %619 = arith.truncf %590 : vector<1x128xf32> to vector<1x128xbf16>
    %c0_195 = arith.constant 0 : index
    %c0_196 = arith.constant 0 : index
    %c0_197 = arith.constant 0 : index
    %620 = vector.load %arg5[%c0_195, %c0_196, %c0_197] : memref<2x128x512xbf16, #tpu.memory_space<vmem>>, vector<1x128x512xbf16>
    %621 = vector.shape_cast %620 : vector<1x128x512xbf16> to vector<128x512xbf16>
    %cst_198 = arith.constant dense<0.000000e+00> : vector<1x512xf32>
    %622 = tpu.matmul %619, %621, %cst_198 {dimension_numbers = #tpu.dot_dimension_numbers<[1], [0], [0], [1], [0, 0, 1, 1], [], []>} : vector<1x128xbf16>, vector<128x512xbf16>, vector<1x512xf32> -> vector<1x512xf32>
    %623 = arith.addf %618, %622 : vector<1x512xf32>
    %624 = vector.extract_strided_slice %549 {offsets = [6, 0], sizes = [1, 512], strides = [1, 1]} : vector<8x512xf32> to vector<1x512xf32>
    %625 = arith.truncf %615 : vector<1x128xf32> to vector<1x128xbf16>
    %c1_199 = arith.constant 1 : index
    %c0_200 = arith.constant 0 : index
    %c0_201 = arith.constant 0 : index
    %626 = vector.load %arg5[%c1_199, %c0_200, %c0_201] : memref<2x128x512xbf16, #tpu.memory_space<vmem>>, vector<1x128x512xbf16>
    %627 = vector.shape_cast %626 : vector<1x128x512xbf16> to vector<128x512xbf16>
    %cst_202 = arith.constant dense<0.000000e+00> : vector<1x512xf32>
    %628 = tpu.matmul %625, %627, %cst_202 {dimension_numbers = #tpu.dot_dimension_numbers<[1], [0], [0], [1], [0, 0, 1, 1], [], []>} : vector<1x128xbf16>, vector<128x512xbf16>, vector<1x512xf32> -> vector<1x512xf32>
    %629 = arith.addf %624, %628 : vector<1x512xf32>
    %630 = vector.extract_strided_slice %623 {offsets = [0, 0], sizes = [1, 128], strides = [1, 1]} : vector<1x512xf32> to vector<1x128xf32>
    %631 = arith.negf %630 : vector<1x128xf32>
    %632 = math.exp %631 : vector<1x128xf32>
    %cst_203 = arith.constant 1.000000e+00 : f32
    %633 = vector.broadcast %cst_203 : f32 to vector<1x128xf32>
    %634 = arith.addf %633, %632 : vector<1x128xf32>
    %635 = arith.divf %633, %634 : vector<1x128xf32>
    %636 = vector.extract_strided_slice %623 {offsets = [0, 128], sizes = [1, 128], strides = [1, 1]} : vector<1x512xf32> to vector<1x128xf32>
    %637 = arith.negf %636 : vector<1x128xf32>
    %638 = math.exp %637 : vector<1x128xf32>
    %cst_204 = arith.constant 1.000000e+00 : f32
    %639 = vector.broadcast %cst_204 : f32 to vector<1x128xf32>
    %640 = arith.addf %639, %638 : vector<1x128xf32>
    %641 = arith.divf %639, %640 : vector<1x128xf32>
    %642 = vector.extract_strided_slice %623 {offsets = [0, 256], sizes = [1, 128], strides = [1, 1]} : vector<1x512xf32> to vector<1x128xf32>
    %643 = math.tanh %642 : vector<1x128xf32>
    %644 = vector.extract_strided_slice %623 {offsets = [0, 384], sizes = [1, 128], strides = [1, 1]} : vector<1x512xf32> to vector<1x128xf32>
    %645 = arith.negf %644 : vector<1x128xf32>
    %646 = math.exp %645 : vector<1x128xf32>
    %cst_205 = arith.constant 1.000000e+00 : f32
    %647 = vector.broadcast %cst_205 : f32 to vector<1x128xf32>
    %648 = arith.addf %647, %646 : vector<1x128xf32>
    %649 = arith.divf %647, %648 : vector<1x128xf32>
    %650 = arith.mulf %641, %588 : vector<1x128xf32>
    %651 = arith.mulf %635, %643 : vector<1x128xf32>
    %652 = arith.addf %650, %651 : vector<1x128xf32>
    %653 = math.tanh %652 : vector<1x128xf32>
    %654 = arith.mulf %649, %653 : vector<1x128xf32>
    %655 = vector.extract_strided_slice %629 {offsets = [0, 0], sizes = [1, 128], strides = [1, 1]} : vector<1x512xf32> to vector<1x128xf32>
    %656 = arith.negf %655 : vector<1x128xf32>
    %657 = math.exp %656 : vector<1x128xf32>
    %cst_206 = arith.constant 1.000000e+00 : f32
    %658 = vector.broadcast %cst_206 : f32 to vector<1x128xf32>
    %659 = arith.addf %658, %657 : vector<1x128xf32>
    %660 = arith.divf %658, %659 : vector<1x128xf32>
    %661 = vector.extract_strided_slice %629 {offsets = [0, 128], sizes = [1, 128], strides = [1, 1]} : vector<1x512xf32> to vector<1x128xf32>
    %662 = arith.negf %661 : vector<1x128xf32>
    %663 = math.exp %662 : vector<1x128xf32>
    %cst_207 = arith.constant 1.000000e+00 : f32
    %664 = vector.broadcast %cst_207 : f32 to vector<1x128xf32>
    %665 = arith.addf %664, %663 : vector<1x128xf32>
    %666 = arith.divf %664, %665 : vector<1x128xf32>
    %667 = vector.extract_strided_slice %629 {offsets = [0, 256], sizes = [1, 128], strides = [1, 1]} : vector<1x512xf32> to vector<1x128xf32>
    %668 = math.tanh %667 : vector<1x128xf32>
    %669 = vector.extract_strided_slice %629 {offsets = [0, 384], sizes = [1, 128], strides = [1, 1]} : vector<1x512xf32> to vector<1x128xf32>
    %670 = arith.negf %669 : vector<1x128xf32>
    %671 = math.exp %670 : vector<1x128xf32>
    %cst_208 = arith.constant 1.000000e+00 : f32
    %672 = vector.broadcast %cst_208 : f32 to vector<1x128xf32>
    %673 = arith.addf %672, %671 : vector<1x128xf32>
    %674 = arith.divf %672, %673 : vector<1x128xf32>
    %675 = arith.mulf %666, %613 : vector<1x128xf32>
    %676 = arith.mulf %660, %668 : vector<1x128xf32>
    %677 = arith.addf %675, %676 : vector<1x128xf32>
    %678 = math.tanh %677 : vector<1x128xf32>
    %679 = arith.mulf %674, %678 : vector<1x128xf32>
    %c1_209 = arith.constant 1 : index
    %c0_210 = arith.constant 0 : index
    %680 = vector.load %arg16[%c1_209, %c0_210] : memref<8x128xf32, #tpu.memory_space<vmem>>, vector<1x128xf32>
    tpu.vector_store %arg16[%c1_209, %c0_210], %654 {strides = array<i32>} : memref<8x128xf32, #tpu.memory_space<vmem>>, vector<1x128xf32>,
    %c6_211 = arith.constant 6 : index
    %c0_212 = arith.constant 0 : index
    %681 = vector.load %arg17[%c6_211, %c0_212] : memref<8x128xf32, #tpu.memory_space<vmem>>, vector<1x128xf32>
    tpu.vector_store %arg17[%c6_211, %c0_212], %679 {strides = array<i32>} : memref<8x128xf32, #tpu.memory_space<vmem>>, vector<1x128xf32>,
    %682 = vector.extract_strided_slice %542 {offsets = [2, 0], sizes = [1, 512], strides = [1, 1]} : vector<8x512xf32> to vector<1x512xf32>
    %683 = arith.truncf %654 : vector<1x128xf32> to vector<1x128xbf16>
    %c0_213 = arith.constant 0 : index
    %c0_214 = arith.constant 0 : index
    %c0_215 = arith.constant 0 : index
    %684 = vector.load %arg5[%c0_213, %c0_214, %c0_215] : memref<2x128x512xbf16, #tpu.memory_space<vmem>>, vector<1x128x512xbf16>
    %685 = vector.shape_cast %684 : vector<1x128x512xbf16> to vector<128x512xbf16>
    %cst_216 = arith.constant dense<0.000000e+00> : vector<1x512xf32>
    %686 = tpu.matmul %683, %685, %cst_216 {dimension_numbers = #tpu.dot_dimension_numbers<[1], [0], [0], [1], [0, 0, 1, 1], [], []>} : vector<1x128xbf16>, vector<128x512xbf16>, vector<1x512xf32> -> vector<1x512xf32>
    %687 = arith.addf %682, %686 : vector<1x512xf32>
    %688 = vector.extract_strided_slice %549 {offsets = [5, 0], sizes = [1, 512], strides = [1, 1]} : vector<8x512xf32> to vector<1x512xf32>
    %689 = arith.truncf %679 : vector<1x128xf32> to vector<1x128xbf16>
    %c1_217 = arith.constant 1 : index
    %c0_218 = arith.constant 0 : index
    %c0_219 = arith.constant 0 : index
    %690 = vector.load %arg5[%c1_217, %c0_218, %c0_219] : memref<2x128x512xbf16, #tpu.memory_space<vmem>>, vector<1x128x512xbf16>
    %691 = vector.shape_cast %690 : vector<1x128x512xbf16> to vector<128x512xbf16>
    %cst_220 = arith.constant dense<0.000000e+00> : vector<1x512xf32>
    %692 = tpu.matmul %689, %691, %cst_220 {dimension_numbers = #tpu.dot_dimension_numbers<[1], [0], [0], [1], [0, 0, 1, 1], [], []>} : vector<1x128xbf16>, vector<128x512xbf16>, vector<1x512xf32> -> vector<1x512xf32>
    %693 = arith.addf %688, %692 : vector<1x512xf32>
    %694 = vector.extract_strided_slice %687 {offsets = [0, 0], sizes = [1, 128], strides = [1, 1]} : vector<1x512xf32> to vector<1x128xf32>
    %695 = arith.negf %694 : vector<1x128xf32>
    %696 = math.exp %695 : vector<1x128xf32>
    %cst_221 = arith.constant 1.000000e+00 : f32
    %697 = vector.broadcast %cst_221 : f32 to vector<1x128xf32>
    %698 = arith.addf %697, %696 : vector<1x128xf32>
    %699 = arith.divf %697, %698 : vector<1x128xf32>
    %700 = vector.extract_strided_slice %687 {offsets = [0, 128], sizes = [1, 128], strides = [1, 1]} : vector<1x512xf32> to vector<1x128xf32>
    %701 = arith.negf %700 : vector<1x128xf32>
    %702 = math.exp %701 : vector<1x128xf32>
    %cst_222 = arith.constant 1.000000e+00 : f32
    %703 = vector.broadcast %cst_222 : f32 to vector<1x128xf32>
    %704 = arith.addf %703, %702 : vector<1x128xf32>
    %705 = arith.divf %703, %704 : vector<1x128xf32>
    %706 = vector.extract_strided_slice %687 {offsets = [0, 256], sizes = [1, 128], strides = [1, 1]} : vector<1x512xf32> to vector<1x128xf32>
    %707 = math.tanh %706 : vector<1x128xf32>
    %708 = vector.extract_strided_slice %687 {offsets = [0, 384], sizes = [1, 128], strides = [1, 1]} : vector<1x512xf32> to vector<1x128xf32>
    %709 = arith.negf %708 : vector<1x128xf32>
    %710 = math.exp %709 : vector<1x128xf32>
    %cst_223 = arith.constant 1.000000e+00 : f32
    %711 = vector.broadcast %cst_223 : f32 to vector<1x128xf32>
    %712 = arith.addf %711, %710 : vector<1x128xf32>
    %713 = arith.divf %711, %712 : vector<1x128xf32>
    %714 = arith.mulf %705, %652 : vector<1x128xf32>
    %715 = arith.mulf %699, %707 : vector<1x128xf32>
    %716 = arith.addf %714, %715 : vector<1x128xf32>
    %717 = math.tanh %716 : vector<1x128xf32>
    %718 = arith.mulf %713, %717 : vector<1x128xf32>
    %719 = vector.extract_strided_slice %693 {offsets = [0, 0], sizes = [1, 128], strides = [1, 1]} : vector<1x512xf32> to vector<1x128xf32>
    %720 = arith.negf %719 : vector<1x128xf32>
    %721 = math.exp %720 : vector<1x128xf32>
    %cst_224 = arith.constant 1.000000e+00 : f32
    %722 = vector.broadcast %cst_224 : f32 to vector<1x128xf32>
    %723 = arith.addf %722, %721 : vector<1x128xf32>
    %724 = arith.divf %722, %723 : vector<1x128xf32>
    %725 = vector.extract_strided_slice %693 {offsets = [0, 128], sizes = [1, 128], strides = [1, 1]} : vector<1x512xf32> to vector<1x128xf32>
    %726 = arith.negf %725 : vector<1x128xf32>
    %727 = math.exp %726 : vector<1x128xf32>
    %cst_225 = arith.constant 1.000000e+00 : f32
    %728 = vector.broadcast %cst_225 : f32 to vector<1x128xf32>
    %729 = arith.addf %728, %727 : vector<1x128xf32>
    %730 = arith.divf %728, %729 : vector<1x128xf32>
    %731 = vector.extract_strided_slice %693 {offsets = [0, 256], sizes = [1, 128], strides = [1, 1]} : vector<1x512xf32> to vector<1x128xf32>
    %732 = math.tanh %731 : vector<1x128xf32>
    %733 = vector.extract_strided_slice %693 {offsets = [0, 384], sizes = [1, 128], strides = [1, 1]} : vector<1x512xf32> to vector<1x128xf32>
    %734 = arith.negf %733 : vector<1x128xf32>
    %735 = math.exp %734 : vector<1x128xf32>
    %cst_226 = arith.constant 1.000000e+00 : f32
    %736 = vector.broadcast %cst_226 : f32 to vector<1x128xf32>
    %737 = arith.addf %736, %735 : vector<1x128xf32>
    %738 = arith.divf %736, %737 : vector<1x128xf32>
    %739 = arith.mulf %730, %677 : vector<1x128xf32>
    %740 = arith.mulf %724, %732 : vector<1x128xf32>
    %741 = arith.addf %739, %740 : vector<1x128xf32>
    %742 = math.tanh %741 : vector<1x128xf32>
    %743 = arith.mulf %738, %742 : vector<1x128xf32>
    %c2_227 = arith.constant 2 : index
    %c0_228 = arith.constant 0 : index
    %744 = vector.load %arg16[%c2_227, %c0_228] : memref<8x128xf32, #tpu.memory_space<vmem>>, vector<1x128xf32>
    tpu.vector_store %arg16[%c2_227, %c0_228], %718 {strides = array<i32>} : memref<8x128xf32, #tpu.memory_space<vmem>>, vector<1x128xf32>,
    %c5_229 = arith.constant 5 : index
    %c0_230 = arith.constant 0 : index
    %745 = vector.load %arg17[%c5_229, %c0_230] : memref<8x128xf32, #tpu.memory_space<vmem>>, vector<1x128xf32>
    tpu.vector_store %arg17[%c5_229, %c0_230], %743 {strides = array<i32>} : memref<8x128xf32, #tpu.memory_space<vmem>>, vector<1x128xf32>,
    %746 = vector.extract_strided_slice %542 {offsets = [3, 0], sizes = [1, 512], strides = [1, 1]} : vector<8x512xf32> to vector<1x512xf32>
    %747 = arith.truncf %718 : vector<1x128xf32> to vector<1x128xbf16>
    %c0_231 = arith.constant 0 : index
    %c0_232 = arith.constant 0 : index
    %c0_233 = arith.constant 0 : index
    %748 = vector.load %arg5[%c0_231, %c0_232, %c0_233] : memref<2x128x512xbf16, #tpu.memory_space<vmem>>, vector<1x128x512xbf16>
    %749 = vector.shape_cast %748 : vector<1x128x512xbf16> to vector<128x512xbf16>
    %cst_234 = arith.constant dense<0.000000e+00> : vector<1x512xf32>
    %750 = tpu.matmul %747, %749, %cst_234 {dimension_numbers = #tpu.dot_dimension_numbers<[1], [0], [0], [1], [0, 0, 1, 1], [], []>} : vector<1x128xbf16>, vector<128x512xbf16>, vector<1x512xf32> -> vector<1x512xf32>
    %751 = arith.addf %746, %750 : vector<1x512xf32>
    %752 = vector.extract_strided_slice %549 {offsets = [4, 0], sizes = [1, 512], strides = [1, 1]} : vector<8x512xf32> to vector<1x512xf32>
    %753 = arith.truncf %743 : vector<1x128xf32> to vector<1x128xbf16>
    %c1_235 = arith.constant 1 : index
    %c0_236 = arith.constant 0 : index
    %c0_237 = arith.constant 0 : index
    %754 = vector.load %arg5[%c1_235, %c0_236, %c0_237] : memref<2x128x512xbf16, #tpu.memory_space<vmem>>, vector<1x128x512xbf16>
    %755 = vector.shape_cast %754 : vector<1x128x512xbf16> to vector<128x512xbf16>
    %cst_238 = arith.constant dense<0.000000e+00> : vector<1x512xf32>
    %756 = tpu.matmul %753, %755, %cst_238 {dimension_numbers = #tpu.dot_dimension_numbers<[1], [0], [0], [1], [0, 0, 1, 1], [], []>} : vector<1x128xbf16>, vector<128x512xbf16>, vector<1x512xf32> -> vector<1x512xf32>
    %757 = arith.addf %752, %756 : vector<1x512xf32>
    %758 = vector.extract_strided_slice %751 {offsets = [0, 0], sizes = [1, 128], strides = [1, 1]} : vector<1x512xf32> to vector<1x128xf32>
    %759 = arith.negf %758 : vector<1x128xf32>
    %760 = math.exp %759 : vector<1x128xf32>
    %cst_239 = arith.constant 1.000000e+00 : f32
    %761 = vector.broadcast %cst_239 : f32 to vector<1x128xf32>
    %762 = arith.addf %761, %760 : vector<1x128xf32>
    %763 = arith.divf %761, %762 : vector<1x128xf32>
    %764 = vector.extract_strided_slice %751 {offsets = [0, 128], sizes = [1, 128], strides = [1, 1]} : vector<1x512xf32> to vector<1x128xf32>
    %765 = arith.negf %764 : vector<1x128xf32>
    %766 = math.exp %765 : vector<1x128xf32>
    %cst_240 = arith.constant 1.000000e+00 : f32
    %767 = vector.broadcast %cst_240 : f32 to vector<1x128xf32>
    %768 = arith.addf %767, %766 : vector<1x128xf32>
    %769 = arith.divf %767, %768 : vector<1x128xf32>
    %770 = vector.extract_strided_slice %751 {offsets = [0, 256], sizes = [1, 128], strides = [1, 1]} : vector<1x512xf32> to vector<1x128xf32>
    %771 = math.tanh %770 : vector<1x128xf32>
    %772 = vector.extract_strided_slice %751 {offsets = [0, 384], sizes = [1, 128], strides = [1, 1]} : vector<1x512xf32> to vector<1x128xf32>
    %773 = arith.negf %772 : vector<1x128xf32>
    %774 = math.exp %773 : vector<1x128xf32>
    %cst_241 = arith.constant 1.000000e+00 : f32
    %775 = vector.broadcast %cst_241 : f32 to vector<1x128xf32>
    %776 = arith.addf %775, %774 : vector<1x128xf32>
    %777 = arith.divf %775, %776 : vector<1x128xf32>
    %778 = arith.mulf %769, %716 : vector<1x128xf32>
    %779 = arith.mulf %763, %771 : vector<1x128xf32>
    %780 = arith.addf %778, %779 : vector<1x128xf32>
    %781 = math.tanh %780 : vector<1x128xf32>
    %782 = arith.mulf %777, %781 : vector<1x128xf32>
    %783 = vector.extract_strided_slice %757 {offsets = [0, 0], sizes = [1, 128], strides = [1, 1]} : vector<1x512xf32> to vector<1x128xf32>
    %784 = arith.negf %783 : vector<1x128xf32>
    %785 = math.exp %784 : vector<1x128xf32>
    %cst_242 = arith.constant 1.000000e+00 : f32
    %786 = vector.broadcast %cst_242 : f32 to vector<1x128xf32>
    %787 = arith.addf %786, %785 : vector<1x128xf32>
    %788 = arith.divf %786, %787 : vector<1x128xf32>
    %789 = vector.extract_strided_slice %757 {offsets = [0, 128], sizes = [1, 128], strides = [1, 1]} : vector<1x512xf32> to vector<1x128xf32>
    %790 = arith.negf %789 : vector<1x128xf32>
    %791 = math.exp %790 : vector<1x128xf32>
    %cst_243 = arith.constant 1.000000e+00 : f32
    %792 = vector.broadcast %cst_243 : f32 to vector<1x128xf32>
    %793 = arith.addf %792, %791 : vector<1x128xf32>
    %794 = arith.divf %792, %793 : vector<1x128xf32>
    %795 = vector.extract_strided_slice %757 {offsets = [0, 256], sizes = [1, 128], strides = [1, 1]} : vector<1x512xf32> to vector<1x128xf32>
    %796 = math.tanh %795 : vector<1x128xf32>
    %797 = vector.extract_strided_slice %757 {offsets = [0, 384], sizes = [1, 128], strides = [1, 1]} : vector<1x512xf32> to vector<1x128xf32>
    %798 = arith.negf %797 : vector<1x128xf32>
    %799 = math.exp %798 : vector<1x128xf32>
    %cst_244 = arith.constant 1.000000e+00 : f32
    %800 = vector.broadcast %cst_244 : f32 to vector<1x128xf32>
    %801 = arith.addf %800, %799 : vector<1x128xf32>
    %802 = arith.divf %800, %801 : vector<1x128xf32>
    %803 = arith.mulf %794, %741 : vector<1x128xf32>
    %804 = arith.mulf %788, %796 : vector<1x128xf32>
    %805 = arith.addf %803, %804 : vector<1x128xf32>
    %806 = math.tanh %805 : vector<1x128xf32>
    %807 = arith.mulf %802, %806 : vector<1x128xf32>
    %c3_245 = arith.constant 3 : index
    %c0_246 = arith.constant 0 : index
    %808 = vector.load %arg16[%c3_245, %c0_246] : memref<8x128xf32, #tpu.memory_space<vmem>>, vector<1x128xf32>
    tpu.vector_store %arg16[%c3_245, %c0_246], %782 {strides = array<i32>} : memref<8x128xf32, #tpu.memory_space<vmem>>, vector<1x128xf32>,
    %c4_247 = arith.constant 4 : index
    %c0_248 = arith.constant 0 : index
    %809 = vector.load %arg17[%c4_247, %c0_248] : memref<8x128xf32, #tpu.memory_space<vmem>>, vector<1x128xf32>
    tpu.vector_store %arg17[%c4_247, %c0_248], %807 {strides = array<i32>} : memref<8x128xf32, #tpu.memory_space<vmem>>, vector<1x128xf32>,
    %810 = vector.extract_strided_slice %542 {offsets = [4, 0], sizes = [1, 512], strides = [1, 1]} : vector<8x512xf32> to vector<1x512xf32>
    %811 = arith.truncf %782 : vector<1x128xf32> to vector<1x128xbf16>
    %c0_249 = arith.constant 0 : index
    %c0_250 = arith.constant 0 : index
    %c0_251 = arith.constant 0 : index
    %812 = vector.load %arg5[%c0_249, %c0_250, %c0_251] : memref<2x128x512xbf16, #tpu.memory_space<vmem>>, vector<1x128x512xbf16>
    %813 = vector.shape_cast %812 : vector<1x128x512xbf16> to vector<128x512xbf16>
    %cst_252 = arith.constant dense<0.000000e+00> : vector<1x512xf32>
    %814 = tpu.matmul %811, %813, %cst_252 {dimension_numbers = #tpu.dot_dimension_numbers<[1], [0], [0], [1], [0, 0, 1, 1], [], []>} : vector<1x128xbf16>, vector<128x512xbf16>, vector<1x512xf32> -> vector<1x512xf32>
    %815 = arith.addf %810, %814 : vector<1x512xf32>
    %816 = vector.extract_strided_slice %549 {offsets = [3, 0], sizes = [1, 512], strides = [1, 1]} : vector<8x512xf32> to vector<1x512xf32>
    %817 = arith.truncf %807 : vector<1x128xf32> to vector<1x128xbf16>
    %c1_253 = arith.constant 1 : index
    %c0_254 = arith.constant 0 : index
    %c0_255 = arith.constant 0 : index
    %818 = vector.load %arg5[%c1_253, %c0_254, %c0_255] : memref<2x128x512xbf16, #tpu.memory_space<vmem>>, vector<1x128x512xbf16>
    %819 = vector.shape_cast %818 : vector<1x128x512xbf16> to vector<128x512xbf16>
    %cst_256 = arith.constant dense<0.000000e+00> : vector<1x512xf32>
    %820 = tpu.matmul %817, %819, %cst_256 {dimension_numbers = #tpu.dot_dimension_numbers<[1], [0], [0], [1], [0, 0, 1, 1], [], []>} : vector<1x128xbf16>, vector<128x512xbf16>, vector<1x512xf32> -> vector<1x512xf32>
    %821 = arith.addf %816, %820 : vector<1x512xf32>
    %822 = vector.extract_strided_slice %815 {offsets = [0, 0], sizes = [1, 128], strides = [1, 1]} : vector<1x512xf32> to vector<1x128xf32>
    %823 = arith.negf %822 : vector<1x128xf32>
    %824 = math.exp %823 : vector<1x128xf32>
    %cst_257 = arith.constant 1.000000e+00 : f32
    %825 = vector.broadcast %cst_257 : f32 to vector<1x128xf32>
    %826 = arith.addf %825, %824 : vector<1x128xf32>
    %827 = arith.divf %825, %826 : vector<1x128xf32>
    %828 = vector.extract_strided_slice %815 {offsets = [0, 128], sizes = [1, 128], strides = [1, 1]} : vector<1x512xf32> to vector<1x128xf32>
    %829 = arith.negf %828 : vector<1x128xf32>
    %830 = math.exp %829 : vector<1x128xf32>
    %cst_258 = arith.constant 1.000000e+00 : f32
    %831 = vector.broadcast %cst_258 : f32 to vector<1x128xf32>
    %832 = arith.addf %831, %830 : vector<1x128xf32>
    %833 = arith.divf %831, %832 : vector<1x128xf32>
    %834 = vector.extract_strided_slice %815 {offsets = [0, 256], sizes = [1, 128], strides = [1, 1]} : vector<1x512xf32> to vector<1x128xf32>
    %835 = math.tanh %834 : vector<1x128xf32>
    %836 = vector.extract_strided_slice %815 {offsets = [0, 384], sizes = [1, 128], strides = [1, 1]} : vector<1x512xf32> to vector<1x128xf32>
    %837 = arith.negf %836 : vector<1x128xf32>
    %838 = math.exp %837 : vector<1x128xf32>
    %cst_259 = arith.constant 1.000000e+00 : f32
    %839 = vector.broadcast %cst_259 : f32 to vector<1x128xf32>
    %840 = arith.addf %839, %838 : vector<1x128xf32>
    %841 = arith.divf %839, %840 : vector<1x128xf32>
    %842 = arith.mulf %833, %780 : vector<1x128xf32>
    %843 = arith.mulf %827, %835 : vector<1x128xf32>
    %844 = arith.addf %842, %843 : vector<1x128xf32>
    %845 = math.tanh %844 : vector<1x128xf32>
    %846 = arith.mulf %841, %845 : vector<1x128xf32>
    %847 = vector.extract_strided_slice %821 {offsets = [0, 0], sizes = [1, 128], strides = [1, 1]} : vector<1x512xf32> to vector<1x128xf32>
    %848 = arith.negf %847 : vector<1x128xf32>
    %849 = math.exp %848 : vector<1x128xf32>
    %cst_260 = arith.constant 1.000000e+00 : f32
    %850 = vector.broadcast %cst_260 : f32 to vector<1x128xf32>
    %851 = arith.addf %850, %849 : vector<1x128xf32>
    %852 = arith.divf %850, %851 : vector<1x128xf32>
    %853 = vector.extract_strided_slice %821 {offsets = [0, 128], sizes = [1, 128], strides = [1, 1]} : vector<1x512xf32> to vector<1x128xf32>
    %854 = arith.negf %853 : vector<1x128xf32>
    %855 = math.exp %854 : vector<1x128xf32>
    %cst_261 = arith.constant 1.000000e+00 : f32
    %856 = vector.broadcast %cst_261 : f32 to vector<1x128xf32>
    %857 = arith.addf %856, %855 : vector<1x128xf32>
    %858 = arith.divf %856, %857 : vector<1x128xf32>
    %859 = vector.extract_strided_slice %821 {offsets = [0, 256], sizes = [1, 128], strides = [1, 1]} : vector<1x512xf32> to vector<1x128xf32>
    %860 = math.tanh %859 : vector<1x128xf32>
    %861 = vector.extract_strided_slice %821 {offsets = [0, 384], sizes = [1, 128], strides = [1, 1]} : vector<1x512xf32> to vector<1x128xf32>
    %862 = arith.negf %861 : vector<1x128xf32>
    %863 = math.exp %862 : vector<1x128xf32>
    %cst_262 = arith.constant 1.000000e+00 : f32
    %864 = vector.broadcast %cst_262 : f32 to vector<1x128xf32>
    %865 = arith.addf %864, %863 : vector<1x128xf32>
    %866 = arith.divf %864, %865 : vector<1x128xf32>
    %867 = arith.mulf %858, %805 : vector<1x128xf32>
    %868 = arith.mulf %852, %860 : vector<1x128xf32>
    %869 = arith.addf %867, %868 : vector<1x128xf32>
    %870 = math.tanh %869 : vector<1x128xf32>
    %871 = arith.mulf %866, %870 : vector<1x128xf32>
    %c4_263 = arith.constant 4 : index
    %c0_264 = arith.constant 0 : index
    %872 = vector.load %arg16[%c4_263, %c0_264] : memref<8x128xf32, #tpu.memory_space<vmem>>, vector<1x128xf32>
    tpu.vector_store %arg16[%c4_263, %c0_264], %846 {strides = array<i32>} : memref<8x128xf32, #tpu.memory_space<vmem>>, vector<1x128xf32>,
    %c3_265 = arith.constant 3 : index
    %c0_266 = arith.constant 0 : index
    %873 = vector.load %arg17[%c3_265, %c0_266] : memref<8x128xf32, #tpu.memory_space<vmem>>, vector<1x128xf32>
    tpu.vector_store %arg17[%c3_265, %c0_266], %871 {strides = array<i32>} : memref<8x128xf32, #tpu.memory_space<vmem>>, vector<1x128xf32>,
    %874 = vector.extract_strided_slice %542 {offsets = [5, 0], sizes = [1, 512], strides = [1, 1]} : vector<8x512xf32> to vector<1x512xf32>
    %875 = arith.truncf %846 : vector<1x128xf32> to vector<1x128xbf16>
    %c0_267 = arith.constant 0 : index
    %c0_268 = arith.constant 0 : index
    %c0_269 = arith.constant 0 : index
    %876 = vector.load %arg5[%c0_267, %c0_268, %c0_269] : memref<2x128x512xbf16, #tpu.memory_space<vmem>>, vector<1x128x512xbf16>
    %877 = vector.shape_cast %876 : vector<1x128x512xbf16> to vector<128x512xbf16>
    %cst_270 = arith.constant dense<0.000000e+00> : vector<1x512xf32>
    %878 = tpu.matmul %875, %877, %cst_270 {dimension_numbers = #tpu.dot_dimension_numbers<[1], [0], [0], [1], [0, 0, 1, 1], [], []>} : vector<1x128xbf16>, vector<128x512xbf16>, vector<1x512xf32> -> vector<1x512xf32>
    %879 = arith.addf %874, %878 : vector<1x512xf32>
    %880 = vector.extract_strided_slice %549 {offsets = [2, 0], sizes = [1, 512], strides = [1, 1]} : vector<8x512xf32> to vector<1x512xf32>
    %881 = arith.truncf %871 : vector<1x128xf32> to vector<1x128xbf16>
    %c1_271 = arith.constant 1 : index
    %c0_272 = arith.constant 0 : index
    %c0_273 = arith.constant 0 : index
    %882 = vector.load %arg5[%c1_271, %c0_272, %c0_273] : memref<2x128x512xbf16, #tpu.memory_space<vmem>>, vector<1x128x512xbf16>
    %883 = vector.shape_cast %882 : vector<1x128x512xbf16> to vector<128x512xbf16>
    %cst_274 = arith.constant dense<0.000000e+00> : vector<1x512xf32>
    %884 = tpu.matmul %881, %883, %cst_274 {dimension_numbers = #tpu.dot_dimension_numbers<[1], [0], [0], [1], [0, 0, 1, 1], [], []>} : vector<1x128xbf16>, vector<128x512xbf16>, vector<1x512xf32> -> vector<1x512xf32>
    %885 = arith.addf %880, %884 : vector<1x512xf32>
    %886 = vector.extract_strided_slice %879 {offsets = [0, 0], sizes = [1, 128], strides = [1, 1]} : vector<1x512xf32> to vector<1x128xf32>
    %887 = arith.negf %886 : vector<1x128xf32>
    %888 = math.exp %887 : vector<1x128xf32>
    %cst_275 = arith.constant 1.000000e+00 : f32
    %889 = vector.broadcast %cst_275 : f32 to vector<1x128xf32>
    %890 = arith.addf %889, %888 : vector<1x128xf32>
    %891 = arith.divf %889, %890 : vector<1x128xf32>
    %892 = vector.extract_strided_slice %879 {offsets = [0, 128], sizes = [1, 128], strides = [1, 1]} : vector<1x512xf32> to vector<1x128xf32>
    %893 = arith.negf %892 : vector<1x128xf32>
    %894 = math.exp %893 : vector<1x128xf32>
    %cst_276 = arith.constant 1.000000e+00 : f32
    %895 = vector.broadcast %cst_276 : f32 to vector<1x128xf32>
    %896 = arith.addf %895, %894 : vector<1x128xf32>
    %897 = arith.divf %895, %896 : vector<1x128xf32>
    %898 = vector.extract_strided_slice %879 {offsets = [0, 256], sizes = [1, 128], strides = [1, 1]} : vector<1x512xf32> to vector<1x128xf32>
    %899 = math.tanh %898 : vector<1x128xf32>
    %900 = vector.extract_strided_slice %879 {offsets = [0, 384], sizes = [1, 128], strides = [1, 1]} : vector<1x512xf32> to vector<1x128xf32>
    %901 = arith.negf %900 : vector<1x128xf32>
    %902 = math.exp %901 : vector<1x128xf32>
    %cst_277 = arith.constant 1.000000e+00 : f32
    %903 = vector.broadcast %cst_277 : f32 to vector<1x128xf32>
    %904 = arith.addf %903, %902 : vector<1x128xf32>
    %905 = arith.divf %903, %904 : vector<1x128xf32>
    %906 = arith.mulf %897, %844 : vector<1x128xf32>
    %907 = arith.mulf %891, %899 : vector<1x128xf32>
    %908 = arith.addf %906, %907 : vector<1x128xf32>
    %909 = math.tanh %908 : vector<1x128xf32>
    %910 = arith.mulf %905, %909 : vector<1x128xf32>
    %911 = vector.extract_strided_slice %885 {offsets = [0, 0], sizes = [1, 128], strides = [1, 1]} : vector<1x512xf32> to vector<1x128xf32>
    %912 = arith.negf %911 : vector<1x128xf32>
    %913 = math.exp %912 : vector<1x128xf32>
    %cst_278 = arith.constant 1.000000e+00 : f32
    %914 = vector.broadcast %cst_278 : f32 to vector<1x128xf32>
    %915 = arith.addf %914, %913 : vector<1x128xf32>
    %916 = arith.divf %914, %915 : vector<1x128xf32>
    %917 = vector.extract_strided_slice %885 {offsets = [0, 128], sizes = [1, 128], strides = [1, 1]} : vector<1x512xf32> to vector<1x128xf32>
    %918 = arith.negf %917 : vector<1x128xf32>
    %919 = math.exp %918 : vector<1x128xf32>
    %cst_279 = arith.constant 1.000000e+00 : f32
    %920 = vector.broadcast %cst_279 : f32 to vector<1x128xf32>
    %921 = arith.addf %920, %919 : vector<1x128xf32>
    %922 = arith.divf %920, %921 : vector<1x128xf32>
    %923 = vector.extract_strided_slice %885 {offsets = [0, 256], sizes = [1, 128], strides = [1, 1]} : vector<1x512xf32> to vector<1x128xf32>
    %924 = math.tanh %923 : vector<1x128xf32>
    %925 = vector.extract_strided_slice %885 {offsets = [0, 384], sizes = [1, 128], strides = [1, 1]} : vector<1x512xf32> to vector<1x128xf32>
    %926 = arith.negf %925 : vector<1x128xf32>
    %927 = math.exp %926 : vector<1x128xf32>
    %cst_280 = arith.constant 1.000000e+00 : f32
    %928 = vector.broadcast %cst_280 : f32 to vector<1x128xf32>
    %929 = arith.addf %928, %927 : vector<1x128xf32>
    %930 = arith.divf %928, %929 : vector<1x128xf32>
    %931 = arith.mulf %922, %869 : vector<1x128xf32>
    %932 = arith.mulf %916, %924 : vector<1x128xf32>
    %933 = arith.addf %931, %932 : vector<1x128xf32>
    %934 = math.tanh %933 : vector<1x128xf32>
    %935 = arith.mulf %930, %934 : vector<1x128xf32>
    %c5_281 = arith.constant 5 : index
    %c0_282 = arith.constant 0 : index
    %936 = vector.load %arg16[%c5_281, %c0_282] : memref<8x128xf32, #tpu.memory_space<vmem>>, vector<1x128xf32>
    tpu.vector_store %arg16[%c5_281, %c0_282], %910 {strides = array<i32>} : memref<8x128xf32, #tpu.memory_space<vmem>>, vector<1x128xf32>,
    %c2_283 = arith.constant 2 : index
    %c0_284 = arith.constant 0 : index
    %937 = vector.load %arg17[%c2_283, %c0_284] : memref<8x128xf32, #tpu.memory_space<vmem>>, vector<1x128xf32>
    tpu.vector_store %arg17[%c2_283, %c0_284], %935 {strides = array<i32>} : memref<8x128xf32, #tpu.memory_space<vmem>>, vector<1x128xf32>,
    %938 = vector.extract_strided_slice %542 {offsets = [6, 0], sizes = [1, 512], strides = [1, 1]} : vector<8x512xf32> to vector<1x512xf32>
    %939 = arith.truncf %910 : vector<1x128xf32> to vector<1x128xbf16>
    %c0_285 = arith.constant 0 : index
    %c0_286 = arith.constant 0 : index
    %c0_287 = arith.constant 0 : index
    %940 = vector.load %arg5[%c0_285, %c0_286, %c0_287] : memref<2x128x512xbf16, #tpu.memory_space<vmem>>, vector<1x128x512xbf16>
    %941 = vector.shape_cast %940 : vector<1x128x512xbf16> to vector<128x512xbf16>
    %cst_288 = arith.constant dense<0.000000e+00> : vector<1x512xf32>
    %942 = tpu.matmul %939, %941, %cst_288 {dimension_numbers = #tpu.dot_dimension_numbers<[1], [0], [0], [1], [0, 0, 1, 1], [], []>} : vector<1x128xbf16>, vector<128x512xbf16>, vector<1x512xf32> -> vector<1x512xf32>
    %943 = arith.addf %938, %942 : vector<1x512xf32>
    %944 = vector.extract_strided_slice %549 {offsets = [1, 0], sizes = [1, 512], strides = [1, 1]} : vector<8x512xf32> to vector<1x512xf32>
    %945 = arith.truncf %935 : vector<1x128xf32> to vector<1x128xbf16>
    %c1_289 = arith.constant 1 : index
    %c0_290 = arith.constant 0 : index
    %c0_291 = arith.constant 0 : index
    %946 = vector.load %arg5[%c1_289, %c0_290, %c0_291] : memref<2x128x512xbf16, #tpu.memory_space<vmem>>, vector<1x128x512xbf16>
    %947 = vector.shape_cast %946 : vector<1x128x512xbf16> to vector<128x512xbf16>
    %cst_292 = arith.constant dense<0.000000e+00> : vector<1x512xf32>
    %948 = tpu.matmul %945, %947, %cst_292 {dimension_numbers = #tpu.dot_dimension_numbers<[1], [0], [0], [1], [0, 0, 1, 1], [], []>} : vector<1x128xbf16>, vector<128x512xbf16>, vector<1x512xf32> -> vector<1x512xf32>
    %949 = arith.addf %944, %948 : vector<1x512xf32>
    %950 = vector.extract_strided_slice %943 {offsets = [0, 0], sizes = [1, 128], strides = [1, 1]} : vector<1x512xf32> to vector<1x128xf32>
    %951 = arith.negf %950 : vector<1x128xf32>
    %952 = math.exp %951 : vector<1x128xf32>
    %cst_293 = arith.constant 1.000000e+00 : f32
    %953 = vector.broadcast %cst_293 : f32 to vector<1x128xf32>
    %954 = arith.addf %953, %952 : vector<1x128xf32>
    %955 = arith.divf %953, %954 : vector<1x128xf32>
    %956 = vector.extract_strided_slice %943 {offsets = [0, 128], sizes = [1, 128], strides = [1, 1]} : vector<1x512xf32> to vector<1x128xf32>
    %957 = arith.negf %956 : vector<1x128xf32>
    %958 = math.exp %957 : vector<1x128xf32>
    %cst_294 = arith.constant 1.000000e+00 : f32
    %959 = vector.broadcast %cst_294 : f32 to vector<1x128xf32>
    %960 = arith.addf %959, %958 : vector<1x128xf32>
    %961 = arith.divf %959, %960 : vector<1x128xf32>
    %962 = vector.extract_strided_slice %943 {offsets = [0, 256], sizes = [1, 128], strides = [1, 1]} : vector<1x512xf32> to vector<1x128xf32>
    %963 = math.tanh %962 : vector<1x128xf32>
    %964 = vector.extract_strided_slice %943 {offsets = [0, 384], sizes = [1, 128], strides = [1, 1]} : vector<1x512xf32> to vector<1x128xf32>
    %965 = arith.negf %964 : vector<1x128xf32>
    %966 = math.exp %965 : vector<1x128xf32>
    %cst_295 = arith.constant 1.000000e+00 : f32
    %967 = vector.broadcast %cst_295 : f32 to vector<1x128xf32>
    %968 = arith.addf %967, %966 : vector<1x128xf32>
    %969 = arith.divf %967, %968 : vector<1x128xf32>
    %970 = arith.mulf %961, %908 : vector<1x128xf32>
    %971 = arith.mulf %955, %963 : vector<1x128xf32>
    %972 = arith.addf %970, %971 : vector<1x128xf32>
    %973 = math.tanh %972 : vector<1x128xf32>
    %974 = arith.mulf %969, %973 : vector<1x128xf32>
    %975 = vector.extract_strided_slice %949 {offsets = [0, 0], sizes = [1, 128], strides = [1, 1]} : vector<1x512xf32> to vector<1x128xf32>
    %976 = arith.negf %975 : vector<1x128xf32>
    %977 = math.exp %976 : vector<1x128xf32>
    %cst_296 = arith.constant 1.000000e+00 : f32
    %978 = vector.broadcast %cst_296 : f32 to vector<1x128xf32>
    %979 = arith.addf %978, %977 : vector<1x128xf32>
    %980 = arith.divf %978, %979 : vector<1x128xf32>
    %981 = vector.extract_strided_slice %949 {offsets = [0, 128], sizes = [1, 128], strides = [1, 1]} : vector<1x512xf32> to vector<1x128xf32>
    %982 = arith.negf %981 : vector<1x128xf32>
    %983 = math.exp %982 : vector<1x128xf32>
    %cst_297 = arith.constant 1.000000e+00 : f32
    %984 = vector.broadcast %cst_297 : f32 to vector<1x128xf32>
    %985 = arith.addf %984, %983 : vector<1x128xf32>
    %986 = arith.divf %984, %985 : vector<1x128xf32>
    %987 = vector.extract_strided_slice %949 {offsets = [0, 256], sizes = [1, 128], strides = [1, 1]} : vector<1x512xf32> to vector<1x128xf32>
    %988 = math.tanh %987 : vector<1x128xf32>
    %989 = vector.extract_strided_slice %949 {offsets = [0, 384], sizes = [1, 128], strides = [1, 1]} : vector<1x512xf32> to vector<1x128xf32>
    %990 = arith.negf %989 : vector<1x128xf32>
    %991 = math.exp %990 : vector<1x128xf32>
    %cst_298 = arith.constant 1.000000e+00 : f32
    %992 = vector.broadcast %cst_298 : f32 to vector<1x128xf32>
    %993 = arith.addf %992, %991 : vector<1x128xf32>
    %994 = arith.divf %992, %993 : vector<1x128xf32>
    %995 = arith.mulf %986, %933 : vector<1x128xf32>
    %996 = arith.mulf %980, %988 : vector<1x128xf32>
    %997 = arith.addf %995, %996 : vector<1x128xf32>
    %998 = math.tanh %997 : vector<1x128xf32>
    %999 = arith.mulf %994, %998 : vector<1x128xf32>
    %c6_299 = arith.constant 6 : index
    %c0_300 = arith.constant 0 : index
    %1000 = vector.load %arg16[%c6_299, %c0_300] : memref<8x128xf32, #tpu.memory_space<vmem>>, vector<1x128xf32>
    tpu.vector_store %arg16[%c6_299, %c0_300], %974 {strides = array<i32>} : memref<8x128xf32, #tpu.memory_space<vmem>>, vector<1x128xf32>,
    %c1_301 = arith.constant 1 : index
    %c0_302 = arith.constant 0 : index
    %1001 = vector.load %arg17[%c1_301, %c0_302] : memref<8x128xf32, #tpu.memory_space<vmem>>, vector<1x128xf32>
    tpu.vector_store %arg17[%c1_301, %c0_302], %999 {strides = array<i32>} : memref<8x128xf32, #tpu.memory_space<vmem>>, vector<1x128xf32>,
    %1002 = vector.extract_strided_slice %542 {offsets = [7, 0], sizes = [1, 512], strides = [1, 1]} : vector<8x512xf32> to vector<1x512xf32>
    %1003 = arith.truncf %974 : vector<1x128xf32> to vector<1x128xbf16>
    %c0_303 = arith.constant 0 : index
    %c0_304 = arith.constant 0 : index
    %c0_305 = arith.constant 0 : index
    %1004 = vector.load %arg5[%c0_303, %c0_304, %c0_305] : memref<2x128x512xbf16, #tpu.memory_space<vmem>>, vector<1x128x512xbf16>
    %1005 = vector.shape_cast %1004 : vector<1x128x512xbf16> to vector<128x512xbf16>
    %cst_306 = arith.constant dense<0.000000e+00> : vector<1x512xf32>
    %1006 = tpu.matmul %1003, %1005, %cst_306 {dimension_numbers = #tpu.dot_dimension_numbers<[1], [0], [0], [1], [0, 0, 1, 1], [], []>} : vector<1x128xbf16>, vector<128x512xbf16>, vector<1x512xf32> -> vector<1x512xf32>
    %1007 = arith.addf %1002, %1006 : vector<1x512xf32>
    %1008 = vector.extract_strided_slice %549 {offsets = [0, 0], sizes = [1, 512], strides = [1, 1]} : vector<8x512xf32> to vector<1x512xf32>
    %1009 = arith.truncf %999 : vector<1x128xf32> to vector<1x128xbf16>
    %c1_307 = arith.constant 1 : index
    %c0_308 = arith.constant 0 : index
    %c0_309 = arith.constant 0 : index
    %1010 = vector.load %arg5[%c1_307, %c0_308, %c0_309] : memref<2x128x512xbf16, #tpu.memory_space<vmem>>, vector<1x128x512xbf16>
    %1011 = vector.shape_cast %1010 : vector<1x128x512xbf16> to vector<128x512xbf16>
    %cst_310 = arith.constant dense<0.000000e+00> : vector<1x512xf32>
    %1012 = tpu.matmul %1009, %1011, %cst_310 {dimension_numbers = #tpu.dot_dimension_numbers<[1], [0], [0], [1], [0, 0, 1, 1], [], []>} : vector<1x128xbf16>, vector<128x512xbf16>, vector<1x512xf32> -> vector<1x512xf32>
    %1013 = arith.addf %1008, %1012 : vector<1x512xf32>
    %1014 = vector.extract_strided_slice %1007 {offsets = [0, 0], sizes = [1, 128], strides = [1, 1]} : vector<1x512xf32> to vector<1x128xf32>
    %1015 = arith.negf %1014 : vector<1x128xf32>
    %1016 = math.exp %1015 : vector<1x128xf32>
    %cst_311 = arith.constant 1.000000e+00 : f32
    %1017 = vector.broadcast %cst_311 : f32 to vector<1x128xf32>
    %1018 = arith.addf %1017, %1016 : vector<1x128xf32>
    %1019 = arith.divf %1017, %1018 : vector<1x128xf32>
    %1020 = vector.extract_strided_slice %1007 {offsets = [0, 128], sizes = [1, 128], strides = [1, 1]} : vector<1x512xf32> to vector<1x128xf32>
    %1021 = arith.negf %1020 : vector<1x128xf32>
    %1022 = math.exp %1021 : vector<1x128xf32>
    %cst_312 = arith.constant 1.000000e+00 : f32
    %1023 = vector.broadcast %cst_312 : f32 to vector<1x128xf32>
    %1024 = arith.addf %1023, %1022 : vector<1x128xf32>
    %1025 = arith.divf %1023, %1024 : vector<1x128xf32>
    %1026 = vector.extract_strided_slice %1007 {offsets = [0, 256], sizes = [1, 128], strides = [1, 1]} : vector<1x512xf32> to vector<1x128xf32>
    %1027 = math.tanh %1026 : vector<1x128xf32>
    %1028 = vector.extract_strided_slice %1007 {offsets = [0, 384], sizes = [1, 128], strides = [1, 1]} : vector<1x512xf32> to vector<1x128xf32>
    %1029 = arith.negf %1028 : vector<1x128xf32>
    %1030 = math.exp %1029 : vector<1x128xf32>
    %cst_313 = arith.constant 1.000000e+00 : f32
    %1031 = vector.broadcast %cst_313 : f32 to vector<1x128xf32>
    %1032 = arith.addf %1031, %1030 : vector<1x128xf32>
    %1033 = arith.divf %1031, %1032 : vector<1x128xf32>
    %1034 = arith.mulf %1025, %972 : vector<1x128xf32>
    %1035 = arith.mulf %1019, %1027 : vector<1x128xf32>
    %1036 = arith.addf %1034, %1035 : vector<1x128xf32>
    %1037 = math.tanh %1036 : vector<1x128xf32>
    %1038 = arith.mulf %1033, %1037 : vector<1x128xf32>
    %1039 = vector.extract_strided_slice %1013 {offsets = [0, 0], sizes = [1, 128], strides = [1, 1]} : vector<1x512xf32> to vector<1x128xf32>
    %1040 = arith.negf %1039 : vector<1x128xf32>
    %1041 = math.exp %1040 : vector<1x128xf32>
    %cst_314 = arith.constant 1.000000e+00 : f32
    %1042 = vector.broadcast %cst_314 : f32 to vector<1x128xf32>
    %1043 = arith.addf %1042, %1041 : vector<1x128xf32>
    %1044 = arith.divf %1042, %1043 : vector<1x128xf32>
    %1045 = vector.extract_strided_slice %1013 {offsets = [0, 128], sizes = [1, 128], strides = [1, 1]} : vector<1x512xf32> to vector<1x128xf32>
    %1046 = arith.negf %1045 : vector<1x128xf32>
    %1047 = math.exp %1046 : vector<1x128xf32>
    %cst_315 = arith.constant 1.000000e+00 : f32
    %1048 = vector.broadcast %cst_315 : f32 to vector<1x128xf32>
    %1049 = arith.addf %1048, %1047 : vector<1x128xf32>
    %1050 = arith.divf %1048, %1049 : vector<1x128xf32>
    %1051 = vector.extract_strided_slice %1013 {offsets = [0, 256], sizes = [1, 128], strides = [1, 1]} : vector<1x512xf32> to vector<1x128xf32>
    %1052 = math.tanh %1051 : vector<1x128xf32>
    %1053 = vector.extract_strided_slice %1013 {offsets = [0, 384], sizes = [1, 128], strides = [1, 1]} : vector<1x512xf32> to vector<1x128xf32>
    %1054 = arith.negf %1053 : vector<1x128xf32>
    %1055 = math.exp %1054 : vector<1x128xf32>
    %cst_316 = arith.constant 1.000000e+00 : f32
    %1056 = vector.broadcast %cst_316 : f32 to vector<1x128xf32>
    %1057 = arith.addf %1056, %1055 : vector<1x128xf32>
    %1058 = arith.divf %1056, %1057 : vector<1x128xf32>
    %1059 = arith.mulf %1050, %997 : vector<1x128xf32>
    %1060 = arith.mulf %1044, %1052 : vector<1x128xf32>
    %1061 = arith.addf %1059, %1060 : vector<1x128xf32>
    %1062 = math.tanh %1061 : vector<1x128xf32>
    %1063 = arith.mulf %1058, %1062 : vector<1x128xf32>
    %c7_317 = arith.constant 7 : index
    %c0_318 = arith.constant 0 : index
    %1064 = vector.load %arg16[%c7_317, %c0_318] : memref<8x128xf32, #tpu.memory_space<vmem>>, vector<1x128xf32>
    tpu.vector_store %arg16[%c7_317, %c0_318], %1038 {strides = array<i32>} : memref<8x128xf32, #tpu.memory_space<vmem>>, vector<1x128xf32>,
    %c0_319 = arith.constant 0 : index
    %c0_320 = arith.constant 0 : index
    %1065 = vector.load %arg17[%c0_319, %c0_320] : memref<8x128xf32, #tpu.memory_space<vmem>>, vector<1x128xf32>
    tpu.vector_store %arg17[%c0_319, %c0_320], %1063 {strides = array<i32>} : memref<8x128xf32, #tpu.memory_space<vmem>>, vector<1x128xf32>,
    %c0_321 = arith.constant 0 : index
    %c0_322 = arith.constant 0 : index
    %1066 = vector.load %arg16[%c0_321, %c0_322] : memref<8x128xf32, #tpu.memory_space<vmem>>, vector<8x128xf32>
    %c0_323 = arith.constant 0 : index
    %c0_324 = arith.constant 0 : index
    %1067 = vector.load %arg17[%c0_323, %c0_324] : memref<8x128xf32, #tpu.memory_space<vmem>>, vector<8x128xf32>
    %1068 = tpu.concatenate %1066, %1067 in 1 : vector<8x128xf32>, vector<8x128xf32> -> vector<8x256xf32>
    %1069 = arith.truncf %1068 : vector<8x256xf32> to vector<8x256xbf16>
    %c0_325 = arith.constant 0 : index
    %c0_326 = arith.constant 0 : index
    %1070 = vector.load %arg7[%c0_325, %c0_326] : memref<256x128xbf16, #tpu.memory_space<vmem>>, vector<256x128xbf16>
    %cst_327 = arith.constant dense<0.000000e+00> : vector<8x128xf32>
    %1071 = tpu.matmul %1069, %1070, %cst_327 {dimension_numbers = #tpu.dot_dimension_numbers<[1], [0], [0], [1], [0, 0, 1, 1], [], []>} : vector<8x256xbf16>, vector<256x128xbf16>, vector<8x128xf32> -> vector<8x128xf32>
    %c0_328 = arith.constant 0 : index
    %c0_329 = arith.constant 0 : index
    %1072 = vector.load %arg8[%c0_328, %c0_329] : memref<1x128xf32, #tpu.memory_space<vmem>>, vector<1x128xf32>
    %1073 = vector.broadcast %1072 : vector<1x128xf32> to vector<8x128xf32>
    %1074 = arith.addf %1071, %1073 : vector<8x128xf32>
    %c0_330 = arith.constant 0 : index
    %c0_331 = arith.constant 0 : index
    %1075 = vector.load %arg9[%c0_330, %c0_331] : memref<256x128xbf16, #tpu.memory_space<vmem>>, vector<256x128xbf16>
    %cst_332 = arith.constant dense<0.000000e+00> : vector<8x128xf32>
    %1076 = tpu.matmul %1069, %1075, %cst_332 {dimension_numbers = #tpu.dot_dimension_numbers<[1], [0], [0], [1], [0, 0, 1, 1], [], []>} : vector<8x256xbf16>, vector<256x128xbf16>, vector<8x128xf32> -> vector<8x128xf32>
    %c0_333 = arith.constant 0 : index
    %c0_334 = arith.constant 0 : index
    %1077 = vector.load %arg10[%c0_333, %c0_334] : memref<1x128xf32, #tpu.memory_space<vmem>>, vector<1x128xf32>
    %1078 = vector.broadcast %1077 : vector<1x128xf32> to vector<8x128xf32>
    %1079 = arith.addf %1076, %1078 : vector<8x128xf32>
    %1080 = vector.shape_cast %1074 : vector<8x128xf32> to vector<8x1x128xf32>
    %1081 = vector.shape_cast %1079 : vector<8x128xf32> to vector<1x8x128xf32>
    %1082 = vector.broadcast %1080 : vector<8x1x128xf32> to vector<8x8x128xf32>
    %1083 = vector.broadcast %1081 : vector<1x8x128xf32> to vector<8x8x128xf32>
    %1084 = arith.addf %1082, %1083 : vector<8x8x128xf32>
    %1085 = math.tanh %1084 : vector<8x8x128xf32>
    %c0_335 = arith.constant 0 : index
    %c0_336 = arith.constant 0 : index
    %1086 = vector.load %arg11[%c0_335, %c0_336] : memref<1x128xf32, #tpu.memory_space<vmem>>, vector<1x128xf32>
    %1087 = vector.shape_cast %1086 : vector<1x128xf32> to vector<1x1x128xf32>
    %1088 = vector.broadcast %1087 : vector<1x1x128xf32> to vector<8x8x128xf32>
    %1089 = arith.mulf %1085, %1088 : vector<8x8x128xf32>
    %cst_337 = arith.constant dense<0.000000e+00> : vector<8x8xf32>
    %1090 = vector.multi_reduction <add>, %1089, %cst_337 [2] : vector<8x8x128xf32> to vector<8x8xf32>
    %c0_338 = arith.constant 0 : index
    %c0_339 = arith.constant 0 : index
    %1091 = memref.load %arg12[%c0_338, %c0_339] : memref<1x1xf32, #tpu.memory_space<smem>>
    %1092 = vector.broadcast %1091 : f32 to vector<8x8xf32>
    %1093 = arith.addf %1090, %1092 : vector<8x8xf32>
    %1094 = tpu.iota {dimensions = array<i32: 0>} : vector<8x8xi32>
    %1095 = tpu.iota {dimensions = array<i32: 1>} : vector<8x8xi32>
    %1096 = arith.cmpi eq, %1094, %1095 : vector<8x8xi32>
    %cst_340 = arith.constant 0xFF800000 : f32
    %1097 = vector.broadcast %cst_340 : f32 to vector<8x8xf32>
    %1098 = arith.select %1096, %1097, %1093 : vector<8x8xi1>, vector<8x8xf32>
    %c0_341 = arith.constant 0 : index
    %c0_342 = arith.constant 0 : index
    %1099 = vector.load %arg13[%c0_341, %c0_342] : memref<8x8xf32, #tpu.memory_space<vmem>>, vector<8x8xf32>
    tpu.vector_store %arg13[%c0_341, %c0_342], %1098 {strides = array<i32>} : memref<8x8xf32, #tpu.memory_space<vmem>>, vector<8x8xf32>,
    return
  }
}

</mosaic_0001>

<bundles_post_ra>
// kernel: dependency_parser_forward.1
= control target key start
LH: loop header
LB: loop body
LE: loop exit
PB: predicated region body
PF: predicated region fallthrough
CT: control target
= control target key end

     0   :  { %19 = vsyncpa [#allocation8], 0  ;;  %s18306_s0 = inlined_call_operand.vmem [shape: f32[8,128], index: 0, kind: input, shape index: {}]   ;;  %s18307_s1 = inlined_call_operand.hbm [shape: bf16[2,128,512], index: 1, kind: input, shape index: {}]   ;;  %s18308_s2 = inlined_call_operand.hbm [shape: bf16[2,128,512], index: 2, kind: input, shape index: {}]   ;;  %s18309_s3 = inlined_call_operand.vmem [shape: f32[2,1,512], index: 3, kind: input, shape index: {}]   ;;  %s18310_s4 = inlined_call_operand.hbm [shape: bf16[2,256,512], index: 4, kind: input, shape index: {}]   ;;  %s18311_s5 = inlined_call_operand.hbm [shape: bf16[2,128,512], index: 5, kind: input, shape index: {}]   ;;  %s18312_s6 = inlined_call_operand.vmem [shape: f32[2,1,512], index: 6, kind: input, shape index: {}]   ;;  %s18313_s7 = inlined_call_operand.vmem [shape: bf16[256,128], index: 7, kind: input, shape index: {}]   ;;  %s18314_s8 = inlined_call_operand.vmem [shape: f32[1,128], index: 8, kind: input, shape index: {}]   ;;  %s18315_s9 = inlined_call_operand.vmem [shape: bf16[256,128], index: 9, kind: input, shape index: {}]   ;;  %s18316_s10 = inlined_call_operand.vmem [shape: f32[1,128], index: 10, kind: input, shape index: {}]   ;;  %s18317_s11 = inlined_call_operand.vmem [shape: f32[1,128], index: 11, kind: input, shape index: {}]   ;;  %s18318_s12 = inlined_call_operand.<no memory space> [shape: f32[1,1], index: 12, kind: input, shape index: {}]   ;;  %s18319_s13 = inlined_call_operand.hbm [shape: f32[8,8], index: 13, kind: output, shape index: {}]  }
   0x1   :  { %20 = vsyncpa [#allocation11], 0 }
   0x2   :  { %21 = vsyncpa [#allocation14], 0 }
   0x3   :  { %22 = vsyncpa [#allocation9], 0  ;;  %s15675_s25 = smov [#allocation10]   ;;  %s15676_s27 = smov [#allocation7]  }
   0x4   :  { %s42_s26 = sshll.u32 %s15675_s25, 4  ;;  %s30_s28 = sshll.u32 %s15676_s27, 4  ;;  %s43_s26 = int_to_ptr.vmem [resolvable:$true] %s42_s26  ;;  %s15754_s28 = int_to_ptr.vmem [resolvable:$true] %s30_s28 }
   0x5   :  { %s15557_s14 = scalar_lea.hbm %s18308_s2, 8192 }
   0x6   :  { %p15558_p0 = scmp.ne.s32.totalorder %s18308_s2, %s15557_s14  ;;  %p15561_p1 = scmp.lt.u32.totalorder %s15557_s14, %s18308_s2 }
   0x8   :  { %p15563_p2 = pnand %p15561_p1, %p15558_p0 }
   0xa   :  { %15566 = shalt.err (!%p15563_p2)
}
   0xb   :  { %s15567_s19 = scalar_lea.vmem %s43_s26, 8192  ;;  %p15572_p4 = scmp.lt.s32.totalorder %s43_s26, %s43_s26 }
   0xc   :  { %p15568_p3 = scmp.ne.s32.totalorder %s43_s26, %s15567_s19  ;;  %p15573_p5 = scmp.lt.s32.totalorder %s15567_s19, %s15567_s19 }
   0xe   :  { %p15574_p6 = por %p15573_p5, %p15572_p4 }
  0x10   :  { %p15575_p7 = pnand %p15574_p6, %p15568_p3 }
  0x12   :  { %15578 = shalt.err (!%p15575_p7)
}
  0x13   :  { %s15677_s20 = smov 256   ;;  %s15678_s21 = smov 16  }
  0x14   :  { %48 = dma.hbm_to_vmem [thread:$0]  %s18308_s2, 8192, %s43_s26, [#allocation11], %s15677_s20, %s15677_s20, %s15678_s21  }
  0x15   :  { %s15579_s27 = scalar_lea.hbm %s18307_s1, 8192 }
  0x16   :  { %p15580_p8 = scmp.ne.s32.totalorder %s18307_s1, %s15579_s27  ;;  %p15583_p9 = scmp.lt.u32.totalorder %s15579_s27, %s18307_s1 }
  0x18   :  { %p15585_p10 = pnand %p15583_p9, %p15580_p8 }
  0x1a   :  { %15588 = shalt.err (!%p15585_p10)
}
  0x1b   :  { %s15589_s16 = scalar_lea.vmem %s15754_s28, 8192  ;;  %p15594_p12 = scmp.lt.s32.totalorder %s15754_s28, %s15754_s28 }
  0x1c   :  { %p15590_p11 = scmp.ne.s32.totalorder %s15754_s28, %s15589_s16  ;;  %p15595_p13 = scmp.lt.s32.totalorder %s15589_s16, %s15589_s16 }
  0x1e   :  { %p15596_p0 = por %p15595_p13, %p15594_p12 }
  0x20   :  { %p15597_p1 = pnand %p15596_p0, %p15590_p11 }
  0x22   :  { %15600 = shalt.err (!%p15597_p1)
}
  0x23   :  { %36 = dma.hbm_to_vmem [thread:$0]  %s18307_s1, 8192, %s15754_s28, [#allocation8], %s15677_s20, %s15677_s20, %s15678_s21  }
  0x24   :  { %s15679_s17 = smov [#allocation12]   ;;  %s15680_s19 = smov [#allocation13]  }
  0x25   :  { %s56_s18 = sshll.u32 %s15679_s17, 4  ;;  %s68_s22 = sshll.u32 %s15680_s19, 4  ;;  %s57_s18 = int_to_ptr.vmem [resolvable:$true] %s56_s18  ;;  %s15791_s22 = int_to_ptr.vmem [resolvable:$true] %s68_s22 }
  0x26   :  { %s15601_s25 = scalar_lea.hbm %s18310_s4, 16384 }
  0x27   :  { %p15602_p2 = scmp.ne.s32.totalorder %s18310_s4, %s15601_s25  ;;  %p15605_p3 = scmp.lt.u32.totalorder %s15601_s25, %s18310_s4 }
  0x29   :  { %p15607_p4 = pnand %p15605_p3, %p15602_p2 }
  0x2b   :  { %15610 = shalt.err (!%p15607_p4)
}
  0x2c   :  { %s15611_s1 = scalar_lea.vmem %s57_s18, 16384  ;;  %p15616_p6 = scmp.lt.s32.totalorder %s57_s18, %s57_s18 }
  0x2d   :  { %p15612_p5 = scmp.ne.s32.totalorder %s57_s18, %s15611_s1  ;;  %p15617_p7 = scmp.lt.s32.totalorder %s15611_s1, %s15611_s1 }
  0x2f   :  { %p15618_p8 = por %p15617_p7, %p15616_p6 }
  0x31   :  { %p15619_p9 = pnand %p15618_p8, %p15612_p5 }
  0x33   :  { %15622 = shalt.err (!%p15619_p9)
}
  0x34   :  { %62 = dma.hbm_to_vmem [thread:$0]  %s18310_s4, 16384, %s57_s18, [#allocation11], %s15677_s20, %s15677_s20, %s15678_s21  }
  0x35   :  { %s15623_s26 = scalar_lea.hbm %s18311_s5, 8192 }
  0x36   :  { %p15624_p10 = scmp.ne.s32.totalorder %s18311_s5, %s15623_s26  ;;  %p15627_p11 = scmp.lt.u32.totalorder %s15623_s26, %s18311_s5 }
  0x38   :  { %p15629_p12 = pnand %p15627_p11, %p15624_p10 }
  0x3a   :  { %15632 = shalt.err (!%p15629_p12)
}
  0x3b   :  { %s15633_s25 = scalar_lea.vmem %s15791_s22, 8192  ;;  %p15638_p0 = scmp.lt.s32.totalorder %s15791_s22, %s15791_s22 }
  0x3c   :  { %p15634_p13 = scmp.ne.s32.totalorder %s15791_s22, %s15633_s25  ;;  %p15639_p1 = scmp.lt.s32.totalorder %s15633_s25, %s15633_s25 }
  0x3e   :  { %p15640_p2 = por %p15639_p1, %p15638_p0 }
  0x40   :  { %p15641_p3 = pnand %p15640_p2, %p15634_p13 }
  0x42   :  { %15644 = shalt.err (!%p15641_p3)
}
  0x43   :  { %74 = dma.hbm_to_vmem [thread:$0]  %s18311_s5, 8192, %s15791_s22, [#allocation14], %s15677_s20, %s15677_s20, %s15678_s21  }
  0x44   :  { %15667 = dma.done.wait [#allocation8], 8192  }
  0x45   :  { %15668 = vsyncadd [#allocation8], 4294959104 }
  0x46   :  { %15669 = dma.done.wait [#allocation11], 24576  }
  0x47   :  { %15670 = vsyncadd [#allocation11], 4294942720 }
  0x48   :  { %15671 = dma.done.wait [#allocation14], 8192  }
  0x49   :  { %15672 = vsyncadd [#allocation14], 4294959104  ;;  %v18321_v0 = vmov 0   ;;  %v13911_v1 = vld [vmem:[#allocation7 + $0x4] ss:$16 sps:$4 sm:$0xff]   ;;  %vm12474_vm0 = vcmask 1041409  }
  0x4a   :  { %350 = vmatprep.mubr.bf16.mxu0 %v18321_v0  ;;  %391 = vmatprep.mubr.bf16.mxu1 %v18321_v0  ;;  %v13913_v2 = vld [vmem:[#allocation7 + $0xc] ss:$16 sps:$4 sm:$0xff]   ;;  %v13915_v3 = vld [vmem:[#allocation7] ss:$16 sps:$4 sm:$0xff]   ;;  %v13916_v4 = vld [vmem:[#allocation7 + $0x8] ss:$16 sps:$4 sm:$0xff]  }
  0x4b   :  { %318 = vmatprep.subr.bf16.mxu0 %v13911_v1  ;;  %359 = vmatprep.subr.bf16.mxu1 %v13913_v2  ;;  %v13917_v5 = vld [vmem:[#allocation7 + $0x24] ss:$16 sps:$4 sm:$0xff]   ;;  %v13919_v6 = vld [vmem:[#allocation7 + $0x2c] ss:$16 sps:$4 sm:$0xff]   ;;  %v13921_v7 = vld [vmem:[#allocation7 + $0x20] ss:$16 sps:$4 sm:$0xff]  }
  0x4c   :  { %319 = vmatpush1.bf16.msra.mxu0 %v13915_v3  ;;  %360 = vmatpush1.bf16.msra.mxu1 %v13916_v4  ;;  %v13922_v8 = vld [vmem:[#allocation7 + $0x28] ss:$16 sps:$4 sm:$0xff]   ;;  %v13923_v9 = vld [vmem:[#allocation7 + $0x44] ss:$16 sps:$4 sm:$0xff]   ;;  %v13925_v10 = vld [vmem:[#allocation7 + $0x4c] ss:$16 sps:$4 sm:$0xff]  }
  0x4d   :  { %320 = vmatprep.subr.bf16.mxu0 %v13917_v5  ;;  %361 = vmatprep.subr.bf16.mxu1 %v13919_v6  ;;  %v13927_v11 = vld [vmem:[#allocation7 + $0x40] ss:$16 sps:$4 sm:$0xff]   ;;  %v13928_v12 = vld [vmem:[#allocation7 + $0x48] ss:$16 sps:$4 sm:$0xff]   ;;  %v13929_v13 = vld [vmem:[#allocation7 + $0x64] ss:$16 sps:$4 sm:$0xff]  }
  0x4e   :  { %v13931_v14 = vld [vmem:[#allocation7 + $0x6c] ss:$16 sps:$4 sm:$0xff]   ;;  %v13933_v15 = vld [vmem:[#allocation7 + $0x60] ss:$16 sps:$4 sm:$0xff]   ;;  %v13934_v16 = vld [vmem:[#allocation7 + $0x68] ss:$16 sps:$4 sm:$0xff]  }
  0x4f   :  { %v13935_v17 = vld [vmem:[#allocation7 + $0x84] ss:$16 sps:$4 sm:$0xff]   ;;  %v13937_v18 = vld [vmem:[#allocation7 + $0x8c] ss:$16 sps:$4 sm:$0xff]   ;;  %v13939_v19 = vld [vmem:[#allocation7 + $0x80] ss:$16 sps:$4 sm:$0xff]  }
  0x50   :  { %321 = vmatpush1.bf16.msra.mxu0 %v13921_v7  ;;  %362 = vmatpush1.bf16.msra.mxu1 %v13922_v8  ;;  %v13940_v20 = vld [vmem:[#allocation7 + $0x88] ss:$16 sps:$4 sm:$0xff]   ;;  %v13941_v21 = vld [vmem:[#allocation7 + $0xa4] ss:$16 sps:$4 sm:$0xff]   ;;  %v13943_v22 = vld [vmem:[#allocation7 + $0xac] ss:$16 sps:$4 sm:$0xff]  }
  0x51   :  { %322 = vmatprep.subr.bf16.mxu0 %v13923_v9  ;;  %363 = vmatprep.subr.bf16.mxu1 %v13925_v10  ;;  %v13945_v23 = vld [vmem:[#allocation7 + $0xa0] ss:$16 sps:$4 sm:$0xff]   ;;  %v13946_v24 = vld [vmem:[#allocation7 + $0xa8] ss:$16 sps:$4 sm:$0xff]   ;;  %v13947_v25 = vld [vmem:[#allocation7 + $0xc4] ss:$16 sps:$4 sm:$0xff]  }
  0x52   :  { %v13949_v26 = vld [vmem:[#allocation7 + $0xcc] ss:$16 sps:$4 sm:$0xff]   ;;  %v13951_v27 = vld [vmem:[#allocation7 + $0xc0] ss:$16 sps:$4 sm:$0xff]   ;;  %v13952_v28 = vld [vmem:[#allocation7 + $0xc8] ss:$16 sps:$4 sm:$0xff]  }
  0x53   :  { %v13953_v29 = vld [vmem:[#allocation7 + $0xe4] ss:$16 sps:$4 sm:$0xff]   ;;  %v13955_v30 = vld [vmem:[#allocation7 + $0xec] ss:$16 sps:$4 sm:$0xff]   ;;  %v13957_v31 = vld [vmem:[#allocation7 + $0xe0] ss:$16 sps:$4 sm:$0xff]  }
  0x54   :  { %323 = vmatpush1.bf16.msra.mxu0 %v13927_v11  ;;  %364 = vmatpush1.bf16.msra.mxu1 %v13928_v12  ;;  %v13958_v32 = vld [vmem:[#allocation7 + $0xe8] ss:$16 sps:$4 sm:$0xff]   ;;  %v102_v33 = vld [vmem:[%s18306_s0] sm:$0xff]  ;;  %v13964_v35 = vld [vmem:[#allocation7 + $0x10c] ss:$16 sps:$4 sm:$0xff]   ;;  %vm12476_vm1 = vcmask 1042434  }
  0x55   :  { %324 = vmatprep.subr.bf16.mxu0 %v13929_v13  ;;  %365 = vmatprep.subr.bf16.mxu1 %v13931_v14  ;;  %v13961_v34 = vld [vmem:[#allocation7 + $0x104] ss:$16 sps:$4 sm:$0xff]   ;;  %v15833_v36 = vpack.c.bf16 %v102_v33, %v102_v33  ;;  %v13959_v37 = vld [vmem:[#allocation7 + $0x100] ss:$16 sps:$4 sm:$0xff]   ;;  %v13962_v38 = vld [vmem:[#allocation7 + $0x108] ss:$16 sps:$4 sm:$0xff]  }
  0x56   :  { %v13967_v39 = vld [vmem:[#allocation7 + $0x124] ss:$16 sps:$4 sm:$0xff]   ;;  %v13970_v40 = vld [vmem:[#allocation7 + $0x12c] ss:$16 sps:$4 sm:$0xff]   ;;  %v13965_v41 = vld [vmem:[#allocation7 + $0x120] ss:$16 sps:$4 sm:$0xff]  }
  0x57   :  { %v13968_v42 = vld [vmem:[#allocation7 + $0x128] ss:$16 sps:$4 sm:$0xff]   ;;  %v13973_v43 = vld [vmem:[#allocation7 + $0x144] ss:$16 sps:$4 sm:$0xff]   ;;  %v13976_v44 = vld [vmem:[#allocation7 + $0x14c] ss:$16 sps:$4 sm:$0xff]  }
  0x58   :  { %325 = vmatpush1.bf16.msra.mxu0 %v13933_v15  ;;  %366 = vmatpush1.bf16.msra.mxu1 %v13934_v16  ;;  %v13971_v45 = vld [vmem:[#allocation7 + $0x140] ss:$16 sps:$4 sm:$0xff]   ;;  %v13974_v46 = vld [vmem:[#allocation7 + $0x148] ss:$16 sps:$4 sm:$0xff]   ;;  %v13979_v47 = vld [vmem:[#allocation7 + $0x164] ss:$16 sps:$4 sm:$0xff]  }
  0x59   :  { %326 = vmatprep.subr.bf16.mxu0 %v13935_v17  ;;  %367 = vmatprep.subr.bf16.mxu1 %v13937_v18  ;;  %v13982_v48 = vld [vmem:[#allocation7 + $0x16c] ss:$16 sps:$4 sm:$0xff]   ;;  %v13977_v49 = vld [vmem:[#allocation7 + $0x160] ss:$16 sps:$4 sm:$0xff]   ;;  %v13980_v50 = vld [vmem:[#allocation7 + $0x168] ss:$16 sps:$4 sm:$0xff]  }
  0x5a   :  { %v13985_v51 = vld [vmem:[#allocation7 + $0x184] ss:$16 sps:$4 sm:$0xff]   ;;  %v13988_v52 = vld [vmem:[#allocation7 + $0x18c] ss:$16 sps:$4 sm:$0xff]   ;;  %v13983_v53 = vld [vmem:[#allocation7 + $0x180] ss:$16 sps:$4 sm:$0xff]  }
  0x5b   :  { %v13986_v54 = vld [vmem:[#allocation7 + $0x188] ss:$16 sps:$4 sm:$0xff]   ;;  %v13991_v55 = vld [vmem:[#allocation7 + $0x1a4] ss:$16 sps:$4 sm:$0xff]   ;;  %v13994_v56 = vld [vmem:[#allocation7 + $0x1ac] ss:$16 sps:$4 sm:$0xff]  }
  0x5c   :  { %327 = vmatpush1.bf16.msra.mxu0 %v13939_v19  ;;  %368 = vmatpush1.bf16.msra.mxu1 %v13940_v20  ;;  %v13989_v57 = vld [vmem:[#allocation7 + $0x1a0] ss:$16 sps:$4 sm:$0xff]   ;;  %v13992_v58 = vld [vmem:[#allocation7 + $0x1a8] ss:$16 sps:$4 sm:$0xff]   ;;  %v13997_v59 = vld [vmem:[#allocation7 + $0x1c4] ss:$16 sps:$4 sm:$0xff]  }
  0x5d   :  { %328 = vmatprep.subr.bf16.mxu0 %v13941_v21  ;;  %369 = vmatprep.subr.bf16.mxu1 %v13943_v22  ;;  %v14000_v60 = vld [vmem:[#allocation7 + $0x1cc] ss:$16 sps:$4 sm:$0xff]   ;;  %v13995_v61 = vld [vmem:[#allocation7 + $0x1c0] ss:$16 sps:$4 sm:$0xff]   ;;  %v13998_v62 = vld [vmem:[#allocation7 + $0x1c8] ss:$16 sps:$4 sm:$0xff]  }
  0x5e   :  { %v14003_v63 = vld [vmem:[#allocation7 + $0x1e4] ss:$16 sps:$4 sm:$0xff]   ;;  %v14006_v1 = vld [vmem:[#allocation7 + $0x1ec] ss:$16 sps:$4 sm:$0xff]   ;;  %v14001_v2 = vld [vmem:[#allocation7 + $0x1e0] ss:$16 sps:$4 sm:$0xff]  }
  0x5f   :  { %v14004_v3 = vld [vmem:[#allocation7 + $0x1e8] ss:$16 sps:$4 sm:$0xff]   ;;  %v15839_v4 = vld [vmem:[#allocation10 + $0x4] ss:$16 sps:$4 sm:$0xff]   ;;  %v15841_v5 = vld [vmem:[#allocation10 + $0xc] ss:$16 sps:$4 sm:$0xff]  }
  0x60   :  { %329 = vmatpush1.bf16.msra.mxu0 %v13945_v23  ;;  %370 = vmatpush1.bf16.msra.mxu1 %v13946_v24  ;;  %v15843_v6 = vld [vmem:[#allocation10] ss:$16 sps:$4 sm:$0xff]   ;;  %v15845_v7 = vld [vmem:[#allocation10 + $0x8] ss:$16 sps:$4 sm:$0xff]   ;;  %v15849_v8 = vld [vmem:[#allocation10 + $0x24] ss:$16 sps:$4 sm:$0xff]  }
  0x61   :  { %330 = vmatprep.subr.bf16.mxu0 %v13947_v25  ;;  %371 = vmatprep.subr.bf16.mxu1 %v13949_v26  ;;  %v15851_v9 = vld [vmem:[#allocation10 + $0x2c] ss:$16 sps:$4 sm:$0xff]   ;;  %v15855_v10 = vld [vmem:[#allocation10 + $0x20] ss:$16 sps:$4 sm:$0xff]   ;;  %v15859_v11 = vld [vmem:[#allocation10 + $0x28] ss:$16 sps:$4 sm:$0xff]  }
  0x62   :  { %v15863_v12 = vld [vmem:[#allocation10 + $0x44] ss:$16 sps:$4 sm:$0xff]   ;;  %v15865_v13 = vld [vmem:[#allocation10 + $0x4c] ss:$16 sps:$4 sm:$0xff]   ;;  %v15869_v14 = vld [vmem:[#allocation10 + $0x40] ss:$16 sps:$4 sm:$0xff]  }
  0x63   :  { %v15873_v15 = vld [vmem:[#allocation10 + $0x48] ss:$16 sps:$4 sm:$0xff]   ;;  %v15877_v16 = vld [vmem:[#allocation10 + $0x64] ss:$16 sps:$4 sm:$0xff]   ;;  %v15879_v17 = vld [vmem:[#allocation10 + $0x6c] ss:$16 sps:$4 sm:$0xff]  }
  0x64   :  { %331 = vmatpush1.bf16.msra.mxu0 %v13951_v27  ;;  %372 = vmatpush1.bf16.msra.mxu1 %v13952_v28  ;;  %v15881_v18 = vld [vmem:[#allocation10 + $0x60] ss:$16 sps:$4 sm:$0xff]   ;;  %v15885_v19 = vld [vmem:[#allocation10 + $0x68] ss:$16 sps:$4 sm:$0xff]   ;;  %v15889_v20 = vld [vmem:[#allocation10 + $0x84] ss:$16 sps:$4 sm:$0xff]  }
  0x65   :  { %332 = vmatprep.subr.bf16.mxu0 %v13953_v29  ;;  %373 = vmatprep.subr.bf16.mxu1 %v13955_v30  ;;  %v15891_v21 = vld [vmem:[#allocation10 + $0x8c] ss:$16 sps:$4 sm:$0xff]   ;;  %v15893_v22 = vld [vmem:[#allocation10 + $0x80] ss:$16 sps:$4 sm:$0xff]   ;;  %v15897_v23 = vld [vmem:[#allocation10 + $0x88] ss:$16 sps:$4 sm:$0xff]  }
  0x66   :  { %v15901_v24 = vld [vmem:[#allocation10 + $0xa4] ss:$16 sps:$4 sm:$0xff]   ;;  %v15903_v25 = vld [vmem:[#allocation10 + $0xac] ss:$16 sps:$4 sm:$0xff]   ;;  %v15905_v26 = vld [vmem:[#allocation10 + $0xa0] ss:$16 sps:$4 sm:$0xff]  }
  0x67   :  { %v15909_v27 = vld [vmem:[#allocation10 + $0xa8] ss:$16 sps:$4 sm:$0xff]   ;;  %v15913_v28 = vld [vmem:[#allocation10 + $0xc4] ss:$16 sps:$4 sm:$0xff]   ;;  %v15915_v29 = vld [vmem:[#allocation10 + $0xcc] ss:$16 sps:$4 sm:$0xff]  }
  0x68   :  { %333 = vmatpush1.bf16.msra.mxu0 %v13957_v31  ;;  %374 = vmatpush1.bf16.msra.mxu1 %v13958_v32  ;;  %v15917_v30 = vld [vmem:[#allocation10 + $0xc0] ss:$16 sps:$4 sm:$0xff]   ;;  %v15919_v31 = vld [vmem:[#allocation10 + $0xc8] ss:$16 sps:$4 sm:$0xff]   ;;  %v15921_v32 = vld [vmem:[#allocation10 + $0xe4] ss:$16 sps:$4 sm:$0xff]  }
  0x69   :  { %616 = vmatprep.subr.bf16.mxu0 %v13961_v34  ;;  %657 = vmatprep.subr.bf16.mxu1 %v13964_v35  ;;  %v15923_v33 = vld [vmem:[#allocation10 + $0xec] ss:$16 sps:$4 sm:$0xff]   ;;  %v15929_v34 = vld [vmem:[#allocation10 + $0xe0] ss:$16 sps:$4 sm:$0xff]   ;;  %v15931_v35 = vld [vmem:[#allocation10 + $0xe8] ss:$16 sps:$4 sm:$0xff]  }
  0x6a   :  { %vm12478_vm2 = vcmask 1043459   ;;  %vm12480_vm3 = vcmask 1044484   ;;  %vm12482_vm4 = vcmask 1045509   ;;  %vm12484_vm5 = vcmask 1046534  }
  0x6b   :  { %351 = vmatmul.mubr.bf16.vlgmr.msra.gmra.mrb[0].mxu0 %v15833_v36  ;;  %392 = vmatmul.mubr.bf16.vlgmr.msra.gmra.mrb[0].mxu1 %v15833_v36  ;;  %vm12486_vm6 = vcmask 1047559   ;;  %vm12490_vm8 = vcmask 64512  }
  0x6c   :  { %617 = vmatpush1.bf16.msra.mxu0 %v13959_v37  ;;  %658 = vmatpush1.bf16.msra.mxu1 %v13962_v38  ;;  %v15935_v37 = vld [vmem:[#allocation10 + $0x10c] ss:$16 sps:$4 sm:$0xff]   ;;  %v14055_v38 = vld [vmem:[#allocation10 + $0x100] ss:$16 sps:$4 sm:$0xff]  }
  0x6d   :  { %618 = vmatprep.subr.bf16.mxu0 %v13967_v39  ;;  %659 = vmatprep.subr.bf16.mxu1 %v13970_v40  ;;  %v14058_v39 = vld [vmem:[#allocation10 + $0x108] ss:$16 sps:$4 sm:$0xff]   ;;  %v14063_v40 = vld [vmem:[#allocation10 + $0x124] ss:$16 sps:$4 sm:$0xff]  }
  0x6e   :  { %648 = vmatprep.mubr.bf16.mxu0 %v18321_v0  ;;  %689 = vmatprep.mubr.bf16.mxu1 %v18321_v0 }
  0x70   :  { %619 = vmatpush1.bf16.msra.mxu0 %v13965_v41  ;;  %660 = vmatpush1.bf16.msra.mxu1 %v13968_v42  ;;  %v14066_v41 = vld [vmem:[#allocation10 + $0x12c] ss:$16 sps:$4 sm:$0xff]   ;;  %v14061_v42 = vld [vmem:[#allocation10 + $0x120] ss:$16 sps:$4 sm:$0xff]  }
  0x71   :  { %620 = vmatprep.subr.bf16.mxu0 %v13973_v43  ;;  %661 = vmatprep.subr.bf16.mxu1 %v13976_v44  ;;  %v14064_v43 = vld [vmem:[#allocation10 + $0x128] ss:$16 sps:$4 sm:$0xff]   ;;  %v14069_v44 = vld [vmem:[#allocation10 + $0x144] ss:$16 sps:$4 sm:$0xff]  }
  0x74   :  { %621 = vmatpush1.bf16.msra.mxu0 %v13971_v45  ;;  %662 = vmatpush1.bf16.msra.mxu1 %v13974_v46  ;;  %v14072_v45 = vld [vmem:[#allocation10 + $0x14c] ss:$16 sps:$4 sm:$0xff]   ;;  %v14067_v46 = vld [vmem:[#allocation10 + $0x140] ss:$16 sps:$4 sm:$0xff]  }
  0x75   :  { %622 = vmatprep.subr.bf16.mxu0 %v13979_v47  ;;  %663 = vmatprep.subr.bf16.mxu1 %v13982_v48  ;;  %v14070_v47 = vld [vmem:[#allocation10 + $0x148] ss:$16 sps:$4 sm:$0xff]   ;;  %v14075_v48 = vld [vmem:[#allocation10 + $0x164] ss:$16 sps:$4 sm:$0xff]  }
  0x78   :  { %623 = vmatpush1.bf16.msra.mxu0 %v13977_v49  ;;  %664 = vmatpush1.bf16.msra.mxu1 %v13980_v50  ;;  %v14078_v49 = vld [vmem:[#allocation10 + $0x16c] ss:$16 sps:$4 sm:$0xff]   ;;  %v14073_v50 = vld [vmem:[#allocation10 + $0x160] ss:$16 sps:$4 sm:$0xff]  }
  0x79   :  { %624 = vmatprep.subr.bf16.mxu0 %v13985_v51  ;;  %665 = vmatprep.subr.bf16.mxu1 %v13988_v52  ;;  %v14076_v51 = vld [vmem:[#allocation10 + $0x168] ss:$16 sps:$4 sm:$0xff]   ;;  %v14081_v52 = vld [vmem:[#allocation10 + $0x184] ss:$16 sps:$4 sm:$0xff]  }
  0x7c   :  { %625 = vmatpush1.bf16.msra.mxu0 %v13983_v53  ;;  %666 = vmatpush1.bf16.msra.mxu1 %v13986_v54  ;;  %v14084_v53 = vld [vmem:[#allocation10 + $0x18c] ss:$16 sps:$4 sm:$0xff]   ;;  %v14079_v54 = vld [vmem:[#allocation10 + $0x180] ss:$16 sps:$4 sm:$0xff]  }
  0x7d   :  { %626 = vmatprep.subr.bf16.mxu0 %v13991_v55  ;;  %667 = vmatprep.subr.bf16.mxu1 %v13994_v56  ;;  %v14082_v55 = vld [vmem:[#allocation10 + $0x188] ss:$16 sps:$4 sm:$0xff]   ;;  %v14087_v56 = vld [vmem:[#allocation10 + $0x1a4] ss:$16 sps:$4 sm:$0xff]  }
  0x80   :  { %627 = vmatpush1.bf16.msra.mxu0 %v13989_v57  ;;  %668 = vmatpush1.bf16.msra.mxu1 %v13992_v58  ;;  %v14090_v57 = vld [vmem:[#allocation10 + $0x1ac] ss:$16 sps:$4 sm:$0xff]   ;;  %v14085_v58 = vld [vmem:[#allocation10 + $0x1a0] ss:$16 sps:$4 sm:$0xff]  }
  0x81   :  { %628 = vmatprep.subr.bf16.mxu0 %v13997_v59  ;;  %669 = vmatprep.subr.bf16.mxu1 %v14000_v60  ;;  %v14088_v59 = vld [vmem:[#allocation10 + $0x1a8] ss:$16 sps:$4 sm:$0xff]   ;;  %v14093_v60 = vld [vmem:[#allocation10 + $0x1c4] ss:$16 sps:$4 sm:$0xff]  }
  0x84   :  { %629 = vmatpush1.bf16.msra.mxu0 %v13995_v61  ;;  %670 = vmatpush1.bf16.msra.mxu1 %v13998_v62  ;;  %v14096_v61 = vld [vmem:[#allocation10 + $0x1cc] ss:$16 sps:$4 sm:$0xff]   ;;  %v14091_v62 = vld [vmem:[#allocation10 + $0x1c0] ss:$16 sps:$4 sm:$0xff]  }
  0x85   :  { %630 = vmatprep.subr.bf16.mxu0 %v14003_v63  ;;  %671 = vmatprep.subr.bf16.mxu1 %v14006_v1  ;;  %v14094_v63 = vld [vmem:[#allocation10 + $0x1c8] ss:$16 sps:$4 sm:$0xff]   ;;  %v14099_v1 = vld [vmem:[#allocation10 + $0x1e4] ss:$16 sps:$4 sm:$0xff]  }
  0x88   :  { %631 = vmatpush1.bf16.msra.mxu0 %v14001_v2  ;;  %672 = vmatpush1.bf16.msra.mxu1 %v14004_v3  ;;  %v14102_v2 = vld [vmem:[#allocation10 + $0x1ec] ss:$16 sps:$4 sm:$0xff]   ;;  %v14097_v3 = vld [vmem:[#allocation10 + $0x1e0] ss:$16 sps:$4 sm:$0xff]  }
  0x89   :  { %890 = vmatprep.subr.bf16.mxu0 %v15839_v4  ;;  %931 = vmatprep.subr.bf16.mxu1 %v15841_v5 }
  0x8b   :  { %649 = vmatmul.mubr.bf16.vlgmr.msra.gmra.mrb[4].mxu0 %v15833_v36  ;;  %690 = vmatmul.mubr.bf16.vlgmr.msra.gmra.mrb[4].mxu1 %v15833_v36  ;;  %v15933_v36 = vld [vmem:[#allocation10 + $0x104] ss:$16 sps:$4 sm:$0xff]  }
  0x8c   :  { %891 = vmatpush1.bf16.msra.mxu0 %v15843_v6  ;;  %932 = vmatpush1.bf16.msra.mxu1 %v15845_v7 }
  0x8d   :  { %892 = vmatprep.subr.bf16.mxu0 %v15849_v8  ;;  %933 = vmatprep.subr.bf16.mxu1 %v15851_v9 }
  0x8e   :  { %922 = vmatprep.mubr.bf16.mxu0 %v18321_v0  ;;  %963 = vmatprep.mubr.bf16.mxu1 %v18321_v0 }
  0x90   :  { %893 = vmatpush1.bf16.msra.mxu0 %v15855_v10  ;;  %934 = vmatpush1.bf16.msra.mxu1 %v15859_v11 }
  0x91   :  { %894 = vmatprep.subr.bf16.mxu0 %v15863_v12  ;;  %935 = vmatprep.subr.bf16.mxu1 %v15865_v13 }
  0x94   :  { %895 = vmatpush1.bf16.msra.mxu0 %v15869_v14  ;;  %936 = vmatpush1.bf16.msra.mxu1 %v15873_v15 }
  0x95   :  { %896 = vmatprep.subr.bf16.mxu0 %v15877_v16  ;;  %937 = vmatprep.subr.bf16.mxu1 %v15879_v17 }
  0x98   :  { %897 = vmatpush1.bf16.msra.mxu0 %v15881_v18  ;;  %938 = vmatpush1.bf16.msra.mxu1 %v15885_v19 }
  0x99   :  { %898 = vmatprep.subr.bf16.mxu0 %v15889_v20  ;;  %939 = vmatprep.subr.bf16.mxu1 %v15891_v21 }
  0x9c   :  { %899 = vmatpush1.bf16.msra.mxu0 %v15893_v22  ;;  %940 = vmatpush1.bf16.msra.mxu1 %v15897_v23 }
  0x9d   :  { %900 = vmatprep.subr.bf16.mxu0 %v15901_v24  ;;  %941 = vmatprep.subr.bf16.mxu1 %v15903_v25 }
  0xa0   :  { %901 = vmatpush1.bf16.msra.mxu0 %v15905_v26  ;;  %942 = vmatpush1.bf16.msra.mxu1 %v15909_v27 }
  0xa1   :  { %902 = vmatprep.subr.bf16.mxu0 %v15913_v28  ;;  %943 = vmatprep.subr.bf16.mxu1 %v15915_v29 }
  0xa4   :  { %903 = vmatpush1.bf16.msra.mxu0 %v15917_v30  ;;  %944 = vmatpush1.bf16.msra.mxu1 %v15919_v31 }
  0xa5   :  { %904 = vmatprep.subr.bf16.mxu0 %v15921_v32  ;;  %945 = vmatprep.subr.bf16.mxu1 %v15923_v33 }
  0xa8   :  { %905 = vmatpush1.bf16.msra.mxu0 %v15929_v34  ;;  %946 = vmatpush1.bf16.msra.mxu1 %v15931_v35 }
  0xa9   :  { %1169 = vmatprep.subr.bf16.mxu0 %v15933_v36  ;;  %1210 = vmatprep.subr.bf16.mxu1 %v15935_v37 }
  0xab   :  { %923 = vmatmul.mubr.bf16.vlgmr.msra.gmra.mrb[8].mxu0 %v18321_v0  ;;  %964 = vmatmul.mubr.bf16.vlgmr.msra.gmra.mrb[8].mxu1 %v18321_v0 }
  0xac   :  { %1170 = vmatpush1.bf16.msra.mxu0 %v14055_v38  ;;  %1211 = vmatpush1.bf16.msra.mxu1 %v14058_v39  ;;  %v14100_v38 = vld [vmem:[#allocation10 + $0x1e8] ss:$16 sps:$4 sm:$0xff]  }
  0xad   :  { %1171 = vmatprep.subr.bf16.mxu0 %v14063_v40  ;;  %1212 = vmatprep.subr.bf16.mxu1 %v14066_v41 }
  0xae   :  { %1201 = vmatprep.mubr.bf16.mxu0 %v18321_v0  ;;  %1242 = vmatprep.mubr.bf16.mxu1 %v18321_v0 }
  0xb0   :  { %1172 = vmatpush1.bf16.msra.mxu0 %v14061_v42  ;;  %1213 = vmatpush1.bf16.msra.mxu1 %v14064_v43 }
  0xb1   :  { %1173 = vmatprep.subr.bf16.mxu0 %v14069_v44  ;;  %1214 = vmatprep.subr.bf16.mxu1 %v14072_v45 }
  0xb4   :  { %1174 = vmatpush1.bf16.msra.mxu0 %v14067_v46  ;;  %1215 = vmatpush1.bf16.msra.mxu1 %v14070_v47 }
  0xb5   :  { %1175 = vmatprep.subr.bf16.mxu0 %v14075_v48  ;;  %1216 = vmatprep.subr.bf16.mxu1 %v14078_v49 }
  0xb8   :  { %1176 = vmatpush1.bf16.msra.mxu0 %v14073_v50  ;;  %1217 = vmatpush1.bf16.msra.mxu1 %v14076_v51 }
  0xb9   :  { %1177 = vmatprep.subr.bf16.mxu0 %v14081_v52  ;;  %1218 = vmatprep.subr.bf16.mxu1 %v14084_v53 }
  0xbc   :  { %1178 = vmatpush1.bf16.msra.mxu0 %v14079_v54  ;;  %1219 = vmatpush1.bf16.msra.mxu1 %v14082_v55 }
  0xbd   :  { %1179 = vmatprep.subr.bf16.mxu0 %v14087_v56  ;;  %1220 = vmatprep.subr.bf16.mxu1 %v14090_v57  ;;  %v12541_v56 = vld [vmem:[%s18309_s3 + $0x4] sm:$0xf] }
  0xc0   :  { %1180 = vmatpush1.bf16.msra.mxu0 %v14085_v58  ;;  %1221 = vmatpush1.bf16.msra.mxu1 %v14088_v59 }
  0xc1   :  { %1181 = vmatprep.subr.bf16.mxu0 %v14093_v60  ;;  %1222 = vmatprep.subr.bf16.mxu1 %v14096_v61 }
  0xc4   :  { %1182 = vmatpush1.bf16.msra.mxu0 %v14091_v62  ;;  %1223 = vmatpush1.bf16.msra.mxu1 %v14094_v63 }
  0xc5   :  { %1183 = vmatprep.subr.bf16.mxu0 %v14099_v1  ;;  %1224 = vmatprep.subr.bf16.mxu1 %v14102_v2 }
  0xc8   :  { %1184 = vmatpush1.bf16.msra.mxu0 %v14097_v3  ;;  %1225 = vmatpush1.bf16.msra.mxu1 %v14100_v38 }
  0xc9   :  { %1510 = vmatprep.subr.bf16.mxu0 %v15839_v4  ;;  %1551 = vmatprep.subr.bf16.mxu1 %v15841_v5 }
  0xcb   :  { %1202 = vmatmul.mubr.bf16.vlgmr.msra.gmra.mrb[12].mxu0 %v18321_v0  ;;  %1243 = vmatmul.mubr.bf16.vlgmr.msra.gmra.mrb[12].mxu1 %v18321_v0 }
  0xcc   :  { %1511 = vmatpush1.bf16.msra.mxu0 %v15843_v6  ;;  %1552 = vmatpush1.bf16.msra.mxu1 %v15845_v7 }
  0xcd   :  { %1512 = vmatprep.subr.bf16.mxu0 %v15849_v8  ;;  %1553 = vmatprep.subr.bf16.mxu1 %v15851_v9 }
  0xce   :  { %1542 = vmatprep.mubr.bf16.mxu0 %v18321_v0  ;;  %1583 = vmatprep.mubr.bf16.mxu1 %v18321_v0 }
  0xd0   :  { %1513 = vmatpush1.bf16.msra.mxu0 %v15855_v10  ;;  %1554 = vmatpush1.bf16.msra.mxu1 %v15859_v11 }
  0xd1   :  { %1514 = vmatprep.subr.bf16.mxu0 %v15863_v12  ;;  %1555 = vmatprep.subr.bf16.mxu1 %v15865_v13  ;;  %v18320_v12 = vlaneseq }
  0xd3   :  { %v15988_v13 = vshrl.u32 %v18320_v12, 7 }
  0xd4   :  { %1515 = vmatpush1.bf16.msra.mxu0 %v15869_v14  ;;  %1556 = vmatpush1.bf16.msra.mxu1 %v15873_v15 }
  0xd5   :  { %1516 = vmatprep.subr.bf16.mxu0 %v15877_v16  ;;  %1557 = vmatprep.subr.bf16.mxu1 %v15879_v17  ;;  %18431 = vst [vmem:[#allocation20_spill] sm:$0xff] %v15988_v13  ;;  %v16016_v40 = vsub.s32 2, %v15988_v13 }
  0xd7   :  { %18435 = vst [vmem:[#allocation24_spill] sm:$0xff] %v16016_v40 }
  0xd8   :  { %1517 = vmatpush1.bf16.msra.mxu0 %v15881_v18  ;;  %1558 = vmatpush1.bf16.msra.mxu1 %v15885_v19 }
  0xd9   :  { %1518 = vmatprep.subr.bf16.mxu0 %v15889_v20  ;;  %1559 = vmatprep.subr.bf16.mxu1 %v15891_v21 }
  0xdc   :  { %1519 = vmatpush1.bf16.msra.mxu0 %v15893_v22  ;;  %1560 = vmatpush1.bf16.msra.mxu1 %v15897_v23  ;;  %v15995_v22 = vsub.s32 0, %v15988_v13  ;;  %v136_v23 = vld [vmem:[%s18309_s3] sm:$0xf] }
  0xdd   :  { %1520 = vmatprep.subr.bf16.mxu0 %v15901_v24  ;;  %1561 = vmatprep.subr.bf16.mxu1 %v15903_v25  ;;  %v16001_v24 = vsub.s32 1, %v15988_v13  ;;  %v149_v46 = vrot.slane %v136_v23, %v16016_v40 }
  0xde   :  { %18432 = vst [vmem:[#allocation21_spill] sm:$0xff] %v15995_v22  ;;  %v141_v25 = vrot.slane %v136_v23, %v15995_v22  ;;  %v439_v60 = vrot.slane %v12541_v56, %v15995_v22  ;;  %v16220_v22 = vld [vmem:[#allocation10 + $0x188] ss:$16 sps:$4 sm:$0xff]  }
  0xdf   :  { %18433 = vst [vmem:[#allocation22_spill] sm:$0xff] %v16001_v24  ;;  %v443_v63 = vrot.slane %v12541_v56, %v16001_v24 }
  0xe0   :  { %1521 = vmatpush1.bf16.msra.mxu0 %v15905_v26  ;;  %1562 = vmatpush1.bf16.msra.mxu1 %v15909_v27  ;;  %v145_v26 = vrot.slane %v136_v23, %v16001_v24  ;;  %v16006_v27 = vsub.s32 3, %v15988_v13 }
  0xe1   :  { %1522 = vmatprep.subr.bf16.mxu0 %v15913_v28  ;;  %1563 = vmatprep.subr.bf16.mxu1 %v15915_v29 }
  0xe2   :  { %18434 = vst [vmem:[#allocation23_spill] sm:$0xff] %v16006_v27 }
  0xe4   :  { %1523 = vmatpush1.bf16.msra.mxu0 %v15917_v30  ;;  %1564 = vmatpush1.bf16.msra.mxu1 %v15919_v31 }
  0xe5   :  { %1524 = vmatprep.subr.bf16.mxu0 %v15921_v32  ;;  %1565 = vmatprep.subr.bf16.mxu1 %v15923_v33 }
  0xe8   :  { %1525 = vmatpush1.bf16.msra.mxu0 %v15929_v34  ;;  %1566 = vmatpush1.bf16.msra.mxu1 %v15931_v35  ;;  %v153_v35 = vrot.slane %v136_v23, %v16006_v27 }
  0xe9   :  { %1806 = vmatprep.subr.bf16.mxu0 %v15933_v36  ;;  %1847 = vmatprep.subr.bf16.mxu1 %v15935_v37 }
 0x13e   :  { %v352_v4 = vpop.f32.mrb[0].mxu0  ;;  %v393_v5 = vpop.f32.mrb[0].mxu1 }
 0x13f   :  { %v354_v6 = vpop.f32.mrb[1].mxu0  ;;  %v395_v7 = vpop.f32.mrb[1].mxu1  ;;  %v16008_v28 = vadd.f32 %v352_v4, %v141_v25  ;;  %v16022_v48 = vadd.f32 %v393_v5, %v149_v46  ;;  %v15528_v46 = vld [vmem:[#allocation10 + $0x108] ss:$16 sps:$4 sm:$0xff]  }
 0x140   :  { %v356_v8 = vpop.f32.mrb[2].mxu0  ;;  %v397_v9 = vpop.f32.mrb[2].mxu1  ;;  %v16010_v29 = vadd.f32 %v354_v6, %v145_v26  ;;  %v16018_v45 = vadd.f32 %v395_v7, %v153_v35 }
 0x141   :  { %v357_v10 = vpop.f32.mrb[3].mxu0  ;;  %v398_v11 = vpop.f32.mrb[3].mxu1 }
 0x15e   :  { %v650_v14 = vpop.f32.mrb[4].mxu0  ;;  %v15990_v15 = vpop.f32.mrb[4].mxu1 }
 0x15f   :  { %v652_v16 = vpop.f32.mrb[5].mxu0  ;;  %v15992_v17 = vpop.f32.mrb[5].mxu1  ;;  %v16032_v4 = vadd.f32 %v650_v14, %v439_v60 }
 0x160   :  { %v654_v18 = vpop.f32.mrb[6].mxu0  ;;  %v695_v19 = vpop.f32.mrb[6].mxu1  ;;  %v16034_v8 = vadd.f32 %v652_v16, %v443_v63 }
 0x161   :  { %v655_v20 = vpop.f32.mrb[7].mxu0  ;;  %v696_v21 = vpop.f32.mrb[7].mxu1 }
 0x162   :  { %v451_v21 = vrot.slane %v12541_v56, %v16006_v27 }
 0x164   :  { %v16041_v16 = vadd.f32 %v15992_v17, %v451_v21  ;;  %v15549_v21 = vld [vmem:[#allocation10 + $0x1c4] ss:$16 sps:$4 sm:$0xff]  }
 0x17e   :  { %v924_v30 = vpop.f32.mrb[8].mxu0  ;;  %v965_v31 = vpop.f32.mrb[8].mxu1 }
 0x17f   :  { %v972_v32 = vadd.f32 %v924_v30, %v16008_v28  ;;  %v926_v33 = vpop.f32.mrb[9].mxu0  ;;  %v967_v34 = vpop.f32.mrb[9].mxu1  ;;  %v974_v50 = vadd.f32 %v965_v31, %v16022_v48  ;;  %v447_v30 = vrot.slane %v12541_v56, %v16016_v40  ;;  %v15537_v56 = vld [vmem:[#allocation10 + $0x164] ss:$16 sps:$4 sm:$0xff]  }
 0x180   :  { %v973_v36 = vadd.f32 %v926_v33, %v16010_v29  ;;  %v928_v37 = vpop.f32.mrb[10].mxu0  ;;  %v969_v39 = vpop.f32.mrb[10].mxu1  ;;  %v975_v47 = vadd.f32 %v967_v34, %v16018_v45 }
 0x181   :  { %v12638_v41 = vmul.f32 -1.442695, %v972_v32  ;;  %v929_v42 = vpop.f32.mrb[11].mxu0  ;;  %v970_v43 = vpop.f32.mrb[11].mxu1  ;;  %v16046_v35 = vadd.f32 %v15990_v15, %v447_v30  ;;  %v15529_v15 = vld [vmem:[#allocation10 + $0x124] ss:$16 sps:$4 sm:$0xff]  }
 0x182   :  { %v12639_v44 = vmul.f32 -1.442695, %v973_v36  ;;  %v12640_v49 = vmul.f32 -1.442695, %v975_v47  ;;  %v15554_v30 = vld [vmem:[#allocation10 + $0x1ec] ss:$16 sps:$4 sm:$0xff]  }
 0x183   :  { %14999 = vpow2.f32 %v12638_v41 }
 0x184   :  { %15001 = vpow2.f32 %v12639_v44  ;;  %v15527_v44 = vld [vmem:[#allocation10 + $0x100] ss:$16 sps:$4 sm:$0xff]  }
 0x185   :  { %15003 = vpow2.f32 %v12640_v49  ;;  %v15530_v49 = vld [vmem:[#allocation10 + $0x12c] ss:$16 sps:$4 sm:$0xff]  }
 0x186   :  { %15005 = vtanh.f32 %v974_v50  ;;  %v15531_v50 = vld [vmem:[#allocation10 + $0x120] ss:$16 sps:$4 sm:$0xff]  }
 0x18d   :  { %v15000_v51 = vpop.eup %14999 }
 0x18e   :  { %v15002_v52 = vpop.eup %15001  ;;  %v1270_v53 = vadd.f32 1.0, %v15000_v51  ;;  %v15532_v51 = vld [vmem:[#allocation10 + $0x128] ss:$16 sps:$4 sm:$0xff]  }
 0x18f   :  { %v1276_v54 = vadd.f32 1.0, %v15002_v52  ;;  %v15004_v55 = vpop.eup %15003  ;;  %v15533_v52 = vld [vmem:[#allocation10 + $0x144] ss:$16 sps:$4 sm:$0xff]  }
 0x190   :  { %15007 = vrcp.f32 %v1270_v53  ;;  %v15006_v57 = vpop.eup %15005  ;;  %v1283_v62 = vadd.f32 1.0, %v15004_v55  ;;  %v15534_v53 = vld [vmem:[#allocation10 + $0x14c] ss:$16 sps:$4 sm:$0xff]   ;;  %v15536_v55 = vld [vmem:[#allocation10 + $0x148] ss:$16 sps:$4 sm:$0xff]  }
 0x191   :  { %15009 = vrcp.f32 %v1276_v54  ;;  %v15535_v54 = vld [vmem:[#allocation10 + $0x140] ss:$16 sps:$4 sm:$0xff]  }
 0x192   :  { %15011 = vrcp.f32 %v1283_v62  ;;  %v15540_v62 = vld [vmem:[#allocation10 + $0x168] ss:$16 sps:$4 sm:$0xff]  }
 0x19a   :  { %v15008_v58 = vpop.eup %15007 }
 0x19b   :  { %v15010_v59 = vpop.eup %15009  ;;  %v1287_v61 = vmul.f32 %v15008_v58, %v15006_v57  ;;  %v15538_v57 = vld [vmem:[#allocation10 + $0x16c] ss:$16 sps:$4 sm:$0xff]  }
 0x19c   :  { %v1286_v1 = vmul.f32 0.0, %v15010_v59  ;;  %v15012_v32 = vpop.eup %15011 }
 0x19e   :  { %v16030_v2 = vadd.f32 %v1287_v61, %v1286_v1  ;;  %v1203_v3 = vpop.f32.mrb[12].mxu0  ;;  %v1244_v38 = vpop.f32.mrb[12].mxu1  ;;  %v15539_v61 = vld [vmem:[#allocation10 + $0x160] ss:$16 sps:$4 sm:$0xff]  }
 0x19f   :  { %v1255_v5 = vrot.slane %v1203_v3, 1  ;;  %v1205_v6 = vpop.f32.mrb[13].mxu0  ;;  %v1246_v7 = vpop.f32.mrb[13].mxu1  ;;  %v1257_v33 = vrot.slane %v1244_v38, 1  ;;  %v15541_v38 = vld [vmem:[#allocation10 + $0x184] ss:$16 sps:$4 sm:$0xff]  }
 0x1a0   :  { %15013 = vtanh.f32 %v16030_v2  ;;  %v1256_v9 = vrot.slane %v1205_v6, 1  ;;  %v1207_v10 = vpop.f32.mrb[14].mxu0  ;;  %v1248_v11 = vpop.f32.mrb[14].mxu1  ;;  %v1258_v26 = vrot.slane %v1246_v7, 1 }
 0x1a1   :  { %v1263_v18 = vadd.f32 %v1255_v5, %v16032_v4  ;;  %v1208_v19 = vpop.f32.mrb[15].mxu0  ;;  %v1249_v20 = vpop.f32.mrb[15].mxu1  ;;  %v1265_v39 = vadd.f32 %v1257_v33, %v16046_v35  ;;  %v15542_v5 = vld [vmem:[#allocation10 + $0x18c] ss:$16 sps:$4 sm:$0xff]   ;;  %v15544_v10 = vld [vmem:[#allocation10 + $0x188] ss:$16 sps:$4 sm:$0xff]  }
 0x1a2   :  { %v1264_v14 = vadd.f32 %v1256_v9, %v16034_v8  ;;  %v1266_v31 = vadd.f32 %v1258_v26, %v16041_v16  ;;  %v15543_v9 = vld [vmem:[#allocation10 + $0x180] ss:$16 sps:$4 sm:$0xff]   ;;  %v15545_v11 = vld [vmem:[#allocation10 + $0x1a4] ss:$16 sps:$4 sm:$0xff]   ;;  %v15548_v20 = vld [vmem:[#allocation10 + $0x1a8] ss:$16 sps:$4 sm:$0xff]  }
 0x1a3   :  { %v12641_v23 = vmul.f32 -1.442695, %v1263_v18  ;;  %v15546_v18 = vld [vmem:[#allocation10 + $0x1ac] ss:$16 sps:$4 sm:$0xff]   ;;  %v15547_v19 = vld [vmem:[#allocation10 + $0x1a0] ss:$16 sps:$4 sm:$0xff]  }
 0x1a4   :  { %v12642_v25 = vmul.f32 -1.442695, %v1264_v14  ;;  %v12643_v37 = vmul.f32 -1.442695, %v1266_v31  ;;  %v15550_v14 = vld [vmem:[#allocation10 + $0x1cc] ss:$16 sps:$4 sm:$0xff]  }
 0x1a5   :  { %15015 = vpow2.f32 %v12641_v23  ;;  %v15551_v23 = vld [vmem:[#allocation10 + $0x1c0] ss:$16 sps:$4 sm:$0xff]   ;;  %v15553_v26 = vld [vmem:[#allocation10 + $0x1e4] ss:$16 sps:$4 sm:$0xff]  }
 0x1a6   :  { %15017 = vpow2.f32 %v12642_v25  ;;  %v15552_v25 = vld [vmem:[#allocation10 + $0x1c8] ss:$16 sps:$4 sm:$0xff]   ;;  %v15555_v33 = vld [vmem:[#allocation10 + $0x1e0] ss:$16 sps:$4 sm:$0xff]  }
 0x1a7   :  { %15019 = vpow2.f32 %v12643_v37 }
 0x1a8   :  { %15021 = vtanh.f32 %v1265_v39 }
 0x1aa   :  { %v15014_v34 = vpop.eup %15013 }
 0x1ab   :  { %v1290_v36 = vmul.f32 %v15014_v34, %v15012_v32  ;;  %v15556_v34 = vld [vmem:[#allocation10 + $0x1e8] ss:$16 sps:$4 sm:$0xff]  }
 0x1ad   :  { %1315 = vst [vmem:[#allocation2] sm:$0x1] %v1290_v36  ;;  %v1317_v41 = vpack.c.bf16 %v1290_v36, %v1290_v36 }
 0x1af   :  { %v15016_v42 = vpop.eup %15015  ;;  %1543 = vmatmul.mubr.bf16.vlgmr.msra.gmra.mrb[16].mxu0 %v1317_v41  ;;  %1584 = vmatmul.mubr.bf16.vlgmr.msra.gmra.mrb[16].mxu1 %v1317_v41 }
 0x1b0   :  { %v15018_v17 = vpop.eup %15017  ;;  %v1294_v43 = vadd.f32 1.0, %v15016_v42  ;;  %1807 = vmatpush1.bf16.msra.mxu0 %v15527_v44  ;;  %1848 = vmatpush1.bf16.msra.mxu1 %v15528_v46  ;;  %v16056_v42 = vld [vmem:[#allocation10 + $0x4] ss:$16 sps:$4 sm:$0xff]   ;;  %v16062_v44 = vld [vmem:[#allocation10 + $0x8] ss:$16 sps:$4 sm:$0xff]  }
 0x1b1   :  { %v1300_v47 = vadd.f32 1.0, %v15018_v17  ;;  %1808 = vmatprep.subr.bf16.mxu0 %v15529_v15  ;;  %1849 = vmatprep.subr.bf16.mxu1 %v15530_v49  ;;  %v15020_v58 = vpop.eup %15019  ;;  %v16058_v17 = vld [vmem:[#allocation10 + $0xc] ss:$16 sps:$4 sm:$0xff]   ;;  %v16068_v46 = vld [vmem:[#allocation10 + $0x24] ss:$16 sps:$4 sm:$0xff]  }
 0x1b2   :  { %15023 = vrcp.f32 %v1294_v43  ;;  %1838 = vmatprep.mubr.bf16.mxu0 %v18321_v0  ;;  %1879 = vmatprep.mubr.bf16.mxu1 %v18321_v0  ;;  %v15022_v59 = vpop.eup %15021  ;;  %v1307_v3 = vadd.f32 1.0, %v15020_v58  ;;  %v16060_v43 = vld [vmem:[#allocation10] ss:$16 sps:$4 sm:$0xff]   ;;  %v16074_v49 = vld [vmem:[#allocation10 + $0x28] ss:$16 sps:$4 sm:$0xff]  }
 0x1b3   :  { %15025 = vrcp.f32 %v1300_v47  ;;  %v16070_v47 = vld [vmem:[#allocation10 + $0x2c] ss:$16 sps:$4 sm:$0xff]   ;;  %v16072_v15 = vld [vmem:[#allocation10 + $0x20] ss:$16 sps:$4 sm:$0xff]   ;;  %v16102_v58 = vld [vmem:[#allocation10 + $0x84] ss:$16 sps:$4 sm:$0xff]  }
 0x1b4   :  { %1809 = vmatpush1.bf16.msra.mxu0 %v15531_v50  ;;  %1850 = vmatpush1.bf16.msra.mxu1 %v15532_v51  ;;  %15027 = vrcp.f32 %v1307_v3  ;;  %v16080_v50 = vld [vmem:[#allocation10 + $0x44] ss:$16 sps:$4 sm:$0xff]   ;;  %v16082_v51 = vld [vmem:[#allocation10 + $0x4c] ss:$16 sps:$4 sm:$0xff]   ;;  %v16122_v3 = vld [vmem:[#allocation10 + $0xa8] ss:$16 sps:$4 sm:$0xff]  }
 0x1b5   :  { %1810 = vmatprep.subr.bf16.mxu0 %v15533_v52  ;;  %1851 = vmatprep.subr.bf16.mxu1 %v15534_v53  ;;  %v16084_v52 = vld [vmem:[#allocation10 + $0x40] ss:$16 sps:$4 sm:$0xff]   ;;  %v16086_v53 = vld [vmem:[#allocation10 + $0x48] ss:$16 sps:$4 sm:$0xff]  }
 0x1b8   :  { %1811 = vmatpush1.bf16.msra.mxu0 %v15535_v54  ;;  %1852 = vmatpush1.bf16.msra.mxu1 %v15536_v55  ;;  %v16092_v54 = vld [vmem:[#allocation10 + $0x64] ss:$16 sps:$4 sm:$0xff]   ;;  %v16094_v55 = vld [vmem:[#allocation10 + $0x6c] ss:$16 sps:$4 sm:$0xff]  }
 0x1b9   :  { %1812 = vmatprep.subr.bf16.mxu0 %v15537_v56  ;;  %1853 = vmatprep.subr.bf16.mxu1 %v15538_v57  ;;  %v16096_v56 = vld [vmem:[#allocation10 + $0x60] ss:$16 sps:$4 sm:$0xff]   ;;  %v16098_v57 = vld [vmem:[#allocation10 + $0x68] ss:$16 sps:$4 sm:$0xff]  }
 0x1bc   :  { %v15024_v60 = vpop.eup %15023  ;;  %1813 = vmatpush1.bf16.msra.mxu0 %v15539_v61  ;;  %1854 = vmatpush1.bf16.msra.mxu1 %v15540_v62  ;;  %v16110_v61 = vld [vmem:[#allocation10 + $0x8c] ss:$16 sps:$4 sm:$0xff]   ;;  %v16116_v62 = vld [vmem:[#allocation10 + $0xa4] ss:$16 sps:$4 sm:$0xff]  }
 0x1bd   :  { %v15026_v63 = vpop.eup %15025  ;;  %v1311_v1 = vmul.f32 %v15024_v60, %v15022_v59  ;;  %1814 = vmatprep.subr.bf16.mxu0 %v15541_v38  ;;  %1855 = vmatprep.subr.bf16.mxu1 %v15542_v5  ;;  %v16106_v59 = vld [vmem:[#allocation10 + $0x80] ss:$16 sps:$4 sm:$0xff]   ;;  %v16108_v60 = vld [vmem:[#allocation10 + $0x88] ss:$16 sps:$4 sm:$0xff]   ;;  %v16128_v38 = vld [vmem:[#allocation10 + $0xc4] ss:$16 sps:$4 sm:$0xff]  }
 0x1be   :  { %v1310_v6 = vmul.f32 0.0, %v15026_v63  ;;  %v15028_v31 = vpop.eup %15027  ;;  %v16118_v63 = vld [vmem:[#allocation10 + $0xac] ss:$16 sps:$4 sm:$0xff]  }
 0x1bf   :  { %v16130_v5 = vld [vmem:[#allocation10 + $0xcc] ss:$16 sps:$4 sm:$0xff]  }
 0x1c0   :  { %v16051_v7 = vadd.f32 %v1311_v1, %v1310_v6  ;;  %1815 = vmatpush1.bf16.msra.mxu0 %v15543_v9  ;;  %1856 = vmatpush1.bf16.msra.mxu1 %v15544_v10  ;;  %v16120_v1 = vld [vmem:[#allocation10 + $0xa0] ss:$16 sps:$4 sm:$0xff]   ;;  %v16134_v9 = vld [vmem:[#allocation10 + $0xc8] ss:$16 sps:$4 sm:$0xff]   ;;  %v16140_v10 = vld [vmem:[#allocation10 + $0xe4] ss:$16 sps:$4 sm:$0xff]  }
 0x1c1   :  { %1816 = vmatprep.subr.bf16.mxu0 %v15545_v11  ;;  %1857 = vmatprep.subr.bf16.mxu1 %v15546_v18  ;;  %v16132_v6 = vld [vmem:[#allocation10 + $0xc0] ss:$16 sps:$4 sm:$0xff]   ;;  %v16142_v11 = vld [vmem:[#allocation10 + $0xec] ss:$16 sps:$4 sm:$0xff]  }
 0x1c2   :  { %15029 = vtanh.f32 %v16051_v7  ;;  %v16144_v18 = vld [vmem:[#allocation10 + $0xe0] ss:$16 sps:$4 sm:$0xff]  }
 0x1c4   :  { %1817 = vmatpush1.bf16.msra.mxu0 %v15547_v19  ;;  %1858 = vmatpush1.bf16.msra.mxu1 %v15548_v20  ;;  %v16146_v19 = vld [vmem:[#allocation10 + $0xe8] ss:$16 sps:$4 sm:$0xff]   ;;  %v16152_v20 = vld [vmem:[#allocation10 + $0x104] ss:$16 sps:$4 sm:$0xff]  }
 0x1c5   :  { %1818 = vmatprep.subr.bf16.mxu0 %v15549_v21  ;;  %1859 = vmatprep.subr.bf16.mxu1 %v15550_v14  ;;  %v16154_v21 = vld [vmem:[#allocation10 + $0x10c] ss:$16 sps:$4 sm:$0xff]  }
 0x1c8   :  { %1819 = vmatpush1.bf16.msra.mxu0 %v15551_v23  ;;  %1860 = vmatpush1.bf16.msra.mxu1 %v15552_v25 }
 0x1c9   :  { %1820 = vmatprep.subr.bf16.mxu0 %v15553_v26  ;;  %1861 = vmatprep.subr.bf16.mxu1 %v15554_v30 }
 0x1cc   :  { %v15030_v32 = vpop.eup %15029  ;;  %1821 = vmatpush1.bf16.msra.mxu0 %v15555_v33  ;;  %1862 = vmatpush1.bf16.msra.mxu1 %v15556_v34 }
 0x1cd   :  { %v1314_v36 = vmul.f32 %v15030_v32, %v15028_v31  ;;  %2157 = vmatprep.subr.bf16.mxu0 %v16056_v42  ;;  %2198 = vmatprep.subr.bf16.mxu1 %v16058_v17 }
 0x1cf   :  { %1316 = vst [vmem:[#allocation3] sm:$0x80] %v1314_v36  ;;  %v1608_v37 = vpack.c.bf16 %v1314_v36, %v1314_v36 }
 0x1d1   :  { %v1642_v39 = vshrl.u32 %v1608_v37, 16 }
 0x1d3   :  { %v1644_v41 = vrot.slane %v1642_v39, 3 }
 0x1d5   :  { %1839 = vmatmul.mubr.bf16.vlgmr.msra.gmra.mrb[20].mxu0 %v1644_v41  ;;  %1880 = vmatmul.mubr.bf16.vlgmr.msra.gmra.mrb[20].mxu1 %v1644_v41 }
 0x1d6   :  { %2189 = vmatprep.mubr.bf16.mxu0 %v18321_v0  ;;  %2230 = vmatprep.mubr.bf16.mxu1 %v18321_v0 }
 0x1d7   :  { %2158 = vmatpush1.bf16.msra.mxu0 %v16060_v43  ;;  %2199 = vmatpush1.bf16.msra.mxu1 %v16062_v44 }
 0x1d8   :  { %2159 = vmatprep.subr.bf16.mxu0 %v16068_v46  ;;  %2200 = vmatprep.subr.bf16.mxu1 %v16070_v47 }
 0x1db   :  { %2160 = vmatpush1.bf16.msra.mxu0 %v16072_v15  ;;  %2201 = vmatpush1.bf16.msra.mxu1 %v16074_v49 }
 0x1dc   :  { %2161 = vmatprep.subr.bf16.mxu0 %v16080_v50  ;;  %2202 = vmatprep.subr.bf16.mxu1 %v16082_v51 }
 0x1df   :  { %2162 = vmatpush1.bf16.msra.mxu0 %v16084_v52  ;;  %2203 = vmatpush1.bf16.msra.mxu1 %v16086_v53 }
 0x1e0   :  { %2163 = vmatprep.subr.bf16.mxu0 %v16092_v54  ;;  %2204 = vmatprep.subr.bf16.mxu1 %v16094_v55 }
 0x1e3   :  { %2164 = vmatpush1.bf16.msra.mxu0 %v16096_v56  ;;  %2205 = vmatpush1.bf16.msra.mxu1 %v16098_v57 }
 0x1e4   :  { %2165 = vmatprep.subr.bf16.mxu0 %v16102_v58  ;;  %2206 = vmatprep.subr.bf16.mxu1 %v16110_v61 }
 0x1e7   :  { %2166 = vmatpush1.bf16.msra.mxu0 %v16106_v59  ;;  %2207 = vmatpush1.bf16.msra.mxu1 %v16108_v60 }
 0x1e8   :  { %2167 = vmatprep.subr.bf16.mxu0 %v16116_v62  ;;  %2208 = vmatprep.subr.bf16.mxu1 %v16118_v63 }
 0x1eb   :  { %2168 = vmatpush1.bf16.msra.mxu0 %v16120_v1  ;;  %2209 = vmatpush1.bf16.msra.mxu1 %v16122_v3 }
 0x1ec   :  { %2169 = vmatprep.subr.bf16.mxu0 %v16128_v38  ;;  %2210 = vmatprep.subr.bf16.mxu1 %v16130_v5 }
 0x1ef   :  { %2170 = vmatpush1.bf16.msra.mxu0 %v16132_v6  ;;  %2211 = vmatpush1.bf16.msra.mxu1 %v16134_v9 }
 0x1f0   :  { %2171 = vmatprep.subr.bf16.mxu0 %v16140_v10  ;;  %2212 = vmatprep.subr.bf16.mxu1 %v16142_v11 }
 0x1f3   :  { %2172 = vmatpush1.bf16.msra.mxu0 %v16144_v18  ;;  %2213 = vmatpush1.bf16.msra.mxu1 %v16146_v19 }
 0x1f4   :  { %2451 = vmatprep.subr.bf16.mxu0 %v16152_v20  ;;  %2492 = vmatprep.subr.bf16.mxu1 %v16154_v21 }
 0x282   :  { %v1544_v14 = vpop.f32.mrb[16].mxu0  ;;  %v1585_v23 = vpop.f32.mrb[16].mxu1 }
 0x283   :  { %v1596_v25 = vrot.slane %v1544_v14, 7  ;;  %v1546_v26 = vpop.f32.mrb[17].mxu0  ;;  %v1587_v30 = vpop.f32.mrb[17].mxu1  ;;  %v1598_v40 = vrot.slane %v1585_v23, 7 }
 0x284   :  { %v1597_v31 = vrot.slane %v1546_v26, 7  ;;  %v1548_v32 = vpop.f32.mrb[18].mxu0  ;;  %v1589_v33 = vpop.f32.mrb[18].mxu1  ;;  %v1599_v0 = vrot.slane %v1587_v30, 7  ;;  %v1924_v30 = vrot.slane %v16030_v2, 7 }
 0x285   :  { %v1604_v34 = vadd.f32 %v1596_v25, %v16008_v28  ;;  %v1549_v36 = vpop.f32.mrb[19].mxu0  ;;  %v1590_v37 = vpop.f32.mrb[19].mxu1  ;;  %v1606_v27 = vadd.f32 %v1598_v40, %v16022_v48 }
 0x286   :  { %v1605_v39 = vadd.f32 %v1597_v31, %v16010_v29  ;;  %v1607_v13 = vadd.f32 %v1599_v0, %v16018_v45 }
 0x287   :  { %v12708_v41 = vmul.f32 -1.442695, %v1604_v34 }
 0x288   :  { %v12709_v12 = vmul.f32 -1.442695, %v1605_v39  ;;  %v12710_v14 = vmul.f32 -1.442695, %v1607_v13 }
 0x289   :  { %15031 = vpow2.f32 %v12708_v41 }
 0x28a   :  { %15033 = vpow2.f32 %v12709_v12 }
 0x28b   :  { %15035 = vpow2.f32 %v12710_v14 }
 0x28c   :  { %15037 = vtanh.f32 %v1606_v27 }
 0x293   :  { %v15032_v26 = vpop.eup %15031 }
 0x294   :  { %v15034_v32 = vpop.eup %15033  ;;  %v1907_v33 = vadd.f32 1.0, %v15032_v26 }
 0x295   :  { %v1913_v25 = vadd.f32 1.0, %v15034_v32  ;;  %v15036_v31 = vpop.eup %15035 }
 0x296   :  { %15039 = vrcp.f32 %v1907_v33  ;;  %v15038_v34 = vpop.eup %15037  ;;  %v1920_v0 = vadd.f32 1.0, %v15036_v31 }
 0x297   :  { %15041 = vrcp.f32 %v1913_v25 }
 0x298   :  { %15043 = vrcp.f32 %v1920_v0 }
 0x2a0   :  { %v15040_v36 = vpop.eup %15039 }
 0x2a1   :  { %v15042_v12 = vpop.eup %15041  ;;  %v1927_v37 = vmul.f32 %v15040_v36, %v15038_v34 }
 0x2a2   :  { %v1926_v23 = vmul.f32 %v15042_v12, %v1924_v30  ;;  %v15044_v12 = vpop.eup %15043 }
 0x2a4   :  { %v16163_v13 = vadd.f32 %v1927_v37, %v1926_v23 }
 0x2a6   :  { %15045 = vtanh.f32 %v16163_v13 }
 0x2a8   :  { %v1840_v40 = vpop.f32.mrb[20].mxu0  ;;  %v1881_v39 = vpop.f32.mrb[20].mxu1 }
 0x2a9   :  { %v1892_v27 = vrot.slane %v1840_v40, 2  ;;  %v1842_v41 = vpop.f32.mrb[21].mxu0  ;;  %v1883_v14 = vpop.f32.mrb[21].mxu1  ;;  %v1894_v40 = vrot.slane %v1881_v39, 2  ;;  %v16180_v39 = vld [vmem:[#allocation10 + $0x120] ss:$16 sps:$4 sm:$0xff]  }
 0x2aa   :  { %v1893_v26 = vrot.slane %v1842_v41, 2  ;;  %v1844_v32 = vpop.f32.mrb[22].mxu0  ;;  %v1885_v33 = vpop.f32.mrb[22].mxu1  ;;  %v1895_v30 = vrot.slane %v1883_v14, 2  ;;  %18437 = vst [vmem:[#allocation26_spill] sm:$0xff] %v16180_v39 }
 0x2ab   :  { %v1900_v25 = vadd.f32 %v1892_v27, %v16032_v4  ;;  %v1845_v2 = vpop.f32.mrb[23].mxu0  ;;  %v1886_v24 = vpop.f32.mrb[23].mxu1  ;;  %v16169_v32 = vld [vmem:[#allocation10 + $0x100] ss:$16 sps:$4 sm:$0xff]   ;;  %v16171_v27 = vld [vmem:[#allocation10 + $0x108] ss:$16 sps:$4 sm:$0xff]  }
 0x2ac   :  { %v1901_v31 = vadd.f32 %v1893_v26, %v16034_v8  ;;  %v1903_v23 = vadd.f32 %v1895_v30, %v16041_v16  ;;  %v16173_v33 = vld [vmem:[#allocation10 + $0x124] ss:$16 sps:$4 sm:$0xff]   ;;  %v16175_v26 = vld [vmem:[#allocation10 + $0x12c] ss:$16 sps:$4 sm:$0xff]   ;;  %v16182_v2 = vld [vmem:[#allocation10 + $0x128] ss:$16 sps:$4 sm:$0xff]  }
 0x2ad   :  { %v12711_v34 = vmul.f32 -1.442695, %v1900_v25  ;;  %18436 = vst [vmem:[#allocation25_spill] sm:$0xff] %v16175_v26  ;;  %v1902_v25 = vadd.f32 %v1894_v40, %v16046_v35  ;;  %18438 = vst [vmem:[#allocation27_spill] sm:$0xff] %v16182_v2  ;;  %v16196_v40 = vld [vmem:[#allocation10 + $0x148] ss:$16 sps:$4 sm:$0xff]  }
 0x2ae   :  { %v12712_v36 = vmul.f32 -1.442695, %v1901_v31  ;;  %v12713_v14 = vmul.f32 -1.442695, %v1903_v23  ;;  %v16194_v23 = vld [vmem:[#allocation10 + $0x140] ss:$16 sps:$4 sm:$0xff]  }
 0x2af   :  { %15047 = vpow2.f32 %v12711_v34  ;;  %v16186_v34 = vld [vmem:[#allocation10 + $0x144] ss:$16 sps:$4 sm:$0xff]   ;;  %18442 = vst [vmem:[#allocation30_spill] sm:$0xff] %v16194_v23  ;;  %18443 = vst [vmem:[#allocation31_spill] sm:$0xff] %v16196_v40 }
 0x2b0   :  { %v15046_v37 = vpop.eup %15045  ;;  %15049 = vpow2.f32 %v12712_v36  ;;  %18439 = vst [vmem:[#allocation28_spill] sm:$0xff] %v16186_v34  ;;  %v16188_v36 = vld [vmem:[#allocation10 + $0x14c] ss:$16 sps:$4 sm:$0xff]  }
 0x2b1   :  { %v1930_v0 = vmul.f32 %v15046_v37, %v15044_v12  ;;  %18440 = vst [vmem:[#allocation29_spill] sm:$0xff] %v16188_v36  ;;  %15051 = vpow2.f32 %v12713_v14  ;;  %v18441_v37 = vmov 0   ;;  %v16206_v14 = vld [vmem:[#allocation10 + $0x160] ss:$16 sps:$4 sm:$0xff]  }
 0x2b2   :  { %15053 = vtanh.f32 %v1902_v25  ;;  %18446 = vst [vmem:[#allocation34_spill] sm:$0xff] %v16206_v14  ;;  %v16208_v25 = vld [vmem:[#allocation10 + $0x168] ss:$16 sps:$4 sm:$0xff]  }
 0x2b3   :  { %1958 = vst [vmem:[#allocation2] sm:$0x2] %v1930_v0  ;;  %v1960_v41 = vpack.c.bf16 %v1930_v0, %v1930_v0  ;;  %18447 = vst [vmem:[#allocation35_spill] sm:$0xff] %v16208_v25 }
 0x2b5   :  { %v1994_v24 = vshrl.u32 %v1960_v41, 16  ;;  %v16200_v41 = vld [vmem:[#allocation10 + $0x164] ss:$16 sps:$4 sm:$0xff]  }
 0x2b6   :  { %18444 = vst [vmem:[#allocation32_spill] sm:$0xff] %v16200_v41 }
 0x2b7   :  { %2190 = vmatmul.mubr.bf16.vlgmr.msra.gmra.mrb[24].mxu0 %v1994_v24  ;;  %2231 = vmatmul.mubr.bf16.vlgmr.msra.gmra.mrb[24].mxu1 %v1994_v24  ;;  %v16202_v24 = vld [vmem:[#allocation10 + $0x16c] ss:$16 sps:$4 sm:$0xff]  }
 0x2b8   :  { %2452 = vmatpush1.bf16.msra.mxu0 %v16169_v32  ;;  %2493 = vmatpush1.bf16.msra.mxu1 %v16171_v27  ;;  %18445 = vst [vmem:[#allocation33_spill] sm:$0xff] %v16202_v24 }
 0x2b9   :  { %v15048_v31 = vpop.eup %15047  ;;  %2453 = vmatprep.subr.bf16.mxu0 %v16173_v33  ;;  %2494 = vmatprep.subr.bf16.mxu1 %v16175_v26  ;;  %v16239_v26 = vld [vmem:[#allocation10 + $0x1cc] ss:$16 sps:$4 sm:$0xff]  }
 0x2ba   :  { %v15050_v30 = vpop.eup %15049  ;;  %v1934_v12 = vadd.f32 1.0, %v15048_v31  ;;  %2483 = vmatprep.mubr.bf16.mxu0 %v18441_v37  ;;  %2524 = vmatprep.mubr.bf16.mxu1 %v18441_v37  ;;  %v16212_v31 = vld [vmem:[#allocation10 + $0x184] ss:$16 sps:$4 sm:$0xff]   ;;  %18450 = vst [vmem:[#allocation38_spill] sm:$0xff] %v16239_v26 }
 0x2bb   :  { %v1940_v0 = vadd.f32 1.0, %v15050_v30  ;;  %18448 = vst [vmem:[#allocation36_spill] sm:$0xff] %v16212_v31  ;;  %v16214_v30 = vld [vmem:[#allocation10 + $0x18c] ss:$16 sps:$4 sm:$0xff]  }
 0x2bc   :  { %15055 = vrcp.f32 %v1934_v12  ;;  %2454 = vmatpush1.bf16.msra.mxu0 %v16180_v39  ;;  %2495 = vmatpush1.bf16.msra.mxu1 %v16182_v2  ;;  %18449 = vst [vmem:[#allocation37_spill] sm:$0xff] %v16214_v30  ;;  %v15052_v12 = vpop.eup %15051  ;;  %v16231_v39 = vld [vmem:[#allocation10 + $0x1a0] ss:$16 sps:$4 sm:$0xff]  }
 0x2bd   :  { %15057 = vrcp.f32 %v1940_v0  ;;  %2455 = vmatprep.subr.bf16.mxu0 %v16186_v34  ;;  %2496 = vmatprep.subr.bf16.mxu1 %v16188_v36  ;;  %v16218_v0 = vld [vmem:[#allocation10 + $0x180] ss:$16 sps:$4 sm:$0xff]   ;;  %v1951_v36 = vrot.slane %v16051_v7, 1  ;;  %v1947_v2 = vadd.f32 1.0, %v15052_v12 }
 0x2bf   :  { %15059 = vrcp.f32 %v1947_v2  ;;  %v16258_v2 = vld [vmem:[#allocation10 + $0x1e0] ss:$16 sps:$4 sm:$0xff]  }
 0x2c0   :  { %2456 = vmatpush1.bf16.msra.mxu0 %v16194_v23  ;;  %2497 = vmatpush1.bf16.msra.mxu1 %v16196_v40  ;;  %v15054_v40 = vpop.eup %15053 }
 0x2c1   :  { %2457 = vmatprep.subr.bf16.mxu0 %v16200_v41  ;;  %2498 = vmatprep.subr.bf16.mxu1 %v16202_v24  ;;  %v16224_v41 = vld [vmem:[#allocation10 + $0x1a4] ss:$16 sps:$4 sm:$0xff]   ;;  %v16226_v24 = vld [vmem:[#allocation10 + $0x1ac] ss:$16 sps:$4 sm:$0xff]  }
 0x2c4   :  { %2458 = vmatpush1.bf16.msra.mxu0 %v16206_v14  ;;  %2499 = vmatpush1.bf16.msra.mxu1 %v16208_v25 }
 0x2c5   :  { %2459 = vmatprep.subr.bf16.mxu0 %v16212_v31  ;;  %2500 = vmatprep.subr.bf16.mxu1 %v16214_v30  ;;  %v16233_v31 = vld [vmem:[#allocation10 + $0x1a8] ss:$16 sps:$4 sm:$0xff]   ;;  %v16237_v30 = vld [vmem:[#allocation10 + $0x1c4] ss:$16 sps:$4 sm:$0xff]  }
 0x2c6   :  { %v15056_v23 = vpop.eup %15055 }
 0x2c7   :  { %v15058_v34 = vpop.eup %15057  ;;  %v1954_v14 = vmul.f32 %v15056_v23, %v15054_v40  ;;  %v16252_v23 = vld [vmem:[#allocation10 + $0x1e4] ss:$16 sps:$4 sm:$0xff]   ;;  %v16254_v40 = vld [vmem:[#allocation10 + $0x1ec] ss:$16 sps:$4 sm:$0xff]  }
 0x2c8   :  { %v1953_v25 = vmul.f32 %v15058_v34, %v1951_v36  ;;  %2460 = vmatpush1.bf16.msra.mxu0 %v16218_v0  ;;  %2501 = vmatpush1.bf16.msra.mxu1 %v16220_v22  ;;  %v16245_v34 = vld [vmem:[#allocation10 + $0x1c0] ss:$16 sps:$4 sm:$0xff]   ;;  %v16247_v36 = vld [vmem:[#allocation10 + $0x1c8] ss:$16 sps:$4 sm:$0xff]  }
 0x2c9   :  { %2461 = vmatprep.subr.bf16.mxu0 %v16224_v41  ;;  %2502 = vmatprep.subr.bf16.mxu1 %v16226_v24  ;;  %18451 = vst [vmem:[#allocation39_spill] sm:$0xff] %v16245_v34  ;;  %18452 = vst [vmem:[#allocation40_spill] sm:$0xff] %v16247_v36 }
 0x2ca   :  { %v16241_v7 = vadd.f32 %v1954_v14, %v1953_v25  ;;  %v16260_v14 = vld [vmem:[#allocation10 + $0x1e8] ss:$16 sps:$4 sm:$0xff]   ;;  %v15060_v25 = vpop.eup %15059 }
 0x2cc   :  { %2462 = vmatpush1.bf16.msra.mxu0 %v16231_v39  ;;  %2503 = vmatpush1.bf16.msra.mxu1 %v16233_v31  ;;  %15061 = vtanh.f32 %v16241_v7 }
 0x2cd   :  { %2463 = vmatprep.subr.bf16.mxu0 %v16237_v30  ;;  %2504 = vmatprep.subr.bf16.mxu1 %v16239_v26 }
 0x2d0   :  { %2464 = vmatpush1.bf16.msra.mxu0 %v16245_v34  ;;  %2505 = vmatpush1.bf16.msra.mxu1 %v16247_v36 }
 0x2d1   :  { %2465 = vmatprep.subr.bf16.mxu0 %v16252_v23  ;;  %2506 = vmatprep.subr.bf16.mxu1 %v16254_v40 }
 0x2d4   :  { %2466 = vmatpush1.bf16.msra.mxu0 %v16258_v2  ;;  %2507 = vmatpush1.bf16.msra.mxu1 %v16260_v14 }
 0x2d5   :  { %2801 = vmatprep.subr.bf16.mxu0 %v16056_v42  ;;  %2842 = vmatprep.subr.bf16.mxu1 %v16058_v17 }
 0x2d6   :  { %v15062_v12 = vpop.eup %15061 }
 0x2d7   :  { %v1957_v34 = vmul.f32 %v15062_v12, %v15060_v25 }
 0x2d9   :  { %1959 = vst [vmem:[#allocation3] sm:$0x40] %v1957_v34  ;;  %v2255_v36 = vpack.c.bf16 %v1957_v34, %v1957_v34 }
 0x2db   :  { %v2289_v26 = vrot.slane %v2255_v36, 3 }
 0x2dd   :  { %2484 = vmatmul.mubr.bf16.vlgmr.msra.gmra.mrb[28].mxu0 %v2289_v26  ;;  %2525 = vmatmul.mubr.bf16.vlgmr.msra.gmra.mrb[28].mxu1 %v2289_v26 }
 0x2de   :  { %2802 = vmatpush1.bf16.msra.mxu0 %v16060_v43  ;;  %2843 = vmatpush1.bf16.msra.mxu1 %v16062_v44 }
 0x2df   :  { %2803 = vmatprep.subr.bf16.mxu0 %v16068_v46  ;;  %2844 = vmatprep.subr.bf16.mxu1 %v16070_v47 }
 0x2e0   :  { %2833 = vmatprep.mubr.bf16.mxu0 %v18441_v37  ;;  %2874 = vmatprep.mubr.bf16.mxu1 %v18441_v37 }
 0x2e2   :  { %2804 = vmatpush1.bf16.msra.mxu0 %v16072_v15  ;;  %2845 = vmatpush1.bf16.msra.mxu1 %v16074_v49 }
 0x2e3   :  { %2805 = vmatprep.subr.bf16.mxu0 %v16080_v50  ;;  %2846 = vmatprep.subr.bf16.mxu1 %v16082_v51 }
 0x2e6   :  { %2806 = vmatpush1.bf16.msra.mxu0 %v16084_v52  ;;  %2847 = vmatpush1.bf16.msra.mxu1 %v16086_v53 }
 0x2e7   :  { %2807 = vmatprep.subr.bf16.mxu0 %v16092_v54  ;;  %2848 = vmatprep.subr.bf16.mxu1 %v16094_v55 }
 0x2ea   :  { %2808 = vmatpush1.bf16.msra.mxu0 %v16096_v56  ;;  %2849 = vmatpush1.bf16.msra.mxu1 %v16098_v57 }
 0x2eb   :  { %2809 = vmatprep.subr.bf16.mxu0 %v16102_v58  ;;  %2850 = vmatprep.subr.bf16.mxu1 %v16110_v61 }
 0x2ee   :  { %2810 = vmatpush1.bf16.msra.mxu0 %v16106_v59  ;;  %2851 = vmatpush1.bf16.msra.mxu1 %v16108_v60 }
 0x2ef   :  { %2811 = vmatprep.subr.bf16.mxu0 %v16116_v62  ;;  %2852 = vmatprep.subr.bf16.mxu1 %v16118_v63 }
 0x2f2   :  { %2812 = vmatpush1.bf16.msra.mxu0 %v16120_v1  ;;  %2853 = vmatpush1.bf16.msra.mxu1 %v16122_v3 }
 0x2f3   :  { %2813 = vmatprep.subr.bf16.mxu0 %v16128_v38  ;;  %2854 = vmatprep.subr.bf16.mxu1 %v16130_v5 }
 0x2f6   :  { %2814 = vmatpush1.bf16.msra.mxu0 %v16132_v6  ;;  %2855 = vmatpush1.bf16.msra.mxu1 %v16134_v9  ;;  %v2569_v6 = vrot.slane %v16163_v13, 7 }
 0x2f7   :  { %2815 = vmatprep.subr.bf16.mxu0 %v16140_v10  ;;  %2856 = vmatprep.subr.bf16.mxu1 %v16142_v11 }
 0x2fa   :  { %2816 = vmatpush1.bf16.msra.mxu0 %v16144_v18  ;;  %2857 = vmatpush1.bf16.msra.mxu1 %v16146_v19 }
 0x2fb   :  { %3097 = vmatprep.subr.bf16.mxu0 %v16152_v20  ;;  %3138 = vmatprep.subr.bf16.mxu1 %v16154_v21 }
 0x38a   :  { %v2191_v42 = vpop.f32.mrb[24].mxu0  ;;  %v2232_v17 = vpop.f32.mrb[24].mxu1 }
 0x38b   :  { %v2243_v43 = vrot.slane %v2191_v42, 6  ;;  %v2193_v44 = vpop.f32.mrb[25].mxu0  ;;  %v2234_v46 = vpop.f32.mrb[25].mxu1  ;;  %v2245_v58 = vrot.slane %v2232_v17, 6 }
 0x38c   :  { %v2244_v47 = vrot.slane %v2193_v44, 6  ;;  %v2195_v15 = vpop.f32.mrb[26].mxu0  ;;  %v2236_v49 = vpop.f32.mrb[26].mxu1  ;;  %v2246_v56 = vrot.slane %v2234_v46, 6 }
 0x38d   :  { %v2251_v50 = vadd.f32 %v2243_v43, %v16008_v28  ;;  %v2196_v51 = vpop.f32.mrb[27].mxu0  ;;  %v2237_v52 = vpop.f32.mrb[27].mxu1  ;;  %v2253_v60 = vadd.f32 %v2245_v58, %v16022_v48 }
 0x38e   :  { %v2252_v53 = vadd.f32 %v2244_v47, %v16010_v29  ;;  %v2254_v57 = vadd.f32 %v2246_v56, %v16018_v45 }
 0x38f   :  { %v12778_v54 = vmul.f32 -1.442695, %v2251_v50 }
 0x390   :  { %v12779_v55 = vmul.f32 -1.442695, %v2252_v53  ;;  %v12780_v59 = vmul.f32 -1.442695, %v2254_v57 }
 0x391   :  { %15063 = vpow2.f32 %v12778_v54 }
 0x392   :  { %15065 = vpow2.f32 %v12779_v55 }
 0x393   :  { %15067 = vpow2.f32 %v12780_v59  ;;  %v18453_v59 = vld [vmem:[#allocation25_spill] sm:$0xff] }
 0x394   :  { %15069 = vtanh.f32 %v2253_v60 }
 0x39b   :  { %v15064_v61 = vpop.eup %15063 }
 0x39c   :  { %v15066_v62 = vpop.eup %15065  ;;  %v2552_v63 = vadd.f32 1.0, %v15064_v61 }
 0x39d   :  { %v2558_v1 = vadd.f32 1.0, %v15066_v62  ;;  %v15068_v3 = vpop.eup %15067 }
 0x39e   :  { %15071 = vrcp.f32 %v2552_v63  ;;  %v15070_v38 = vpop.eup %15069  ;;  %v2565_v11 = vadd.f32 1.0, %v15068_v3  ;;  %v18454_v63 = vld [vmem:[#allocation26_spill] sm:$0xff]  ;;  %v18459_v3 = vld [vmem:[#allocation31_spill] sm:$0xff] }
 0x39f   :  { %15073 = vrcp.f32 %v2558_v1  ;;  %v18458_v1 = vld [vmem:[#allocation30_spill] sm:$0xff] }
 0x3a0   :  { %15075 = vrcp.f32 %v2565_v11 }
 0x3a8   :  { %v15072_v5 = vpop.eup %15071 }
 0x3a9   :  { %v15074_v9 = vpop.eup %15073  ;;  %v2572_v10 = vmul.f32 %v15072_v5, %v15070_v38  ;;  %v18460_v38 = vld [vmem:[#allocation32_spill] sm:$0xff]  ;;  %v18461_v5 = vld [vmem:[#allocation33_spill] sm:$0xff] }
 0x3aa   :  { %v2571_v18 = vmul.f32 %v15074_v9, %v2569_v6  ;;  %v15076_v49 = vpop.eup %15075  ;;  %v18462_v9 = vld [vmem:[#allocation34_spill] sm:$0xff] }
 0x3ac   :  { %v16307_v19 = vadd.f32 %v2572_v10, %v2571_v18  ;;  %v18463_v10 = vld [vmem:[#allocation35_spill] sm:$0xff]  ;;  %v18464_v18 = vld [vmem:[#allocation36_spill] sm:$0xff] }
 0x3ae   :  { %15077 = vtanh.f32 %v16307_v19 }
 0x3b0   :  { %v2485_v20 = vpop.f32.mrb[28].mxu0  ;;  %v2526_v21 = vpop.f32.mrb[28].mxu1 }
 0x3b1   :  { %v2537_v26 = vrot.slane %v2485_v20, 3  ;;  %v2487_v34 = vpop.f32.mrb[29].mxu0  ;;  %v2528_v36 = vpop.f32.mrb[29].mxu1  ;;  %v2539_v53 = vrot.slane %v2526_v21, 3  ;;  %v18465_v20 = vld [vmem:[#allocation37_spill] sm:$0xff] }
 0x3b2   :  { %v2538_v25 = vrot.slane %v2487_v34, 3  ;;  %v2489_v12 = vpop.f32.mrb[30].mxu0  ;;  %v2530_v42 = vpop.f32.mrb[30].mxu1  ;;  %v2540_v15 = vrot.slane %v2528_v36, 3 }
 0x3b3   :  { %v2545_v17 = vadd.f32 %v2537_v26, %v16032_v4  ;;  %v2490_v13 = vpop.f32.mrb[31].mxu0  ;;  %v2531_v43 = vpop.f32.mrb[31].mxu1  ;;  %v2547_v57 = vadd.f32 %v2539_v53, %v16046_v35  ;;  %v2596_v26 = vrot.slane %v16241_v7, 1  ;;  %v18466_v7 = vld [vmem:[#allocation38_spill] sm:$0xff] }
 0x3b4   :  { %v2546_v44 = vadd.f32 %v2538_v25, %v16034_v8  ;;  %v2548_v52 = vadd.f32 %v2540_v15, %v16041_v16  ;;  %v16364_v13 = vld [vmem:[#allocation10 + $0x24] ss:$16 sps:$4 sm:$0xff]   ;;  %v16366_v43 = vld [vmem:[#allocation10 + $0x2c] ss:$16 sps:$4 sm:$0xff]   ;;  %v16392_v53 = vld [vmem:[#allocation10 + $0x68] ss:$16 sps:$4 sm:$0xff]  }
 0x3b5   :  { %v12781_v46 = vmul.f32 -1.442695, %v2545_v17  ;;  %v16378_v15 = vld [vmem:[#allocation10 + $0x4c] ss:$16 sps:$4 sm:$0xff]  }
 0x3b6   :  { %v12782_v47 = vmul.f32 -1.442695, %v2546_v44  ;;  %v12783_v56 = vmul.f32 -1.442695, %v2548_v52  ;;  %v16368_v44 = vld [vmem:[#allocation10 + $0x20] ss:$16 sps:$4 sm:$0xff]  }
 0x3b7   :  { %15079 = vpow2.f32 %v12781_v46  ;;  %v16370_v46 = vld [vmem:[#allocation10 + $0x28] ss:$16 sps:$4 sm:$0xff]   ;;  %v16390_v52 = vld [vmem:[#allocation10 + $0x64] ss:$16 sps:$4 sm:$0xff]  }
 0x3b8   :  { %v15078_v50 = vpop.eup %15077  ;;  %15081 = vpow2.f32 %v12782_v47  ;;  %v16376_v47 = vld [vmem:[#allocation10 + $0x44] ss:$16 sps:$4 sm:$0xff]  }
 0x3b9   :  { %v2575_v51 = vmul.f32 %v15078_v50, %v15076_v49  ;;  %15083 = vpow2.f32 %v12783_v56  ;;  %v16380_v49 = vld [vmem:[#allocation10 + $0x40] ss:$16 sps:$4 sm:$0xff]   ;;  %v16382_v50 = vld [vmem:[#allocation10 + $0x48] ss:$16 sps:$4 sm:$0xff]   ;;  %v16399_v56 = vld [vmem:[#allocation10 + $0x8c] ss:$16 sps:$4 sm:$0xff]  }
 0x3ba   :  { %15085 = vtanh.f32 %v2547_v57  ;;  %v16403_v57 = vld [vmem:[#allocation10 + $0x80] ss:$16 sps:$4 sm:$0xff]  }
 0x3bb   :  { %2603 = vst [vmem:[#allocation2] sm:$0x4] %v2575_v51  ;;  %v2605_v54 = vpack.c.bf16 %v2575_v51, %v2575_v51  ;;  %v16388_v51 = vld [vmem:[#allocation10 + $0x60] ss:$16 sps:$4 sm:$0xff]  }
 0x3bd   :  { %v2639_v55 = vrot.slane %v2605_v54, 1  ;;  %v16394_v54 = vld [vmem:[#allocation10 + $0x6c] ss:$16 sps:$4 sm:$0xff]  }
 0x3bf   :  { %2834 = vmatmul.mubr.bf16.vlgmr.msra.gmra.mrb[32].mxu0 %v2639_v55  ;;  %2875 = vmatmul.mubr.bf16.vlgmr.msra.gmra.mrb[32].mxu1 %v2639_v55  ;;  %v16396_v55 = vld [vmem:[#allocation10 + $0x84] ss:$16 sps:$4 sm:$0xff]  }
 0x3c0   :  { %3098 = vmatpush1.bf16.msra.mxu0 %v16169_v32  ;;  %3139 = vmatpush1.bf16.msra.mxu1 %v16171_v27  ;;  %v18455_v32 = vld [vmem:[#allocation27_spill] sm:$0xff]  ;;  %v18456_v27 = vld [vmem:[#allocation28_spill] sm:$0xff] }
 0x3c1   :  { %v15080_v58 = vpop.eup %15079  ;;  %3099 = vmatprep.subr.bf16.mxu0 %v16173_v33  ;;  %3140 = vmatprep.subr.bf16.mxu1 %v18453_v59  ;;  %v18457_v33 = vld [vmem:[#allocation29_spill] sm:$0xff] }
 0x3c2   :  { %v15082_v60 = vpop.eup %15081  ;;  %v2579_v61 = vadd.f32 1.0, %v15080_v58  ;;  %3129 = vmatprep.mubr.bf16.mxu0 %v18441_v37  ;;  %3170 = vmatprep.mubr.bf16.mxu1 %v18441_v37  ;;  %v16407_v58 = vld [vmem:[#allocation10 + $0x88] ss:$16 sps:$4 sm:$0xff]   ;;  %v16412_v59 = vld [vmem:[#allocation10 + $0xa4] ss:$16 sps:$4 sm:$0xff]  }
 0x3c3   :  { %v2585_v62 = vadd.f32 1.0, %v15082_v60  ;;  %v15084_v6 = vpop.eup %15083  ;;  %v16414_v60 = vld [vmem:[#allocation10 + $0xac] ss:$16 sps:$4 sm:$0xff]  }
 0x3c4   :  { %15087 = vrcp.f32 %v2579_v61  ;;  %3100 = vmatpush1.bf16.msra.mxu0 %v18454_v63  ;;  %3141 = vmatpush1.bf16.msra.mxu1 %v18455_v32  ;;  %v15086_v11 = vpop.eup %15085  ;;  %v2592_v25 = vadd.f32 1.0, %v15084_v6  ;;  %v16416_v61 = vld [vmem:[#allocation10 + $0xa0] ss:$16 sps:$4 sm:$0xff]   ;;  %v16424_v63 = vld [vmem:[#allocation10 + $0xc4] ss:$16 sps:$4 sm:$0xff]  }
 0x3c5   :  { %15089 = vrcp.f32 %v2585_v62  ;;  %3101 = vmatprep.subr.bf16.mxu0 %v18456_v27  ;;  %3142 = vmatprep.subr.bf16.mxu1 %v18457_v33  ;;  %v16418_v62 = vld [vmem:[#allocation10 + $0xa8] ss:$16 sps:$4 sm:$0xff]   ;;  %v16426_v32 = vld [vmem:[#allocation10 + $0xcc] ss:$16 sps:$4 sm:$0xff]   ;;  %v16428_v27 = vld [vmem:[#allocation10 + $0xc0] ss:$16 sps:$4 sm:$0xff]  }
 0x3c6   :  { %15091 = vrcp.f32 %v2592_v25  ;;  %v16430_v33 = vld [vmem:[#allocation10 + $0xc8] ss:$16 sps:$4 sm:$0xff]   ;;  %v16448_v6 = vld [vmem:[#allocation10 + $0x104] ss:$16 sps:$4 sm:$0xff]  }
 0x3c8   :  { %3102 = vmatpush1.bf16.msra.mxu0 %v18458_v1  ;;  %3143 = vmatpush1.bf16.msra.mxu1 %v18459_v3  ;;  %v16436_v1 = vld [vmem:[#allocation10 + $0xe4] ss:$16 sps:$4 sm:$0xff]   ;;  %v16438_v3 = vld [vmem:[#allocation10 + $0xec] ss:$16 sps:$4 sm:$0xff]  }
 0x3c9   :  { %3103 = vmatprep.subr.bf16.mxu0 %v18460_v38  ;;  %3144 = vmatprep.subr.bf16.mxu1 %v18461_v5  ;;  %v16440_v38 = vld [vmem:[#allocation10 + $0xe0] ss:$16 sps:$4 sm:$0xff]   ;;  %v16442_v5 = vld [vmem:[#allocation10 + $0xe8] ss:$16 sps:$4 sm:$0xff]  }
 0x3cc   :  { %3104 = vmatpush1.bf16.msra.mxu0 %v18462_v9  ;;  %3145 = vmatpush1.bf16.msra.mxu1 %v18463_v10  ;;  %v16450_v9 = vld [vmem:[#allocation10 + $0x10c] ss:$16 sps:$4 sm:$0xff]  }
 0x3cd   :  { %3105 = vmatprep.subr.bf16.mxu0 %v18464_v18  ;;  %3146 = vmatprep.subr.bf16.mxu1 %v18465_v20 }
 0x3ce   :  { %v15088_v21 = vpop.eup %15087 }
 0x3cf   :  { %v15090_v34 = vpop.eup %15089  ;;  %v2599_v36 = vmul.f32 %v15088_v21, %v15086_v11 }
 0x3d0   :  { %v2598_v12 = vmul.f32 %v15090_v34, %v2596_v26  ;;  %3106 = vmatpush1.bf16.msra.mxu0 %v16218_v0  ;;  %3147 = vmatpush1.bf16.msra.mxu1 %v16220_v22  ;;  %v18467_v0 = vld [vmem:[#allocation39_spill] sm:$0xff]  ;;  %v18468_v22 = vld [vmem:[#allocation40_spill] sm:$0xff] }
 0x3d1   :  { %3107 = vmatprep.subr.bf16.mxu0 %v16224_v41  ;;  %3148 = vmatprep.subr.bf16.mxu1 %v16226_v24 }
 0x3d2   :  { %v16337_v42 = vadd.f32 %v2599_v36, %v2598_v12 }
 0x3d4   :  { %3108 = vmatpush1.bf16.msra.mxu0 %v16231_v39  ;;  %3149 = vmatpush1.bf16.msra.mxu1 %v16233_v31  ;;  %15093 = vtanh.f32 %v16337_v42  ;;  %v15092_v39 = vpop.eup %15091 }
 0x3d5   :  { %3109 = vmatprep.subr.bf16.mxu0 %v16237_v30  ;;  %3150 = vmatprep.subr.bf16.mxu1 %v18466_v7 }
 0x3d8   :  { %3110 = vmatpush1.bf16.msra.mxu0 %v18467_v0  ;;  %3151 = vmatpush1.bf16.msra.mxu1 %v18468_v22 }
 0x3d9   :  { %3111 = vmatprep.subr.bf16.mxu0 %v16252_v23  ;;  %3152 = vmatprep.subr.bf16.mxu1 %v16254_v40  ;;  %v16352_v23 = vld [vmem:[#allocation10 + $0x4] ss:$16 sps:$4 sm:$0xff]   ;;  %v16354_v40 = vld [vmem:[#allocation10 + $0xc] ss:$16 sps:$4 sm:$0xff]  }
 0x3dc   :  { %3112 = vmatpush1.bf16.msra.mxu0 %v16258_v2  ;;  %3153 = vmatpush1.bf16.msra.mxu1 %v16260_v14  ;;  %v16356_v2 = vld [vmem:[#allocation10] ss:$16 sps:$4 sm:$0xff]   ;;  %v16358_v14 = vld [vmem:[#allocation10 + $0x8] ss:$16 sps:$4 sm:$0xff]  }
 0x3dd   :  { %3449 = vmatprep.subr.bf16.mxu0 %v16352_v23  ;;  %3490 = vmatprep.subr.bf16.mxu1 %v16354_v40 }
 0x3de   :  { %v15094_v41 = vpop.eup %15093 }
 0x3df   :  { %v2602_v24 = vmul.f32 %v15094_v41, %v15092_v39 }
 0x3e1   :  { %2604 = vst [vmem:[#allocation3] sm:$0x20] %v2602_v24  ;;  %v2899_v31 = vpack.c.bf16 %v2602_v24, %v2602_v24 }
 0x3e3   :  { %v2933_v30 = vshrl.u32 %v2899_v31, 16 }
 0x3e5   :  { %v2935_v17 = vrot.slane %v2933_v30, 2 }
 0x3e7   :  { %3130 = vmatmul.mubr.bf16.vlgmr.msra.gmra.mrb[36].mxu0 %v2935_v17  ;;  %3171 = vmatmul.mubr.bf16.vlgmr.msra.gmra.mrb[36].mxu1 %v2935_v17 }
 0x3e8   :  { %3481 = vmatprep.mubr.bf16.mxu0 %v18441_v37  ;;  %3522 = vmatprep.mubr.bf16.mxu1 %v18441_v37 }
 0x3e9   :  { %3450 = vmatpush1.bf16.msra.mxu0 %v16356_v2  ;;  %3491 = vmatpush1.bf16.msra.mxu1 %v16358_v14 }
 0x3ea   :  { %3451 = vmatprep.subr.bf16.mxu0 %v16364_v13  ;;  %3492 = vmatprep.subr.bf16.mxu1 %v16366_v43 }
 0x3ed   :  { %3452 = vmatpush1.bf16.msra.mxu0 %v16368_v44  ;;  %3493 = vmatpush1.bf16.msra.mxu1 %v16370_v46 }
 0x3ee   :  { %3453 = vmatprep.subr.bf16.mxu0 %v16376_v47  ;;  %3494 = vmatprep.subr.bf16.mxu1 %v16378_v15 }
 0x3f1   :  { %3454 = vmatpush1.bf16.msra.mxu0 %v16380_v49  ;;  %3495 = vmatpush1.bf16.msra.mxu1 %v16382_v50 }
 0x3f2   :  { %3455 = vmatprep.subr.bf16.mxu0 %v16390_v52  ;;  %3496 = vmatprep.subr.bf16.mxu1 %v16394_v54 }
 0x3f5   :  { %3456 = vmatpush1.bf16.msra.mxu0 %v16388_v51  ;;  %3497 = vmatpush1.bf16.msra.mxu1 %v16392_v53 }
 0x3f6   :  { %3457 = vmatprep.subr.bf16.mxu0 %v16396_v55  ;;  %3498 = vmatprep.subr.bf16.mxu1 %v16399_v56 }
 0x3f9   :  { %3458 = vmatpush1.bf16.msra.mxu0 %v16403_v57  ;;  %3499 = vmatpush1.bf16.msra.mxu1 %v16407_v58 }
 0x3fa   :  { %3459 = vmatprep.subr.bf16.mxu0 %v16412_v59  ;;  %3500 = vmatprep.subr.bf16.mxu1 %v16414_v60 }
 0x3fd   :  { %3460 = vmatpush1.bf16.msra.mxu0 %v16416_v61  ;;  %3501 = vmatpush1.bf16.msra.mxu1 %v16418_v62 }
 0x3fe   :  { %3461 = vmatprep.subr.bf16.mxu0 %v16424_v63  ;;  %3502 = vmatprep.subr.bf16.mxu1 %v16426_v32 }
 0x401   :  { %3462 = vmatpush1.bf16.msra.mxu0 %v16428_v27  ;;  %3503 = vmatpush1.bf16.msra.mxu1 %v16430_v33 }
 0x402   :  { %3463 = vmatprep.subr.bf16.mxu0 %v16436_v1  ;;  %3504 = vmatprep.subr.bf16.mxu1 %v16438_v3 }
 0x405   :  { %3464 = vmatpush1.bf16.msra.mxu0 %v16440_v38  ;;  %3505 = vmatpush1.bf16.msra.mxu1 %v16442_v5 }
 0x406   :  { %3743 = vmatprep.subr.bf16.mxu0 %v16448_v6  ;;  %3784 = vmatprep.subr.bf16.mxu1 %v16450_v9 }
 0x492   :  { %v2835_v10 = vpop.f32.mrb[32].mxu0  ;;  %v2876_v11 = vpop.f32.mrb[32].mxu1 }
 0x493   :  { %v2887_v18 = vrot.slane %v2835_v10, 5  ;;  %v2837_v20 = vpop.f32.mrb[33].mxu0  ;;  %v2878_v21 = vpop.f32.mrb[33].mxu1  ;;  %v2889_v31 = vrot.slane %v2876_v11, 5 }
 0x494   :  { %v2888_v26 = vrot.slane %v2837_v20, 5  ;;  %v2839_v34 = vpop.f32.mrb[34].mxu0  ;;  %v2880_v36 = vpop.f32.mrb[34].mxu1  ;;  %v2890_v41 = vrot.slane %v2878_v21, 5  ;;  %v3215_v21 = vrot.slane %v16307_v19, 7 }
 0x495   :  { %v2895_v25 = vadd.f32 %v2887_v18, %v16008_v28  ;;  %v2840_v12 = vpop.f32.mrb[35].mxu0  ;;  %v2881_v7 = vpop.f32.mrb[35].mxu1  ;;  %v2897_v17 = vadd.f32 %v2889_v31, %v16022_v48 }
 0x496   :  { %v2896_v0 = vadd.f32 %v2888_v26, %v16010_v29  ;;  %v2898_v24 = vadd.f32 %v2890_v41, %v16018_v45 }
 0x497   :  { %v12848_v22 = vmul.f32 -1.442695, %v2895_v25 }
 0x498   :  { %v12849_v39 = vmul.f32 -1.442695, %v2896_v0  ;;  %v12850_v30 = vmul.f32 -1.442695, %v2898_v24 }
 0x499   :  { %15095 = vpow2.f32 %v12848_v22 }
 0x49a   :  { %15097 = vpow2.f32 %v12849_v39 }
 0x49b   :  { %15099 = vpow2.f32 %v12850_v30 }
 0x49c   :  { %15101 = vtanh.f32 %v2897_v17 }
 0x4a3   :  { %v15096_v10 = vpop.eup %15095 }
 0x4a4   :  { %v15098_v20 = vpop.eup %15097  ;;  %v3198_v34 = vadd.f32 1.0, %v15096_v10 }
 0x4a5   :  { %v3204_v18 = vadd.f32 1.0, %v15098_v20  ;;  %v15100_v26 = vpop.eup %15099 }
 0x4a6   :  { %15103 = vrcp.f32 %v3198_v34  ;;  %v15102_v36 = vpop.eup %15101  ;;  %v3211_v0 = vadd.f32 1.0, %v15100_v26 }
 0x4a7   :  { %15105 = vrcp.f32 %v3204_v18 }
 0x4a8   :  { %15107 = vrcp.f32 %v3211_v0 }
 0x4b0   :  { %v15104_v25 = vpop.eup %15103 }
 0x4b1   :  { %v15106_v12 = vpop.eup %15105  ;;  %v3218_v7 = vmul.f32 %v15104_v25, %v15102_v36 }
 0x4b2   :  { %v3217_v11 = vmul.f32 %v15106_v12, %v3215_v21  ;;  %v15108_v36 = vpop.eup %15107 }
 0x4b4   :  { %v16459_v22 = vadd.f32 %v3218_v7, %v3217_v11 }
 0x4b6   :  { %15109 = vtanh.f32 %v16459_v22 }
 0x4ba   :  { %v3131_v39 = vpop.f32.mrb[36].mxu0  ;;  %v3172_v41 = vpop.f32.mrb[36].mxu1 }
 0x4bb   :  { %v3183_v24 = vrot.slane %v3131_v39, 4  ;;  %v3133_v31 = vpop.f32.mrb[37].mxu0  ;;  %v3174_v30 = vpop.f32.mrb[37].mxu1 }
 0x4bc   :  { %v3184_v17 = vrot.slane %v3133_v31, 4  ;;  %v3135_v10 = vpop.f32.mrb[38].mxu0  ;;  %v3176_v20 = vpop.f32.mrb[38].mxu1  ;;  %v3186_v7 = vrot.slane %v3174_v30, 4  ;;  %v3185_v31 = vrot.slane %v3172_v41, 4 }
 0x4bd   :  { %v3191_v34 = vadd.f32 %v3183_v24, %v16032_v4  ;;  %v3136_v19 = vpop.f32.mrb[39].mxu0  ;;  %v3177_v18 = vpop.f32.mrb[39].mxu1  ;;  %v16465_v20 = vld [vmem:[#allocation10 + $0x100] ss:$16 sps:$4 sm:$0xff]   ;;  %v16467_v24 = vld [vmem:[#allocation10 + $0x108] ss:$16 sps:$4 sm:$0xff]  }
 0x4be   :  { %v3192_v26 = vadd.f32 %v3184_v17, %v16034_v8  ;;  %v3194_v39 = vadd.f32 %v3186_v7, %v16041_v16  ;;  %v16469_v17 = vld [vmem:[#allocation10 + $0x124] ss:$16 sps:$4 sm:$0xff]   ;;  %v3193_v30 = vadd.f32 %v3185_v31, %v16046_v35  ;;  %v16476_v41 = vld [vmem:[#allocation10 + $0x120] ss:$16 sps:$4 sm:$0xff]  }
 0x4bf   :  { %v12851_v25 = vmul.f32 -1.442695, %v3191_v34  ;;  %v16471_v34 = vld [vmem:[#allocation10 + $0x12c] ss:$16 sps:$4 sm:$0xff]   ;;  %18470 = vst [vmem:[#allocation26_spill] sm:$0xff] %v16476_v41 }
 0x4c0   :  { %v15110_v21 = vpop.eup %15109  ;;  %v12852_v12 = vmul.f32 -1.442695, %v3192_v26  ;;  %18469 = vst [vmem:[#allocation25_spill] sm:$0xff] %v16471_v34  ;;  %v12853_v18 = vmul.f32 -1.442695, %v3194_v39 }
 0x4c1   :  { %15111 = vpow2.f32 %v12851_v25  ;;  %v3221_v0 = vmul.f32 %v15110_v21, %v15108_v36  ;;  %v16478_v26 = vld [vmem:[#allocation10 + $0x128] ss:$16 sps:$4 sm:$0xff]   ;;  %v16482_v25 = vld [vmem:[#allocation10 + $0x144] ss:$16 sps:$4 sm:$0xff]   ;;  %v16484_v21 = vld [vmem:[#allocation10 + $0x14c] ss:$16 sps:$4 sm:$0xff]  }
 0x4c2   :  { %15113 = vpow2.f32 %v12852_v12  ;;  %18471 = vst [vmem:[#allocation27_spill] sm:$0xff] %v16478_v26  ;;  %18472 = vst [vmem:[#allocation28_spill] sm:$0xff] %v16482_v25  ;;  %v16492_v39 = vld [vmem:[#allocation10 + $0x148] ss:$16 sps:$4 sm:$0xff]   ;;  %v16496_v31 = vld [vmem:[#allocation10 + $0x164] ss:$16 sps:$4 sm:$0xff]  }
 0x4c3   :  { %3249 = vst [vmem:[#allocation2] sm:$0x8] %v3221_v0  ;;  %v3251_v11 = vpack.c.bf16 %v3221_v0, %v3221_v0  ;;  %18473 = vst [vmem:[#allocation29_spill] sm:$0xff] %v16484_v21  ;;  %15115 = vpow2.f32 %v12853_v18  ;;  %v16504_v18 = vld [vmem:[#allocation10 + $0x168] ss:$16 sps:$4 sm:$0xff]  }
 0x4c4   :  { %15117 = vtanh.f32 %v3193_v30  ;;  %18475 = vst [vmem:[#allocation31_spill] sm:$0xff] %v16492_v39  ;;  %18476 = vst [vmem:[#allocation32_spill] sm:$0xff] %v16496_v31  ;;  %v16508_v30 = vld [vmem:[#allocation10 + $0x184] ss:$16 sps:$4 sm:$0xff]  }
 0x4c5   :  { %v3285_v10 = vshrl.u32 %v3251_v11, 16  ;;  %v16490_v11 = vld [vmem:[#allocation10 + $0x140] ss:$16 sps:$4 sm:$0xff]   ;;  %18479 = vst [vmem:[#allocation35_spill] sm:$0xff] %v16504_v18  ;;  %18480 = vst [vmem:[#allocation36_spill] sm:$0xff] %v16508_v30 }
 0x4c6   :  { %18474 = vst [vmem:[#allocation30_spill] sm:$0xff] %v16490_v11 }
 0x4c7   :  { %v3287_v19 = vrot.slane %v3285_v10, 1  ;;  %v16498_v10 = vld [vmem:[#allocation10 + $0x16c] ss:$16 sps:$4 sm:$0xff]  }
 0x4c8   :  { %18477 = vst [vmem:[#allocation33_spill] sm:$0xff] %v16498_v10 }
 0x4c9   :  { %3482 = vmatmul.mubr.bf16.vlgmr.msra.gmra.mrb[40].mxu0 %v3287_v19  ;;  %3523 = vmatmul.mubr.bf16.vlgmr.msra.gmra.mrb[40].mxu1 %v3287_v19  ;;  %v16502_v19 = vld [vmem:[#allocation10 + $0x160] ss:$16 sps:$4 sm:$0xff]  }
 0x4ca   :  { %3744 = vmatpush1.bf16.msra.mxu0 %v16465_v20  ;;  %3785 = vmatpush1.bf16.msra.mxu1 %v16467_v24  ;;  %18478 = vst [vmem:[#allocation34_spill] sm:$0xff] %v16502_v19 }
 0x4cb   :  { %v15112_v36 = vpop.eup %15111  ;;  %3745 = vmatprep.subr.bf16.mxu0 %v16469_v17  ;;  %3786 = vmatprep.subr.bf16.mxu1 %v16471_v34  ;;  %v16535_v34 = vld [vmem:[#allocation10 + $0x1cc] ss:$16 sps:$4 sm:$0xff]  }
 0x4cc   :  { %v15114_v12 = vpop.eup %15113  ;;  %v3225_v7 = vadd.f32 1.0, %v15112_v36  ;;  %3775 = vmatprep.mubr.bf16.mxu0 %v18441_v37  ;;  %3816 = vmatprep.mubr.bf16.mxu1 %v18441_v37  ;;  %v16510_v36 = vld [vmem:[#allocation10 + $0x18c] ss:$16 sps:$4 sm:$0xff]   ;;  %18482 = vst [vmem:[#allocation38_spill] sm:$0xff] %v16535_v34 }
 0x4cd   :  { %v3231_v0 = vadd.f32 1.0, %v15114_v12  ;;  %18481 = vst [vmem:[#allocation37_spill] sm:$0xff] %v16510_v36  ;;  %v15116_v12 = vpop.eup %15115 }
 0x4ce   :  { %15119 = vrcp.f32 %v3225_v7  ;;  %3746 = vmatpush1.bf16.msra.mxu0 %v16476_v41  ;;  %3787 = vmatpush1.bf16.msra.mxu1 %v16478_v26  ;;  %v16514_v7 = vld [vmem:[#allocation10 + $0x180] ss:$16 sps:$4 sm:$0xff]   ;;  %v3238_v26 = vadd.f32 1.0, %v15116_v12 }
 0x4cf   :  { %15121 = vrcp.f32 %v3231_v0  ;;  %3747 = vmatprep.subr.bf16.mxu0 %v16482_v25  ;;  %3788 = vmatprep.subr.bf16.mxu1 %v16484_v21  ;;  %v16516_v0 = vld [vmem:[#allocation10 + $0x188] ss:$16 sps:$4 sm:$0xff]   ;;  %v3242_v21 = vrot.slane %v16337_v42, 1  ;;  %v16527_v41 = vld [vmem:[#allocation10 + $0x1a0] ss:$16 sps:$4 sm:$0xff]  }
 0x4d0   :  { %15123 = vrcp.f32 %v3238_v26  ;;  %v16554_v26 = vld [vmem:[#allocation10 + $0x1e0] ss:$16 sps:$4 sm:$0xff]  }
 0x4d2   :  { %3748 = vmatpush1.bf16.msra.mxu0 %v16490_v11  ;;  %3789 = vmatpush1.bf16.msra.mxu1 %v16492_v39  ;;  %v15118_v39 = vpop.eup %15117 }
 0x4d3   :  { %3749 = vmatprep.subr.bf16.mxu0 %v16496_v31  ;;  %3790 = vmatprep.subr.bf16.mxu1 %v16498_v10  ;;  %v16520_v31 = vld [vmem:[#allocation10 + $0x1a4] ss:$16 sps:$4 sm:$0xff]   ;;  %v16522_v10 = vld [vmem:[#allocation10 + $0x1ac] ss:$16 sps:$4 sm:$0xff]  }
 0x4d6   :  { %3750 = vmatpush1.bf16.msra.mxu0 %v16502_v19  ;;  %3791 = vmatpush1.bf16.msra.mxu1 %v16504_v18 }
 0x4d7   :  { %3751 = vmatprep.subr.bf16.mxu0 %v16508_v30  ;;  %3792 = vmatprep.subr.bf16.mxu1 %v16510_v36  ;;  %v16529_v30 = vld [vmem:[#allocation10 + $0x1a8] ss:$16 sps:$4 sm:$0xff]   ;;  %v16533_v36 = vld [vmem:[#allocation10 + $0x1c4] ss:$16 sps:$4 sm:$0xff]  }
 0x4d8   :  { %v15120_v11 = vpop.eup %15119 }
 0x4d9   :  { %v15122_v25 = vpop.eup %15121  ;;  %v3245_v19 = vmul.f32 %v15120_v11, %v15118_v39  ;;  %v16548_v11 = vld [vmem:[#allocation10 + $0x1e4] ss:$16 sps:$4 sm:$0xff]   ;;  %v16550_v39 = vld [vmem:[#allocation10 + $0x1ec] ss:$16 sps:$4 sm:$0xff]  }
 0x4da   :  { %v3244_v18 = vmul.f32 %v15122_v25, %v3242_v21  ;;  %3752 = vmatpush1.bf16.msra.mxu0 %v16514_v7  ;;  %3793 = vmatpush1.bf16.msra.mxu1 %v16516_v0  ;;  %v16541_v25 = vld [vmem:[#allocation10 + $0x1c0] ss:$16 sps:$4 sm:$0xff]   ;;  %v16543_v21 = vld [vmem:[#allocation10 + $0x1c8] ss:$16 sps:$4 sm:$0xff]  }
 0x4db   :  { %3753 = vmatprep.subr.bf16.mxu0 %v16520_v31  ;;  %3794 = vmatprep.subr.bf16.mxu1 %v16522_v10  ;;  %18483 = vst [vmem:[#allocation39_spill] sm:$0xff] %v16541_v25  ;;  %18484 = vst [vmem:[#allocation40_spill] sm:$0xff] %v16543_v21 }
 0x4dc   :  { %v16537_v42 = vadd.f32 %v3245_v19, %v3244_v18  ;;  %v16556_v19 = vld [vmem:[#allocation10 + $0x1e8] ss:$16 sps:$4 sm:$0xff]   ;;  %v15124_v18 = vpop.eup %15123 }
 0x4de   :  { %3754 = vmatpush1.bf16.msra.mxu0 %v16527_v41  ;;  %3795 = vmatpush1.bf16.msra.mxu1 %v16529_v30  ;;  %15125 = vtanh.f32 %v16537_v42 }
 0x4df   :  { %3755 = vmatprep.subr.bf16.mxu0 %v16533_v36  ;;  %3796 = vmatprep.subr.bf16.mxu1 %v16535_v34 }
 0x4e2   :  { %3756 = vmatpush1.bf16.msra.mxu0 %v16541_v25  ;;  %3797 = vmatpush1.bf16.msra.mxu1 %v16543_v21 }
 0x4e3   :  { %3757 = vmatprep.subr.bf16.mxu0 %v16548_v11  ;;  %3798 = vmatprep.subr.bf16.mxu1 %v16550_v39 }
 0x4e6   :  { %3758 = vmatpush1.bf16.msra.mxu0 %v16554_v26  ;;  %3799 = vmatpush1.bf16.msra.mxu1 %v16556_v19 }
 0x4e7   :  { %4093 = vmatprep.subr.bf16.mxu0 %v16352_v23  ;;  %4134 = vmatprep.subr.bf16.mxu1 %v16354_v40 }
 0x4e8   :  { %v15126_v12 = vpop.eup %15125 }
 0x4e9   :  { %v3248_v25 = vmul.f32 %v15126_v12, %v15124_v18 }
 0x4eb   :  { %3250 = vst [vmem:[#allocation3] sm:$0x10] %v3248_v25  ;;  %v3547_v21 = vpack.c.bf16 %v3248_v25, %v3248_v25 }
 0x4ed   :  { %v3581_v34 = vrot.slane %v3547_v21, 2 }
 0x4ef   :  { %3776 = vmatmul.mubr.bf16.vlgmr.msra.gmra.mrb[44].mxu0 %v3581_v34  ;;  %3817 = vmatmul.mubr.bf16.vlgmr.msra.gmra.mrb[44].mxu1 %v3581_v34 }
 0x4f0   :  { %4094 = vmatpush1.bf16.msra.mxu0 %v16356_v2  ;;  %4135 = vmatpush1.bf16.msra.mxu1 %v16358_v14 }
 0x4f1   :  { %4095 = vmatprep.subr.bf16.mxu0 %v16364_v13  ;;  %4136 = vmatprep.subr.bf16.mxu1 %v16366_v43 }
 0x4f2   :  { %4125 = vmatprep.mubr.bf16.mxu0 %v18441_v37  ;;  %4166 = vmatprep.mubr.bf16.mxu1 %v18441_v37 }
 0x4f4   :  { %4096 = vmatpush1.bf16.msra.mxu0 %v16368_v44  ;;  %4137 = vmatpush1.bf16.msra.mxu1 %v16370_v46 }
 0x4f5   :  { %4097 = vmatprep.subr.bf16.mxu0 %v16376_v47  ;;  %4138 = vmatprep.subr.bf16.mxu1 %v16378_v15 }
 0x4f8   :  { %4098 = vmatpush1.bf16.msra.mxu0 %v16380_v49  ;;  %4139 = vmatpush1.bf16.msra.mxu1 %v16382_v50 }
 0x4f9   :  { %4099 = vmatprep.subr.bf16.mxu0 %v16390_v52  ;;  %4140 = vmatprep.subr.bf16.mxu1 %v16394_v54 }
 0x4fc   :  { %4100 = vmatpush1.bf16.msra.mxu0 %v16388_v51  ;;  %4141 = vmatpush1.bf16.msra.mxu1 %v16392_v53 }
 0x4fd   :  { %4101 = vmatprep.subr.bf16.mxu0 %v16396_v55  ;;  %4142 = vmatprep.subr.bf16.mxu1 %v16399_v56 }
 0x500   :  { %4102 = vmatpush1.bf16.msra.mxu0 %v16403_v57  ;;  %4143 = vmatpush1.bf16.msra.mxu1 %v16407_v58 }
 0x501   :  { %4103 = vmatprep.subr.bf16.mxu0 %v16412_v59  ;;  %4144 = vmatprep.subr.bf16.mxu1 %v16414_v60 }
 0x504   :  { %4104 = vmatpush1.bf16.msra.mxu0 %v16416_v61  ;;  %4145 = vmatpush1.bf16.msra.mxu1 %v16418_v62 }
 0x505   :  { %4105 = vmatprep.subr.bf16.mxu0 %v16424_v63  ;;  %4146 = vmatprep.subr.bf16.mxu1 %v16426_v32 }
 0x508   :  { %4106 = vmatpush1.bf16.msra.mxu0 %v16428_v27  ;;  %4147 = vmatpush1.bf16.msra.mxu1 %v16430_v33  ;;  %v3861_v27 = vrot.slane %v16459_v22, 7 }
 0x509   :  { %4107 = vmatprep.subr.bf16.mxu0 %v16436_v1  ;;  %4148 = vmatprep.subr.bf16.mxu1 %v16438_v3 }
 0x50c   :  { %4108 = vmatpush1.bf16.msra.mxu0 %v16440_v38  ;;  %4149 = vmatpush1.bf16.msra.mxu1 %v16442_v5 }
 0x50d   :  { %4389 = vmatprep.subr.bf16.mxu0 %v16448_v6  ;;  %4430 = vmatprep.subr.bf16.mxu1 %v16450_v9 }
 0x59c   :  { %v3483_v23 = vpop.f32.mrb[40].mxu0  ;;  %v3524_v40 = vpop.f32.mrb[40].mxu1 }
 0x59d   :  { %v3535_v2 = vrot.slane %v3483_v23, 4  ;;  %v3485_v14 = vpop.f32.mrb[41].mxu0  ;;  %v3526_v13 = vpop.f32.mrb[41].mxu1  ;;  %v3537_v55 = vrot.slane %v3524_v40, 4 }
 0x59e   :  { %v3536_v43 = vrot.slane %v3485_v14, 4  ;;  %v3487_v44 = vpop.f32.mrb[42].mxu0  ;;  %v3528_v46 = vpop.f32.mrb[42].mxu1  ;;  %v3538_v53 = vrot.slane %v3526_v13, 4 }
 0x59f   :  { %v3543_v47 = vadd.f32 %v3535_v2, %v16008_v28  ;;  %v3488_v15 = vpop.f32.mrb[43].mxu0  ;;  %v3529_v49 = vpop.f32.mrb[43].mxu1  ;;  %v3545_v57 = vadd.f32 %v3537_v55, %v16022_v48 }
 0x5a0   :  { %v3544_v50 = vadd.f32 %v3536_v43, %v16010_v29  ;;  %v3546_v54 = vadd.f32 %v3538_v53, %v16018_v45 }
 0x5a1   :  { %v12918_v51 = vmul.f32 -1.442695, %v3543_v47 }
 0x5a2   :  { %v12919_v52 = vmul.f32 -1.442695, %v3544_v50  ;;  %v12920_v56 = vmul.f32 -1.442695, %v3546_v54 }
 0x5a3   :  { %15127 = vpow2.f32 %v12918_v51 }
 0x5a4   :  { %15129 = vpow2.f32 %v12919_v52 }
 0x5a5   :  { %15131 = vpow2.f32 %v12920_v56  ;;  %v18485_v56 = vld [vmem:[#allocation25_spill] sm:$0xff] }
 0x5a6   :  { %15133 = vtanh.f32 %v3545_v57 }
 0x5ad   :  { %v15128_v58 = vpop.eup %15127 }
 0x5ae   :  { %v15130_v59 = vpop.eup %15129  ;;  %v3844_v60 = vadd.f32 1.0, %v15128_v58 }
 0x5af   :  { %v3850_v61 = vadd.f32 1.0, %v15130_v59  ;;  %v15132_v62 = vpop.eup %15131 }
 0x5b0   :  { %15135 = vrcp.f32 %v3844_v60  ;;  %v15134_v63 = vpop.eup %15133  ;;  %v3857_v3 = vadd.f32 1.0, %v15132_v62  ;;  %v18486_v60 = vld [vmem:[#allocation26_spill] sm:$0xff]  ;;  %v18491_v62 = vld [vmem:[#allocation31_spill] sm:$0xff] }
 0x5b1   :  { %15137 = vrcp.f32 %v3850_v61  ;;  %v18490_v61 = vld [vmem:[#allocation30_spill] sm:$0xff] }
 0x5b2   :  { %15139 = vrcp.f32 %v3857_v3 }
 0x5ba   :  { %v15136_v32 = vpop.eup %15135 }
 0x5bb   :  { %v15138_v33 = vpop.eup %15137  ;;  %v3864_v1 = vmul.f32 %v15136_v32, %v15134_v63  ;;  %v18492_v63 = vld [vmem:[#allocation32_spill] sm:$0xff]  ;;  %v18493_v32 = vld [vmem:[#allocation33_spill] sm:$0xff] }
 0x5bc   :  { %v3863_v38 = vmul.f32 %v15138_v33, %v3861_v27  ;;  %v15140_v46 = vpop.eup %15139  ;;  %v18494_v33 = vld [vmem:[#allocation34_spill] sm:$0xff] }
 0x5be   :  { %v16603_v5 = vadd.f32 %v3864_v1, %v3863_v38  ;;  %v18495_v1 = vld [vmem:[#allocation35_spill] sm:$0xff]  ;;  %v18496_v38 = vld [vmem:[#allocation36_spill] sm:$0xff] }
 0x5c0   :  { %15141 = vtanh.f32 %v16603_v5 }
 0x5c2   :  { %v3777_v6 = vpop.f32.mrb[44].mxu0  ;;  %v3818_v9 = vpop.f32.mrb[44].mxu1 }
 0x5c3   :  { %v3829_v34 = vrot.slane %v3777_v6, 5  ;;  %v3779_v25 = vpop.f32.mrb[45].mxu0  ;;  %v3820_v21 = vpop.f32.mrb[45].mxu1  ;;  %v3831_v50 = vrot.slane %v3818_v9, 5  ;;  %v18497_v6 = vld [vmem:[#allocation37_spill] sm:$0xff] }
 0x5c4   :  { %v3830_v18 = vrot.slane %v3779_v25, 5  ;;  %v3781_v12 = vpop.f32.mrb[46].mxu0  ;;  %v3822_v23 = vpop.f32.mrb[46].mxu1  ;;  %v3832_v44 = vrot.slane %v3820_v21, 5 }
 0x5c5   :  { %v3837_v40 = vadd.f32 %v3829_v34, %v16032_v4  ;;  %v3782_v22 = vpop.f32.mrb[47].mxu0  ;;  %v3823_v2 = vpop.f32.mrb[47].mxu1  ;;  %v3839_v54 = vadd.f32 %v3831_v50, %v16046_v35  ;;  %v3888_v34 = vrot.slane %v16537_v42, 1  ;;  %v18498_v42 = vld [vmem:[#allocation38_spill] sm:$0xff] }
 0x5c6   :  { %v3838_v14 = vadd.f32 %v3830_v18, %v16034_v8  ;;  %v3840_v49 = vadd.f32 %v3832_v44, %v16041_v16  ;;  %v16660_v22 = vld [vmem:[#allocation10 + $0x24] ss:$16 sps:$4 sm:$0xff]   ;;  %v16662_v2 = vld [vmem:[#allocation10 + $0x2c] ss:$16 sps:$4 sm:$0xff]   ;;  %v16688_v50 = vld [vmem:[#allocation10 + $0x68] ss:$16 sps:$4 sm:$0xff]  }
 0x5c7   :  { %v12921_v13 = vmul.f32 -1.442695, %v3837_v40  ;;  %v16674_v44 = vld [vmem:[#allocation10 + $0x4c] ss:$16 sps:$4 sm:$0xff]  }
 0x5c8   :  { %v12922_v43 = vmul.f32 -1.442695, %v3838_v14  ;;  %v12923_v53 = vmul.f32 -1.442695, %v3840_v49  ;;  %v16664_v14 = vld [vmem:[#allocation10 + $0x20] ss:$16 sps:$4 sm:$0xff]  }
 0x5c9   :  { %15143 = vpow2.f32 %v12921_v13  ;;  %v16666_v13 = vld [vmem:[#allocation10 + $0x28] ss:$16 sps:$4 sm:$0xff]   ;;  %v16686_v49 = vld [vmem:[#allocation10 + $0x64] ss:$16 sps:$4 sm:$0xff]  }
 0x5ca   :  { %v15142_v47 = vpop.eup %15141  ;;  %15145 = vpow2.f32 %v12922_v43  ;;  %v16672_v43 = vld [vmem:[#allocation10 + $0x44] ss:$16 sps:$4 sm:$0xff]  }
 0x5cb   :  { %v3867_v15 = vmul.f32 %v15142_v47, %v15140_v46  ;;  %15147 = vpow2.f32 %v12923_v53  ;;  %v16676_v46 = vld [vmem:[#allocation10 + $0x40] ss:$16 sps:$4 sm:$0xff]   ;;  %v16678_v47 = vld [vmem:[#allocation10 + $0x48] ss:$16 sps:$4 sm:$0xff]   ;;  %v16695_v53 = vld [vmem:[#allocation10 + $0x8c] ss:$16 sps:$4 sm:$0xff]  }
 0x5cc   :  { %15149 = vtanh.f32 %v3839_v54  ;;  %v16699_v54 = vld [vmem:[#allocation10 + $0x80] ss:$16 sps:$4 sm:$0xff]  }
 0x5cd   :  { %3895 = vst [vmem:[#allocation2] sm:$0x10] %v3867_v15  ;;  %v3897_v51 = vpack.c.bf16 %v3867_v15, %v3867_v15  ;;  %v16684_v15 = vld [vmem:[#allocation10 + $0x60] ss:$16 sps:$4 sm:$0xff]  }
 0x5cf   :  { %v3931_v52 = vrot.slane %v3897_v51, 2  ;;  %v16690_v51 = vld [vmem:[#allocation10 + $0x6c] ss:$16 sps:$4 sm:$0xff]  }
 0x5d1   :  { %4126 = vmatmul.mubr.bf16.vlgmr.msra.gmra.mrb[48].mxu0 %v3931_v52  ;;  %4167 = vmatmul.mubr.bf16.vlgmr.msra.gmra.mrb[48].mxu1 %v3931_v52  ;;  %v16692_v52 = vld [vmem:[#allocation10 + $0x84] ss:$16 sps:$4 sm:$0xff]  }
 0x5d2   :  { %4390 = vmatpush1.bf16.msra.mxu0 %v16465_v20  ;;  %4431 = vmatpush1.bf16.msra.mxu1 %v16467_v24  ;;  %v18487_v20 = vld [vmem:[#allocation27_spill] sm:$0xff]  ;;  %v18488_v24 = vld [vmem:[#allocation28_spill] sm:$0xff] }
 0x5d3   :  { %v15144_v55 = vpop.eup %15143  ;;  %4391 = vmatprep.subr.bf16.mxu0 %v16469_v17  ;;  %4432 = vmatprep.subr.bf16.mxu1 %v18485_v56  ;;  %v18489_v17 = vld [vmem:[#allocation29_spill] sm:$0xff] }
 0x5d4   :  { %v15146_v57 = vpop.eup %15145  ;;  %v3871_v58 = vadd.f32 1.0, %v15144_v55  ;;  %4421 = vmatprep.mubr.bf16.mxu0 %v18441_v37  ;;  %4462 = vmatprep.mubr.bf16.mxu1 %v18441_v37  ;;  %v16703_v55 = vld [vmem:[#allocation10 + $0x88] ss:$16 sps:$4 sm:$0xff]   ;;  %v16708_v56 = vld [vmem:[#allocation10 + $0xa4] ss:$16 sps:$4 sm:$0xff]  }
 0x5d5   :  { %v3877_v59 = vadd.f32 1.0, %v15146_v57  ;;  %v15148_v27 = vpop.eup %15147  ;;  %v16710_v57 = vld [vmem:[#allocation10 + $0xac] ss:$16 sps:$4 sm:$0xff]  }
 0x5d6   :  { %15151 = vrcp.f32 %v3871_v58  ;;  %4392 = vmatpush1.bf16.msra.mxu0 %v18486_v60  ;;  %4433 = vmatpush1.bf16.msra.mxu1 %v18487_v20  ;;  %v15150_v3 = vpop.eup %15149  ;;  %v3884_v18 = vadd.f32 1.0, %v15148_v27  ;;  %v16712_v58 = vld [vmem:[#allocation10 + $0xa0] ss:$16 sps:$4 sm:$0xff]   ;;  %v16720_v60 = vld [vmem:[#allocation10 + $0xc4] ss:$16 sps:$4 sm:$0xff]  }
 0x5d7   :  { %15153 = vrcp.f32 %v3877_v59  ;;  %4393 = vmatprep.subr.bf16.mxu0 %v18488_v24  ;;  %4434 = vmatprep.subr.bf16.mxu1 %v18489_v17  ;;  %v16714_v59 = vld [vmem:[#allocation10 + $0xa8] ss:$16 sps:$4 sm:$0xff]   ;;  %v16722_v20 = vld [vmem:[#allocation10 + $0xcc] ss:$16 sps:$4 sm:$0xff]   ;;  %v16724_v24 = vld [vmem:[#allocation10 + $0xc0] ss:$16 sps:$4 sm:$0xff]  }
 0x5d8   :  { %15155 = vrcp.f32 %v3884_v18  ;;  %v16726_v17 = vld [vmem:[#allocation10 + $0xc8] ss:$16 sps:$4 sm:$0xff]   ;;  %v16744_v27 = vld [vmem:[#allocation10 + $0x104] ss:$16 sps:$4 sm:$0xff]  }
 0x5da   :  { %4394 = vmatpush1.bf16.msra.mxu0 %v18490_v61  ;;  %4435 = vmatpush1.bf16.msra.mxu1 %v18491_v62  ;;  %v16732_v61 = vld [vmem:[#allocation10 + $0xe4] ss:$16 sps:$4 sm:$0xff]   ;;  %v16734_v62 = vld [vmem:[#allocation10 + $0xec] ss:$16 sps:$4 sm:$0xff]  }
 0x5db   :  { %4395 = vmatprep.subr.bf16.mxu0 %v18492_v63  ;;  %4436 = vmatprep.subr.bf16.mxu1 %v18493_v32  ;;  %v16736_v63 = vld [vmem:[#allocation10 + $0xe0] ss:$16 sps:$4 sm:$0xff]   ;;  %v16738_v32 = vld [vmem:[#allocation10 + $0xe8] ss:$16 sps:$4 sm:$0xff]  }
 0x5de   :  { %4396 = vmatpush1.bf16.msra.mxu0 %v18494_v33  ;;  %4437 = vmatpush1.bf16.msra.mxu1 %v18495_v1  ;;  %v16746_v33 = vld [vmem:[#allocation10 + $0x10c] ss:$16 sps:$4 sm:$0xff]  }
 0x5df   :  { %4397 = vmatprep.subr.bf16.mxu0 %v18496_v38  ;;  %4438 = vmatprep.subr.bf16.mxu1 %v18497_v6 }
 0x5e0   :  { %v15152_v9 = vpop.eup %15151 }
 0x5e1   :  { %v15154_v25 = vpop.eup %15153  ;;  %v3891_v21 = vmul.f32 %v15152_v9, %v15150_v3 }
 0x5e2   :  { %v3890_v12 = vmul.f32 %v15154_v25, %v3888_v34  ;;  %4398 = vmatpush1.bf16.msra.mxu0 %v16514_v7  ;;  %4439 = vmatpush1.bf16.msra.mxu1 %v16516_v0  ;;  %v18499_v7 = vld [vmem:[#allocation39_spill] sm:$0xff]  ;;  %v18500_v0 = vld [vmem:[#allocation40_spill] sm:$0xff] }
 0x5e3   :  { %4399 = vmatprep.subr.bf16.mxu0 %v16520_v31  ;;  %4440 = vmatprep.subr.bf16.mxu1 %v16522_v10 }
 0x5e4   :  { %v16633_v23 = vadd.f32 %v3891_v21, %v3890_v12 }
 0x5e6   :  { %4400 = vmatpush1.bf16.msra.mxu0 %v16527_v41  ;;  %4441 = vmatpush1.bf16.msra.mxu1 %v16529_v30  ;;  %15157 = vtanh.f32 %v16633_v23  ;;  %v15156_v41 = vpop.eup %15155 }
 0x5e7   :  { %4401 = vmatprep.subr.bf16.mxu0 %v16533_v36  ;;  %4442 = vmatprep.subr.bf16.mxu1 %v18498_v42 }
 0x5ea   :  { %4402 = vmatpush1.bf16.msra.mxu0 %v18499_v7  ;;  %4443 = vmatpush1.bf16.msra.mxu1 %v18500_v0 }
 0x5eb   :  { %4403 = vmatprep.subr.bf16.mxu0 %v16548_v11  ;;  %4444 = vmatprep.subr.bf16.mxu1 %v16550_v39  ;;  %v16648_v11 = vld [vmem:[#allocation10 + $0x4] ss:$16 sps:$4 sm:$0xff]   ;;  %v16650_v39 = vld [vmem:[#allocation10 + $0xc] ss:$16 sps:$4 sm:$0xff]  }
 0x5ee   :  { %4404 = vmatpush1.bf16.msra.mxu0 %v16554_v26  ;;  %4445 = vmatpush1.bf16.msra.mxu1 %v16556_v19  ;;  %v16652_v26 = vld [vmem:[#allocation10] ss:$16 sps:$4 sm:$0xff]   ;;  %v16654_v19 = vld [vmem:[#allocation10 + $0x8] ss:$16 sps:$4 sm:$0xff]  }
 0x5ef   :  { %4741 = vmatprep.subr.bf16.mxu0 %v16648_v11  ;;  %4782 = vmatprep.subr.bf16.mxu1 %v16650_v39 }
 0x5f0   :  { %v15158_v31 = vpop.eup %15157 }
 0x5f1   :  { %v3894_v10 = vmul.f32 %v15158_v31, %v15156_v41 }
 0x5f3   :  { %3896 = vst [vmem:[#allocation3] sm:$0x8] %v3894_v10  ;;  %v4191_v30 = vpack.c.bf16 %v3894_v10, %v3894_v10 }
 0x5f5   :  { %v4225_v36 = vshrl.u32 %v4191_v30, 16 }
 0x5f7   :  { %v4227_v40 = vrot.slane %v4225_v36, 1 }
 0x5f9   :  { %4422 = vmatmul.mubr.bf16.vlgmr.msra.gmra.mrb[52].mxu0 %v4227_v40  ;;  %4463 = vmatmul.mubr.bf16.vlgmr.msra.gmra.mrb[52].mxu1 %v4227_v40 }
 0x5fa   :  { %4773 = vmatprep.mubr.bf16.mxu0 %v18441_v37  ;;  %4814 = vmatprep.mubr.bf16.mxu1 %v18441_v37 }
 0x5fb   :  { %4742 = vmatpush1.bf16.msra.mxu0 %v16652_v26  ;;  %4783 = vmatpush1.bf16.msra.mxu1 %v16654_v19 }
 0x5fc   :  { %4743 = vmatprep.subr.bf16.mxu0 %v16660_v22  ;;  %4784 = vmatprep.subr.bf16.mxu1 %v16662_v2 }
 0x5ff   :  { %4744 = vmatpush1.bf16.msra.mxu0 %v16664_v14  ;;  %4785 = vmatpush1.bf16.msra.mxu1 %v16666_v13 }
 0x600   :  { %4745 = vmatprep.subr.bf16.mxu0 %v16672_v43  ;;  %4786 = vmatprep.subr.bf16.mxu1 %v16674_v44 }
 0x603   :  { %4746 = vmatpush1.bf16.msra.mxu0 %v16676_v46  ;;  %4787 = vmatpush1.bf16.msra.mxu1 %v16678_v47 }
 0x604   :  { %4747 = vmatprep.subr.bf16.mxu0 %v16686_v49  ;;  %4788 = vmatprep.subr.bf16.mxu1 %v16690_v51 }
 0x607   :  { %4748 = vmatpush1.bf16.msra.mxu0 %v16684_v15  ;;  %4789 = vmatpush1.bf16.msra.mxu1 %v16688_v50 }
 0x608   :  { %4749 = vmatprep.subr.bf16.mxu0 %v16692_v52  ;;  %4790 = vmatprep.subr.bf16.mxu1 %v16695_v53 }
 0x60b   :  { %4750 = vmatpush1.bf16.msra.mxu0 %v16699_v54  ;;  %4791 = vmatpush1.bf16.msra.mxu1 %v16703_v55 }
 0x60c   :  { %4751 = vmatprep.subr.bf16.mxu0 %v16708_v56  ;;  %4792 = vmatprep.subr.bf16.mxu1 %v16710_v57 }
 0x60f   :  { %4752 = vmatpush1.bf16.msra.mxu0 %v16712_v58  ;;  %4793 = vmatpush1.bf16.msra.mxu1 %v16714_v59 }
 0x610   :  { %4753 = vmatprep.subr.bf16.mxu0 %v16720_v60  ;;  %4794 = vmatprep.subr.bf16.mxu1 %v16722_v20 }
 0x613   :  { %4754 = vmatpush1.bf16.msra.mxu0 %v16724_v24  ;;  %4795 = vmatpush1.bf16.msra.mxu1 %v16726_v17 }
 0x614   :  { %4755 = vmatprep.subr.bf16.mxu0 %v16732_v61  ;;  %4796 = vmatprep.subr.bf16.mxu1 %v16734_v62 }
 0x617   :  { %4756 = vmatpush1.bf16.msra.mxu0 %v16736_v63  ;;  %4797 = vmatpush1.bf16.msra.mxu1 %v16738_v32 }
 0x618   :  { %5035 = vmatprep.subr.bf16.mxu0 %v16744_v27  ;;  %5076 = vmatprep.subr.bf16.mxu1 %v16746_v33 }
 0x6a4   :  { %v4127_v1 = vpop.f32.mrb[48].mxu0  ;;  %v4168_v3 = vpop.f32.mrb[48].mxu1 }
 0x6a5   :  { %v4179_v38 = vrot.slane %v4127_v1, 3  ;;  %v4129_v6 = vpop.f32.mrb[49].mxu0  ;;  %v4170_v9 = vpop.f32.mrb[49].mxu1  ;;  %v4181_v30 = vrot.slane %v4168_v3, 3 }
 0x6a6   :  { %v4180_v34 = vrot.slane %v4129_v6, 3  ;;  %v4131_v25 = vpop.f32.mrb[50].mxu0  ;;  %v4172_v21 = vpop.f32.mrb[50].mxu1  ;;  %v4182_v31 = vrot.slane %v4170_v9, 3  ;;  %v4507_v9 = vrot.slane %v16603_v5, 7 }
 0x6a7   :  { %v4187_v18 = vadd.f32 %v4179_v38, %v16008_v28  ;;  %v4132_v12 = vpop.f32.mrb[51].mxu0  ;;  %v4173_v42 = vpop.f32.mrb[51].mxu1  ;;  %v4189_v40 = vadd.f32 %v4181_v30, %v16022_v48 }
 0x6a8   :  { %v4188_v7 = vadd.f32 %v4180_v34, %v16010_v29  ;;  %v4190_v10 = vadd.f32 %v4182_v31, %v16018_v45 }
 0x6a9   :  { %v12988_v0 = vmul.f32 -1.442695, %v4187_v18 }
 0x6aa   :  { %v12989_v41 = vmul.f32 -1.442695, %v4188_v7  ;;  %v12990_v36 = vmul.f32 -1.442695, %v4190_v10 }
 0x6ab   :  { %15159 = vpow2.f32 %v12988_v0 }
 0x6ac   :  { %15161 = vpow2.f32 %v12989_v41 }
 0x6ad   :  { %15163 = vpow2.f32 %v12990_v36 }
 0x6ae   :  { %15165 = vtanh.f32 %v4189_v40 }
 0x6b5   :  { %v15160_v1 = vpop.eup %15159 }
 0x6b6   :  { %v15162_v6 = vpop.eup %15161  ;;  %v4490_v25 = vadd.f32 1.0, %v15160_v1 }
 0x6b7   :  { %v4496_v38 = vadd.f32 1.0, %v15162_v6  ;;  %v15164_v34 = vpop.eup %15163 }
 0x6b8   :  { %15167 = vrcp.f32 %v4490_v25  ;;  %v15166_v21 = vpop.eup %15165  ;;  %v4503_v7 = vadd.f32 1.0, %v15164_v34 }
 0x6b9   :  { %15169 = vrcp.f32 %v4496_v38 }
 0x6ba   :  { %15171 = vrcp.f32 %v4503_v7 }
 0x6c2   :  { %v15168_v18 = vpop.eup %15167 }
 0x6c3   :  { %v15170_v12 = vpop.eup %15169  ;;  %v4510_v42 = vmul.f32 %v15168_v18, %v15166_v21 }
 0x6c4   :  { %v4509_v3 = vmul.f32 %v15170_v12, %v4507_v9  ;;  %v15172_v21 = vpop.eup %15171 }
 0x6c6   :  { %v16755_v0 = vadd.f32 %v4510_v42, %v4509_v3 }
 0x6c8   :  { %15173 = vtanh.f32 %v16755_v0 }
 0x6cc   :  { %v4423_v41 = vpop.f32.mrb[52].mxu0  ;;  %v4464_v31 = vpop.f32.mrb[52].mxu1 }
 0x6cd   :  { %v4475_v10 = vrot.slane %v4423_v41, 6  ;;  %v4425_v30 = vpop.f32.mrb[53].mxu0  ;;  %v4466_v36 = vpop.f32.mrb[53].mxu1 }
 0x6ce   :  { %v4476_v40 = vrot.slane %v4425_v30, 6  ;;  %v4427_v1 = vpop.f32.mrb[54].mxu0  ;;  %v4468_v6 = vpop.f32.mrb[54].mxu1  ;;  %v4478_v42 = vrot.slane %v4466_v36, 6  ;;  %v4477_v30 = vrot.slane %v4464_v31, 6 }
 0x6cf   :  { %v4483_v25 = vadd.f32 %v4475_v10, %v16032_v4  ;;  %v4428_v5 = vpop.f32.mrb[55].mxu0  ;;  %v4469_v38 = vpop.f32.mrb[55].mxu1  ;;  %v16761_v6 = vld [vmem:[#allocation10 + $0x100] ss:$16 sps:$4 sm:$0xff]   ;;  %v16763_v10 = vld [vmem:[#allocation10 + $0x108] ss:$16 sps:$4 sm:$0xff]  }
 0x6d0   :  { %v4484_v34 = vadd.f32 %v4476_v40, %v16034_v8  ;;  %v4486_v41 = vadd.f32 %v4478_v42, %v16041_v16  ;;  %v16765_v40 = vld [vmem:[#allocation10 + $0x124] ss:$16 sps:$4 sm:$0xff]   ;;  %v4485_v36 = vadd.f32 %v4477_v30, %v16046_v35  ;;  %v16772_v31 = vld [vmem:[#allocation10 + $0x120] ss:$16 sps:$4 sm:$0xff]  }
 0x6d1   :  { %v12991_v18 = vmul.f32 -1.442695, %v4483_v25  ;;  %v16767_v25 = vld [vmem:[#allocation10 + $0x12c] ss:$16 sps:$4 sm:$0xff]   ;;  %18502 = vst [vmem:[#allocation26_spill] sm:$0xff] %v16772_v31 }
 0x6d2   :  { %v15174_v9 = vpop.eup %15173  ;;  %v12992_v12 = vmul.f32 -1.442695, %v4484_v34  ;;  %18501 = vst [vmem:[#allocation25_spill] sm:$0xff] %v16767_v25  ;;  %v12993_v38 = vmul.f32 -1.442695, %v4486_v41 }
 0x6d3   :  { %15175 = vpow2.f32 %v12991_v18  ;;  %v4513_v7 = vmul.f32 %v15174_v9, %v15172_v21  ;;  %v16774_v34 = vld [vmem:[#allocation10 + $0x128] ss:$16 sps:$4 sm:$0xff]   ;;  %v16778_v18 = vld [vmem:[#allocation10 + $0x144] ss:$16 sps:$4 sm:$0xff]   ;;  %v16780_v9 = vld [vmem:[#allocation10 + $0x14c] ss:$16 sps:$4 sm:$0xff]  }
 0x6d4   :  { %15177 = vpow2.f32 %v12992_v12  ;;  %18503 = vst [vmem:[#allocation27_spill] sm:$0xff] %v16774_v34  ;;  %18504 = vst [vmem:[#allocation28_spill] sm:$0xff] %v16778_v18  ;;  %v16788_v41 = vld [vmem:[#allocation10 + $0x148] ss:$16 sps:$4 sm:$0xff]   ;;  %v16792_v30 = vld [vmem:[#allocation10 + $0x164] ss:$16 sps:$4 sm:$0xff]  }
 0x6d5   :  { %4541 = vst [vmem:[#allocation2] sm:$0x20] %v4513_v7  ;;  %v4543_v3 = vpack.c.bf16 %v4513_v7, %v4513_v7  ;;  %18505 = vst [vmem:[#allocation29_spill] sm:$0xff] %v16780_v9  ;;  %15179 = vpow2.f32 %v12993_v38  ;;  %v16800_v38 = vld [vmem:[#allocation10 + $0x168] ss:$16 sps:$4 sm:$0xff]  }
 0x6d6   :  { %15181 = vtanh.f32 %v4485_v36  ;;  %18507 = vst [vmem:[#allocation31_spill] sm:$0xff] %v16788_v41  ;;  %18508 = vst [vmem:[#allocation32_spill] sm:$0xff] %v16792_v30  ;;  %v16804_v36 = vld [vmem:[#allocation10 + $0x184] ss:$16 sps:$4 sm:$0xff]  }
 0x6d7   :  { %v4577_v1 = vshrl.u32 %v4543_v3, 16  ;;  %v16786_v3 = vld [vmem:[#allocation10 + $0x140] ss:$16 sps:$4 sm:$0xff]   ;;  %18511 = vst [vmem:[#allocation35_spill] sm:$0xff] %v16800_v38  ;;  %18512 = vst [vmem:[#allocation36_spill] sm:$0xff] %v16804_v36 }
 0x6d8   :  { %18506 = vst [vmem:[#allocation30_spill] sm:$0xff] %v16786_v3 }
 0x6d9   :  { %v4579_v5 = vrot.slane %v4577_v1, 2  ;;  %v16794_v1 = vld [vmem:[#allocation10 + $0x16c] ss:$16 sps:$4 sm:$0xff]  }
 0x6da   :  { %18509 = vst [vmem:[#allocation33_spill] sm:$0xff] %v16794_v1 }
 0x6db   :  { %4774 = vmatmul.mubr.bf16.vlgmr.msra.gmra.mrb[56].mxu0 %v4579_v5  ;;  %4815 = vmatmul.mubr.bf16.vlgmr.msra.gmra.mrb[56].mxu1 %v4579_v5  ;;  %v16798_v5 = vld [vmem:[#allocation10 + $0x160] ss:$16 sps:$4 sm:$0xff]  }
 0x6dc   :  { %5036 = vmatpush1.bf16.msra.mxu0 %v16761_v6  ;;  %5077 = vmatpush1.bf16.msra.mxu1 %v16763_v10  ;;  %18510 = vst [vmem:[#allocation34_spill] sm:$0xff] %v16798_v5 }
 0x6dd   :  { %v15176_v21 = vpop.eup %15175  ;;  %5037 = vmatprep.subr.bf16.mxu0 %v16765_v40  ;;  %5078 = vmatprep.subr.bf16.mxu1 %v16767_v25  ;;  %v16831_v25 = vld [vmem:[#allocation10 + $0x1cc] ss:$16 sps:$4 sm:$0xff]  }
 0x6de   :  { %v15178_v12 = vpop.eup %15177  ;;  %v4517_v42 = vadd.f32 1.0, %v15176_v21  ;;  %5067 = vmatprep.mubr.bf16.mxu0 %v18441_v37  ;;  %5108 = vmatprep.mubr.bf16.mxu1 %v18441_v37  ;;  %v16806_v21 = vld [vmem:[#allocation10 + $0x18c] ss:$16 sps:$4 sm:$0xff]   ;;  %18514 = vst [vmem:[#allocation38_spill] sm:$0xff] %v16831_v25 }
 0x6df   :  { %v4523_v7 = vadd.f32 1.0, %v15178_v12  ;;  %18513 = vst [vmem:[#allocation37_spill] sm:$0xff] %v16806_v21  ;;  %v15180_v12 = vpop.eup %15179 }
 0x6e0   :  { %15183 = vrcp.f32 %v4517_v42  ;;  %5038 = vmatpush1.bf16.msra.mxu0 %v16772_v31  ;;  %5079 = vmatpush1.bf16.msra.mxu1 %v16774_v34  ;;  %v16810_v42 = vld [vmem:[#allocation10 + $0x180] ss:$16 sps:$4 sm:$0xff]   ;;  %v4530_v34 = vadd.f32 1.0, %v15180_v12 }
 0x6e1   :  { %15185 = vrcp.f32 %v4523_v7  ;;  %5039 = vmatprep.subr.bf16.mxu0 %v16778_v18  ;;  %5080 = vmatprep.subr.bf16.mxu1 %v16780_v9  ;;  %v16812_v7 = vld [vmem:[#allocation10 + $0x188] ss:$16 sps:$4 sm:$0xff]   ;;  %v4534_v9 = vrot.slane %v16633_v23, 1  ;;  %v16823_v31 = vld [vmem:[#allocation10 + $0x1a0] ss:$16 sps:$4 sm:$0xff]  }
 0x6e2   :  { %15187 = vrcp.f32 %v4530_v34  ;;  %v16850_v34 = vld [vmem:[#allocation10 + $0x1e0] ss:$16 sps:$4 sm:$0xff]  }
 0x6e4   :  { %5040 = vmatpush1.bf16.msra.mxu0 %v16786_v3  ;;  %5081 = vmatpush1.bf16.msra.mxu1 %v16788_v41  ;;  %v15182_v41 = vpop.eup %15181 }
 0x6e5   :  { %5041 = vmatprep.subr.bf16.mxu0 %v16792_v30  ;;  %5082 = vmatprep.subr.bf16.mxu1 %v16794_v1  ;;  %v16816_v30 = vld [vmem:[#allocation10 + $0x1a4] ss:$16 sps:$4 sm:$0xff]   ;;  %v16818_v1 = vld [vmem:[#allocation10 + $0x1ac] ss:$16 sps:$4 sm:$0xff]  }
 0x6e8   :  { %5042 = vmatpush1.bf16.msra.mxu0 %v16798_v5  ;;  %5083 = vmatpush1.bf16.msra.mxu1 %v16800_v38 }
 0x6e9   :  { %5043 = vmatprep.subr.bf16.mxu0 %v16804_v36  ;;  %5084 = vmatprep.subr.bf16.mxu1 %v16806_v21  ;;  %v16825_v36 = vld [vmem:[#allocation10 + $0x1a8] ss:$16 sps:$4 sm:$0xff]   ;;  %v16829_v21 = vld [vmem:[#allocation10 + $0x1c4] ss:$16 sps:$4 sm:$0xff]  }
 0x6ea   :  { %v15184_v3 = vpop.eup %15183 }
 0x6eb   :  { %v15186_v18 = vpop.eup %15185  ;;  %v4537_v5 = vmul.f32 %v15184_v3, %v15182_v41  ;;  %v16844_v3 = vld [vmem:[#allocation10 + $0x1e4] ss:$16 sps:$4 sm:$0xff]   ;;  %v16846_v41 = vld [vmem:[#allocation10 + $0x1ec] ss:$16 sps:$4 sm:$0xff]  }
 0x6ec   :  { %v4536_v38 = vmul.f32 %v15186_v18, %v4534_v9  ;;  %5044 = vmatpush1.bf16.msra.mxu0 %v16810_v42  ;;  %5085 = vmatpush1.bf16.msra.mxu1 %v16812_v7  ;;  %v16837_v18 = vld [vmem:[#allocation10 + $0x1c0] ss:$16 sps:$4 sm:$0xff]   ;;  %v16839_v9 = vld [vmem:[#allocation10 + $0x1c8] ss:$16 sps:$4 sm:$0xff]  }
 0x6ed   :  { %5045 = vmatprep.subr.bf16.mxu0 %v16816_v30  ;;  %5086 = vmatprep.subr.bf16.mxu1 %v16818_v1  ;;  %18515 = vst [vmem:[#allocation39_spill] sm:$0xff] %v16837_v18  ;;  %18516 = vst [vmem:[#allocation40_spill] sm:$0xff] %v16839_v9 }
 0x6ee   :  { %v16833_v23 = vadd.f32 %v4537_v5, %v4536_v38  ;;  %v16852_v5 = vld [vmem:[#allocation10 + $0x1e8] ss:$16 sps:$4 sm:$0xff]   ;;  %v15188_v38 = vpop.eup %15187 }
 0x6f0   :  { %5046 = vmatpush1.bf16.msra.mxu0 %v16823_v31  ;;  %5087 = vmatpush1.bf16.msra.mxu1 %v16825_v36  ;;  %15189 = vtanh.f32 %v16833_v23 }
 0x6f1   :  { %5047 = vmatprep.subr.bf16.mxu0 %v16829_v21  ;;  %5088 = vmatprep.subr.bf16.mxu1 %v16831_v25 }
 0x6f4   :  { %5048 = vmatpush1.bf16.msra.mxu0 %v16837_v18  ;;  %5089 = vmatpush1.bf16.msra.mxu1 %v16839_v9 }
 0x6f5   :  { %5049 = vmatprep.subr.bf16.mxu0 %v16844_v3  ;;  %5090 = vmatprep.subr.bf16.mxu1 %v16846_v41 }
 0x6f8   :  { %5050 = vmatpush1.bf16.msra.mxu0 %v16850_v34  ;;  %5091 = vmatpush1.bf16.msra.mxu1 %v16852_v5 }
 0x6f9   :  { %5385 = vmatprep.subr.bf16.mxu0 %v16648_v11  ;;  %5426 = vmatprep.subr.bf16.mxu1 %v16650_v39 }
 0x6fa   :  { %v15190_v12 = vpop.eup %15189 }
 0x6fb   :  { %v4540_v18 = vmul.f32 %v15190_v12, %v15188_v38 }
 0x6fd   :  { %4542 = vst [vmem:[#allocation3] sm:$0x4] %v4540_v18  ;;  %v4839_v9 = vpack.c.bf16 %v4540_v18, %v4540_v18 }
 0x6ff   :  { %v4873_v25 = vrot.slane %v4839_v9, 1 }
 0x701   :  { %5068 = vmatmul.mubr.bf16.vlgmr.msra.gmra.mrb[60].mxu0 %v4873_v25  ;;  %5109 = vmatmul.mubr.bf16.vlgmr.msra.gmra.mrb[60].mxu1 %v4873_v25 }
 0x702   :  { %5386 = vmatpush1.bf16.msra.mxu0 %v16652_v26  ;;  %5427 = vmatpush1.bf16.msra.mxu1 %v16654_v19 }
 0x703   :  { %5387 = vmatprep.subr.bf16.mxu0 %v16660_v22  ;;  %5428 = vmatprep.subr.bf16.mxu1 %v16662_v2 }
 0x704   :  { %5417 = vmatprep.mubr.bf16.mxu0 %v18441_v37  ;;  %5458 = vmatprep.mubr.bf16.mxu1 %v18441_v37 }
 0x706   :  { %5388 = vmatpush1.bf16.msra.mxu0 %v16664_v14  ;;  %5429 = vmatpush1.bf16.msra.mxu1 %v16666_v13 }
 0x707   :  { %5389 = vmatprep.subr.bf16.mxu0 %v16672_v43  ;;  %5430 = vmatprep.subr.bf16.mxu1 %v16674_v44 }
 0x70a   :  { %5390 = vmatpush1.bf16.msra.mxu0 %v16676_v46  ;;  %5431 = vmatpush1.bf16.msra.mxu1 %v16678_v47 }
 0x70b   :  { %5391 = vmatprep.subr.bf16.mxu0 %v16686_v49  ;;  %5432 = vmatprep.subr.bf16.mxu1 %v16690_v51 }
 0x70e   :  { %5392 = vmatpush1.bf16.msra.mxu0 %v16684_v15  ;;  %5433 = vmatpush1.bf16.msra.mxu1 %v16688_v50 }
 0x70f   :  { %5393 = vmatprep.subr.bf16.mxu0 %v16692_v52  ;;  %5434 = vmatprep.subr.bf16.mxu1 %v16695_v53 }
 0x712   :  { %5394 = vmatpush1.bf16.msra.mxu0 %v16699_v54  ;;  %5435 = vmatpush1.bf16.msra.mxu1 %v16703_v55 }
 0x713   :  { %5395 = vmatprep.subr.bf16.mxu0 %v16708_v56  ;;  %5436 = vmatprep.subr.bf16.mxu1 %v16710_v57 }
 0x716   :  { %5396 = vmatpush1.bf16.msra.mxu0 %v16712_v58  ;;  %5437 = vmatpush1.bf16.msra.mxu1 %v16714_v59 }
 0x717   :  { %5397 = vmatprep.subr.bf16.mxu0 %v16720_v60  ;;  %5438 = vmatprep.subr.bf16.mxu1 %v16722_v20 }
 0x71a   :  { %5398 = vmatpush1.bf16.msra.mxu0 %v16724_v24  ;;  %5439 = vmatpush1.bf16.msra.mxu1 %v16726_v17  ;;  %v5153_v24 = vrot.slane %v16755_v0, 7 }
 0x71b   :  { %5399 = vmatprep.subr.bf16.mxu0 %v16732_v61  ;;  %5440 = vmatprep.subr.bf16.mxu1 %v16734_v62 }
 0x71e   :  { %5400 = vmatpush1.bf16.msra.mxu0 %v16736_v63  ;;  %5441 = vmatpush1.bf16.msra.mxu1 %v16738_v32 }
 0x71f   :  { %5680 = vmatprep.subr.bf16.mxu0 %v16744_v27  ;;  %5721 = vmatprep.subr.bf16.mxu1 %v16746_v33 }
 0x7ae   :  { %v4775_v11 = vpop.f32.mrb[56].mxu0  ;;  %v4816_v39 = vpop.f32.mrb[56].mxu1 }
 0x7af   :  { %v4827_v26 = vrot.slane %v4775_v11, 2  ;;  %v4777_v19 = vpop.f32.mrb[57].mxu0  ;;  %v4818_v22 = vpop.f32.mrb[57].mxu1  ;;  %v4829_v52 = vrot.slane %v4816_v39, 2 }
 0x7b0   :  { %v4828_v2 = vrot.slane %v4777_v19, 2  ;;  %v4779_v14 = vpop.f32.mrb[58].mxu0  ;;  %v4820_v13 = vpop.f32.mrb[58].mxu1  ;;  %v4830_v50 = vrot.slane %v4818_v22, 2 }
 0x7b1   :  { %v4835_v43 = vadd.f32 %v4827_v26, %v16008_v28  ;;  %v4780_v44 = vpop.f32.mrb[59].mxu0  ;;  %v4821_v46 = vpop.f32.mrb[59].mxu1  ;;  %v4837_v54 = vadd.f32 %v4829_v52, %v16022_v48 }
 0x7b2   :  { %v4836_v47 = vadd.f32 %v4828_v2, %v16010_v29  ;;  %v4838_v51 = vadd.f32 %v4830_v50, %v16018_v45 }
 0x7b3   :  { %v13058_v15 = vmul.f32 -1.442695, %v4835_v43 }
 0x7b4   :  { %v13059_v49 = vmul.f32 -1.442695, %v4836_v47  ;;  %v13060_v53 = vmul.f32 -1.442695, %v4838_v51 }
 0x7b5   :  { %15191 = vpow2.f32 %v13058_v15 }
 0x7b6   :  { %15193 = vpow2.f32 %v13059_v49 }
 0x7b7   :  { %15195 = vpow2.f32 %v13060_v53  ;;  %v18517_v53 = vld [vmem:[#allocation25_spill] sm:$0xff] }
 0x7b8   :  { %15197 = vtanh.f32 %v4837_v54 }
 0x7bf   :  { %v15192_v55 = vpop.eup %15191 }
 0x7c0   :  { %v15194_v56 = vpop.eup %15193  ;;  %v5136_v57 = vadd.f32 1.0, %v15192_v55 }
 0x7c1   :  { %v5142_v58 = vadd.f32 1.0, %v15194_v56  ;;  %v15196_v59 = vpop.eup %15195 }
 0x7c2   :  { %15199 = vrcp.f32 %v5136_v57  ;;  %v15198_v60 = vpop.eup %15197  ;;  %v5149_v62 = vadd.f32 1.0, %v15196_v59  ;;  %v18518_v57 = vld [vmem:[#allocation26_spill] sm:$0xff]  ;;  %v18523_v59 = vld [vmem:[#allocation31_spill] sm:$0xff] }
 0x7c3   :  { %15201 = vrcp.f32 %v5142_v58  ;;  %v18522_v58 = vld [vmem:[#allocation30_spill] sm:$0xff] }
 0x7c4   :  { %15203 = vrcp.f32 %v5149_v62 }
 0x7cc   :  { %v15200_v20 = vpop.eup %15199 }
 0x7cd   :  { %v15202_v17 = vpop.eup %15201  ;;  %v5156_v61 = vmul.f32 %v15200_v20, %v15198_v60  ;;  %v18524_v60 = vld [vmem:[#allocation32_spill] sm:$0xff]  ;;  %v18525_v20 = vld [vmem:[#allocation33_spill] sm:$0xff] }
 0x7ce   :  { %v5155_v63 = vmul.f32 %v15202_v17, %v5153_v24  ;;  %v15204_v13 = vpop.eup %15203  ;;  %v18526_v17 = vld [vmem:[#allocation34_spill] sm:$0xff] }
 0x7d0   :  { %v16899_v32 = vadd.f32 %v5156_v61, %v5155_v63  ;;  %v18527_v61 = vld [vmem:[#allocation35_spill] sm:$0xff]  ;;  %v18528_v63 = vld [vmem:[#allocation36_spill] sm:$0xff] }
 0x7d2   :  { %15205 = vtanh.f32 %v16899_v32 }
 0x7d4   :  { %v5069_v27 = vpop.f32.mrb[60].mxu0  ;;  %v5110_v33 = vpop.f32.mrb[60].mxu1 }
 0x7d5   :  { %v5121_v25 = vrot.slane %v5069_v27, 7  ;;  %v5071_v18 = vpop.f32.mrb[61].mxu0  ;;  %v5112_v9 = vpop.f32.mrb[61].mxu1  ;;  %v5123_v47 = vrot.slane %v5110_v33, 7  ;;  %v18529_v27 = vld [vmem:[#allocation37_spill] sm:$0xff] }
 0x7d6   :  { %v5122_v38 = vrot.slane %v5071_v18, 7  ;;  %v5073_v12 = vpop.f32.mrb[62].mxu0  ;;  %v5114_v11 = vpop.f32.mrb[62].mxu1  ;;  %v5124_v14 = vrot.slane %v5112_v9, 7 }
 0x7d7   :  { %v5129_v39 = vadd.f32 %v5121_v25, %v16032_v4  ;;  %v5074_v0 = vpop.f32.mrb[63].mxu0  ;;  %v5115_v26 = vpop.f32.mrb[63].mxu1  ;;  %v5131_v51 = vadd.f32 %v5123_v47, %v16046_v35  ;;  %v5180_v25 = vrot.slane %v16833_v23, 1  ;;  %v18530_v23 = vld [vmem:[#allocation38_spill] sm:$0xff] }
 0x7d8   :  { %v5130_v19 = vadd.f32 %v5122_v38, %v16034_v8  ;;  %v5132_v46 = vadd.f32 %v5124_v14, %v16041_v16  ;;  %v14396_v0 = vld [vmem:[#allocation12 + $0xc] ss:$16 sps:$4 sm:$0xff]   ;;  %v14391_v26 = vld [vmem:[#allocation12] ss:$16 sps:$4 sm:$0xff]   ;;  %v14412_v47 = vld [vmem:[#allocation12 + $0x68] ss:$16 sps:$4 sm:$0xff]  }
 0x7d9   :  { %v13061_v22 = vmul.f32 -1.442695, %v5129_v39  ;;  %v14393_v39 = vld [vmem:[#allocation12 + $0x4] ss:$16 sps:$4 sm:$0xff]   ;;  %v14403_v14 = vld [vmem:[#allocation12 + $0x40] ss:$16 sps:$4 sm:$0xff]  }
 0x7da   :  { %v13062_v2 = vmul.f32 -1.442695, %v5130_v19  ;;  %v13063_v50 = vmul.f32 -1.442695, %v5132_v46  ;;  %v14394_v19 = vld [vmem:[#allocation12 + $0x8] ss:$16 sps:$4 sm:$0xff]  }
 0x7db   :  { %15207 = vpow2.f32 %v13061_v22  ;;  %v14405_v22 = vld [vmem:[#allocation12 + $0x44] ss:$16 sps:$4 sm:$0xff]   ;;  %v14409_v46 = vld [vmem:[#allocation12 + $0x60] ss:$16 sps:$4 sm:$0xff]  }
 0x7dc   :  { %v15206_v43 = vpop.eup %15205  ;;  %15209 = vpow2.f32 %v13062_v2  ;;  %v14408_v2 = vld [vmem:[#allocation12 + $0x4c] ss:$16 sps:$4 sm:$0xff]  }
 0x7dd   :  { %v5159_v44 = vmul.f32 %v15206_v43, %v15204_v13  ;;  %15211 = vpow2.f32 %v13063_v50  ;;  %v14406_v13 = vld [vmem:[#allocation12 + $0x48] ss:$16 sps:$4 sm:$0xff]   ;;  %v14411_v43 = vld [vmem:[#allocation12 + $0x64] ss:$16 sps:$4 sm:$0xff]   ;;  %v14415_v50 = vld [vmem:[#allocation12 + $0x80] ss:$16 sps:$4 sm:$0xff]  }
 0x7de   :  { %15213 = vtanh.f32 %v5131_v51  ;;  %v14418_v51 = vld [vmem:[#allocation12 + $0x88] ss:$16 sps:$4 sm:$0xff]  }
 0x7df   :  { %5187 = vst [vmem:[#allocation2] sm:$0x40] %v5159_v44  ;;  %v5189_v15 = vpack.c.bf16 %v5159_v44, %v5159_v44  ;;  %v14414_v44 = vld [vmem:[#allocation12 + $0x6c] ss:$16 sps:$4 sm:$0xff]  }
 0x7e1   :  { %v5223_v49 = vrot.slane %v5189_v15, 3  ;;  %v14417_v15 = vld [vmem:[#allocation12 + $0x84] ss:$16 sps:$4 sm:$0xff]  }
 0x7e3   :  { %5418 = vmatmul.mubr.bf16.vlgmr.msra.gmra.mrb[64].mxu0 %v5223_v49  ;;  %5459 = vmatmul.mubr.bf16.vlgmr.msra.gmra.mrb[64].mxu1 %v5223_v49  ;;  %v14420_v49 = vld [vmem:[#allocation12 + $0x8c] ss:$16 sps:$4 sm:$0xff]  }
 0x7e4   :  { %5681 = vmatpush1.bf16.msra.mxu0 %v16761_v6  ;;  %5722 = vmatpush1.bf16.msra.mxu1 %v16763_v10  ;;  %v18519_v6 = vld [vmem:[#allocation27_spill] sm:$0xff]  ;;  %v18520_v10 = vld [vmem:[#allocation28_spill] sm:$0xff] }
 0x7e5   :  { %v15208_v52 = vpop.eup %15207  ;;  %5682 = vmatprep.subr.bf16.mxu0 %v16765_v40  ;;  %5723 = vmatprep.subr.bf16.mxu1 %v18517_v53  ;;  %v18521_v40 = vld [vmem:[#allocation29_spill] sm:$0xff]  ;;  %v14426_v53 = vld [vmem:[#allocation12 + $0xac] ss:$16 sps:$4 sm:$0xff]  }
 0x7e6   :  { %v15210_v54 = vpop.eup %15209  ;;  %v5163_v55 = vadd.f32 1.0, %v15208_v52  ;;  %5712 = vmatprep.mubr.bf16.mxu0 %v18441_v37  ;;  %5753 = vmatprep.mubr.bf16.mxu1 %v18441_v37  ;;  %v14423_v52 = vld [vmem:[#allocation12 + $0xa4] ss:$16 sps:$4 sm:$0xff]  }
 0x7e7   :  { %v5169_v56 = vadd.f32 1.0, %v15210_v54  ;;  %v15212_v24 = vpop.eup %15211  ;;  %v14421_v54 = vld [vmem:[#allocation12 + $0xa0] ss:$16 sps:$4 sm:$0xff]  }
 0x7e8   :  { %15215 = vrcp.f32 %v5163_v55  ;;  %5683 = vmatpush1.bf16.msra.mxu0 %v18518_v57  ;;  %5724 = vmatpush1.bf16.msra.mxu1 %v18519_v6  ;;  %v15214_v62 = vpop.eup %15213  ;;  %v5176_v38 = vadd.f32 1.0, %v15212_v24  ;;  %v14424_v55 = vld [vmem:[#allocation12 + $0xa8] ss:$16 sps:$4 sm:$0xff]   ;;  %v14432_v57 = vld [vmem:[#allocation12 + $0xcc] ss:$16 sps:$4 sm:$0xff]  }
 0x7e9   :  { %15217 = vrcp.f32 %v5169_v56  ;;  %5684 = vmatprep.subr.bf16.mxu0 %v18520_v10  ;;  %5725 = vmatprep.subr.bf16.mxu1 %v18521_v40  ;;  %v14429_v56 = vld [vmem:[#allocation12 + $0xc4] ss:$16 sps:$4 sm:$0xff]   ;;  %v14427_v6 = vld [vmem:[#allocation12 + $0xc0] ss:$16 sps:$4 sm:$0xff]   ;;  %v14430_v10 = vld [vmem:[#allocation12 + $0xc8] ss:$16 sps:$4 sm:$0xff]  }
 0x7ea   :  { %15219 = vrcp.f32 %v5176_v38  ;;  %v14435_v40 = vld [vmem:[#allocation12 + $0xe4] ss:$16 sps:$4 sm:$0xff]   ;;  %v14444_v24 = vld [vmem:[#allocation12 + $0x10c] ss:$16 sps:$4 sm:$0xff]   ;;  %v14454_v38 = vld [vmem:[#allocation12 + $0x148] ss:$16 sps:$4 sm:$0xff]  }
 0x7ec   :  { %5685 = vmatpush1.bf16.msra.mxu0 %v18522_v58  ;;  %5726 = vmatpush1.bf16.msra.mxu1 %v18523_v59  ;;  %v14438_v58 = vld [vmem:[#allocation12 + $0xec] ss:$16 sps:$4 sm:$0xff]   ;;  %v14433_v59 = vld [vmem:[#allocation12 + $0xe0] ss:$16 sps:$4 sm:$0xff]  }
 0x7ed   :  { %5686 = vmatprep.subr.bf16.mxu0 %v18524_v60  ;;  %5727 = vmatprep.subr.bf16.mxu1 %v18525_v20  ;;  %v14436_v60 = vld [vmem:[#allocation12 + $0xe8] ss:$16 sps:$4 sm:$0xff]   ;;  %v14441_v20 = vld [vmem:[#allocation12 + $0x104] ss:$16 sps:$4 sm:$0xff]  }
 0x7f0   :  { %5687 = vmatpush1.bf16.msra.mxu0 %v18526_v17  ;;  %5728 = vmatpush1.bf16.msra.mxu1 %v18527_v61  ;;  %v14439_v17 = vld [vmem:[#allocation12 + $0x100] ss:$16 sps:$4 sm:$0xff]   ;;  %v14442_v61 = vld [vmem:[#allocation12 + $0x108] ss:$16 sps:$4 sm:$0xff]  }
 0x7f1   :  { %5688 = vmatprep.subr.bf16.mxu0 %v18528_v63  ;;  %5729 = vmatprep.subr.bf16.mxu1 %v18529_v27  ;;  %v14450_v63 = vld [vmem:[#allocation12 + $0x12c] ss:$16 sps:$4 sm:$0xff]   ;;  %v14445_v27 = vld [vmem:[#allocation12 + $0x120] ss:$16 sps:$4 sm:$0xff]  }
 0x7f2   :  { %v15216_v33 = vpop.eup %15215 }
 0x7f3   :  { %v15218_v18 = vpop.eup %15217  ;;  %v5183_v9 = vmul.f32 %v15216_v33, %v15214_v62  ;;  %v14447_v62 = vld [vmem:[#allocation12 + $0x124] ss:$16 sps:$4 sm:$0xff]   ;;  %v14448_v33 = vld [vmem:[#allocation12 + $0x128] ss:$16 sps:$4 sm:$0xff]  }
 0x7f4   :  { %v5182_v12 = vmul.f32 %v15218_v18, %v5180_v25  ;;  %5689 = vmatpush1.bf16.msra.mxu0 %v16810_v42  ;;  %5730 = vmatpush1.bf16.msra.mxu1 %v16812_v7  ;;  %v18531_v42 = vld [vmem:[#allocation39_spill] sm:$0xff]  ;;  %v18532_v7 = vld [vmem:[#allocation40_spill] sm:$0xff] }
 0x7f5   :  { %5690 = vmatprep.subr.bf16.mxu0 %v16816_v30  ;;  %5731 = vmatprep.subr.bf16.mxu1 %v16818_v1  ;;  %v14453_v25 = vld [vmem:[#allocation12 + $0x144] ss:$16 sps:$4 sm:$0xff]   ;;  %v14456_v18 = vld [vmem:[#allocation12 + $0x14c] ss:$16 sps:$4 sm:$0xff]  }
 0x7f6   :  { %v16929_v11 = vadd.f32 %v5183_v9, %v5182_v12  ;;  %v14451_v9 = vld [vmem:[#allocation12 + $0x140] ss:$16 sps:$4 sm:$0xff]   ;;  %v14459_v12 = vld [vmem:[#allocation12 + $0x164] ss:$16 sps:$4 sm:$0xff]  }
 0x7f8   :  { %5691 = vmatpush1.bf16.msra.mxu0 %v16823_v31  ;;  %5732 = vmatpush1.bf16.msra.mxu1 %v16825_v36  ;;  %15221 = vtanh.f32 %v16929_v11  ;;  %v15220_v31 = vpop.eup %15219 }
 0x7f9   :  { %5692 = vmatprep.subr.bf16.mxu0 %v16829_v21  ;;  %5733 = vmatprep.subr.bf16.mxu1 %v18530_v23  ;;  %v14462_v23 = vld [vmem:[#allocation12 + $0x16c] ss:$16 sps:$4 sm:$0xff]  }
 0x7fc   :  { %5693 = vmatpush1.bf16.msra.mxu0 %v18531_v42  ;;  %5734 = vmatpush1.bf16.msra.mxu1 %v18532_v7  ;;  %v14457_v42 = vld [vmem:[#allocation12 + $0x160] ss:$16 sps:$4 sm:$0xff]   ;;  %v14460_v7 = vld [vmem:[#allocation12 + $0x168] ss:$16 sps:$4 sm:$0xff]  }
 0x7fd   :  { %5694 = vmatprep.subr.bf16.mxu0 %v16844_v3  ;;  %5735 = vmatprep.subr.bf16.mxu1 %v16846_v41  ;;  %v14399_v3 = vld [vmem:[#allocation12 + $0x24] ss:$16 sps:$4 sm:$0xff]   ;;  %v14402_v41 = vld [vmem:[#allocation12 + $0x2c] ss:$16 sps:$4 sm:$0xff]  }
 0x800   :  { %5695 = vmatpush1.bf16.msra.mxu0 %v16850_v34  ;;  %5736 = vmatpush1.bf16.msra.mxu1 %v16852_v5  ;;  %v14397_v34 = vld [vmem:[#allocation12 + $0x20] ss:$16 sps:$4 sm:$0xff]   ;;  %v14400_v5 = vld [vmem:[#allocation12 + $0x28] ss:$16 sps:$4 sm:$0xff]  }
 0x801   :  { %6232 = vmatprep.subr.bf16.mxu0 %v14393_v39  ;;  %6273 = vmatprep.subr.bf16.mxu1 %v14396_v0  ;;  %v14474_v39 = vld [vmem:[#allocation12 + $0x1ac] ss:$16 sps:$4 sm:$0xff]   ;;  %v14469_v0 = vld [vmem:[#allocation12 + $0x1a0] ss:$16 sps:$4 sm:$0xff]  }
 0x802   :  { %v15222_v30 = vpop.eup %15221 }
 0x803   :  { %v5186_v1 = vmul.f32 %v15222_v30, %v15220_v31  ;;  %v14465_v31 = vld [vmem:[#allocation12 + $0x184] ss:$16 sps:$4 sm:$0xff]   ;;  %v14468_v30 = vld [vmem:[#allocation12 + $0x18c] ss:$16 sps:$4 sm:$0xff]  }
 0x805   :  { %5188 = vst [vmem:[#allocation3] sm:$0x2] %v5186_v1  ;;  %v5483_v36 = vpack.c.bf16 %v5186_v1, %v5186_v1  ;;  %v14463_v1 = vld [vmem:[#allocation12 + $0x180] ss:$16 sps:$4 sm:$0xff]  }
 0x807   :  { %v5517_v21 = vshrl.u32 %v5483_v36, 16  ;;  %v14466_v36 = vld [vmem:[#allocation12 + $0x188] ss:$16 sps:$4 sm:$0xff]  }
 0x809   :  { %5713 = vmatmul.mubr.bf16.vlgmr.msra.gmra.mrb[68].mxu0 %v5517_v21  ;;  %5754 = vmatmul.mubr.bf16.vlgmr.msra.gmra.mrb[68].mxu1 %v5517_v21  ;;  %v14471_v21 = vld [vmem:[#allocation12 + $0x1a4] ss:$16 sps:$4 sm:$0xff]  }
 0x80a   :  { %6233 = vmatpush1.bf16.msra.mxu0 %v14391_v26  ;;  %6274 = vmatpush1.bf16.msra.mxu1 %v14394_v19  ;;  %v14472_v26 = vld [vmem:[#allocation12 + $0x1a8] ss:$16 sps:$4 sm:$0xff]   ;;  %v14475_v19 = vld [vmem:[#allocation12 + $0x1c0] ss:$16 sps:$4 sm:$0xff]  }
 0x80b   :  { %6234 = vmatprep.subr.bf16.mxu0 %v14399_v3  ;;  %6275 = vmatprep.subr.bf16.mxu1 %v14402_v41  ;;  %v14477_v3 = vld [vmem:[#allocation12 + $0x1c4] ss:$16 sps:$4 sm:$0xff]   ;;  %v14478_v41 = vld [vmem:[#allocation12 + $0x1c8] ss:$16 sps:$4 sm:$0xff]  }
 0x80e   :  { %6235 = vmatpush1.bf16.msra.mxu0 %v14397_v34  ;;  %6276 = vmatpush1.bf16.msra.mxu1 %v14400_v5  ;;  %v14480_v34 = vld [vmem:[#allocation12 + $0x1cc] ss:$16 sps:$4 sm:$0xff]   ;;  %v14483_v5 = vld [vmem:[#allocation12 + $0x1e4] ss:$16 sps:$4 sm:$0xff]  }
 0x80f   :  { %6236 = vmatprep.subr.bf16.mxu0 %v14405_v22  ;;  %6277 = vmatprep.subr.bf16.mxu1 %v14408_v2  ;;  %v14486_v22 = vld [vmem:[#allocation12 + $0x1ec] ss:$16 sps:$4 sm:$0xff]   ;;  %v14481_v2 = vld [vmem:[#allocation12 + $0x1e0] ss:$16 sps:$4 sm:$0xff]  }
 0x812   :  { %6237 = vmatpush1.bf16.msra.mxu0 %v14403_v14  ;;  %6278 = vmatpush1.bf16.msra.mxu1 %v14406_v13  ;;  %v14484_v14 = vld [vmem:[#allocation12 + $0x1e8] ss:$16 sps:$4 sm:$0xff]   ;;  %v14489_v13 = vld [vmem:[#allocation12 + $0x204] ss:$16 sps:$4 sm:$0xff]  }
 0x813   :  { %6238 = vmatprep.subr.bf16.mxu0 %v14411_v43  ;;  %6279 = vmatprep.subr.bf16.mxu1 %v14414_v44  ;;  %v14492_v43 = vld [vmem:[#allocation12 + $0x20c] ss:$16 sps:$4 sm:$0xff]  }
 0x816   :  { %6239 = vmatpush1.bf16.msra.mxu0 %v14409_v46  ;;  %6280 = vmatpush1.bf16.msra.mxu1 %v14412_v47 }
 0x817   :  { %6240 = vmatprep.subr.bf16.mxu0 %v14417_v15  ;;  %6281 = vmatprep.subr.bf16.mxu1 %v14420_v49 }
 0x81a   :  { %6241 = vmatpush1.bf16.msra.mxu0 %v14415_v50  ;;  %6282 = vmatpush1.bf16.msra.mxu1 %v14418_v51 }
 0x81b   :  { %6242 = vmatprep.subr.bf16.mxu0 %v14423_v52  ;;  %6283 = vmatprep.subr.bf16.mxu1 %v14426_v53 }
 0x81e   :  { %6243 = vmatpush1.bf16.msra.mxu0 %v14421_v54  ;;  %6284 = vmatpush1.bf16.msra.mxu1 %v14424_v55 }
 0x81f   :  { %6244 = vmatprep.subr.bf16.mxu0 %v14429_v56  ;;  %6285 = vmatprep.subr.bf16.mxu1 %v14432_v57 }
 0x822   :  { %6245 = vmatpush1.bf16.msra.mxu0 %v14427_v6  ;;  %6286 = vmatpush1.bf16.msra.mxu1 %v14430_v10 }
 0x823   :  { %6246 = vmatprep.subr.bf16.mxu0 %v14435_v40  ;;  %6287 = vmatprep.subr.bf16.mxu1 %v14438_v58 }
 0x826   :  { %6247 = vmatpush1.bf16.msra.mxu0 %v14433_v59  ;;  %6288 = vmatpush1.bf16.msra.mxu1 %v14436_v60 }
 0x827   :  { %6248 = vmatprep.subr.bf16.mxu0 %v14441_v20  ;;  %6289 = vmatprep.subr.bf16.mxu1 %v14444_v24 }
 0x82a   :  { %6249 = vmatpush1.bf16.msra.mxu0 %v14439_v17  ;;  %6290 = vmatpush1.bf16.msra.mxu1 %v14442_v61 }
 0x82b   :  { %6250 = vmatprep.subr.bf16.mxu0 %v14447_v62  ;;  %6291 = vmatprep.subr.bf16.mxu1 %v14450_v63  ;;  %v5786_v63 = vrot.slane %v16899_v32, 7 }
 0x82e   :  { %6251 = vmatpush1.bf16.msra.mxu0 %v14445_v27  ;;  %6292 = vmatpush1.bf16.msra.mxu1 %v14448_v33 }
 0x82f   :  { %6252 = vmatprep.subr.bf16.mxu0 %v14453_v25  ;;  %6293 = vmatprep.subr.bf16.mxu1 %v14456_v18 }
 0x832   :  { %6253 = vmatpush1.bf16.msra.mxu0 %v14451_v9  ;;  %6294 = vmatpush1.bf16.msra.mxu1 %v14454_v38 }
 0x833   :  { %6254 = vmatprep.subr.bf16.mxu0 %v14459_v12  ;;  %6295 = vmatprep.subr.bf16.mxu1 %v14462_v23 }
 0x836   :  { %6255 = vmatpush1.bf16.msra.mxu0 %v14457_v42  ;;  %6296 = vmatpush1.bf16.msra.mxu1 %v14460_v7 }
 0x837   :  { %6256 = vmatprep.subr.bf16.mxu0 %v14465_v31  ;;  %6297 = vmatprep.subr.bf16.mxu1 %v14468_v30 }
 0x83a   :  { %6257 = vmatpush1.bf16.msra.mxu0 %v14463_v1  ;;  %6298 = vmatpush1.bf16.msra.mxu1 %v14466_v36 }
 0x83b   :  { %6258 = vmatprep.subr.bf16.mxu0 %v14471_v21  ;;  %6299 = vmatprep.subr.bf16.mxu1 %v14474_v39 }
 0x83e   :  { %6259 = vmatpush1.bf16.msra.mxu0 %v14469_v0  ;;  %6300 = vmatpush1.bf16.msra.mxu1 %v14472_v26 }
 0x83f   :  { %6260 = vmatprep.subr.bf16.mxu0 %v14477_v3  ;;  %6301 = vmatprep.subr.bf16.mxu1 %v14480_v34 }
 0x842   :  { %6261 = vmatpush1.bf16.msra.mxu0 %v14475_v19  ;;  %6302 = vmatpush1.bf16.msra.mxu1 %v14478_v41 }
 0x843   :  { %6262 = vmatprep.subr.bf16.mxu0 %v14483_v5  ;;  %6303 = vmatprep.subr.bf16.mxu1 %v14486_v22 }
 0x846   :  { %6263 = vmatpush1.bf16.msra.mxu0 %v14481_v2  ;;  %6304 = vmatpush1.bf16.msra.mxu1 %v14484_v14  ;;  %v5813_v14 = vrot.slane %v16929_v11, 1  ;;  %v14495_v11 = vld [vmem:[#allocation12 + $0x224] ss:$16 sps:$4 sm:$0xff]  }
 0x847   :  { %6722 = vmatprep.subr.bf16.mxu0 %v14489_v13  ;;  %6763 = vmatprep.subr.bf16.mxu1 %v14492_v43 }
 0x8b6   :  { %v5419_v44 = vpop.f32.mrb[64].mxu0  ;;  %v5460_v46 = vpop.f32.mrb[64].mxu1 }
 0x8b7   :  { %v5471_v47 = vrot.slane %v5419_v44, 1  ;;  %v5421_v15 = vpop.f32.mrb[65].mxu0  ;;  %v5462_v49 = vpop.f32.mrb[65].mxu1  ;;  %v5473_v58 = vrot.slane %v5460_v46, 1 }
 0x8b8   :  { %v5472_v50 = vrot.slane %v5421_v15, 1  ;;  %v5423_v51 = vpop.f32.mrb[66].mxu0  ;;  %v5464_v52 = vpop.f32.mrb[66].mxu1  ;;  %v5474_v10 = vrot.slane %v5462_v49, 1 }
 0x8b9   :  { %v5479_v53 = vadd.f32 %v5471_v47, %v16008_v28  ;;  %v5424_v54 = vpop.f32.mrb[67].mxu0  ;;  %v5465_v55 = vpop.f32.mrb[67].mxu1  ;;  %v5481_v60 = vadd.f32 %v5473_v58, %v16022_v48  ;;  %v14487_v52 = vld [vmem:[#allocation12 + $0x200] ss:$16 sps:$4 sm:$0xff]   ;;  %v14502_v58 = vld [vmem:[#allocation12 + $0x248] ss:$16 sps:$4 sm:$0xff]  }
 0x8ba   :  { %v5480_v56 = vadd.f32 %v5472_v50, %v16010_v29  ;;  %v5482_v40 = vadd.f32 %v5474_v10, %v16018_v45  ;;  %v14498_v55 = vld [vmem:[#allocation12 + $0x22c] ss:$16 sps:$4 sm:$0xff]  }
 0x8bb   :  { %v13128_v57 = vmul.f32 -1.442695, %v5479_v53  ;;  %v14490_v53 = vld [vmem:[#allocation12 + $0x208] ss:$16 sps:$4 sm:$0xff]   ;;  %v14504_v10 = vld [vmem:[#allocation12 + $0x24c] ss:$16 sps:$4 sm:$0xff]  }
 0x8bc   :  { %v13129_v6 = vmul.f32 -1.442695, %v5480_v56  ;;  %v13130_v59 = vmul.f32 -1.442695, %v5482_v40  ;;  %v14493_v56 = vld [vmem:[#allocation12 + $0x220] ss:$16 sps:$4 sm:$0xff]  }
 0x8bd   :  { %15223 = vpow2.f32 %v13128_v57  ;;  %v14496_v57 = vld [vmem:[#allocation12 + $0x228] ss:$16 sps:$4 sm:$0xff]   ;;  %v14499_v40 = vld [vmem:[#allocation12 + $0x240] ss:$16 sps:$4 sm:$0xff]  }
 0x8be   :  { %15225 = vpow2.f32 %v13129_v6  ;;  %v14501_v6 = vld [vmem:[#allocation12 + $0x244] ss:$16 sps:$4 sm:$0xff]  }
 0x8bf   :  { %15227 = vpow2.f32 %v13130_v59  ;;  %v14507_v59 = vld [vmem:[#allocation12 + $0x264] ss:$16 sps:$4 sm:$0xff]  }
 0x8c0   :  { %15229 = vtanh.f32 %v5481_v60  ;;  %v14510_v60 = vld [vmem:[#allocation12 + $0x26c] ss:$16 sps:$4 sm:$0xff]  }
 0x8c7   :  { %v15224_v20 = vpop.eup %15223 }
 0x8c8   :  { %v15226_v24 = vpop.eup %15225  ;;  %v5769_v17 = vadd.f32 1.0, %v15224_v20  ;;  %v14505_v20 = vld [vmem:[#allocation12 + $0x260] ss:$16 sps:$4 sm:$0xff]  }
 0x8c9   :  { %v5775_v28 = vadd.f32 1.0, %v15226_v24  ;;  %v15228_v29 = vpop.eup %15227  ;;  %v14508_v24 = vld [vmem:[#allocation12 + $0x268] ss:$16 sps:$4 sm:$0xff]  }
 0x8ca   :  { %15231 = vrcp.f32 %v5769_v17  ;;  %v15230_v61 = vpop.eup %15229  ;;  %v5782_v45 = vadd.f32 1.0, %v15228_v29  ;;  %v14513_v17 = vld [vmem:[#allocation12 + $0x284] ss:$16 sps:$4 sm:$0xff]   ;;  %v14511_v29 = vld [vmem:[#allocation12 + $0x280] ss:$16 sps:$4 sm:$0xff]  }
 0x8cb   :  { %15233 = vrcp.f32 %v5775_v28  ;;  %v14516_v28 = vld [vmem:[#allocation12 + $0x28c] ss:$16 sps:$4 sm:$0xff]  }
 0x8cc   :  { %15235 = vrcp.f32 %v5782_v45  ;;  %v14525_v45 = vld [vmem:[#allocation12 + $0x2c4] ss:$16 sps:$4 sm:$0xff]  }
 0x8d4   :  { %v15232_v62 = vpop.eup %15231 }
 0x8d5   :  { %v15234_v27 = vpop.eup %15233  ;;  %v5789_v33 = vmul.f32 %v15232_v62, %v15230_v61  ;;  %v14514_v61 = vld [vmem:[#allocation12 + $0x288] ss:$16 sps:$4 sm:$0xff]   ;;  %v14519_v62 = vld [vmem:[#allocation12 + $0x2a4] ss:$16 sps:$4 sm:$0xff]  }
 0x8d6   :  { %v5788_v25 = vmul.f32 %v15234_v27, %v5786_v63  ;;  %v15236_v21 = vpop.eup %15235  ;;  %v14522_v63 = vld [vmem:[#allocation12 + $0x2ac] ss:$16 sps:$4 sm:$0xff]   ;;  %v14517_v27 = vld [vmem:[#allocation12 + $0x2a0] ss:$16 sps:$4 sm:$0xff]  }
 0x8d8   :  { %v5790_v18 = vadd.f32 %v5789_v33, %v5788_v25  ;;  %v14520_v33 = vld [vmem:[#allocation12 + $0x2a8] ss:$16 sps:$4 sm:$0xff]   ;;  %v14528_v25 = vld [vmem:[#allocation12 + $0x2cc] ss:$16 sps:$4 sm:$0xff]  }
 0x8da   :  { %15237 = vtanh.f32 %v5790_v18  ;;  %v14523_v18 = vld [vmem:[#allocation12 + $0x2c0] ss:$16 sps:$4 sm:$0xff]  }
 0x8dc   :  { %v5714_v48 = vpop.f32.mrb[68].mxu0  ;;  %v5755_v9 = vpop.f32.mrb[68].mxu1 }
 0x8dd   :  { %v5762_v38 = vadd.f32 %v5714_v48, %v16032_v4  ;;  %v5716_v12 = vpop.f32.mrb[69].mxu0  ;;  %v5757_v23 = vpop.f32.mrb[69].mxu1  ;;  %v5764_v4 = vadd.f32 %v5755_v9, %v16046_v35  ;;  %v14526_v48 = vld [vmem:[#allocation12 + $0x2c8] ss:$16 sps:$4 sm:$0xff]   ;;  %v14531_v9 = vld [vmem:[#allocation12 + $0x2e4] ss:$16 sps:$4 sm:$0xff]  }
 0x8de   :  { %v5763_v42 = vadd.f32 %v5716_v12, %v16034_v8  ;;  %v5718_v7 = vpop.f32.mrb[70].mxu0  ;;  %v5759_v31 = vpop.f32.mrb[70].mxu1  ;;  %v5765_v0 = vadd.f32 %v5757_v23, %v16041_v16  ;;  %v14529_v12 = vld [vmem:[#allocation12 + $0x2e0] ss:$16 sps:$4 sm:$0xff]   ;;  %v14532_v23 = vld [vmem:[#allocation12 + $0x2e8] ss:$16 sps:$4 sm:$0xff]  }
 0x8df   :  { %v13131_v30 = vmul.f32 -1.442695, %v5762_v38  ;;  %v5719_v1 = vpop.f32.mrb[71].mxu0  ;;  %v5760_v32 = vpop.f32.mrb[71].mxu1  ;;  %v14534_v38 = vld [vmem:[#allocation12 + $0x2ec] ss:$16 sps:$4 sm:$0xff]  }
 0x8e0   :  { %v13132_v36 = vmul.f32 -1.442695, %v5763_v42  ;;  %v13133_v19 = vmul.f32 -1.442695, %v5765_v0  ;;  %v14537_v42 = vld [vmem:[#allocation12 + $0x304] ss:$16 sps:$4 sm:$0xff]  }
 0x8e1   :  { %15239 = vpow2.f32 %v13131_v30  ;;  %v14540_v7 = vld [vmem:[#allocation12 + $0x30c] ss:$16 sps:$4 sm:$0xff]   ;;  %v14535_v31 = vld [vmem:[#allocation12 + $0x300] ss:$16 sps:$4 sm:$0xff]   ;;  %v14538_v30 = vld [vmem:[#allocation12 + $0x308] ss:$16 sps:$4 sm:$0xff]  }
 0x8e2   :  { %15241 = vpow2.f32 %v13132_v36  ;;  %v14543_v1 = vld [vmem:[#allocation12 + $0x324] ss:$16 sps:$4 sm:$0xff]   ;;  %v14546_v32 = vld [vmem:[#allocation12 + $0x32c] ss:$16 sps:$4 sm:$0xff]   ;;  %v14541_v36 = vld [vmem:[#allocation12 + $0x320] ss:$16 sps:$4 sm:$0xff]  }
 0x8e3   :  { %15243 = vpow2.f32 %v13133_v19  ;;  %v14552_v0 = vld [vmem:[#allocation12 + $0x34c] ss:$16 sps:$4 sm:$0xff]   ;;  %v14550_v19 = vld [vmem:[#allocation12 + $0x348] ss:$16 sps:$4 sm:$0xff]  }
 0x8e4   :  { %v15238_v39 = vpop.eup %15237  ;;  %15245 = vtanh.f32 %v5764_v4  ;;  %v14555_v4 = vld [vmem:[#allocation12 + $0x364] ss:$16 sps:$4 sm:$0xff]  }
 0x8e5   :  { %v5792_v26 = vmul.f32 %v15238_v39, %v15236_v21  ;;  %v14544_v21 = vld [vmem:[#allocation12 + $0x328] ss:$16 sps:$4 sm:$0xff]   ;;  %v14549_v39 = vld [vmem:[#allocation12 + $0x344] ss:$16 sps:$4 sm:$0xff]  }
 0x8e7   :  { %5820 = vst [vmem:[#allocation2] sm:$0x80] %v5792_v26  ;;  %v14547_v26 = vld [vmem:[#allocation12 + $0x340] ss:$16 sps:$4 sm:$0xff]  }
 0x8eb   :  { %v15240_v3 = vpop.eup %15239 }
 0x8ec   :  { %v15242_v41 = vpop.eup %15241  ;;  %v5796_v8 = vadd.f32 1.0, %v15240_v3  ;;  %v14558_v3 = vld [vmem:[#allocation12 + $0x36c] ss:$16 sps:$4 sm:$0xff]  }
 0x8ed   :  { %v5802_v34 = vadd.f32 1.0, %v15242_v41  ;;  %v15244_v5 = vpop.eup %15243  ;;  %v14553_v41 = vld [vmem:[#allocation12 + $0x360] ss:$16 sps:$4 sm:$0xff]  }
 0x8ee   :  { %15247 = vrcp.f32 %v5796_v8  ;;  %v15246_v22 = vpop.eup %15245  ;;  %v5809_v43 = vadd.f32 1.0, %v15244_v5  ;;  %v5822_v49 = vld [vmem:[#allocation2] sm:$0xff]  ;;  %v14556_v8 = vld [vmem:[#allocation12 + $0x368] ss:$16 sps:$4 sm:$0xff]   ;;  %v14564_v5 = vld [vmem:[#allocation12 + $0x38c] ss:$16 sps:$4 sm:$0xff]  }
 0x8ef   :  { %15249 = vrcp.f32 %v5802_v34  ;;  %v16952_v54 = vpack.c.bf16 %v5822_v49, %v5822_v49  ;;  %v14561_v34 = vld [vmem:[#allocation12 + $0x384] ss:$16 sps:$4 sm:$0xff]   ;;  %v14582_v49 = vld [vmem:[#allocation12 + $0x3ec] ss:$16 sps:$4 sm:$0xff]  }
 0x8f0   :  { %15251 = vrcp.f32 %v5809_v43  ;;  %v14568_v43 = vld [vmem:[#allocation12 + $0x3a8] ss:$16 sps:$4 sm:$0xff]  }
 0x8f8   :  { %v15248_v2 = vpop.eup %15247 }
 0x8f9   :  { %v15250_v13 = vpop.eup %15249  ;;  %v5816_v16 = vmul.f32 %v15248_v2, %v15246_v22  ;;  %v14559_v22 = vld [vmem:[#allocation12 + $0x380] ss:$16 sps:$4 sm:$0xff]   ;;  %v14562_v2 = vld [vmem:[#allocation12 + $0x388] ss:$16 sps:$4 sm:$0xff]  }
 0x8fa   :  { %v5815_v44 = vmul.f32 %v15250_v13, %v5813_v14  ;;  %v15252_v35 = vpop.eup %15251  ;;  %v14567_v14 = vld [vmem:[#allocation12 + $0x3a4] ss:$16 sps:$4 sm:$0xff]   ;;  %v14570_v13 = vld [vmem:[#allocation12 + $0x3ac] ss:$16 sps:$4 sm:$0xff]  }
 0x8fc   :  { %v5817_v46 = vadd.f32 %v5816_v16, %v5815_v44  ;;  %v14565_v16 = vld [vmem:[#allocation12 + $0x3a0] ss:$16 sps:$4 sm:$0xff]   ;;  %v14573_v44 = vld [vmem:[#allocation12 + $0x3c4] ss:$16 sps:$4 sm:$0xff]  }
 0x8fe   :  { %15253 = vtanh.f32 %v5817_v46  ;;  %v14576_v46 = vld [vmem:[#allocation12 + $0x3cc] ss:$16 sps:$4 sm:$0xff]  }
 0x908   :  { %v15254_v47 = vpop.eup %15253 }
 0x909   :  { %v5819_v15 = vmul.f32 %v15254_v47, %v15252_v35  ;;  %v14571_v35 = vld [vmem:[#allocation12 + $0x3c0] ss:$16 sps:$4 sm:$0xff]   ;;  %v14574_v47 = vld [vmem:[#allocation12 + $0x3c8] ss:$16 sps:$4 sm:$0xff]  }
 0x90b   :  { %5821 = vst [vmem:[#allocation3] sm:$0x1] %v5819_v15  ;;  %v14579_v15 = vld [vmem:[#allocation12 + $0x3e4] ss:$16 sps:$4 sm:$0xff]  }
 0x912   :  { %v5823_v50 = vld [vmem:[#allocation3] sm:$0xff] }
 0x913   :  { %v5825_v51 = vpack.c.bf16 %v5823_v50, %v5823_v50  ;;  %v14577_v50 = vld [vmem:[#allocation12 + $0x3e0] ss:$16 sps:$4 sm:$0xff]  }
 0x915   :  { %6264 = vmatprep.mubr.bf16.mxu0 %v5825_v51  ;;  %6305 = vmatprep.mubr.bf16.mxu1 %v5825_v51 }
 0x916   :  { %6265 = vmatmul.mubr.bf16.vlgmr.msra.gmra.mrb[72].mxu0 %v16952_v54  ;;  %6306 = vmatmul.mubr.bf16.vlgmr.msra.gmra.mrb[72].mxu1 %v16952_v54 }
 0x917   :  { %6723 = vmatpush1.bf16.msra.mxu0 %v14487_v52  ;;  %6764 = vmatpush1.bf16.msra.mxu1 %v14490_v53  ;;  %v16956_v52 = vld [vmem:[#allocation13 + $0x4] ss:$16 sps:$4 sm:$0xff]   ;;  %v16958_v53 = vld [vmem:[#allocation13 + $0xc] ss:$16 sps:$4 sm:$0xff]  }
 0x918   :  { %6754 = vmatprep.mubr.bf16.mxu0 %v5825_v51  ;;  %6795 = vmatprep.mubr.bf16.mxu1 %v5825_v51  ;;  %v14580_v51 = vld [vmem:[#allocation12 + $0x3e8] ss:$16 sps:$4 sm:$0xff]  }
 0x919   :  { %6724 = vmatprep.subr.bf16.mxu0 %v14495_v11  ;;  %6765 = vmatprep.subr.bf16.mxu1 %v14498_v55  ;;  %v16960_v11 = vld [vmem:[#allocation13] ss:$16 sps:$4 sm:$0xff]   ;;  %v16962_v55 = vld [vmem:[#allocation13 + $0x8] ss:$16 sps:$4 sm:$0xff]  }
 0x91b   :  { %6725 = vmatpush1.bf16.msra.mxu0 %v14493_v56  ;;  %6766 = vmatpush1.bf16.msra.mxu1 %v14496_v57  ;;  %v16966_v56 = vld [vmem:[#allocation13 + $0x24] ss:$16 sps:$4 sm:$0xff]   ;;  %v16968_v57 = vld [vmem:[#allocation13 + $0x2c] ss:$16 sps:$4 sm:$0xff]  }
 0x91c   :  { %6726 = vmatprep.subr.bf16.mxu0 %v14501_v6  ;;  %6767 = vmatprep.subr.bf16.mxu1 %v14504_v10  ;;  %v16974_v6 = vld [vmem:[#allocation13 + $0x20] ss:$16 sps:$4 sm:$0xff]   ;;  %v16976_v10 = vld [vmem:[#allocation13 + $0x28] ss:$16 sps:$4 sm:$0xff]  }
 0x91f   :  { %6727 = vmatpush1.bf16.msra.mxu0 %v14499_v40  ;;  %6768 = vmatpush1.bf16.msra.mxu1 %v14502_v58  ;;  %v16980_v40 = vld [vmem:[#allocation13 + $0x44] ss:$16 sps:$4 sm:$0xff]   ;;  %v16982_v58 = vld [vmem:[#allocation13 + $0x4c] ss:$16 sps:$4 sm:$0xff]  }
 0x920   :  { %6728 = vmatprep.subr.bf16.mxu0 %v14507_v59  ;;  %6769 = vmatprep.subr.bf16.mxu1 %v14510_v60  ;;  %v16990_v59 = vld [vmem:[#allocation13 + $0x48] ss:$16 sps:$4 sm:$0xff]   ;;  %v16994_v60 = vld [vmem:[#allocation13 + $0x64] ss:$16 sps:$4 sm:$0xff]  }
 0x923   :  { %6729 = vmatpush1.bf16.msra.mxu0 %v14505_v20  ;;  %6770 = vmatpush1.bf16.msra.mxu1 %v14508_v24  ;;  %v16996_v20 = vld [vmem:[#allocation13 + $0x6c] ss:$16 sps:$4 sm:$0xff]   ;;  %v17000_v24 = vld [vmem:[#allocation13 + $0x60] ss:$16 sps:$4 sm:$0xff]  }
 0x924   :  { %6730 = vmatprep.subr.bf16.mxu0 %v14513_v17  ;;  %6771 = vmatprep.subr.bf16.mxu1 %v14516_v28  ;;  %v17002_v17 = vld [vmem:[#allocation13 + $0x68] ss:$16 sps:$4 sm:$0xff]   ;;  %v17006_v28 = vld [vmem:[#allocation13 + $0x84] ss:$16 sps:$4 sm:$0xff]  }
 0x927   :  { %6731 = vmatpush1.bf16.msra.mxu0 %v14511_v29  ;;  %6772 = vmatpush1.bf16.msra.mxu1 %v14514_v61  ;;  %v17008_v29 = vld [vmem:[#allocation13 + $0x8c] ss:$16 sps:$4 sm:$0xff]   ;;  %v17012_v61 = vld [vmem:[#allocation13 + $0x80] ss:$16 sps:$4 sm:$0xff]  }
 0x928   :  { %6732 = vmatprep.subr.bf16.mxu0 %v14519_v62  ;;  %6773 = vmatprep.subr.bf16.mxu1 %v14522_v63  ;;  %v17014_v62 = vld [vmem:[#allocation13 + $0x88] ss:$16 sps:$4 sm:$0xff]   ;;  %v17018_v63 = vld [vmem:[#allocation13 + $0xa4] ss:$16 sps:$4 sm:$0xff]  }
 0x92b   :  { %6733 = vmatpush1.bf16.msra.mxu0 %v14517_v27  ;;  %6774 = vmatpush1.bf16.msra.mxu1 %v14520_v33  ;;  %v17020_v27 = vld [vmem:[#allocation13 + $0xac] ss:$16 sps:$4 sm:$0xff]   ;;  %v17024_v33 = vld [vmem:[#allocation13 + $0xa0] ss:$16 sps:$4 sm:$0xff]  }
 0x92c   :  { %6734 = vmatprep.subr.bf16.mxu0 %v14525_v45  ;;  %6775 = vmatprep.subr.bf16.mxu1 %v14528_v25  ;;  %v17026_v45 = vld [vmem:[#allocation13 + $0xa8] ss:$16 sps:$4 sm:$0xff]   ;;  %v17030_v25 = vld [vmem:[#allocation13 + $0xc4] ss:$16 sps:$4 sm:$0xff]  }
 0x92f   :  { %6735 = vmatpush1.bf16.msra.mxu0 %v14523_v18  ;;  %6776 = vmatpush1.bf16.msra.mxu1 %v14526_v48  ;;  %v17032_v18 = vld [vmem:[#allocation13 + $0xcc] ss:$16 sps:$4 sm:$0xff]   ;;  %v17036_v48 = vld [vmem:[#allocation13 + $0xc0] ss:$16 sps:$4 sm:$0xff]  }
 0x930   :  { %6736 = vmatprep.subr.bf16.mxu0 %v14531_v9  ;;  %6777 = vmatprep.subr.bf16.mxu1 %v14534_v38  ;;  %v17038_v9 = vld [vmem:[#allocation13 + $0xc8] ss:$16 sps:$4 sm:$0xff]   ;;  %v17042_v38 = vld [vmem:[#allocation13 + $0xe4] ss:$16 sps:$4 sm:$0xff]  }
 0x933   :  { %6737 = vmatpush1.bf16.msra.mxu0 %v14529_v12  ;;  %6778 = vmatpush1.bf16.msra.mxu1 %v14532_v23  ;;  %v17044_v12 = vld [vmem:[#allocation13 + $0xec] ss:$16 sps:$4 sm:$0xff]   ;;  %v17048_v23 = vld [vmem:[#allocation13 + $0xe0] ss:$16 sps:$4 sm:$0xff]  }
 0x934   :  { %6738 = vmatprep.subr.bf16.mxu0 %v14537_v42  ;;  %6779 = vmatprep.subr.bf16.mxu1 %v14540_v7  ;;  %v17050_v42 = vld [vmem:[#allocation13 + $0xe8] ss:$16 sps:$4 sm:$0xff]   ;;  %v17054_v7 = vld [vmem:[#allocation13 + $0x104] ss:$16 sps:$4 sm:$0xff]  }
 0x937   :  { %6739 = vmatpush1.bf16.msra.mxu0 %v14535_v31  ;;  %6780 = vmatpush1.bf16.msra.mxu1 %v14538_v30  ;;  %v17056_v31 = vld [vmem:[#allocation13 + $0x10c] ss:$16 sps:$4 sm:$0xff]   ;;  %v17060_v30 = vld [vmem:[#allocation13 + $0x100] ss:$16 sps:$4 sm:$0xff]  }
 0x938   :  { %6740 = vmatprep.subr.bf16.mxu0 %v14543_v1  ;;  %6781 = vmatprep.subr.bf16.mxu1 %v14546_v32  ;;  %v17062_v1 = vld [vmem:[#allocation13 + $0x108] ss:$16 sps:$4 sm:$0xff]   ;;  %v17066_v32 = vld [vmem:[#allocation13 + $0x124] ss:$16 sps:$4 sm:$0xff]  }
 0x93b   :  { %6741 = vmatpush1.bf16.msra.mxu0 %v14541_v36  ;;  %6782 = vmatpush1.bf16.msra.mxu1 %v14544_v21  ;;  %v17068_v36 = vld [vmem:[#allocation13 + $0x12c] ss:$16 sps:$4 sm:$0xff]   ;;  %v17074_v21 = vld [vmem:[#allocation13 + $0x120] ss:$16 sps:$4 sm:$0xff]  }
 0x93c   :  { %6742 = vmatprep.subr.bf16.mxu0 %v14549_v39  ;;  %6783 = vmatprep.subr.bf16.mxu1 %v14552_v0  ;;  %v17076_v39 = vld [vmem:[#allocation13 + $0x128] ss:$16 sps:$4 sm:$0xff]   ;;  %v17080_v0 = vld [vmem:[#allocation13 + $0x144] ss:$16 sps:$4 sm:$0xff]  }
 0x93f   :  { %6743 = vmatpush1.bf16.msra.mxu0 %v14547_v26  ;;  %6784 = vmatpush1.bf16.msra.mxu1 %v14550_v19  ;;  %v17082_v26 = vld [vmem:[#allocation13 + $0x14c] ss:$16 sps:$4 sm:$0xff]   ;;  %v17088_v19 = vld [vmem:[#allocation13 + $0x140] ss:$16 sps:$4 sm:$0xff]  }
 0x940   :  { %6744 = vmatprep.subr.bf16.mxu0 %v14555_v4  ;;  %6785 = vmatprep.subr.bf16.mxu1 %v14558_v3  ;;  %v17090_v4 = vld [vmem:[#allocation13 + $0x148] ss:$16 sps:$4 sm:$0xff]   ;;  %v17094_v3 = vld [vmem:[#allocation13 + $0x164] ss:$16 sps:$4 sm:$0xff]  }
 0x943   :  { %6745 = vmatpush1.bf16.msra.mxu0 %v14553_v41  ;;  %6786 = vmatpush1.bf16.msra.mxu1 %v14556_v8  ;;  %v17096_v41 = vld [vmem:[#allocation13 + $0x16c] ss:$16 sps:$4 sm:$0xff]   ;;  %v17100_v8 = vld [vmem:[#allocation13 + $0x160] ss:$16 sps:$4 sm:$0xff]  }
 0x944   :  { %6746 = vmatprep.subr.bf16.mxu0 %v14561_v34  ;;  %6787 = vmatprep.subr.bf16.mxu1 %v14564_v5  ;;  %v17102_v34 = vld [vmem:[#allocation13 + $0x168] ss:$16 sps:$4 sm:$0xff]   ;;  %v17106_v5 = vld [vmem:[#allocation13 + $0x184] ss:$16 sps:$4 sm:$0xff]  }
 0x947   :  { %6747 = vmatpush1.bf16.msra.mxu0 %v14559_v22  ;;  %6788 = vmatpush1.bf16.msra.mxu1 %v14562_v2  ;;  %v17108_v22 = vld [vmem:[#allocation13 + $0x18c] ss:$16 sps:$4 sm:$0xff]   ;;  %v17112_v2 = vld [vmem:[#allocation13 + $0x180] ss:$16 sps:$4 sm:$0xff]  }
 0x948   :  { %6748 = vmatprep.subr.bf16.mxu0 %v14567_v14  ;;  %6789 = vmatprep.subr.bf16.mxu1 %v14570_v13  ;;  %v17114_v14 = vld [vmem:[#allocation13 + $0x188] ss:$16 sps:$4 sm:$0xff]   ;;  %v17118_v13 = vld [vmem:[#allocation13 + $0x1a4] ss:$16 sps:$4 sm:$0xff]  }
 0x94b   :  { %6749 = vmatpush1.bf16.msra.mxu0 %v14565_v16  ;;  %6790 = vmatpush1.bf16.msra.mxu1 %v14568_v43  ;;  %v17120_v16 = vld [vmem:[#allocation13 + $0x1ac] ss:$16 sps:$4 sm:$0xff]   ;;  %v17124_v43 = vld [vmem:[#allocation13 + $0x1a0] ss:$16 sps:$4 sm:$0xff]  }
 0x94c   :  { %6750 = vmatprep.subr.bf16.mxu0 %v14573_v44  ;;  %6791 = vmatprep.subr.bf16.mxu1 %v14576_v46  ;;  %18533 = vst [vmem:[#allocation25_spill] sm:$0xff] %v17124_v43  ;;  %v17126_v44 = vld [vmem:[#allocation13 + $0x1a8] ss:$16 sps:$4 sm:$0xff]   ;;  %v17130_v46 = vld [vmem:[#allocation13 + $0x1c4] ss:$16 sps:$4 sm:$0xff]  }
 0x94f   :  { %6751 = vmatpush1.bf16.msra.mxu0 %v14571_v35  ;;  %6792 = vmatpush1.bf16.msra.mxu1 %v14574_v47  ;;  %v17132_v35 = vld [vmem:[#allocation13 + $0x1cc] ss:$16 sps:$4 sm:$0xff]   ;;  %v17136_v47 = vld [vmem:[#allocation13 + $0x1c0] ss:$16 sps:$4 sm:$0xff]  }
 0x950   :  { %6752 = vmatprep.subr.bf16.mxu0 %v14579_v15  ;;  %6793 = vmatprep.subr.bf16.mxu1 %v14582_v49  ;;  %v17138_v15 = vld [vmem:[#allocation13 + $0x1c8] ss:$16 sps:$4 sm:$0xff]   ;;  %v17142_v49 = vld [vmem:[#allocation13 + $0x1e4] ss:$16 sps:$4 sm:$0xff]  }
 0x953   :  { %6753 = vmatpush1.bf16.msra.mxu0 %v14577_v50  ;;  %6794 = vmatpush1.bf16.msra.mxu1 %v14580_v51  ;;  %v17144_v50 = vld [vmem:[#allocation13 + $0x1ec] ss:$16 sps:$4 sm:$0xff]   ;;  %v17148_v51 = vld [vmem:[#allocation13 + $0x1e0] ss:$16 sps:$4 sm:$0xff]  }
 0x954   :  { %6996 = vmatprep.subr.bf16.mxu0 %v16956_v52  ;;  %7037 = vmatprep.subr.bf16.mxu1 %v16958_v53 }
 0x956   :  { %6755 = vmatmul.mubr.bf16.vlgmr.msra.gmra.mrb[76].mxu0 %v16952_v54  ;;  %6796 = vmatmul.mubr.bf16.vlgmr.msra.gmra.mrb[76].mxu1 %v16952_v54  ;;  %v16988_v54 = vld [vmem:[#allocation13 + $0x40] ss:$16 sps:$4 sm:$0xff]  }
 0x957   :  { %6997 = vmatpush1.bf16.msra.mxu0 %v16960_v11  ;;  %7038 = vmatpush1.bf16.msra.mxu1 %v16962_v55 }
 0x958   :  { %6998 = vmatprep.subr.bf16.mxu0 %v16966_v56  ;;  %7039 = vmatprep.subr.bf16.mxu1 %v16968_v57 }
 0x959   :  { %7028 = vmatprep.mubr.bf16.mxu0 %v18441_v37  ;;  %7069 = vmatprep.mubr.bf16.mxu1 %v18441_v37 }
 0x95b   :  { %6999 = vmatpush1.bf16.msra.mxu0 %v16974_v6  ;;  %7040 = vmatpush1.bf16.msra.mxu1 %v16976_v10 }
 0x95c   :  { %7000 = vmatprep.subr.bf16.mxu0 %v16980_v40  ;;  %7041 = vmatprep.subr.bf16.mxu1 %v16982_v58 }
 0x95f   :  { %7001 = vmatpush1.bf16.msra.mxu0 %v16988_v54  ;;  %7042 = vmatpush1.bf16.msra.mxu1 %v16990_v59 }
 0x960   :  { %7002 = vmatprep.subr.bf16.mxu0 %v16994_v60  ;;  %7043 = vmatprep.subr.bf16.mxu1 %v16996_v20 }
 0x963   :  { %7003 = vmatpush1.bf16.msra.mxu0 %v17000_v24  ;;  %7044 = vmatpush1.bf16.msra.mxu1 %v17002_v17 }
 0x964   :  { %7004 = vmatprep.subr.bf16.mxu0 %v17006_v28  ;;  %7045 = vmatprep.subr.bf16.mxu1 %v17008_v29 }
 0x967   :  { %7005 = vmatpush1.bf16.msra.mxu0 %v17012_v61  ;;  %7046 = vmatpush1.bf16.msra.mxu1 %v17014_v62 }
 0x968   :  { %7006 = vmatprep.subr.bf16.mxu0 %v17018_v63  ;;  %7047 = vmatprep.subr.bf16.mxu1 %v17020_v27 }
 0x96b   :  { %7007 = vmatpush1.bf16.msra.mxu0 %v17024_v33  ;;  %7048 = vmatpush1.bf16.msra.mxu1 %v17026_v45 }
 0x96c   :  { %7008 = vmatprep.subr.bf16.mxu0 %v17030_v25  ;;  %7049 = vmatprep.subr.bf16.mxu1 %v17032_v18 }
 0x96f   :  { %7009 = vmatpush1.bf16.msra.mxu0 %v17036_v48  ;;  %7050 = vmatpush1.bf16.msra.mxu1 %v17038_v9 }
 0x970   :  { %7010 = vmatprep.subr.bf16.mxu0 %v17042_v38  ;;  %7051 = vmatprep.subr.bf16.mxu1 %v17044_v12 }
 0x973   :  { %7011 = vmatpush1.bf16.msra.mxu0 %v17048_v23  ;;  %7052 = vmatpush1.bf16.msra.mxu1 %v17050_v42 }
 0x974   :  { %7275 = vmatprep.subr.bf16.mxu0 %v17054_v7  ;;  %7316 = vmatprep.subr.bf16.mxu1 %v17056_v31 }
 0x976   :  { %7029 = vmatmul.mubr.bf16.vlgmr.msra.gmra.mrb[80].mxu0 %v18441_v37  ;;  %7070 = vmatmul.mubr.bf16.vlgmr.msra.gmra.mrb[80].mxu1 %v18441_v37 }
 0x977   :  { %7276 = vmatpush1.bf16.msra.mxu0 %v17060_v30  ;;  %7317 = vmatpush1.bf16.msra.mxu1 %v17062_v1 }
 0x978   :  { %7277 = vmatprep.subr.bf16.mxu0 %v17066_v32  ;;  %7318 = vmatprep.subr.bf16.mxu1 %v17068_v36 }
 0x979   :  { %7307 = vmatprep.mubr.bf16.mxu0 %v18441_v37  ;;  %7348 = vmatprep.mubr.bf16.mxu1 %v18441_v37 }
 0x97b   :  { %7278 = vmatpush1.bf16.msra.mxu0 %v17074_v21  ;;  %7319 = vmatpush1.bf16.msra.mxu1 %v17076_v39 }
 0x97c   :  { %7279 = vmatprep.subr.bf16.mxu0 %v17080_v0  ;;  %7320 = vmatprep.subr.bf16.mxu1 %v17082_v26 }
 0x97f   :  { %7280 = vmatpush1.bf16.msra.mxu0 %v17088_v19  ;;  %7321 = vmatpush1.bf16.msra.mxu1 %v17090_v4 }
 0x980   :  { %7281 = vmatprep.subr.bf16.mxu0 %v17094_v3  ;;  %7322 = vmatprep.subr.bf16.mxu1 %v17096_v41 }
 0x983   :  { %7282 = vmatpush1.bf16.msra.mxu0 %v17100_v8  ;;  %7323 = vmatpush1.bf16.msra.mxu1 %v17102_v34 }
 0x984   :  { %7283 = vmatprep.subr.bf16.mxu0 %v17106_v5  ;;  %7324 = vmatprep.subr.bf16.mxu1 %v17108_v22 }
 0x987   :  { %7284 = vmatpush1.bf16.msra.mxu0 %v17112_v2  ;;  %7325 = vmatpush1.bf16.msra.mxu1 %v17114_v14 }
 0x988   :  { %7285 = vmatprep.subr.bf16.mxu0 %v17118_v13  ;;  %7326 = vmatprep.subr.bf16.mxu1 %v17120_v16 }
 0x98b   :  { %7286 = vmatpush1.bf16.msra.mxu0 %v17124_v43  ;;  %7327 = vmatpush1.bf16.msra.mxu1 %v17126_v44  ;;  %v17150_v43 = vld [vmem:[#allocation13 + $0x1e8] ss:$16 sps:$4 sm:$0xff]  }
 0x98c   :  { %7287 = vmatprep.subr.bf16.mxu0 %v17130_v46  ;;  %7328 = vmatprep.subr.bf16.mxu1 %v17132_v35 }
 0x98f   :  { %7288 = vmatpush1.bf16.msra.mxu0 %v17136_v47  ;;  %7329 = vmatpush1.bf16.msra.mxu1 %v17138_v15 }
 0x990   :  { %7289 = vmatprep.subr.bf16.mxu0 %v17142_v49  ;;  %7330 = vmatprep.subr.bf16.mxu1 %v17144_v50 }
 0x993   :  { %7290 = vmatpush1.bf16.msra.mxu0 %v17148_v51  ;;  %7331 = vmatpush1.bf16.msra.mxu1 %v17150_v43 }
 0x994   :  { %7616 = vmatprep.subr.bf16.mxu0 %v16956_v52  ;;  %7657 = vmatprep.subr.bf16.mxu1 %v16958_v53 }
 0x996   :  { %7308 = vmatmul.mubr.bf16.vlgmr.msra.gmra.mrb[84].mxu0 %v18441_v37  ;;  %7349 = vmatmul.mubr.bf16.vlgmr.msra.gmra.mrb[84].mxu1 %v18441_v37 }
 0x997   :  { %7617 = vmatpush1.bf16.msra.mxu0 %v16960_v11  ;;  %7658 = vmatpush1.bf16.msra.mxu1 %v16962_v55 }
 0x998   :  { %7618 = vmatprep.subr.bf16.mxu0 %v16966_v56  ;;  %7659 = vmatprep.subr.bf16.mxu1 %v16968_v57 }
 0x999   :  { %7648 = vmatprep.mubr.bf16.mxu0 %v18441_v37  ;;  %7689 = vmatprep.mubr.bf16.mxu1 %v18441_v37 }
 0x99b   :  { %7619 = vmatpush1.bf16.msra.mxu0 %v16974_v6  ;;  %7660 = vmatpush1.bf16.msra.mxu1 %v16976_v10 }
 0x99c   :  { %7620 = vmatprep.subr.bf16.mxu0 %v16980_v40  ;;  %7661 = vmatprep.subr.bf16.mxu1 %v16982_v58 }
 0x99f   :  { %7621 = vmatpush1.bf16.msra.mxu0 %v16988_v54  ;;  %7662 = vmatpush1.bf16.msra.mxu1 %v16990_v59 }
 0x9a0   :  { %7622 = vmatprep.subr.bf16.mxu0 %v16994_v60  ;;  %7663 = vmatprep.subr.bf16.mxu1 %v16996_v20 }
 0x9a3   :  { %7623 = vmatpush1.bf16.msra.mxu0 %v17000_v24  ;;  %7664 = vmatpush1.bf16.msra.mxu1 %v17002_v17 }
 0x9a4   :  { %7624 = vmatprep.subr.bf16.mxu0 %v17006_v28  ;;  %7665 = vmatprep.subr.bf16.mxu1 %v17008_v29  ;;  %v5890_v28 = vld [vmem:[%s18312_s6] sm:$0xf]  ;;  %v18534_v29 = vld [vmem:[#allocation21_spill] sm:$0xff] }
 0x9a7   :  { %7625 = vmatpush1.bf16.msra.mxu0 %v17012_v61  ;;  %7666 = vmatpush1.bf16.msra.mxu1 %v17014_v62  ;;  %v5895_v61 = vrot.slane %v5890_v28, %v18534_v29  ;;  %v18535_v62 = vld [vmem:[#allocation22_spill] sm:$0xff] }
 0x9a8   :  { %7626 = vmatprep.subr.bf16.mxu0 %v17018_v63  ;;  %7667 = vmatprep.subr.bf16.mxu1 %v17020_v27  ;;  %v5899_v63 = vrot.slane %v5890_v28, %v18535_v62 }
 0x9ab   :  { %7627 = vmatpush1.bf16.msra.mxu0 %v17024_v33  ;;  %7668 = vmatpush1.bf16.msra.mxu1 %v17026_v45 }
 0x9ac   :  { %7628 = vmatprep.subr.bf16.mxu0 %v17030_v25  ;;  %7669 = vmatprep.subr.bf16.mxu1 %v17032_v18 }
 0x9af   :  { %7629 = vmatpush1.bf16.msra.mxu0 %v17036_v48  ;;  %7670 = vmatpush1.bf16.msra.mxu1 %v17038_v9 }
 0x9b0   :  { %7630 = vmatprep.subr.bf16.mxu0 %v17042_v38  ;;  %7671 = vmatprep.subr.bf16.mxu1 %v17044_v12  ;;  %v18536_v38 = vld [vmem:[#allocation23_spill] sm:$0xff] }
 0x9b1   :  { %v5907_v12 = vrot.slane %v5890_v28, %v18536_v38 }
 0x9b3   :  { %7631 = vmatpush1.bf16.msra.mxu0 %v17048_v23  ;;  %7672 = vmatpush1.bf16.msra.mxu1 %v17050_v42 }
 0x9b4   :  { %7912 = vmatprep.subr.bf16.mxu0 %v17054_v7  ;;  %7953 = vmatprep.subr.bf16.mxu1 %v17056_v31 }
 0x9e9   :  { %v6266_v52 = vpop.f32.mrb[72].mxu0  ;;  %v6307_v53 = vpop.f32.mrb[72].mxu1 }
 0x9ea   :  { %v6268_v11 = vpop.f32.mrb[73].mxu0  ;;  %v6309_v55 = vpop.f32.mrb[73].mxu1  ;;  %v17203_v27 = vadd.f32 %v6266_v52, %v5895_v61 }
 0x9eb   :  { %v6270_v56 = vpop.f32.mrb[74].mxu0  ;;  %v6311_v57 = vpop.f32.mrb[74].mxu1  ;;  %v17205_v33 = vadd.f32 %v6268_v11, %v5899_v63  ;;  %v17210_v52 = vadd.f32 %v6309_v55, %v5907_v12  ;;  %v18537_v11 = vld [vmem:[#allocation24_spill] sm:$0xff] }
 0x9ec   :  { %v6271_v6 = vpop.f32.mrb[75].mxu0  ;;  %v6312_v10 = vpop.f32.mrb[75].mxu1 }
 0x9ed   :  { %v5903_v10 = vrot.slane %v5890_v28, %v18537_v11  ;;  %v13198_v28 = vld [vmem:[%s18312_s6 + $0x4] sm:$0xf] }
 0x9ee   :  { %v6385_v12 = vrot.slane %v13198_v28, %v18534_v29 }
 0xa29   :  { %v6756_v40 = vpop.f32.mrb[76].mxu0  ;;  %v17194_v58 = vpop.f32.mrb[76].mxu1 }
 0xa2a   :  { %v6758_v54 = vpop.f32.mrb[77].mxu0  ;;  %v17196_v59 = vpop.f32.mrb[77].mxu1 }
 0xa2b   :  { %v6760_v60 = vpop.f32.mrb[78].mxu0  ;;  %v6801_v20 = vpop.f32.mrb[78].mxu1 }
 0xa2c   :  { %v6761_v24 = vpop.f32.mrb[79].mxu0  ;;  %v6802_v17 = vpop.f32.mrb[79].mxu1  ;;  %v17214_v20 = vadd.f32 %v6307_v53, %v5903_v10 }
 0xa49   :  { %v7030_v45 = vpop.f32.mrb[80].mxu0  ;;  %v7071_v25 = vpop.f32.mrb[80].mxu1 }
 0xa4a   :  { %v7078_v18 = vadd.f32 %v7030_v45, %v17203_v27  ;;  %v7032_v48 = vpop.f32.mrb[81].mxu0  ;;  %v7073_v9 = vpop.f32.mrb[81].mxu1  ;;  %v7080_v17 = vadd.f32 %v7071_v25, %v17214_v20 }
 0xa4b   :  { %v7079_v23 = vadd.f32 %v7032_v48, %v17205_v33  ;;  %v7034_v42 = vpop.f32.mrb[82].mxu0  ;;  %v7075_v7 = vpop.f32.mrb[82].mxu1  ;;  %v7081_v60 = vadd.f32 %v7073_v9, %v17210_v52 }
 0xa4c   :  { %v13327_v31 = vmul.f32 -1.442695, %v7078_v18  ;;  %v7035_v56 = vpop.f32.mrb[83].mxu0  ;;  %v7076_v57 = vpop.f32.mrb[83].mxu1  ;;  %v6389_v42 = vrot.slane %v13198_v28, %v18535_v62 }
 0xa4d   :  { %v13328_v6 = vmul.f32 -1.442695, %v7079_v23  ;;  %v13329_v24 = vmul.f32 -1.442695, %v7081_v60 }
 0xa4e   :  { %15255 = vpow2.f32 %v13327_v31 }
 0xa4f   :  { %15257 = vpow2.f32 %v13328_v6  ;;  %v17224_v6 = vadd.f32 %v6756_v40, %v6385_v12 }
 0xa50   :  { %15259 = vpow2.f32 %v13329_v24 }
 0xa51   :  { %15261 = vtanh.f32 %v7080_v17  ;;  %v17226_v17 = vadd.f32 %v6758_v54, %v6389_v42 }
 0xa58   :  { %v15256_v61 = vpop.eup %15255 }
 0xa59   :  { %v15258_v63 = vpop.eup %15257  ;;  %v7376_v45 = vadd.f32 1.0, %v15256_v61 }
 0xa5a   :  { %v7382_v18 = vadd.f32 1.0, %v15258_v63  ;;  %v15260_v55 = vpop.eup %15259 }
 0xa5b   :  { %15263 = vrcp.f32 %v7376_v45  ;;  %v15262_v48 = vpop.eup %15261  ;;  %v7389_v25 = vadd.f32 1.0, %v15260_v55 }
 0xa5c   :  { %15265 = vrcp.f32 %v7382_v18 }
 0xa5d   :  { %15267 = vrcp.f32 %v7389_v25 }
 0xa65   :  { %v15264_v9 = vpop.eup %15263 }
 0xa66   :  { %v15266_v53 = vpop.eup %15265  ;;  %v7393_v23 = vmul.f32 %v15264_v9, %v15262_v48  ;;  %v6397_v48 = vrot.slane %v13198_v28, %v18536_v38 }
 0xa67   :  { %v7392_v7 = vmul.f32 0.0, %v15266_v53  ;;  %v15268_v42 = vpop.eup %15267 }
 0xa68   :  { %v17233_v54 = vadd.f32 %v17196_v59, %v6397_v48  ;;  %v17338_v48 = vld [vmem:[#allocation13 + $0xa4] ss:$16 sps:$4 sm:$0xff]  }
 0xa69   :  { %v17222_v31 = vadd.f32 %v7393_v23, %v7392_v7  ;;  %v7309_v56 = vpop.f32.mrb[84].mxu0  ;;  %v7350_v57 = vpop.f32.mrb[84].mxu1  ;;  %v6393_v23 = vrot.slane %v13198_v28, %v18537_v11  ;;  %v17320_v28 = vld [vmem:[#allocation13 + $0x68] ss:$16 sps:$4 sm:$0xff]  }
 0xa6a   :  { %v7361_v10 = vrot.slane %v7309_v56, 1  ;;  %v7311_v60 = vpop.f32.mrb[85].mxu0  ;;  %v7352_v24 = vpop.f32.mrb[85].mxu1  ;;  %v7363_v7 = vrot.slane %v7350_v57, 1  ;;  %v17324_v57 = vld [vmem:[#allocation13 + $0x84] ss:$16 sps:$4 sm:$0xff]  }
 0xa6b   :  { %15269 = vtanh.f32 %v17222_v31  ;;  %v7362_v61 = vrot.slane %v7311_v60, 1  ;;  %v7313_v63 = vpop.f32.mrb[86].mxu0  ;;  %v7354_v45 = vpop.f32.mrb[86].mxu1  ;;  %v7364_v12 = vrot.slane %v7352_v24, 1 }
 0xa6c   :  { %v7369_v62 = vadd.f32 %v7361_v10, %v17224_v6  ;;  %v7314_v18 = vpop.f32.mrb[87].mxu0  ;;  %v7355_v55 = vpop.f32.mrb[87].mxu1  ;;  %v17238_v10 = vadd.f32 %v17194_v58, %v6393_v23  ;;  %v17318_v58 = vld [vmem:[#allocation13 + $0x60] ss:$16 sps:$4 sm:$0xff]   ;;  %v17352_v23 = vld [vmem:[#allocation13 + $0xcc] ss:$16 sps:$4 sm:$0xff]  }
 0xa6d   :  { %v7370_v40 = vadd.f32 %v7362_v61, %v17226_v17  ;;  %v7372_v25 = vadd.f32 %v7364_v12, %v17233_v54  ;;  %v17330_v18 = vld [vmem:[#allocation13 + $0x88] ss:$16 sps:$4 sm:$0xff]   ;;  %v17332_v55 = vld [vmem:[#allocation13 + $0x8c] ss:$16 sps:$4 sm:$0xff]   ;;  %v17350_v12 = vld [vmem:[#allocation13 + $0xc4] ss:$16 sps:$4 sm:$0xff]  }
 0xa6e   :  { %v13330_v9 = vmul.f32 -1.442695, %v7369_v62  ;;  %v7371_v61 = vadd.f32 %v7363_v7, %v17238_v10  ;;  %v17328_v62 = vld [vmem:[#allocation13 + $0x80] ss:$16 sps:$4 sm:$0xff]   ;;  %v17362_v7 = vld [vmem:[#allocation13 + $0xe4] ss:$16 sps:$4 sm:$0xff]  }
 0xa6f   :  { %v13331_v53 = vmul.f32 -1.442695, %v7370_v40  ;;  %v13332_v60 = vmul.f32 -1.442695, %v7372_v25  ;;  %v17340_v40 = vld [vmem:[#allocation13 + $0xac] ss:$16 sps:$4 sm:$0xff]  }
 0xa70   :  { %15271 = vpow2.f32 %v13330_v9  ;;  %v17342_v9 = vld [vmem:[#allocation13 + $0xa0] ss:$16 sps:$4 sm:$0xff]  }
 0xa71   :  { %15273 = vpow2.f32 %v13331_v53  ;;  %v17344_v53 = vld [vmem:[#allocation13 + $0xa8] ss:$16 sps:$4 sm:$0xff]   ;;  %v17354_v25 = vld [vmem:[#allocation13 + $0xc0] ss:$16 sps:$4 sm:$0xff]  }
 0xa72   :  { %15275 = vpow2.f32 %v13332_v60  ;;  %v17368_v60 = vld [vmem:[#allocation13 + $0xe8] ss:$16 sps:$4 sm:$0xff]  }
 0xa73   :  { %15277 = vtanh.f32 %v7371_v61  ;;  %v17374_v61 = vld [vmem:[#allocation13 + $0x104] ss:$16 sps:$4 sm:$0xff]  }
 0xa75   :  { %v15270_v56 = vpop.eup %15269 }
 0xa76   :  { %v7396_v38 = vmul.f32 %v15270_v56, %v15268_v42  ;;  %v17356_v42 = vld [vmem:[#allocation13 + $0xc8] ss:$16 sps:$4 sm:$0xff]   ;;  %v17364_v56 = vld [vmem:[#allocation13 + $0xec] ss:$16 sps:$4 sm:$0xff]  }
 0xa78   :  { %7421 = vst [vmem:[#allocation4] sm:$0x1] %v7396_v38  ;;  %v7423_v24 = vpack.c.bf16 %v7396_v38, %v7396_v38  ;;  %v17366_v38 = vld [vmem:[#allocation13 + $0xe0] ss:$16 sps:$4 sm:$0xff]  }
 0xa7a   :  { %v15272_v63 = vpop.eup %15271  ;;  %7649 = vmatmul.mubr.bf16.vlgmr.msra.gmra.mrb[88].mxu0 %v7423_v24  ;;  %7690 = vmatmul.mubr.bf16.vlgmr.msra.gmra.mrb[88].mxu1 %v7423_v24  ;;  %v17376_v24 = vld [vmem:[#allocation13 + $0x10c] ss:$16 sps:$4 sm:$0xff]  }
 0xa7b   :  { %v15274_v59 = vpop.eup %15273  ;;  %v7400_v45 = vadd.f32 1.0, %v15272_v63  ;;  %7913 = vmatpush1.bf16.msra.mxu0 %v17060_v30  ;;  %7954 = vmatpush1.bf16.msra.mxu1 %v17062_v1 }
 0xa7c   :  { %v7406_v11 = vadd.f32 1.0, %v15274_v59  ;;  %7914 = vmatprep.subr.bf16.mxu0 %v17066_v32  ;;  %7955 = vmatprep.subr.bf16.mxu1 %v17068_v36  ;;  %v15276_v30 = vpop.eup %15275 }
 0xa7d   :  { %15279 = vrcp.f32 %v7400_v45  ;;  %7944 = vmatprep.mubr.bf16.mxu0 %v18441_v37  ;;  %7985 = vmatprep.mubr.bf16.mxu1 %v18441_v37  ;;  %v15278_v1 = vpop.eup %15277 }
 0xa7e   :  { %15281 = vrcp.f32 %v7406_v11 }
 0xa7f   :  { %7915 = vmatpush1.bf16.msra.mxu0 %v17074_v21  ;;  %7956 = vmatpush1.bf16.msra.mxu1 %v17076_v39  ;;  %v7413_v39 = vadd.f32 1.0, %v15276_v30 }
 0xa80   :  { %7916 = vmatprep.subr.bf16.mxu0 %v17080_v0  ;;  %7957 = vmatprep.subr.bf16.mxu1 %v17082_v26 }
 0xa81   :  { %15283 = vrcp.f32 %v7413_v39 }
 0xa83   :  { %7917 = vmatpush1.bf16.msra.mxu0 %v17088_v19  ;;  %7958 = vmatpush1.bf16.msra.mxu1 %v17090_v4  ;;  %v18538_v19 = vld [vmem:[#allocation25_spill] sm:$0xff] }
 0xa84   :  { %7918 = vmatprep.subr.bf16.mxu0 %v17094_v3  ;;  %7959 = vmatprep.subr.bf16.mxu1 %v17096_v41 }
 0xa87   :  { %v15280_v32 = vpop.eup %15279  ;;  %7919 = vmatpush1.bf16.msra.mxu0 %v17100_v8  ;;  %7960 = vmatpush1.bf16.msra.mxu1 %v17102_v34 }
 0xa88   :  { %v15282_v36 = vpop.eup %15281  ;;  %v7417_v21 = vmul.f32 %v15280_v32, %v15278_v1  ;;  %7920 = vmatprep.subr.bf16.mxu0 %v17106_v5  ;;  %7961 = vmatprep.subr.bf16.mxu1 %v17108_v22  ;;  %v17278_v22 = vld [vmem:[#allocation13 + $0x4] ss:$16 sps:$4 sm:$0xff]  }
 0xa89   :  { %v7416_v0 = vmul.f32 0.0, %v15282_v36 }
 0xa8b   :  { %v17259_v26 = vadd.f32 %v7417_v21, %v7416_v0  ;;  %7921 = vmatpush1.bf16.msra.mxu0 %v17112_v2  ;;  %7962 = vmatpush1.bf16.msra.mxu1 %v17114_v14  ;;  %v15284_v4 = vpop.eup %15283  ;;  %v17280_v2 = vld [vmem:[#allocation13 + $0xc] ss:$16 sps:$4 sm:$0xff]   ;;  %v17282_v14 = vld [vmem:[#allocation13] ss:$16 sps:$4 sm:$0xff]  }
 0xa8c   :  { %7922 = vmatprep.subr.bf16.mxu0 %v17118_v13  ;;  %7963 = vmatprep.subr.bf16.mxu1 %v17120_v16  ;;  %v17284_v13 = vld [vmem:[#allocation13 + $0x8] ss:$16 sps:$4 sm:$0xff]   ;;  %v17290_v16 = vld [vmem:[#allocation13 + $0x24] ss:$16 sps:$4 sm:$0xff]  }
 0xa8d   :  { %15285 = vtanh.f32 %v17259_v26 }
 0xa8f   :  { %7923 = vmatpush1.bf16.msra.mxu0 %v18538_v19  ;;  %7964 = vmatpush1.bf16.msra.mxu1 %v17126_v44  ;;  %v17294_v44 = vld [vmem:[#allocation13 + $0x20] ss:$16 sps:$4 sm:$0xff]  }
 0xa90   :  { %7924 = vmatprep.subr.bf16.mxu0 %v17130_v46  ;;  %7965 = vmatprep.subr.bf16.mxu1 %v17132_v35  ;;  %v17296_v46 = vld [vmem:[#allocation13 + $0x28] ss:$16 sps:$4 sm:$0xff]   ;;  %v17302_v35 = vld [vmem:[#allocation13 + $0x44] ss:$16 sps:$4 sm:$0xff]  }
 0xa93   :  { %7925 = vmatpush1.bf16.msra.mxu0 %v17136_v47  ;;  %7966 = vmatpush1.bf16.msra.mxu1 %v17138_v15  ;;  %v17304_v47 = vld [vmem:[#allocation13 + $0x4c] ss:$16 sps:$4 sm:$0xff]   ;;  %v17306_v15 = vld [vmem:[#allocation13 + $0x40] ss:$16 sps:$4 sm:$0xff]  }
 0xa94   :  { %7926 = vmatprep.subr.bf16.mxu0 %v17142_v49  ;;  %7967 = vmatprep.subr.bf16.mxu1 %v17144_v50  ;;  %v17308_v49 = vld [vmem:[#allocation13 + $0x48] ss:$16 sps:$4 sm:$0xff]   ;;  %v17314_v50 = vld [vmem:[#allocation13 + $0x64] ss:$16 sps:$4 sm:$0xff]  }
 0xa97   :  { %v15286_v3 = vpop.eup %15285  ;;  %7927 = vmatpush1.bf16.msra.mxu0 %v17148_v51  ;;  %7968 = vmatpush1.bf16.msra.mxu1 %v17150_v43  ;;  %v17292_v43 = vld [vmem:[#allocation13 + $0x2c] ss:$16 sps:$4 sm:$0xff]  }
 0xa98   :  { %v7420_v41 = vmul.f32 %v15286_v3, %v15284_v4  ;;  %8263 = vmatprep.subr.bf16.mxu0 %v17278_v22  ;;  %8304 = vmatprep.subr.bf16.mxu1 %v17280_v2  ;;  %v17316_v51 = vld [vmem:[#allocation13 + $0x6c] ss:$16 sps:$4 sm:$0xff]  }
 0xa9a   :  { %7422 = vst [vmem:[#allocation5] sm:$0x80] %v7420_v41  ;;  %v7714_v8 = vpack.c.bf16 %v7420_v41, %v7420_v41 }
 0xa9c   :  { %v7748_v34 = vshrl.u32 %v7714_v8, 16 }
 0xa9e   :  { %v7750_v5 = vrot.slane %v7748_v34, 3 }
 0xaa0   :  { %7945 = vmatmul.mubr.bf16.vlgmr.msra.gmra.mrb[92].mxu0 %v7750_v5  ;;  %7986 = vmatmul.mubr.bf16.vlgmr.msra.gmra.mrb[92].mxu1 %v7750_v5 }
 0xaa1   :  { %8295 = vmatprep.mubr.bf16.mxu0 %v18441_v37  ;;  %8336 = vmatprep.mubr.bf16.mxu1 %v18441_v37 }
 0xaa2   :  { %8264 = vmatpush1.bf16.msra.mxu0 %v17282_v14  ;;  %8305 = vmatpush1.bf16.msra.mxu1 %v17284_v13 }
 0xaa3   :  { %8265 = vmatprep.subr.bf16.mxu0 %v17290_v16  ;;  %8306 = vmatprep.subr.bf16.mxu1 %v17292_v43 }
 0xaa6   :  { %8266 = vmatpush1.bf16.msra.mxu0 %v17294_v44  ;;  %8307 = vmatpush1.bf16.msra.mxu1 %v17296_v46 }
 0xaa7   :  { %8267 = vmatprep.subr.bf16.mxu0 %v17302_v35  ;;  %8308 = vmatprep.subr.bf16.mxu1 %v17304_v47 }
 0xaaa   :  { %8268 = vmatpush1.bf16.msra.mxu0 %v17306_v15  ;;  %8309 = vmatpush1.bf16.msra.mxu1 %v17308_v49 }
 0xaab   :  { %8269 = vmatprep.subr.bf16.mxu0 %v17314_v50  ;;  %8310 = vmatprep.subr.bf16.mxu1 %v17316_v51 }
 0xaae   :  { %8270 = vmatpush1.bf16.msra.mxu0 %v17318_v58  ;;  %8311 = vmatpush1.bf16.msra.mxu1 %v17320_v28 }
 0xaaf   :  { %8271 = vmatprep.subr.bf16.mxu0 %v17324_v57  ;;  %8312 = vmatprep.subr.bf16.mxu1 %v17332_v55 }
 0xab2   :  { %8272 = vmatpush1.bf16.msra.mxu0 %v17328_v62  ;;  %8313 = vmatpush1.bf16.msra.mxu1 %v17330_v18 }
 0xab3   :  { %8273 = vmatprep.subr.bf16.mxu0 %v17338_v48  ;;  %8314 = vmatprep.subr.bf16.mxu1 %v17340_v40 }
 0xab6   :  { %8274 = vmatpush1.bf16.msra.mxu0 %v17342_v9  ;;  %8315 = vmatpush1.bf16.msra.mxu1 %v17344_v53 }
 0xab7   :  { %8275 = vmatprep.subr.bf16.mxu0 %v17350_v12  ;;  %8316 = vmatprep.subr.bf16.mxu1 %v17352_v23 }
 0xaba   :  { %8276 = vmatpush1.bf16.msra.mxu0 %v17354_v25  ;;  %8317 = vmatpush1.bf16.msra.mxu1 %v17356_v42 }
 0xabb   :  { %8277 = vmatprep.subr.bf16.mxu0 %v17362_v7  ;;  %8318 = vmatprep.subr.bf16.mxu1 %v17364_v56 }
 0xabe   :  { %8278 = vmatpush1.bf16.msra.mxu0 %v17366_v38  ;;  %8319 = vmatpush1.bf16.msra.mxu1 %v17368_v60 }
 0xabf   :  { %8557 = vmatprep.subr.bf16.mxu0 %v17374_v61  ;;  %8598 = vmatprep.subr.bf16.mxu1 %v17376_v24 }
 0xb4d   :  { %v7650_v63 = vpop.f32.mrb[88].mxu0  ;;  %v7691_v59 = vpop.f32.mrb[88].mxu1 }
 0xb4e   :  { %v7702_v45 = vrot.slane %v7650_v63, 7  ;;  %v7652_v11 = vpop.f32.mrb[89].mxu0  ;;  %v7693_v30 = vpop.f32.mrb[89].mxu1  ;;  %v7704_v34 = vrot.slane %v7691_v59, 7 }
 0xb4f   :  { %v7703_v1 = vrot.slane %v7652_v11, 7  ;;  %v7654_v32 = vpop.f32.mrb[90].mxu0  ;;  %v7695_v36 = vpop.f32.mrb[90].mxu1  ;;  %v7705_v41 = vrot.slane %v7693_v30, 7  ;;  %v8030_v30 = vrot.slane %v17222_v31, 7 }
 0xb50   :  { %v7710_v21 = vadd.f32 %v7702_v45, %v17203_v27  ;;  %v7655_v39 = vpop.f32.mrb[91].mxu0  ;;  %v7696_v0 = vpop.f32.mrb[91].mxu1  ;;  %v7712_v63 = vadd.f32 %v7704_v34, %v17214_v20 }
 0xb51   :  { %v7711_v19 = vadd.f32 %v7703_v1, %v17205_v33  ;;  %v7713_v8 = vadd.f32 %v7705_v41, %v17210_v52 }
 0xb52   :  { %v13397_v4 = vmul.f32 -1.442695, %v7710_v21 }
 0xb53   :  { %v13398_v3 = vmul.f32 -1.442695, %v7711_v19  ;;  %v13399_v5 = vmul.f32 -1.442695, %v7713_v8 }
 0xb54   :  { %15287 = vpow2.f32 %v13397_v4 }
 0xb55   :  { %15289 = vpow2.f32 %v13398_v3 }
 0xb56   :  { %15291 = vpow2.f32 %v13399_v5 }
 0xb57   :  { %15293 = vtanh.f32 %v7712_v63 }
 0xb5e   :  { %v15288_v11 = vpop.eup %15287 }
 0xb5f   :  { %v15290_v32 = vpop.eup %15289  ;;  %v8013_v36 = vadd.f32 1.0, %v15288_v11 }
 0xb60   :  { %v8019_v45 = vadd.f32 1.0, %v15290_v32  ;;  %v15292_v1 = vpop.eup %15291 }
 0xb61   :  { %15295 = vrcp.f32 %v8013_v36  ;;  %v15294_v21 = vpop.eup %15293  ;;  %v8026_v4 = vadd.f32 1.0, %v15292_v1 }
 0xb62   :  { %15297 = vrcp.f32 %v8019_v45 }
 0xb63   :  { %15299 = vrcp.f32 %v8026_v4 }
 0xb6b   :  { %v15296_v39 = vpop.eup %15295 }
 0xb6c   :  { %v15298_v0 = vpop.eup %15297  ;;  %v8033_v19 = vmul.f32 %v15296_v39, %v15294_v21 }
 0xb6d   :  { %v8032_v59 = vmul.f32 %v15298_v0, %v8030_v30  ;;  %v15300_v0 = vpop.eup %15299 }
 0xb6f   :  { %v17385_v3 = vadd.f32 %v8033_v19, %v8032_v59 }
 0xb71   :  { %15301 = vtanh.f32 %v17385_v3 }
 0xb73   :  { %v7946_v41 = vpop.f32.mrb[92].mxu0  ;;  %v7987_v8 = vpop.f32.mrb[92].mxu1 }
 0xb74   :  { %v7998_v34 = vrot.slane %v7946_v41, 2  ;;  %v7948_v5 = vpop.f32.mrb[93].mxu0  ;;  %v7989_v63 = vpop.f32.mrb[93].mxu1  ;;  %v8000_v41 = vrot.slane %v7987_v8, 2  ;;  %v17402_v8 = vld [vmem:[#allocation13 + $0x120] ss:$16 sps:$4 sm:$0xff]  }
 0xb75   :  { %v7999_v11 = vrot.slane %v7948_v5, 2  ;;  %v7950_v32 = vpop.f32.mrb[94].mxu0  ;;  %v7991_v36 = vpop.f32.mrb[94].mxu1  ;;  %v8001_v30 = vrot.slane %v7989_v63, 2  ;;  %18540 = vst [vmem:[#allocation27_spill] sm:$0xff] %v17402_v8 }
 0xb76   :  { %v8006_v45 = vadd.f32 %v7998_v34, %v17224_v6  ;;  %v7951_v31 = vpop.f32.mrb[95].mxu0  ;;  %v7992_v29 = vpop.f32.mrb[95].mxu1  ;;  %v17391_v32 = vld [vmem:[#allocation13 + $0x100] ss:$16 sps:$4 sm:$0xff]   ;;  %v17393_v34 = vld [vmem:[#allocation13 + $0x108] ss:$16 sps:$4 sm:$0xff]  }
 0xb77   :  { %v8007_v1 = vadd.f32 %v7999_v11, %v17226_v17  ;;  %v8009_v59 = vadd.f32 %v8001_v30, %v17233_v54  ;;  %v17395_v36 = vld [vmem:[#allocation13 + $0x124] ss:$16 sps:$4 sm:$0xff]   ;;  %v17397_v11 = vld [vmem:[#allocation13 + $0x12c] ss:$16 sps:$4 sm:$0xff]   ;;  %v17404_v31 = vld [vmem:[#allocation13 + $0x128] ss:$16 sps:$4 sm:$0xff]  }
 0xb78   :  { %v13400_v21 = vmul.f32 -1.442695, %v8006_v45  ;;  %18539 = vst [vmem:[#allocation26_spill] sm:$0xff] %v17397_v11  ;;  %v8008_v45 = vadd.f32 %v8000_v41, %v17238_v10  ;;  %18541 = vst [vmem:[#allocation28_spill] sm:$0xff] %v17404_v31  ;;  %v17422_v41 = vld [vmem:[#allocation13 + $0x164] ss:$16 sps:$4 sm:$0xff]  }
 0xb79   :  { %v13401_v39 = vmul.f32 -1.442695, %v8007_v1  ;;  %v13402_v63 = vmul.f32 -1.442695, %v8009_v59  ;;  %v17418_v59 = vld [vmem:[#allocation13 + $0x148] ss:$16 sps:$4 sm:$0xff]  }
 0xb7a   :  { %15303 = vpow2.f32 %v13400_v21  ;;  %v17408_v21 = vld [vmem:[#allocation13 + $0x144] ss:$16 sps:$4 sm:$0xff]   ;;  %18545 = vst [vmem:[#allocation32_spill] sm:$0xff] %v17418_v59  ;;  %18546 = vst [vmem:[#allocation33_spill] sm:$0xff] %v17422_v41 }
 0xb7b   :  { %v15302_v19 = vpop.eup %15301  ;;  %15305 = vpow2.f32 %v13401_v39  ;;  %18542 = vst [vmem:[#allocation29_spill] sm:$0xff] %v17408_v21  ;;  %v17410_v39 = vld [vmem:[#allocation13 + $0x14c] ss:$16 sps:$4 sm:$0xff]  }
 0xb7c   :  { %v8036_v4 = vmul.f32 %v15302_v19, %v15300_v0  ;;  %18543 = vst [vmem:[#allocation30_spill] sm:$0xff] %v17410_v39  ;;  %15307 = vpow2.f32 %v13402_v63  ;;  %v17430_v63 = vld [vmem:[#allocation13 + $0x168] ss:$16 sps:$4 sm:$0xff]  }
 0xb7d   :  { %15309 = vtanh.f32 %v8008_v45  ;;  %18549 = vst [vmem:[#allocation36_spill] sm:$0xff] %v17430_v63  ;;  %v17434_v45 = vld [vmem:[#allocation13 + $0x184] ss:$16 sps:$4 sm:$0xff]  }
 0xb7e   :  { %8064 = vst [vmem:[#allocation4] sm:$0x2] %v8036_v4  ;;  %v8066_v5 = vpack.c.bf16 %v8036_v4, %v8036_v4  ;;  %v17416_v4 = vld [vmem:[#allocation13 + $0x140] ss:$16 sps:$4 sm:$0xff]   ;;  %18550 = vst [vmem:[#allocation37_spill] sm:$0xff] %v17434_v45 }
 0xb7f   :  { %18544 = vst [vmem:[#allocation31_spill] sm:$0xff] %v17416_v4 }
 0xb80   :  { %v8100_v29 = vshrl.u32 %v8066_v5, 16  ;;  %v17424_v5 = vld [vmem:[#allocation13 + $0x16c] ss:$16 sps:$4 sm:$0xff]  }
 0xb81   :  { %18547 = vst [vmem:[#allocation34_spill] sm:$0xff] %v17424_v5 }
 0xb82   :  { %8296 = vmatmul.mubr.bf16.vlgmr.msra.gmra.mrb[96].mxu0 %v8100_v29  ;;  %8337 = vmatmul.mubr.bf16.vlgmr.msra.gmra.mrb[96].mxu1 %v8100_v29  ;;  %v17428_v29 = vld [vmem:[#allocation13 + $0x160] ss:$16 sps:$4 sm:$0xff]  }
 0xb83   :  { %8558 = vmatpush1.bf16.msra.mxu0 %v17391_v32  ;;  %8599 = vmatpush1.bf16.msra.mxu1 %v17393_v34  ;;  %18548 = vst [vmem:[#allocation35_spill] sm:$0xff] %v17428_v29 }
 0xb84   :  { %v15304_v1 = vpop.eup %15303  ;;  %8559 = vmatprep.subr.bf16.mxu0 %v17395_v36  ;;  %8600 = vmatprep.subr.bf16.mxu1 %v17397_v11  ;;  %v17461_v11 = vld [vmem:[#allocation13 + $0x1cc] ss:$16 sps:$4 sm:$0xff]  }
 0xb85   :  { %v15306_v30 = vpop.eup %15305  ;;  %v8040_v0 = vadd.f32 1.0, %v15304_v1  ;;  %8589 = vmatprep.mubr.bf16.mxu0 %v18441_v37  ;;  %8630 = vmatprep.mubr.bf16.mxu1 %v18441_v37  ;;  %v17436_v1 = vld [vmem:[#allocation13 + $0x18c] ss:$16 sps:$4 sm:$0xff]   ;;  %18552 = vst [vmem:[#allocation39_spill] sm:$0xff] %v17461_v11 }
 0xb86   :  { %v8046_v19 = vadd.f32 1.0, %v15306_v30  ;;  %18551 = vst [vmem:[#allocation38_spill] sm:$0xff] %v17436_v1  ;;  %v15308_v30 = vpop.eup %15307 }
 0xb87   :  { %15311 = vrcp.f32 %v8040_v0  ;;  %8560 = vmatpush1.bf16.msra.mxu0 %v17402_v8  ;;  %8601 = vmatpush1.bf16.msra.mxu1 %v17404_v31  ;;  %v17440_v0 = vld [vmem:[#allocation13 + $0x180] ss:$16 sps:$4 sm:$0xff]   ;;  %v8053_v31 = vadd.f32 1.0, %v15308_v30 }
 0xb88   :  { %15313 = vrcp.f32 %v8046_v19  ;;  %8561 = vmatprep.subr.bf16.mxu0 %v17408_v21  ;;  %8602 = vmatprep.subr.bf16.mxu1 %v17410_v39  ;;  %v17442_v19 = vld [vmem:[#allocation13 + $0x188] ss:$16 sps:$4 sm:$0xff]   ;;  %v8057_v39 = vrot.slane %v17259_v26, 1  ;;  %v17453_v8 = vld [vmem:[#allocation13 + $0x1a0] ss:$16 sps:$4 sm:$0xff]  }
 0xb89   :  { %15315 = vrcp.f32 %v8053_v31  ;;  %v17480_v31 = vld [vmem:[#allocation13 + $0x1e0] ss:$16 sps:$4 sm:$0xff]  }
 0xb8b   :  { %8562 = vmatpush1.bf16.msra.mxu0 %v17416_v4  ;;  %8603 = vmatpush1.bf16.msra.mxu1 %v17418_v59  ;;  %v15310_v59 = vpop.eup %15309 }
 0xb8c   :  { %8563 = vmatprep.subr.bf16.mxu0 %v17422_v41  ;;  %8604 = vmatprep.subr.bf16.mxu1 %v17424_v5  ;;  %v17446_v41 = vld [vmem:[#allocation13 + $0x1a4] ss:$16 sps:$4 sm:$0xff]   ;;  %v17448_v5 = vld [vmem:[#allocation13 + $0x1ac] ss:$16 sps:$4 sm:$0xff]  }
 0xb8f   :  { %8564 = vmatpush1.bf16.msra.mxu0 %v17428_v29  ;;  %8605 = vmatpush1.bf16.msra.mxu1 %v17430_v63 }
 0xb90   :  { %8565 = vmatprep.subr.bf16.mxu0 %v17434_v45  ;;  %8606 = vmatprep.subr.bf16.mxu1 %v17436_v1  ;;  %v17455_v45 = vld [vmem:[#allocation13 + $0x1a8] ss:$16 sps:$4 sm:$0xff]   ;;  %v17459_v1 = vld [vmem:[#allocation13 + $0x1c4] ss:$16 sps:$4 sm:$0xff]  }
 0xb91   :  { %v15312_v4 = vpop.eup %15311 }
 0xb92   :  { %v15314_v21 = vpop.eup %15313  ;;  %v8060_v29 = vmul.f32 %v15312_v4, %v15310_v59  ;;  %v17474_v4 = vld [vmem:[#allocation13 + $0x1e4] ss:$16 sps:$4 sm:$0xff]   ;;  %v17476_v59 = vld [vmem:[#allocation13 + $0x1ec] ss:$16 sps:$4 sm:$0xff]  }
 0xb93   :  { %v8059_v63 = vmul.f32 %v15314_v21, %v8057_v39  ;;  %8566 = vmatpush1.bf16.msra.mxu0 %v17440_v0  ;;  %8607 = vmatpush1.bf16.msra.mxu1 %v17442_v19  ;;  %v17467_v21 = vld [vmem:[#allocation13 + $0x1c0] ss:$16 sps:$4 sm:$0xff]   ;;  %v17469_v39 = vld [vmem:[#allocation13 + $0x1c8] ss:$16 sps:$4 sm:$0xff]  }
 0xb94   :  { %8567 = vmatprep.subr.bf16.mxu0 %v17446_v41  ;;  %8608 = vmatprep.subr.bf16.mxu1 %v17448_v5  ;;  %18553 = vst [vmem:[#allocation40_spill] sm:$0xff] %v17467_v21  ;;  %18554 = vst [vmem:[#allocation22_spill] sm:$0xff] %v17469_v39 }
 0xb95   :  { %v17463_v26 = vadd.f32 %v8060_v29, %v8059_v63  ;;  %v17482_v29 = vld [vmem:[#allocation13 + $0x1e8] ss:$16 sps:$4 sm:$0xff]   ;;  %v15316_v63 = vpop.eup %15315 }
 0xb97   :  { %8568 = vmatpush1.bf16.msra.mxu0 %v17453_v8  ;;  %8609 = vmatpush1.bf16.msra.mxu1 %v17455_v45  ;;  %15317 = vtanh.f32 %v17463_v26 }
 0xb98   :  { %8569 = vmatprep.subr.bf16.mxu0 %v17459_v1  ;;  %8610 = vmatprep.subr.bf16.mxu1 %v17461_v11 }
 0xb9b   :  { %8570 = vmatpush1.bf16.msra.mxu0 %v17467_v21  ;;  %8611 = vmatpush1.bf16.msra.mxu1 %v17469_v39 }
 0xb9c   :  { %8571 = vmatprep.subr.bf16.mxu0 %v17474_v4  ;;  %8612 = vmatprep.subr.bf16.mxu1 %v17476_v59 }
 0xb9f   :  { %8572 = vmatpush1.bf16.msra.mxu0 %v17480_v31  ;;  %8613 = vmatpush1.bf16.msra.mxu1 %v17482_v29 }
 0xba0   :  { %8907 = vmatprep.subr.bf16.mxu0 %v17278_v22  ;;  %8948 = vmatprep.subr.bf16.mxu1 %v17280_v2 }
 0xba1   :  { %v15318_v30 = vpop.eup %15317 }
 0xba2   :  { %v8063_v21 = vmul.f32 %v15318_v30, %v15316_v63 }
 0xba4   :  { %8065 = vst [vmem:[#allocation5] sm:$0x40] %v8063_v21  ;;  %v8361_v39 = vpack.c.bf16 %v8063_v21, %v8063_v21 }
 0xba6   :  { %v8395_v11 = vrot.slane %v8361_v39, 3 }
 0xba8   :  { %8590 = vmatmul.mubr.bf16.vlgmr.msra.gmra.mrb[100].mxu0 %v8395_v11  ;;  %8631 = vmatmul.mubr.bf16.vlgmr.msra.gmra.mrb[100].mxu1 %v8395_v11 }
 0xba9   :  { %8908 = vmatpush1.bf16.msra.mxu0 %v17282_v14  ;;  %8949 = vmatpush1.bf16.msra.mxu1 %v17284_v13 }
 0xbaa   :  { %8909 = vmatprep.subr.bf16.mxu0 %v17290_v16  ;;  %8950 = vmatprep.subr.bf16.mxu1 %v17292_v43 }
 0xbab   :  { %8939 = vmatprep.mubr.bf16.mxu0 %v18441_v37  ;;  %8980 = vmatprep.mubr.bf16.mxu1 %v18441_v37 }
 0xbad   :  { %8910 = vmatpush1.bf16.msra.mxu0 %v17294_v44  ;;  %8951 = vmatpush1.bf16.msra.mxu1 %v17296_v46 }
 0xbae   :  { %8911 = vmatprep.subr.bf16.mxu0 %v17302_v35  ;;  %8952 = vmatprep.subr.bf16.mxu1 %v17304_v47 }
 0xbb1   :  { %8912 = vmatpush1.bf16.msra.mxu0 %v17306_v15  ;;  %8953 = vmatpush1.bf16.msra.mxu1 %v17308_v49 }
 0xbb2   :  { %8913 = vmatprep.subr.bf16.mxu0 %v17314_v50  ;;  %8954 = vmatprep.subr.bf16.mxu1 %v17316_v51 }
 0xbb5   :  { %8914 = vmatpush1.bf16.msra.mxu0 %v17318_v58  ;;  %8955 = vmatpush1.bf16.msra.mxu1 %v17320_v28 }
 0xbb6   :  { %8915 = vmatprep.subr.bf16.mxu0 %v17324_v57  ;;  %8956 = vmatprep.subr.bf16.mxu1 %v17332_v55 }
 0xbb9   :  { %8916 = vmatpush1.bf16.msra.mxu0 %v17328_v62  ;;  %8957 = vmatpush1.bf16.msra.mxu1 %v17330_v18 }
 0xbba   :  { %8917 = vmatprep.subr.bf16.mxu0 %v17338_v48  ;;  %8958 = vmatprep.subr.bf16.mxu1 %v17340_v40 }
 0xbbd   :  { %8918 = vmatpush1.bf16.msra.mxu0 %v17342_v9  ;;  %8959 = vmatpush1.bf16.msra.mxu1 %v17344_v53 }
 0xbbe   :  { %8919 = vmatprep.subr.bf16.mxu0 %v17350_v12  ;;  %8960 = vmatprep.subr.bf16.mxu1 %v17352_v23 }
 0xbc1   :  { %8920 = vmatpush1.bf16.msra.mxu0 %v17354_v25  ;;  %8961 = vmatpush1.bf16.msra.mxu1 %v17356_v42  ;;  %v8675_v25 = vrot.slane %v17385_v3, 7 }
 0xbc2   :  { %8921 = vmatprep.subr.bf16.mxu0 %v17362_v7  ;;  %8962 = vmatprep.subr.bf16.mxu1 %v17364_v56 }
 0xbc5   :  { %8922 = vmatpush1.bf16.msra.mxu0 %v17366_v38  ;;  %8963 = vmatpush1.bf16.msra.mxu1 %v17368_v60 }
 0xbc6   :  { %9203 = vmatprep.subr.bf16.mxu0 %v17374_v61  ;;  %9244 = vmatprep.subr.bf16.mxu1 %v17376_v24 }
 0xc55   :  { %v8297_v22 = vpop.f32.mrb[96].mxu0  ;;  %v8338_v2 = vpop.f32.mrb[96].mxu1 }
 0xc56   :  { %v8349_v14 = vrot.slane %v8297_v22, 6  ;;  %v8299_v13 = vpop.f32.mrb[97].mxu0  ;;  %v8340_v16 = vpop.f32.mrb[97].mxu1  ;;  %v8351_v57 = vrot.slane %v8338_v2, 6 }
 0xc57   :  { %v8350_v43 = vrot.slane %v8299_v13, 6  ;;  %v8301_v44 = vpop.f32.mrb[98].mxu0  ;;  %v8342_v46 = vpop.f32.mrb[98].mxu1  ;;  %v8352_v58 = vrot.slane %v8340_v16, 6 }
 0xc58   :  { %v8357_v35 = vadd.f32 %v8349_v14, %v17203_v27  ;;  %v8302_v47 = vpop.f32.mrb[99].mxu0  ;;  %v8343_v15 = vpop.f32.mrb[99].mxu1  ;;  %v8359_v18 = vadd.f32 %v8351_v57, %v17214_v20 }
 0xc59   :  { %v8358_v49 = vadd.f32 %v8350_v43, %v17205_v33  ;;  %v8360_v28 = vadd.f32 %v8352_v58, %v17210_v52 }
 0xc5a   :  { %v13467_v50 = vmul.f32 -1.442695, %v8357_v35 }
 0xc5b   :  { %v13468_v51 = vmul.f32 -1.442695, %v8358_v49  ;;  %v13469_v62 = vmul.f32 -1.442695, %v8360_v28 }
 0xc5c   :  { %15319 = vpow2.f32 %v13467_v50 }
 0xc5d   :  { %15321 = vpow2.f32 %v13468_v51 }
 0xc5e   :  { %15323 = vpow2.f32 %v13469_v62  ;;  %v18555_v62 = vld [vmem:[#allocation26_spill] sm:$0xff] }
 0xc5f   :  { %15325 = vtanh.f32 %v8359_v18 }
 0xc66   :  { %v15320_v55 = vpop.eup %15319 }
 0xc67   :  { %v15322_v48 = vpop.eup %15321  ;;  %v8658_v40 = vadd.f32 1.0, %v15320_v55 }
 0xc68   :  { %v8664_v9 = vadd.f32 1.0, %v15322_v48  ;;  %v15324_v53 = vpop.eup %15323 }
 0xc69   :  { %15327 = vrcp.f32 %v8658_v40  ;;  %v15326_v12 = vpop.eup %15325  ;;  %v8671_v56 = vadd.f32 1.0, %v15324_v53  ;;  %v18556_v40 = vld [vmem:[#allocation27_spill] sm:$0xff]  ;;  %v18561_v53 = vld [vmem:[#allocation32_spill] sm:$0xff] }
 0xc6a   :  { %15329 = vrcp.f32 %v8664_v9  ;;  %v18560_v9 = vld [vmem:[#allocation31_spill] sm:$0xff] }
 0xc6b   :  { %15331 = vrcp.f32 %v8671_v56 }
 0xc73   :  { %v15328_v23 = vpop.eup %15327 }
 0xc74   :  { %v15330_v42 = vpop.eup %15329  ;;  %v8678_v7 = vmul.f32 %v15328_v23, %v15326_v12  ;;  %v18562_v12 = vld [vmem:[#allocation33_spill] sm:$0xff]  ;;  %v18563_v23 = vld [vmem:[#allocation34_spill] sm:$0xff] }
 0xc75   :  { %v8677_v38 = vmul.f32 %v15330_v42, %v8675_v25  ;;  %v15332_v46 = vpop.eup %15331  ;;  %v18564_v42 = vld [vmem:[#allocation35_spill] sm:$0xff] }
 0xc77   :  { %v17529_v60 = vadd.f32 %v8678_v7, %v8677_v38  ;;  %v18565_v7 = vld [vmem:[#allocation36_spill] sm:$0xff]  ;;  %v18566_v38 = vld [vmem:[#allocation37_spill] sm:$0xff] }
 0xc79   :  { %15333 = vtanh.f32 %v17529_v60 }
 0xc7b   :  { %v8591_v61 = vpop.f32.mrb[100].mxu0  ;;  %v8632_v24 = vpop.f32.mrb[100].mxu1 }
 0xc7c   :  { %v8643_v11 = vrot.slane %v8591_v61, 3  ;;  %v8593_v21 = vpop.f32.mrb[101].mxu0  ;;  %v8634_v39 = vpop.f32.mrb[101].mxu1  ;;  %v8645_v49 = vrot.slane %v8632_v24, 3  ;;  %v18567_v61 = vld [vmem:[#allocation38_spill] sm:$0xff] }
 0xc7d   :  { %v8644_v63 = vrot.slane %v8593_v21, 3  ;;  %v8595_v30 = vpop.f32.mrb[102].mxu0  ;;  %v8636_v22 = vpop.f32.mrb[102].mxu1  ;;  %v8646_v44 = vrot.slane %v8634_v39, 3 }
 0xc7e   :  { %v8651_v2 = vadd.f32 %v8643_v11, %v17224_v6  ;;  %v8596_v3 = vpop.f32.mrb[103].mxu0  ;;  %v8637_v14 = vpop.f32.mrb[103].mxu1  ;;  %v8653_v28 = vadd.f32 %v8645_v49, %v17238_v10  ;;  %v8702_v11 = vrot.slane %v17463_v26, 1  ;;  %v18568_v26 = vld [vmem:[#allocation39_spill] sm:$0xff]  ;;  %v17614_v49 = vld [vmem:[#allocation13 + $0x68] ss:$16 sps:$4 sm:$0xff]  }
 0xc7f   :  { %v8652_v13 = vadd.f32 %v8644_v63, %v17226_v17  ;;  %v8654_v15 = vadd.f32 %v8646_v44, %v17233_v54  ;;  %v17586_v3 = vld [vmem:[#allocation13 + $0x24] ss:$16 sps:$4 sm:$0xff]   ;;  %v17588_v14 = vld [vmem:[#allocation13 + $0x2c] ss:$16 sps:$4 sm:$0xff]  }
 0xc80   :  { %v13470_v16 = vmul.f32 -1.442695, %v8651_v2  ;;  %v17600_v44 = vld [vmem:[#allocation13 + $0x4c] ss:$16 sps:$4 sm:$0xff]  }
 0xc81   :  { %v13471_v43 = vmul.f32 -1.442695, %v8652_v13  ;;  %v13472_v58 = vmul.f32 -1.442695, %v8654_v15  ;;  %v17590_v13 = vld [vmem:[#allocation13 + $0x20] ss:$16 sps:$4 sm:$0xff]  }
 0xc82   :  { %15335 = vpow2.f32 %v13470_v16  ;;  %v17592_v16 = vld [vmem:[#allocation13 + $0x28] ss:$16 sps:$4 sm:$0xff]   ;;  %v17612_v15 = vld [vmem:[#allocation13 + $0x64] ss:$16 sps:$4 sm:$0xff]  }
 0xc83   :  { %v15334_v35 = vpop.eup %15333  ;;  %15337 = vpow2.f32 %v13471_v43  ;;  %v17598_v43 = vld [vmem:[#allocation13 + $0x44] ss:$16 sps:$4 sm:$0xff]  }
 0xc84   :  { %v8681_v47 = vmul.f32 %v15334_v35, %v15332_v46  ;;  %15339 = vpow2.f32 %v13472_v58  ;;  %v17602_v46 = vld [vmem:[#allocation13 + $0x40] ss:$16 sps:$4 sm:$0xff]   ;;  %v17604_v35 = vld [vmem:[#allocation13 + $0x48] ss:$16 sps:$4 sm:$0xff]   ;;  %v17621_v58 = vld [vmem:[#allocation13 + $0x8c] ss:$16 sps:$4 sm:$0xff]  }
 0xc85   :  { %15341 = vtanh.f32 %v8653_v28  ;;  %v17625_v28 = vld [vmem:[#allocation13 + $0x80] ss:$16 sps:$4 sm:$0xff]  }
 0xc86   :  { %8709 = vst [vmem:[#allocation4] sm:$0x4] %v8681_v47  ;;  %v8711_v50 = vpack.c.bf16 %v8681_v47, %v8681_v47  ;;  %v17610_v47 = vld [vmem:[#allocation13 + $0x60] ss:$16 sps:$4 sm:$0xff]  }
 0xc88   :  { %v8745_v51 = vrot.slane %v8711_v50, 1  ;;  %v17616_v50 = vld [vmem:[#allocation13 + $0x6c] ss:$16 sps:$4 sm:$0xff]  }
 0xc8a   :  { %8940 = vmatmul.mubr.bf16.vlgmr.msra.gmra.mrb[104].mxu0 %v8745_v51  ;;  %8981 = vmatmul.mubr.bf16.vlgmr.msra.gmra.mrb[104].mxu1 %v8745_v51  ;;  %v17618_v51 = vld [vmem:[#allocation13 + $0x84] ss:$16 sps:$4 sm:$0xff]  }
 0xc8b   :  { %9204 = vmatpush1.bf16.msra.mxu0 %v17391_v32  ;;  %9245 = vmatpush1.bf16.msra.mxu1 %v17393_v34  ;;  %v18557_v32 = vld [vmem:[#allocation28_spill] sm:$0xff]  ;;  %v18558_v34 = vld [vmem:[#allocation29_spill] sm:$0xff] }
 0xc8c   :  { %v15336_v57 = vpop.eup %15335  ;;  %9205 = vmatprep.subr.bf16.mxu0 %v17395_v36  ;;  %9246 = vmatprep.subr.bf16.mxu1 %v18555_v62  ;;  %v18559_v36 = vld [vmem:[#allocation30_spill] sm:$0xff]  ;;  %v17634_v62 = vld [vmem:[#allocation13 + $0xa4] ss:$16 sps:$4 sm:$0xff]  }
 0xc8d   :  { %v15338_v18 = vpop.eup %15337  ;;  %v8685_v55 = vadd.f32 1.0, %v15336_v57  ;;  %9235 = vmatprep.mubr.bf16.mxu0 %v18441_v37  ;;  %9276 = vmatprep.mubr.bf16.mxu1 %v18441_v37  ;;  %v17629_v57 = vld [vmem:[#allocation13 + $0x88] ss:$16 sps:$4 sm:$0xff]  }
 0xc8e   :  { %v8691_v48 = vadd.f32 1.0, %v15338_v18  ;;  %v15340_v25 = vpop.eup %15339  ;;  %v17636_v18 = vld [vmem:[#allocation13 + $0xac] ss:$16 sps:$4 sm:$0xff]  }
 0xc8f   :  { %15343 = vrcp.f32 %v8685_v55  ;;  %9206 = vmatpush1.bf16.msra.mxu0 %v18556_v40  ;;  %9247 = vmatpush1.bf16.msra.mxu1 %v18557_v32  ;;  %v15342_v56 = vpop.eup %15341  ;;  %v8698_v63 = vadd.f32 1.0, %v15340_v25  ;;  %v17638_v55 = vld [vmem:[#allocation13 + $0xa0] ss:$16 sps:$4 sm:$0xff]   ;;  %v17646_v40 = vld [vmem:[#allocation13 + $0xc4] ss:$16 sps:$4 sm:$0xff]  }
 0xc90   :  { %15345 = vrcp.f32 %v8691_v48  ;;  %9207 = vmatprep.subr.bf16.mxu0 %v18558_v34  ;;  %9248 = vmatprep.subr.bf16.mxu1 %v18559_v36  ;;  %v17640_v48 = vld [vmem:[#allocation13 + $0xa8] ss:$16 sps:$4 sm:$0xff]   ;;  %v17648_v32 = vld [vmem:[#allocation13 + $0xcc] ss:$16 sps:$4 sm:$0xff]   ;;  %v17650_v34 = vld [vmem:[#allocation13 + $0xc0] ss:$16 sps:$4 sm:$0xff]  }
 0xc91   :  { %15347 = vrcp.f32 %v8698_v63  ;;  %v17652_v36 = vld [vmem:[#allocation13 + $0xc8] ss:$16 sps:$4 sm:$0xff]   ;;  %v17670_v25 = vld [vmem:[#allocation13 + $0x104] ss:$16 sps:$4 sm:$0xff]  }
 0xc93   :  { %9208 = vmatpush1.bf16.msra.mxu0 %v18560_v9  ;;  %9249 = vmatpush1.bf16.msra.mxu1 %v18561_v53  ;;  %v17658_v9 = vld [vmem:[#allocation13 + $0xe4] ss:$16 sps:$4 sm:$0xff]   ;;  %v17660_v53 = vld [vmem:[#allocation13 + $0xec] ss:$16 sps:$4 sm:$0xff]  }
 0xc94   :  { %9209 = vmatprep.subr.bf16.mxu0 %v18562_v12  ;;  %9250 = vmatprep.subr.bf16.mxu1 %v18563_v23  ;;  %v17662_v12 = vld [vmem:[#allocation13 + $0xe0] ss:$16 sps:$4 sm:$0xff]   ;;  %v17664_v23 = vld [vmem:[#allocation13 + $0xe8] ss:$16 sps:$4 sm:$0xff]  }
 0xc97   :  { %9210 = vmatpush1.bf16.msra.mxu0 %v18564_v42  ;;  %9251 = vmatpush1.bf16.msra.mxu1 %v18565_v7  ;;  %v17672_v42 = vld [vmem:[#allocation13 + $0x10c] ss:$16 sps:$4 sm:$0xff]  }
 0xc98   :  { %9211 = vmatprep.subr.bf16.mxu0 %v18566_v38  ;;  %9252 = vmatprep.subr.bf16.mxu1 %v18567_v61 }
 0xc99   :  { %v15344_v24 = vpop.eup %15343 }
 0xc9a   :  { %v15346_v21 = vpop.eup %15345  ;;  %v8705_v39 = vmul.f32 %v15344_v24, %v15342_v56 }
 0xc9b   :  { %v8704_v30 = vmul.f32 %v15346_v21, %v8702_v11  ;;  %9212 = vmatpush1.bf16.msra.mxu0 %v17440_v0  ;;  %9253 = vmatpush1.bf16.msra.mxu1 %v17442_v19  ;;  %v18569_v0 = vld [vmem:[#allocation40_spill] sm:$0xff]  ;;  %v18570_v19 = vld [vmem:[#allocation22_spill] sm:$0xff] }
 0xc9c   :  { %9213 = vmatprep.subr.bf16.mxu0 %v17446_v41  ;;  %9254 = vmatprep.subr.bf16.mxu1 %v17448_v5 }
 0xc9d   :  { %v17559_v22 = vadd.f32 %v8705_v39, %v8704_v30 }
 0xc9f   :  { %9214 = vmatpush1.bf16.msra.mxu0 %v17453_v8  ;;  %9255 = vmatpush1.bf16.msra.mxu1 %v17455_v45  ;;  %15349 = vtanh.f32 %v17559_v22  ;;  %v15348_v8 = vpop.eup %15347 }
 0xca0   :  { %9215 = vmatprep.subr.bf16.mxu0 %v17459_v1  ;;  %9256 = vmatprep.subr.bf16.mxu1 %v18568_v26 }
 0xca3   :  { %9216 = vmatpush1.bf16.msra.mxu0 %v18569_v0  ;;  %9257 = vmatpush1.bf16.msra.mxu1 %v18570_v19 }
 0xca4   :  { %9217 = vmatprep.subr.bf16.mxu0 %v17474_v4  ;;  %9258 = vmatprep.subr.bf16.mxu1 %v17476_v59  ;;  %v17574_v4 = vld [vmem:[#allocation13 + $0x4] ss:$16 sps:$4 sm:$0xff]   ;;  %v17576_v59 = vld [vmem:[#allocation13 + $0xc] ss:$16 sps:$4 sm:$0xff]  }
 0xca7   :  { %9218 = vmatpush1.bf16.msra.mxu0 %v17480_v31  ;;  %9259 = vmatpush1.bf16.msra.mxu1 %v17482_v29  ;;  %v17578_v31 = vld [vmem:[#allocation13] ss:$16 sps:$4 sm:$0xff]   ;;  %v17580_v29 = vld [vmem:[#allocation13 + $0x8] ss:$16 sps:$4 sm:$0xff]  }
 0xca8   :  { %9555 = vmatprep.subr.bf16.mxu0 %v17574_v4  ;;  %9596 = vmatprep.subr.bf16.mxu1 %v17576_v59 }
 0xca9   :  { %v15350_v41 = vpop.eup %15349 }
 0xcaa   :  { %v8708_v5 = vmul.f32 %v15350_v41, %v15348_v8 }
 0xcac   :  { %8710 = vst [vmem:[#allocation5] sm:$0x20] %v8708_v5  ;;  %v9005_v45 = vpack.c.bf16 %v8708_v5, %v8708_v5 }
 0xcae   :  { %v9039_v1 = vshrl.u32 %v9005_v45, 16 }
 0xcb0   :  { %v9041_v2 = vrot.slane %v9039_v1, 2 }
 0xcb2   :  { %9236 = vmatmul.mubr.bf16.vlgmr.msra.gmra.mrb[108].mxu0 %v9041_v2  ;;  %9277 = vmatmul.mubr.bf16.vlgmr.msra.gmra.mrb[108].mxu1 %v9041_v2 }
 0xcb3   :  { %9587 = vmatprep.mubr.bf16.mxu0 %v18441_v37  ;;  %9628 = vmatprep.mubr.bf16.mxu1 %v18441_v37 }
 0xcb4   :  { %9556 = vmatpush1.bf16.msra.mxu0 %v17578_v31  ;;  %9597 = vmatpush1.bf16.msra.mxu1 %v17580_v29 }
 0xcb5   :  { %9557 = vmatprep.subr.bf16.mxu0 %v17586_v3  ;;  %9598 = vmatprep.subr.bf16.mxu1 %v17588_v14 }
 0xcb8   :  { %9558 = vmatpush1.bf16.msra.mxu0 %v17590_v13  ;;  %9599 = vmatpush1.bf16.msra.mxu1 %v17592_v16 }
 0xcb9   :  { %9559 = vmatprep.subr.bf16.mxu0 %v17598_v43  ;;  %9600 = vmatprep.subr.bf16.mxu1 %v17600_v44 }
 0xcbc   :  { %9560 = vmatpush1.bf16.msra.mxu0 %v17602_v46  ;;  %9601 = vmatpush1.bf16.msra.mxu1 %v17604_v35 }
 0xcbd   :  { %9561 = vmatprep.subr.bf16.mxu0 %v17612_v15  ;;  %9602 = vmatprep.subr.bf16.mxu1 %v17616_v50 }
 0xcc0   :  { %9562 = vmatpush1.bf16.msra.mxu0 %v17610_v47  ;;  %9603 = vmatpush1.bf16.msra.mxu1 %v17614_v49 }
 0xcc1   :  { %9563 = vmatprep.subr.bf16.mxu0 %v17618_v51  ;;  %9604 = vmatprep.subr.bf16.mxu1 %v17621_v58 }
 0xcc4   :  { %9564 = vmatpush1.bf16.msra.mxu0 %v17625_v28  ;;  %9605 = vmatpush1.bf16.msra.mxu1 %v17629_v57 }
 0xcc5   :  { %9565 = vmatprep.subr.bf16.mxu0 %v17634_v62  ;;  %9606 = vmatprep.subr.bf16.mxu1 %v17636_v18 }
 0xcc8   :  { %9566 = vmatpush1.bf16.msra.mxu0 %v17638_v55  ;;  %9607 = vmatpush1.bf16.msra.mxu1 %v17640_v48 }
 0xcc9   :  { %9567 = vmatprep.subr.bf16.mxu0 %v17646_v40  ;;  %9608 = vmatprep.subr.bf16.mxu1 %v17648_v32 }
 0xccc   :  { %9568 = vmatpush1.bf16.msra.mxu0 %v17650_v34  ;;  %9609 = vmatpush1.bf16.msra.mxu1 %v17652_v36 }
 0xccd   :  { %9569 = vmatprep.subr.bf16.mxu0 %v17658_v9  ;;  %9610 = vmatprep.subr.bf16.mxu1 %v17660_v53 }
 0xcd0   :  { %9570 = vmatpush1.bf16.msra.mxu0 %v17662_v12  ;;  %9611 = vmatpush1.bf16.msra.mxu1 %v17664_v23 }
 0xcd1   :  { %9849 = vmatprep.subr.bf16.mxu0 %v17670_v25  ;;  %9890 = vmatprep.subr.bf16.mxu1 %v17672_v42 }
 0xd5d   :  { %v8941_v7 = vpop.f32.mrb[104].mxu0  ;;  %v8982_v56 = vpop.f32.mrb[104].mxu1 }
 0xd5e   :  { %v8993_v38 = vrot.slane %v8941_v7, 5  ;;  %v8943_v61 = vpop.f32.mrb[105].mxu0  ;;  %v8984_v24 = vpop.f32.mrb[105].mxu1  ;;  %v8995_v45 = vrot.slane %v8982_v56, 5 }
 0xd5f   :  { %v8994_v11 = vrot.slane %v8943_v61, 5  ;;  %v8945_v21 = vpop.f32.mrb[106].mxu0  ;;  %v8986_v39 = vpop.f32.mrb[106].mxu1  ;;  %v8996_v41 = vrot.slane %v8984_v24, 5  ;;  %v9321_v24 = vrot.slane %v17529_v60, 7 }
 0xd60   :  { %v9001_v63 = vadd.f32 %v8993_v38, %v17203_v27  ;;  %v8946_v30 = vpop.f32.mrb[107].mxu0  ;;  %v8987_v26 = vpop.f32.mrb[107].mxu1  ;;  %v9003_v2 = vadd.f32 %v8995_v45, %v17214_v20 }
 0xd61   :  { %v9002_v0 = vadd.f32 %v8994_v11, %v17205_v33  ;;  %v9004_v5 = vadd.f32 %v8996_v41, %v17210_v52 }
 0xd62   :  { %v13537_v19 = vmul.f32 -1.442695, %v9001_v63 }
 0xd63   :  { %v13538_v8 = vmul.f32 -1.442695, %v9002_v0  ;;  %v13539_v1 = vmul.f32 -1.442695, %v9004_v5 }
 0xd64   :  { %15351 = vpow2.f32 %v13537_v19 }
 0xd65   :  { %15353 = vpow2.f32 %v13538_v8 }
 0xd66   :  { %15355 = vpow2.f32 %v13539_v1 }
 0xd67   :  { %15357 = vtanh.f32 %v9003_v2 }
 0xd6e   :  { %v15352_v7 = vpop.eup %15351 }
 0xd6f   :  { %v15354_v61 = vpop.eup %15353  ;;  %v9304_v21 = vadd.f32 1.0, %v15352_v7 }
 0xd70   :  { %v9310_v38 = vadd.f32 1.0, %v15354_v61  ;;  %v15356_v11 = vpop.eup %15355 }
 0xd71   :  { %15359 = vrcp.f32 %v9304_v21  ;;  %v15358_v39 = vpop.eup %15357  ;;  %v9317_v0 = vadd.f32 1.0, %v15356_v11 }
 0xd72   :  { %15361 = vrcp.f32 %v9310_v38 }
 0xd73   :  { %15363 = vrcp.f32 %v9317_v0 }
 0xd7b   :  { %v15360_v63 = vpop.eup %15359 }
 0xd7c   :  { %v15362_v30 = vpop.eup %15361  ;;  %v9324_v26 = vmul.f32 %v15360_v63, %v15358_v39 }
 0xd7d   :  { %v9323_v56 = vmul.f32 %v15362_v30, %v9321_v24  ;;  %v15364_v39 = vpop.eup %15363 }
 0xd7f   :  { %v17681_v19 = vadd.f32 %v9324_v26, %v9323_v56 }
 0xd81   :  { %15365 = vtanh.f32 %v17681_v19 }
 0xd85   :  { %v9237_v8 = vpop.f32.mrb[108].mxu0  ;;  %v9278_v41 = vpop.f32.mrb[108].mxu1 }
 0xd86   :  { %v9289_v5 = vrot.slane %v9237_v8, 4  ;;  %v9239_v45 = vpop.f32.mrb[109].mxu0  ;;  %v9280_v1 = vpop.f32.mrb[109].mxu1 }
 0xd87   :  { %v9290_v2 = vrot.slane %v9239_v45, 4  ;;  %v9241_v7 = vpop.f32.mrb[110].mxu0  ;;  %v9282_v61 = vpop.f32.mrb[110].mxu1  ;;  %v9292_v26 = vrot.slane %v9280_v1, 4  ;;  %v9291_v45 = vrot.slane %v9278_v41, 4 }
 0xd88   :  { %v9297_v21 = vadd.f32 %v9289_v5, %v17224_v6  ;;  %v9242_v60 = vpop.f32.mrb[111].mxu0  ;;  %v9283_v38 = vpop.f32.mrb[111].mxu1  ;;  %v17687_v61 = vld [vmem:[#allocation13 + $0x100] ss:$16 sps:$4 sm:$0xff]   ;;  %v17689_v5 = vld [vmem:[#allocation13 + $0x108] ss:$16 sps:$4 sm:$0xff]  }
 0xd89   :  { %v9298_v11 = vadd.f32 %v9290_v2, %v17226_v17  ;;  %v9300_v8 = vadd.f32 %v9292_v26, %v17233_v54  ;;  %v17691_v2 = vld [vmem:[#allocation13 + $0x124] ss:$16 sps:$4 sm:$0xff]   ;;  %v9299_v1 = vadd.f32 %v9291_v45, %v17238_v10  ;;  %v17698_v41 = vld [vmem:[#allocation13 + $0x120] ss:$16 sps:$4 sm:$0xff]  }
 0xd8a   :  { %v13540_v63 = vmul.f32 -1.442695, %v9297_v21  ;;  %v17693_v21 = vld [vmem:[#allocation13 + $0x12c] ss:$16 sps:$4 sm:$0xff]   ;;  %18572 = vst [vmem:[#allocation24_spill] sm:$0xff] %v17698_v41 }
 0xd8b   :  { %v15366_v24 = vpop.eup %15365  ;;  %v13541_v30 = vmul.f32 -1.442695, %v9298_v11  ;;  %18571 = vst [vmem:[#allocation23_spill] sm:$0xff] %v17693_v21  ;;  %v13542_v38 = vmul.f32 -1.442695, %v9300_v8 }
 0xd8c   :  { %15367 = vpow2.f32 %v13540_v63  ;;  %v9327_v0 = vmul.f32 %v15366_v24, %v15364_v39  ;;  %v17700_v11 = vld [vmem:[#allocation13 + $0x128] ss:$16 sps:$4 sm:$0xff]   ;;  %v17704_v63 = vld [vmem:[#allocation13 + $0x144] ss:$16 sps:$4 sm:$0xff]   ;;  %v17706_v24 = vld [vmem:[#allocation13 + $0x14c] ss:$16 sps:$4 sm:$0xff]  }
 0xd8d   :  { %15369 = vpow2.f32 %v13541_v30  ;;  %18573 = vst [vmem:[#allocation25_spill] sm:$0xff] %v17700_v11  ;;  %18574 = vst [vmem:[#allocation26_spill] sm:$0xff] %v17704_v63  ;;  %v17714_v8 = vld [vmem:[#allocation13 + $0x148] ss:$16 sps:$4 sm:$0xff]   ;;  %v17718_v45 = vld [vmem:[#allocation13 + $0x164] ss:$16 sps:$4 sm:$0xff]  }
 0xd8e   :  { %9355 = vst [vmem:[#allocation4] sm:$0x8] %v9327_v0  ;;  %v9357_v56 = vpack.c.bf16 %v9327_v0, %v9327_v0  ;;  %18575 = vst [vmem:[#allocation27_spill] sm:$0xff] %v17706_v24  ;;  %15371 = vpow2.f32 %v13542_v38  ;;  %v17726_v38 = vld [vmem:[#allocation13 + $0x168] ss:$16 sps:$4 sm:$0xff]  }
 0xd8f   :  { %15373 = vtanh.f32 %v9299_v1  ;;  %18577 = vst [vmem:[#allocation29_spill] sm:$0xff] %v17714_v8  ;;  %18578 = vst [vmem:[#allocation30_spill] sm:$0xff] %v17718_v45  ;;  %v17730_v1 = vld [vmem:[#allocation13 + $0x184] ss:$16 sps:$4 sm:$0xff]  }
 0xd90   :  { %v9391_v7 = vshrl.u32 %v9357_v56, 16  ;;  %v17712_v56 = vld [vmem:[#allocation13 + $0x140] ss:$16 sps:$4 sm:$0xff]   ;;  %18581 = vst [vmem:[#allocation33_spill] sm:$0xff] %v17726_v38  ;;  %18582 = vst [vmem:[#allocation34_spill] sm:$0xff] %v17730_v1 }
 0xd91   :  { %18576 = vst [vmem:[#allocation28_spill] sm:$0xff] %v17712_v56 }
 0xd92   :  { %v9393_v60 = vrot.slane %v9391_v7, 1  ;;  %v17720_v7 = vld [vmem:[#allocation13 + $0x16c] ss:$16 sps:$4 sm:$0xff]  }
 0xd93   :  { %18579 = vst [vmem:[#allocation31_spill] sm:$0xff] %v17720_v7 }
 0xd94   :  { %9588 = vmatmul.mubr.bf16.vlgmr.msra.gmra.mrb[112].mxu0 %v9393_v60  ;;  %9629 = vmatmul.mubr.bf16.vlgmr.msra.gmra.mrb[112].mxu1 %v9393_v60  ;;  %v17724_v60 = vld [vmem:[#allocation13 + $0x160] ss:$16 sps:$4 sm:$0xff]  }
 0xd95   :  { %9850 = vmatpush1.bf16.msra.mxu0 %v17687_v61  ;;  %9891 = vmatpush1.bf16.msra.mxu1 %v17689_v5  ;;  %18580 = vst [vmem:[#allocation32_spill] sm:$0xff] %v17724_v60 }
 0xd96   :  { %v15368_v39 = vpop.eup %15367  ;;  %9851 = vmatprep.subr.bf16.mxu0 %v17691_v2  ;;  %9892 = vmatprep.subr.bf16.mxu1 %v17693_v21  ;;  %v17757_v21 = vld [vmem:[#allocation13 + $0x1cc] ss:$16 sps:$4 sm:$0xff]  }
 0xd97   :  { %v15370_v30 = vpop.eup %15369  ;;  %v9331_v26 = vadd.f32 1.0, %v15368_v39  ;;  %9881 = vmatprep.mubr.bf16.mxu0 %v18441_v37  ;;  %9922 = vmatprep.mubr.bf16.mxu1 %v18441_v37  ;;  %v17732_v39 = vld [vmem:[#allocation13 + $0x18c] ss:$16 sps:$4 sm:$0xff]   ;;  %18584 = vst [vmem:[#allocation36_spill] sm:$0xff] %v17757_v21 }
 0xd98   :  { %v9337_v0 = vadd.f32 1.0, %v15370_v30  ;;  %18583 = vst [vmem:[#allocation35_spill] sm:$0xff] %v17732_v39  ;;  %v15372_v30 = vpop.eup %15371 }
 0xd99   :  { %15375 = vrcp.f32 %v9331_v26  ;;  %9852 = vmatpush1.bf16.msra.mxu0 %v17698_v41  ;;  %9893 = vmatpush1.bf16.msra.mxu1 %v17700_v11  ;;  %v17736_v26 = vld [vmem:[#allocation13 + $0x180] ss:$16 sps:$4 sm:$0xff]   ;;  %v9344_v11 = vadd.f32 1.0, %v15372_v30 }
 0xd9a   :  { %15377 = vrcp.f32 %v9337_v0  ;;  %9853 = vmatprep.subr.bf16.mxu0 %v17704_v63  ;;  %9894 = vmatprep.subr.bf16.mxu1 %v17706_v24  ;;  %v17738_v0 = vld [vmem:[#allocation13 + $0x188] ss:$16 sps:$4 sm:$0xff]   ;;  %v9348_v24 = vrot.slane %v17559_v22, 1  ;;  %v17749_v41 = vld [vmem:[#allocation13 + $0x1a0] ss:$16 sps:$4 sm:$0xff]  }
 0xd9b   :  { %15379 = vrcp.f32 %v9344_v11  ;;  %v17776_v11 = vld [vmem:[#allocation13 + $0x1e0] ss:$16 sps:$4 sm:$0xff]  }
 0xd9d   :  { %9854 = vmatpush1.bf16.msra.mxu0 %v17712_v56  ;;  %9895 = vmatpush1.bf16.msra.mxu1 %v17714_v8  ;;  %v15374_v8 = vpop.eup %15373 }
 0xd9e   :  { %9855 = vmatprep.subr.bf16.mxu0 %v17718_v45  ;;  %9896 = vmatprep.subr.bf16.mxu1 %v17720_v7  ;;  %v17742_v45 = vld [vmem:[#allocation13 + $0x1a4] ss:$16 sps:$4 sm:$0xff]   ;;  %v17744_v7 = vld [vmem:[#allocation13 + $0x1ac] ss:$16 sps:$4 sm:$0xff]  }
 0xda1   :  { %9856 = vmatpush1.bf16.msra.mxu0 %v17724_v60  ;;  %9897 = vmatpush1.bf16.msra.mxu1 %v17726_v38 }
 0xda2   :  { %9857 = vmatprep.subr.bf16.mxu0 %v17730_v1  ;;  %9898 = vmatprep.subr.bf16.mxu1 %v17732_v39  ;;  %v17751_v1 = vld [vmem:[#allocation13 + $0x1a8] ss:$16 sps:$4 sm:$0xff]   ;;  %v17755_v39 = vld [vmem:[#allocation13 + $0x1c4] ss:$16 sps:$4 sm:$0xff]  }
 0xda3   :  { %v15376_v56 = vpop.eup %15375 }
 0xda4   :  { %v15378_v63 = vpop.eup %15377  ;;  %v9351_v60 = vmul.f32 %v15376_v56, %v15374_v8  ;;  %v17770_v56 = vld [vmem:[#allocation13 + $0x1e4] ss:$16 sps:$4 sm:$0xff]   ;;  %v17772_v8 = vld [vmem:[#allocation13 + $0x1ec] ss:$16 sps:$4 sm:$0xff]  }
 0xda5   :  { %v9350_v38 = vmul.f32 %v15378_v63, %v9348_v24  ;;  %9858 = vmatpush1.bf16.msra.mxu0 %v17736_v26  ;;  %9899 = vmatpush1.bf16.msra.mxu1 %v17738_v0  ;;  %v17763_v63 = vld [vmem:[#allocation13 + $0x1c0] ss:$16 sps:$4 sm:$0xff]   ;;  %v17765_v24 = vld [vmem:[#allocation13 + $0x1c8] ss:$16 sps:$4 sm:$0xff]  }
 0xda6   :  { %9859 = vmatprep.subr.bf16.mxu0 %v17742_v45  ;;  %9900 = vmatprep.subr.bf16.mxu1 %v17744_v7  ;;  %18585 = vst [vmem:[#allocation37_spill] sm:$0xff] %v17763_v63  ;;  %18586 = vst [vmem:[#allocation38_spill] sm:$0xff] %v17765_v24 }
 0xda7   :  { %v17759_v22 = vadd.f32 %v9351_v60, %v9350_v38  ;;  %v17778_v60 = vld [vmem:[#allocation13 + $0x1e8] ss:$16 sps:$4 sm:$0xff]   ;;  %v15380_v38 = vpop.eup %15379 }
 0xda9   :  { %9860 = vmatpush1.bf16.msra.mxu0 %v17749_v41  ;;  %9901 = vmatpush1.bf16.msra.mxu1 %v17751_v1  ;;  %15381 = vtanh.f32 %v17759_v22 }
 0xdaa   :  { %9861 = vmatprep.subr.bf16.mxu0 %v17755_v39  ;;  %9902 = vmatprep.subr.bf16.mxu1 %v17757_v21 }
 0xdad   :  { %9862 = vmatpush1.bf16.msra.mxu0 %v17763_v63  ;;  %9903 = vmatpush1.bf16.msra.mxu1 %v17765_v24 }
 0xdae   :  { %9863 = vmatprep.subr.bf16.mxu0 %v17770_v56  ;;  %9904 = vmatprep.subr.bf16.mxu1 %v17772_v8 }
 0xdb1   :  { %9864 = vmatpush1.bf16.msra.mxu0 %v17776_v11  ;;  %9905 = vmatpush1.bf16.msra.mxu1 %v17778_v60 }
 0xdb2   :  { %10199 = vmatprep.subr.bf16.mxu0 %v17574_v4  ;;  %10240 = vmatprep.subr.bf16.mxu1 %v17576_v59 }
 0xdb3   :  { %v15382_v30 = vpop.eup %15381 }
 0xdb4   :  { %v9354_v63 = vmul.f32 %v15382_v30, %v15380_v38 }
 0xdb6   :  { %9356 = vst [vmem:[#allocation5] sm:$0x10] %v9354_v63  ;;  %v9653_v24 = vpack.c.bf16 %v9354_v63, %v9354_v63 }
 0xdb8   :  { %v9687_v21 = vrot.slane %v9653_v24, 2 }
 0xdba   :  { %9882 = vmatmul.mubr.bf16.vlgmr.msra.gmra.mrb[116].mxu0 %v9687_v21  ;;  %9923 = vmatmul.mubr.bf16.vlgmr.msra.gmra.mrb[116].mxu1 %v9687_v21 }
 0xdbb   :  { %10200 = vmatpush1.bf16.msra.mxu0 %v17578_v31  ;;  %10241 = vmatpush1.bf16.msra.mxu1 %v17580_v29 }
 0xdbc   :  { %10201 = vmatprep.subr.bf16.mxu0 %v17586_v3  ;;  %10242 = vmatprep.subr.bf16.mxu1 %v17588_v14 }
 0xdbd   :  { %10231 = vmatprep.mubr.bf16.mxu0 %v18441_v37  ;;  %10272 = vmatprep.mubr.bf16.mxu1 %v18441_v37 }
 0xdbf   :  { %10202 = vmatpush1.bf16.msra.mxu0 %v17590_v13  ;;  %10243 = vmatpush1.bf16.msra.mxu1 %v17592_v16 }
 0xdc0   :  { %10203 = vmatprep.subr.bf16.mxu0 %v17598_v43  ;;  %10244 = vmatprep.subr.bf16.mxu1 %v17600_v44 }
 0xdc3   :  { %10204 = vmatpush1.bf16.msra.mxu0 %v17602_v46  ;;  %10245 = vmatpush1.bf16.msra.mxu1 %v17604_v35 }
 0xdc4   :  { %10205 = vmatprep.subr.bf16.mxu0 %v17612_v15  ;;  %10246 = vmatprep.subr.bf16.mxu1 %v17616_v50 }
 0xdc7   :  { %10206 = vmatpush1.bf16.msra.mxu0 %v17610_v47  ;;  %10247 = vmatpush1.bf16.msra.mxu1 %v17614_v49 }
 0xdc8   :  { %10207 = vmatprep.subr.bf16.mxu0 %v17618_v51  ;;  %10248 = vmatprep.subr.bf16.mxu1 %v17621_v58 }
 0xdcb   :  { %10208 = vmatpush1.bf16.msra.mxu0 %v17625_v28  ;;  %10249 = vmatpush1.bf16.msra.mxu1 %v17629_v57 }
 0xdcc   :  { %10209 = vmatprep.subr.bf16.mxu0 %v17634_v62  ;;  %10250 = vmatprep.subr.bf16.mxu1 %v17636_v18 }
 0xdcf   :  { %10210 = vmatpush1.bf16.msra.mxu0 %v17638_v55  ;;  %10251 = vmatpush1.bf16.msra.mxu1 %v17640_v48 }
 0xdd0   :  { %10211 = vmatprep.subr.bf16.mxu0 %v17646_v40  ;;  %10252 = vmatprep.subr.bf16.mxu1 %v17648_v32 }
 0xdd3   :  { %10212 = vmatpush1.bf16.msra.mxu0 %v17650_v34  ;;  %10253 = vmatpush1.bf16.msra.mxu1 %v17652_v36  ;;  %v9967_v34 = vrot.slane %v17681_v19, 7 }
 0xdd4   :  { %10213 = vmatprep.subr.bf16.mxu0 %v17658_v9  ;;  %10254 = vmatprep.subr.bf16.mxu1 %v17660_v53 }
 0xdd7   :  { %10214 = vmatpush1.bf16.msra.mxu0 %v17662_v12  ;;  %10255 = vmatpush1.bf16.msra.mxu1 %v17664_v23 }
 0xdd8   :  { %10495 = vmatprep.subr.bf16.mxu0 %v17670_v25  ;;  %10536 = vmatprep.subr.bf16.mxu1 %v17672_v42 }
 0xe67   :  { %v9589_v4 = vpop.f32.mrb[112].mxu0  ;;  %v9630_v59 = vpop.f32.mrb[112].mxu1 }
 0xe68   :  { %v9641_v31 = vrot.slane %v9589_v4, 4  ;;  %v9591_v29 = vpop.f32.mrb[113].mxu0  ;;  %v9632_v3 = vpop.f32.mrb[113].mxu1  ;;  %v9643_v51 = vrot.slane %v9630_v59, 4 }
 0xe69   :  { %v9642_v14 = vrot.slane %v9591_v29, 4  ;;  %v9593_v13 = vpop.f32.mrb[114].mxu0  ;;  %v9634_v16 = vpop.f32.mrb[114].mxu1  ;;  %v9644_v49 = vrot.slane %v9632_v3, 4 }
 0xe6a   :  { %v9649_v43 = vadd.f32 %v9641_v31, %v17203_v27  ;;  %v9594_v44 = vpop.f32.mrb[115].mxu0  ;;  %v9635_v46 = vpop.f32.mrb[115].mxu1  ;;  %v9651_v28 = vadd.f32 %v9643_v51, %v17214_v20 }
 0xe6b   :  { %v9650_v35 = vadd.f32 %v9642_v14, %v17205_v33  ;;  %v9652_v50 = vadd.f32 %v9644_v49, %v17210_v52 }
 0xe6c   :  { %v13607_v47 = vmul.f32 -1.442695, %v9649_v43 }
 0xe6d   :  { %v13608_v15 = vmul.f32 -1.442695, %v9650_v35  ;;  %v13609_v58 = vmul.f32 -1.442695, %v9652_v50 }
 0xe6e   :  { %15383 = vpow2.f32 %v13607_v47 }
 0xe6f   :  { %15385 = vpow2.f32 %v13608_v15 }
 0xe70   :  { %15387 = vpow2.f32 %v13609_v58  ;;  %v18587_v58 = vld [vmem:[#allocation23_spill] sm:$0xff] }
 0xe71   :  { %15389 = vtanh.f32 %v9651_v28 }
 0xe78   :  { %v15384_v57 = vpop.eup %15383 }
 0xe79   :  { %v15386_v62 = vpop.eup %15385  ;;  %v9950_v18 = vadd.f32 1.0, %v15384_v57 }
 0xe7a   :  { %v9956_v55 = vadd.f32 1.0, %v15386_v62  ;;  %v15388_v48 = vpop.eup %15387 }
 0xe7b   :  { %15391 = vrcp.f32 %v9950_v18  ;;  %v15390_v40 = vpop.eup %15389  ;;  %v9963_v53 = vadd.f32 1.0, %v15388_v48  ;;  %v18588_v18 = vld [vmem:[#allocation24_spill] sm:$0xff]  ;;  %v18593_v48 = vld [vmem:[#allocation29_spill] sm:$0xff] }
 0xe7c   :  { %15393 = vrcp.f32 %v9956_v55  ;;  %v18592_v55 = vld [vmem:[#allocation28_spill] sm:$0xff] }
 0xe7d   :  { %15395 = vrcp.f32 %v9963_v53 }
 0xe85   :  { %v15392_v32 = vpop.eup %15391 }
 0xe86   :  { %v15394_v36 = vpop.eup %15393  ;;  %v9970_v9 = vmul.f32 %v15392_v32, %v15390_v40  ;;  %v18594_v40 = vld [vmem:[#allocation30_spill] sm:$0xff]  ;;  %v18595_v32 = vld [vmem:[#allocation31_spill] sm:$0xff] }
 0xe87   :  { %v9969_v12 = vmul.f32 %v15394_v36, %v9967_v34  ;;  %v15396_v16 = vpop.eup %15395  ;;  %v18596_v36 = vld [vmem:[#allocation32_spill] sm:$0xff] }
 0xe89   :  { %v17825_v23 = vadd.f32 %v9970_v9, %v9969_v12  ;;  %v18597_v9 = vld [vmem:[#allocation33_spill] sm:$0xff]  ;;  %v18598_v12 = vld [vmem:[#allocation34_spill] sm:$0xff] }
 0xe8b   :  { %15397 = vtanh.f32 %v17825_v23 }
 0xe8d   :  { %v9883_v25 = vpop.f32.mrb[116].mxu0  ;;  %v9924_v42 = vpop.f32.mrb[116].mxu1 }
 0xe8e   :  { %v9935_v21 = vrot.slane %v9883_v25, 5  ;;  %v9885_v63 = vpop.f32.mrb[117].mxu0  ;;  %v9926_v24 = vpop.f32.mrb[117].mxu1  ;;  %v9937_v35 = vrot.slane %v9924_v42, 5  ;;  %v18599_v25 = vld [vmem:[#allocation35_spill] sm:$0xff] }
 0xe8f   :  { %v9936_v38 = vrot.slane %v9885_v63, 5  ;;  %v9887_v30 = vpop.f32.mrb[118].mxu0  ;;  %v9928_v4 = vpop.f32.mrb[118].mxu1  ;;  %v9938_v13 = vrot.slane %v9926_v24, 5 }
 0xe90   :  { %v9943_v59 = vadd.f32 %v9935_v21, %v17224_v6  ;;  %v9888_v19 = vpop.f32.mrb[119].mxu0  ;;  %v9929_v31 = vpop.f32.mrb[119].mxu1  ;;  %v9945_v50 = vadd.f32 %v9937_v35, %v17238_v10  ;;  %v9994_v21 = vrot.slane %v17759_v22, 1  ;;  %v18600_v22 = vld [vmem:[#allocation36_spill] sm:$0xff] }
 0xe91   :  { %v9944_v29 = vadd.f32 %v9936_v38, %v17226_v17  ;;  %v9946_v46 = vadd.f32 %v9938_v13, %v17233_v54  ;;  %v17882_v19 = vld [vmem:[#allocation13 + $0x24] ss:$16 sps:$4 sm:$0xff]   ;;  %v17884_v31 = vld [vmem:[#allocation13 + $0x2c] ss:$16 sps:$4 sm:$0xff]   ;;  %v17910_v35 = vld [vmem:[#allocation13 + $0x68] ss:$16 sps:$4 sm:$0xff]  }
 0xe92   :  { %v13610_v3 = vmul.f32 -1.442695, %v9943_v59  ;;  %v17896_v13 = vld [vmem:[#allocation13 + $0x4c] ss:$16 sps:$4 sm:$0xff]  }
 0xe93   :  { %v13611_v14 = vmul.f32 -1.442695, %v9944_v29  ;;  %v13612_v49 = vmul.f32 -1.442695, %v9946_v46  ;;  %v17886_v29 = vld [vmem:[#allocation13 + $0x20] ss:$16 sps:$4 sm:$0xff]  }
 0xe94   :  { %15399 = vpow2.f32 %v13610_v3  ;;  %v17888_v3 = vld [vmem:[#allocation13 + $0x28] ss:$16 sps:$4 sm:$0xff]   ;;  %v17908_v46 = vld [vmem:[#allocation13 + $0x64] ss:$16 sps:$4 sm:$0xff]  }
 0xe95   :  { %v15398_v43 = vpop.eup %15397  ;;  %15401 = vpow2.f32 %v13611_v14  ;;  %v17894_v14 = vld [vmem:[#allocation13 + $0x44] ss:$16 sps:$4 sm:$0xff]  }
 0xe96   :  { %v9973_v44 = vmul.f32 %v15398_v43, %v15396_v16  ;;  %15403 = vpow2.f32 %v13612_v49  ;;  %v17898_v16 = vld [vmem:[#allocation13 + $0x40] ss:$16 sps:$4 sm:$0xff]   ;;  %v17900_v43 = vld [vmem:[#allocation13 + $0x48] ss:$16 sps:$4 sm:$0xff]   ;;  %v17917_v49 = vld [vmem:[#allocation13 + $0x8c] ss:$16 sps:$4 sm:$0xff]  }
 0xe97   :  { %15405 = vtanh.f32 %v9945_v50  ;;  %v17921_v50 = vld [vmem:[#allocation13 + $0x80] ss:$16 sps:$4 sm:$0xff]  }
 0xe98   :  { %10001 = vst [vmem:[#allocation4] sm:$0x10] %v9973_v44  ;;  %v10003_v47 = vpack.c.bf16 %v9973_v44, %v9973_v44  ;;  %v17906_v44 = vld [vmem:[#allocation13 + $0x60] ss:$16 sps:$4 sm:$0xff]  }
 0xe9a   :  { %v10037_v15 = vrot.slane %v10003_v47, 2  ;;  %v17912_v47 = vld [vmem:[#allocation13 + $0x6c] ss:$16 sps:$4 sm:$0xff]  }
 0xe9c   :  { %10232 = vmatmul.mubr.bf16.vlgmr.msra.gmra.mrb[120].mxu0 %v10037_v15  ;;  %10273 = vmatmul.mubr.bf16.vlgmr.msra.gmra.mrb[120].mxu1 %v10037_v15  ;;  %v17914_v15 = vld [vmem:[#allocation13 + $0x84] ss:$16 sps:$4 sm:$0xff]  }
 0xe9d   :  { %10496 = vmatpush1.bf16.msra.mxu0 %v17687_v61  ;;  %10537 = vmatpush1.bf16.msra.mxu1 %v17689_v5  ;;  %v18589_v61 = vld [vmem:[#allocation25_spill] sm:$0xff]  ;;  %v18590_v5 = vld [vmem:[#allocation26_spill] sm:$0xff] }
 0xe9e   :  { %v15400_v51 = vpop.eup %15399  ;;  %10497 = vmatprep.subr.bf16.mxu0 %v17691_v2  ;;  %10538 = vmatprep.subr.bf16.mxu1 %v18587_v58  ;;  %v18591_v2 = vld [vmem:[#allocation27_spill] sm:$0xff] }
 0xe9f   :  { %v15402_v28 = vpop.eup %15401  ;;  %v9977_v57 = vadd.f32 1.0, %v15400_v51  ;;  %10527 = vmatprep.mubr.bf16.mxu0 %v18441_v37  ;;  %10568 = vmatprep.mubr.bf16.mxu1 %v18441_v37  ;;  %v17925_v51 = vld [vmem:[#allocation13 + $0x88] ss:$16 sps:$4 sm:$0xff]   ;;  %v17930_v58 = vld [vmem:[#allocation13 + $0xa4] ss:$16 sps:$4 sm:$0xff]  }
 0xea0   :  { %v9983_v62 = vadd.f32 1.0, %v15402_v28  ;;  %v15404_v34 = vpop.eup %15403  ;;  %v17932_v28 = vld [vmem:[#allocation13 + $0xac] ss:$16 sps:$4 sm:$0xff]  }
 0xea1   :  { %15407 = vrcp.f32 %v9977_v57  ;;  %10498 = vmatpush1.bf16.msra.mxu0 %v18588_v18  ;;  %10539 = vmatpush1.bf16.msra.mxu1 %v18589_v61  ;;  %v15406_v53 = vpop.eup %15405  ;;  %v9990_v38 = vadd.f32 1.0, %v15404_v34  ;;  %v17934_v57 = vld [vmem:[#allocation13 + $0xa0] ss:$16 sps:$4 sm:$0xff]   ;;  %v17942_v18 = vld [vmem:[#allocation13 + $0xc4] ss:$16 sps:$4 sm:$0xff]  }
 0xea2   :  { %15409 = vrcp.f32 %v9983_v62  ;;  %10499 = vmatprep.subr.bf16.mxu0 %v18590_v5  ;;  %10540 = vmatprep.subr.bf16.mxu1 %v18591_v2  ;;  %v17936_v62 = vld [vmem:[#allocation13 + $0xa8] ss:$16 sps:$4 sm:$0xff]   ;;  %v17944_v61 = vld [vmem:[#allocation13 + $0xcc] ss:$16 sps:$4 sm:$0xff]   ;;  %v17946_v5 = vld [vmem:[#allocation13 + $0xc0] ss:$16 sps:$4 sm:$0xff]  }
 0xea3   :  { %15411 = vrcp.f32 %v9990_v38  ;;  %v17948_v2 = vld [vmem:[#allocation13 + $0xc8] ss:$16 sps:$4 sm:$0xff]   ;;  %v17966_v34 = vld [vmem:[#allocation13 + $0x104] ss:$16 sps:$4 sm:$0xff]  }
 0xea5   :  { %10500 = vmatpush1.bf16.msra.mxu0 %v18592_v55  ;;  %10541 = vmatpush1.bf16.msra.mxu1 %v18593_v48  ;;  %v17954_v55 = vld [vmem:[#allocation13 + $0xe4] ss:$16 sps:$4 sm:$0xff]   ;;  %v17956_v48 = vld [vmem:[#allocation13 + $0xec] ss:$16 sps:$4 sm:$0xff]  }
 0xea6   :  { %10501 = vmatprep.subr.bf16.mxu0 %v18594_v40  ;;  %10542 = vmatprep.subr.bf16.mxu1 %v18595_v32  ;;  %v17958_v40 = vld [vmem:[#allocation13 + $0xe0] ss:$16 sps:$4 sm:$0xff]   ;;  %v17960_v32 = vld [vmem:[#allocation13 + $0xe8] ss:$16 sps:$4 sm:$0xff]  }
 0xea9   :  { %10502 = vmatpush1.bf16.msra.mxu0 %v18596_v36  ;;  %10543 = vmatpush1.bf16.msra.mxu1 %v18597_v9  ;;  %v17968_v36 = vld [vmem:[#allocation13 + $0x10c] ss:$16 sps:$4 sm:$0xff]  }
 0xeaa   :  { %10503 = vmatprep.subr.bf16.mxu0 %v18598_v12  ;;  %10544 = vmatprep.subr.bf16.mxu1 %v18599_v25 }
 0xeab   :  { %v15408_v42 = vpop.eup %15407 }
 0xeac   :  { %v15410_v63 = vpop.eup %15409  ;;  %v9997_v24 = vmul.f32 %v15408_v42, %v15406_v53 }
 0xead   :  { %v9996_v30 = vmul.f32 %v15410_v63, %v9994_v21  ;;  %10504 = vmatpush1.bf16.msra.mxu0 %v17736_v26  ;;  %10545 = vmatpush1.bf16.msra.mxu1 %v17738_v0  ;;  %v18601_v26 = vld [vmem:[#allocation37_spill] sm:$0xff]  ;;  %v18602_v0 = vld [vmem:[#allocation38_spill] sm:$0xff] }
 0xeae   :  { %10505 = vmatprep.subr.bf16.mxu0 %v17742_v45  ;;  %10546 = vmatprep.subr.bf16.mxu1 %v17744_v7 }
 0xeaf   :  { %v17855_v4 = vadd.f32 %v9997_v24, %v9996_v30 }
 0xeb1   :  { %10506 = vmatpush1.bf16.msra.mxu0 %v17749_v41  ;;  %10547 = vmatpush1.bf16.msra.mxu1 %v17751_v1  ;;  %15413 = vtanh.f32 %v17855_v4  ;;  %v15412_v41 = vpop.eup %15411 }
 0xeb2   :  { %10507 = vmatprep.subr.bf16.mxu0 %v17755_v39  ;;  %10548 = vmatprep.subr.bf16.mxu1 %v18600_v22 }
 0xeb5   :  { %10508 = vmatpush1.bf16.msra.mxu0 %v18601_v26  ;;  %10549 = vmatpush1.bf16.msra.mxu1 %v18602_v0 }
 0xeb6   :  { %10509 = vmatprep.subr.bf16.mxu0 %v17770_v56  ;;  %10550 = vmatprep.subr.bf16.mxu1 %v17772_v8  ;;  %v17870_v56 = vld [vmem:[#allocation13 + $0x4] ss:$16 sps:$4 sm:$0xff]   ;;  %v17872_v8 = vld [vmem:[#allocation13 + $0xc] ss:$16 sps:$4 sm:$0xff]  }
 0xeb9   :  { %10510 = vmatpush1.bf16.msra.mxu0 %v17776_v11  ;;  %10551 = vmatpush1.bf16.msra.mxu1 %v17778_v60  ;;  %v17874_v11 = vld [vmem:[#allocation13] ss:$16 sps:$4 sm:$0xff]   ;;  %v17876_v60 = vld [vmem:[#allocation13 + $0x8] ss:$16 sps:$4 sm:$0xff]  }
 0xeba   :  { %10847 = vmatprep.subr.bf16.mxu0 %v17870_v56  ;;  %10888 = vmatprep.subr.bf16.mxu1 %v17872_v8 }
 0xebb   :  { %v15414_v45 = vpop.eup %15413 }
 0xebc   :  { %v10000_v7 = vmul.f32 %v15414_v45, %v15412_v41 }
 0xebe   :  { %10002 = vst [vmem:[#allocation5] sm:$0x8] %v10000_v7  ;;  %v10297_v1 = vpack.c.bf16 %v10000_v7, %v10000_v7 }
 0xec0   :  { %v10331_v39 = vshrl.u32 %v10297_v1, 16 }
 0xec2   :  { %v10333_v59 = vrot.slane %v10331_v39, 1 }
 0xec4   :  { %10528 = vmatmul.mubr.bf16.vlgmr.msra.gmra.mrb[124].mxu0 %v10333_v59  ;;  %10569 = vmatmul.mubr.bf16.vlgmr.msra.gmra.mrb[124].mxu1 %v10333_v59 }
 0xec5   :  { %10879 = vmatprep.mubr.bf16.mxu0 %v18441_v37  ;;  %10920 = vmatprep.mubr.bf16.mxu1 %v18441_v37 }
 0xec6   :  { %10848 = vmatpush1.bf16.msra.mxu0 %v17874_v11  ;;  %10889 = vmatpush1.bf16.msra.mxu1 %v17876_v60 }
 0xec7   :  { %10849 = vmatprep.subr.bf16.mxu0 %v17882_v19  ;;  %10890 = vmatprep.subr.bf16.mxu1 %v17884_v31 }
 0xeca   :  { %10850 = vmatpush1.bf16.msra.mxu0 %v17886_v29  ;;  %10891 = vmatpush1.bf16.msra.mxu1 %v17888_v3 }
 0xecb   :  { %10851 = vmatprep.subr.bf16.mxu0 %v17894_v14  ;;  %10892 = vmatprep.subr.bf16.mxu1 %v17896_v13 }
 0xece   :  { %10852 = vmatpush1.bf16.msra.mxu0 %v17898_v16  ;;  %10893 = vmatpush1.bf16.msra.mxu1 %v17900_v43 }
 0xecf   :  { %10853 = vmatprep.subr.bf16.mxu0 %v17908_v46  ;;  %10894 = vmatprep.subr.bf16.mxu1 %v17912_v47 }
 0xed2   :  { %10854 = vmatpush1.bf16.msra.mxu0 %v17906_v44  ;;  %10895 = vmatpush1.bf16.msra.mxu1 %v17910_v35 }
 0xed3   :  { %10855 = vmatprep.subr.bf16.mxu0 %v17914_v15  ;;  %10896 = vmatprep.subr.bf16.mxu1 %v17917_v49 }
 0xed6   :  { %10856 = vmatpush1.bf16.msra.mxu0 %v17921_v50  ;;  %10897 = vmatpush1.bf16.msra.mxu1 %v17925_v51 }
 0xed7   :  { %10857 = vmatprep.subr.bf16.mxu0 %v17930_v58  ;;  %10898 = vmatprep.subr.bf16.mxu1 %v17932_v28 }
 0xeda   :  { %10858 = vmatpush1.bf16.msra.mxu0 %v17934_v57  ;;  %10899 = vmatpush1.bf16.msra.mxu1 %v17936_v62 }
 0xedb   :  { %10859 = vmatprep.subr.bf16.mxu0 %v17942_v18  ;;  %10900 = vmatprep.subr.bf16.mxu1 %v17944_v61 }
 0xede   :  { %10860 = vmatpush1.bf16.msra.mxu0 %v17946_v5  ;;  %10901 = vmatpush1.bf16.msra.mxu1 %v17948_v2 }
 0xedf   :  { %10861 = vmatprep.subr.bf16.mxu0 %v17954_v55  ;;  %10902 = vmatprep.subr.bf16.mxu1 %v17956_v48 }
 0xee2   :  { %10862 = vmatpush1.bf16.msra.mxu0 %v17958_v40  ;;  %10903 = vmatpush1.bf16.msra.mxu1 %v17960_v32 }
 0xee3   :  { %11141 = vmatprep.subr.bf16.mxu0 %v17966_v34  ;;  %11182 = vmatprep.subr.bf16.mxu1 %v17968_v36 }
 0xf6f   :  { %v10233_v9 = vpop.f32.mrb[120].mxu0  ;;  %v10274_v53 = vpop.f32.mrb[120].mxu1 }
 0xf70   :  { %v10285_v12 = vrot.slane %v10233_v9, 3  ;;  %v10235_v25 = vpop.f32.mrb[121].mxu0  ;;  %v10276_v42 = vpop.f32.mrb[121].mxu1  ;;  %v10287_v1 = vrot.slane %v10274_v53, 3 }
 0xf71   :  { %v10286_v21 = vrot.slane %v10235_v25, 3  ;;  %v10237_v63 = vpop.f32.mrb[122].mxu0  ;;  %v10278_v24 = vpop.f32.mrb[122].mxu1  ;;  %v10288_v45 = vrot.slane %v10276_v42, 3  ;;  %v10613_v42 = vrot.slane %v17825_v23, 7 }
 0xf72   :  { %v10293_v38 = vadd.f32 %v10285_v12, %v17203_v27  ;;  %v10238_v30 = vpop.f32.mrb[123].mxu0  ;;  %v10279_v22 = vpop.f32.mrb[123].mxu1  ;;  %v10295_v59 = vadd.f32 %v10287_v1, %v17214_v20 }
 0xf73   :  { %v10294_v26 = vadd.f32 %v10286_v21, %v17205_v33  ;;  %v10296_v7 = vadd.f32 %v10288_v45, %v17210_v52 }
 0xf74   :  { %v13677_v0 = vmul.f32 -1.442695, %v10293_v38 }
 0xf75   :  { %v13678_v41 = vmul.f32 -1.442695, %v10294_v26  ;;  %v13679_v39 = vmul.f32 -1.442695, %v10296_v7 }
 0xf76   :  { %15415 = vpow2.f32 %v13677_v0 }
 0xf77   :  { %15417 = vpow2.f32 %v13678_v41 }
 0xf78   :  { %15419 = vpow2.f32 %v13679_v39 }
 0xf79   :  { %15421 = vtanh.f32 %v10295_v59 }
 0xf80   :  { %v15416_v9 = vpop.eup %15415 }
 0xf81   :  { %v15418_v25 = vpop.eup %15417  ;;  %v10596_v63 = vadd.f32 1.0, %v15416_v9 }
 0xf82   :  { %v10602_v12 = vadd.f32 1.0, %v15418_v25  ;;  %v15420_v21 = vpop.eup %15419 }
 0xf83   :  { %15423 = vrcp.f32 %v10596_v63  ;;  %v15422_v24 = vpop.eup %15421  ;;  %v10609_v26 = vadd.f32 1.0, %v15420_v21 }
 0xf84   :  { %15425 = vrcp.f32 %v10602_v12 }
 0xf85   :  { %15427 = vrcp.f32 %v10609_v26 }
 0xf8d   :  { %v15424_v38 = vpop.eup %15423 }
 0xf8e   :  { %v15426_v30 = vpop.eup %15425  ;;  %v10616_v22 = vmul.f32 %v15424_v38, %v15422_v24 }
 0xf8f   :  { %v10615_v53 = vmul.f32 %v15426_v30, %v10613_v42  ;;  %v15428_v24 = vpop.eup %15427 }
 0xf91   :  { %v17977_v0 = vadd.f32 %v10616_v22, %v10615_v53 }
 0xf93   :  { %15429 = vtanh.f32 %v17977_v0 }
 0xf97   :  { %v10529_v41 = vpop.f32.mrb[124].mxu0  ;;  %v10570_v45 = vpop.f32.mrb[124].mxu1 }
 0xf98   :  { %v10581_v7 = vrot.slane %v10529_v41, 6  ;;  %v10531_v1 = vpop.f32.mrb[125].mxu0  ;;  %v10572_v39 = vpop.f32.mrb[125].mxu1 }
 0xf99   :  { %v10582_v59 = vrot.slane %v10531_v1, 6  ;;  %v10533_v9 = vpop.f32.mrb[126].mxu0  ;;  %v10574_v25 = vpop.f32.mrb[126].mxu1  ;;  %v10584_v22 = vrot.slane %v10572_v39, 6  ;;  %v10583_v1 = vrot.slane %v10570_v45, 6 }
 0xf9a   :  { %v10589_v63 = vadd.f32 %v10581_v7, %v17224_v6  ;;  %v10534_v23 = vpop.f32.mrb[127].mxu0  ;;  %v10575_v12 = vpop.f32.mrb[127].mxu1  ;;  %v17983_v25 = vld [vmem:[#allocation13 + $0x100] ss:$16 sps:$4 sm:$0xff]   ;;  %v17985_v7 = vld [vmem:[#allocation13 + $0x108] ss:$16 sps:$4 sm:$0xff]  }
 0xf9b   :  { %v10590_v21 = vadd.f32 %v10582_v59, %v17226_v17  ;;  %v10592_v41 = vadd.f32 %v10584_v22, %v17233_v54  ;;  %v17987_v59 = vld [vmem:[#allocation13 + $0x124] ss:$16 sps:$4 sm:$0xff]   ;;  %v10591_v39 = vadd.f32 %v10583_v1, %v17238_v10  ;;  %v17994_v45 = vld [vmem:[#allocation13 + $0x120] ss:$16 sps:$4 sm:$0xff]  }
 0xf9c   :  { %v13680_v38 = vmul.f32 -1.442695, %v10589_v63  ;;  %v17989_v63 = vld [vmem:[#allocation13 + $0x12c] ss:$16 sps:$4 sm:$0xff]   ;;  %18604 = vst [vmem:[#allocation40_spill] sm:$0xff] %v17994_v45 }
 0xf9d   :  { %v15430_v42 = vpop.eup %15429  ;;  %v13681_v30 = vmul.f32 -1.442695, %v10590_v21  ;;  %18603 = vst [vmem:[#allocation39_spill] sm:$0xff] %v17989_v63  ;;  %v13682_v12 = vmul.f32 -1.442695, %v10592_v41 }
 0xf9e   :  { %15431 = vpow2.f32 %v13680_v38  ;;  %v10619_v26 = vmul.f32 %v15430_v42, %v15428_v24  ;;  %v17996_v21 = vld [vmem:[#allocation13 + $0x128] ss:$16 sps:$4 sm:$0xff]   ;;  %v18000_v38 = vld [vmem:[#allocation13 + $0x144] ss:$16 sps:$4 sm:$0xff]   ;;  %v18002_v42 = vld [vmem:[#allocation13 + $0x14c] ss:$16 sps:$4 sm:$0xff]  }
 0xf9f   :  { %15433 = vpow2.f32 %v13681_v30  ;;  %18605 = vst [vmem:[#allocation22_spill] sm:$0xff] %v17996_v21  ;;  %18606 = vst [vmem:[#allocation23_spill] sm:$0xff] %v18000_v38  ;;  %v18010_v41 = vld [vmem:[#allocation13 + $0x148] ss:$16 sps:$4 sm:$0xff]   ;;  %v18014_v1 = vld [vmem:[#allocation13 + $0x164] ss:$16 sps:$4 sm:$0xff]  }
 0xfa0   :  { %10647 = vst [vmem:[#allocation4] sm:$0x20] %v10619_v26  ;;  %v10649_v53 = vpack.c.bf16 %v10619_v26, %v10619_v26  ;;  %18607 = vst [vmem:[#allocation24_spill] sm:$0xff] %v18002_v42  ;;  %15435 = vpow2.f32 %v13682_v12  ;;  %v18022_v12 = vld [vmem:[#allocation13 + $0x168] ss:$16 sps:$4 sm:$0xff]  }
 0xfa1   :  { %15437 = vtanh.f32 %v10591_v39  ;;  %18609 = vst [vmem:[#allocation26_spill] sm:$0xff] %v18010_v41  ;;  %18610 = vst [vmem:[#allocation27_spill] sm:$0xff] %v18014_v1  ;;  %v18026_v39 = vld [vmem:[#allocation13 + $0x184] ss:$16 sps:$4 sm:$0xff]  }
 0xfa2   :  { %v10683_v9 = vshrl.u32 %v10649_v53, 16  ;;  %v18008_v53 = vld [vmem:[#allocation13 + $0x140] ss:$16 sps:$4 sm:$0xff]   ;;  %18613 = vst [vmem:[#allocation30_spill] sm:$0xff] %v18022_v12  ;;  %18614 = vst [vmem:[#allocation31_spill] sm:$0xff] %v18026_v39 }
 0xfa3   :  { %18608 = vst [vmem:[#allocation25_spill] sm:$0xff] %v18008_v53 }
 0xfa4   :  { %v10685_v23 = vrot.slane %v10683_v9, 2  ;;  %v18016_v9 = vld [vmem:[#allocation13 + $0x16c] ss:$16 sps:$4 sm:$0xff]  }
 0xfa5   :  { %18611 = vst [vmem:[#allocation28_spill] sm:$0xff] %v18016_v9 }
 0xfa6   :  { %10880 = vmatmul.mubr.bf16.vlgmr.msra.gmra.mrb[128].mxu0 %v10685_v23  ;;  %10921 = vmatmul.mubr.bf16.vlgmr.msra.gmra.mrb[128].mxu1 %v10685_v23  ;;  %v18020_v23 = vld [vmem:[#allocation13 + $0x160] ss:$16 sps:$4 sm:$0xff]  }
 0xfa7   :  { %11142 = vmatpush1.bf16.msra.mxu0 %v17983_v25  ;;  %11183 = vmatpush1.bf16.msra.mxu1 %v17985_v7  ;;  %18612 = vst [vmem:[#allocation29_spill] sm:$0xff] %v18020_v23 }
 0xfa8   :  { %v15432_v24 = vpop.eup %15431  ;;  %11143 = vmatprep.subr.bf16.mxu0 %v17987_v59  ;;  %11184 = vmatprep.subr.bf16.mxu1 %v17989_v63  ;;  %v18053_v63 = vld [vmem:[#allocation13 + $0x1cc] ss:$16 sps:$4 sm:$0xff]  }
 0xfa9   :  { %v15434_v30 = vpop.eup %15433  ;;  %v10623_v22 = vadd.f32 1.0, %v15432_v24  ;;  %11173 = vmatprep.mubr.bf16.mxu0 %v18441_v37  ;;  %11214 = vmatprep.mubr.bf16.mxu1 %v18441_v37  ;;  %v18028_v24 = vld [vmem:[#allocation13 + $0x18c] ss:$16 sps:$4 sm:$0xff]   ;;  %18616 = vst [vmem:[#allocation33_spill] sm:$0xff] %v18053_v63 }
 0xfaa   :  { %v10629_v26 = vadd.f32 1.0, %v15434_v30  ;;  %18615 = vst [vmem:[#allocation32_spill] sm:$0xff] %v18028_v24  ;;  %v15436_v30 = vpop.eup %15435 }
 0xfab   :  { %15439 = vrcp.f32 %v10623_v22  ;;  %11144 = vmatpush1.bf16.msra.mxu0 %v17994_v45  ;;  %11185 = vmatpush1.bf16.msra.mxu1 %v17996_v21  ;;  %v18032_v22 = vld [vmem:[#allocation13 + $0x180] ss:$16 sps:$4 sm:$0xff]   ;;  %v10636_v21 = vadd.f32 1.0, %v15436_v30 }
 0xfac   :  { %15441 = vrcp.f32 %v10629_v26  ;;  %11145 = vmatprep.subr.bf16.mxu0 %v18000_v38  ;;  %11186 = vmatprep.subr.bf16.mxu1 %v18002_v42  ;;  %v18034_v26 = vld [vmem:[#allocation13 + $0x188] ss:$16 sps:$4 sm:$0xff]   ;;  %v10640_v42 = vrot.slane %v17855_v4, 1  ;;  %v18045_v45 = vld [vmem:[#allocation13 + $0x1a0] ss:$16 sps:$4 sm:$0xff]  }
 0xfad   :  { %15443 = vrcp.f32 %v10636_v21  ;;  %v18072_v21 = vld [vmem:[#allocation13 + $0x1e0] ss:$16 sps:$4 sm:$0xff]  }
 0xfaf   :  { %11146 = vmatpush1.bf16.msra.mxu0 %v18008_v53  ;;  %11187 = vmatpush1.bf16.msra.mxu1 %v18010_v41  ;;  %v15438_v41 = vpop.eup %15437 }
 0xfb0   :  { %11147 = vmatprep.subr.bf16.mxu0 %v18014_v1  ;;  %11188 = vmatprep.subr.bf16.mxu1 %v18016_v9  ;;  %v18038_v1 = vld [vmem:[#allocation13 + $0x1a4] ss:$16 sps:$4 sm:$0xff]   ;;  %v18040_v9 = vld [vmem:[#allocation13 + $0x1ac] ss:$16 sps:$4 sm:$0xff]  }
 0xfb3   :  { %11148 = vmatpush1.bf16.msra.mxu0 %v18020_v23  ;;  %11189 = vmatpush1.bf16.msra.mxu1 %v18022_v12 }
 0xfb4   :  { %11149 = vmatprep.subr.bf16.mxu0 %v18026_v39  ;;  %11190 = vmatprep.subr.bf16.mxu1 %v18028_v24  ;;  %v18047_v39 = vld [vmem:[#allocation13 + $0x1a8] ss:$16 sps:$4 sm:$0xff]   ;;  %v18051_v24 = vld [vmem:[#allocation13 + $0x1c4] ss:$16 sps:$4 sm:$0xff]  }
 0xfb5   :  { %v15440_v53 = vpop.eup %15439 }
 0xfb6   :  { %v15442_v38 = vpop.eup %15441  ;;  %v10643_v23 = vmul.f32 %v15440_v53, %v15438_v41  ;;  %v18066_v53 = vld [vmem:[#allocation13 + $0x1e4] ss:$16 sps:$4 sm:$0xff]   ;;  %v18068_v41 = vld [vmem:[#allocation13 + $0x1ec] ss:$16 sps:$4 sm:$0xff]  }
 0xfb7   :  { %v10642_v12 = vmul.f32 %v15442_v38, %v10640_v42  ;;  %11150 = vmatpush1.bf16.msra.mxu0 %v18032_v22  ;;  %11191 = vmatpush1.bf16.msra.mxu1 %v18034_v26  ;;  %v18059_v38 = vld [vmem:[#allocation13 + $0x1c0] ss:$16 sps:$4 sm:$0xff]   ;;  %v18061_v42 = vld [vmem:[#allocation13 + $0x1c8] ss:$16 sps:$4 sm:$0xff]  }
 0xfb8   :  { %11151 = vmatprep.subr.bf16.mxu0 %v18038_v1  ;;  %11192 = vmatprep.subr.bf16.mxu1 %v18040_v9  ;;  %18617 = vst [vmem:[#allocation34_spill] sm:$0xff] %v18059_v38  ;;  %18618 = vst [vmem:[#allocation35_spill] sm:$0xff] %v18061_v42 }
 0xfb9   :  { %v18055_v4 = vadd.f32 %v10643_v23, %v10642_v12  ;;  %v18074_v23 = vld [vmem:[#allocation13 + $0x1e8] ss:$16 sps:$4 sm:$0xff]   ;;  %v15444_v12 = vpop.eup %15443 }
 0xfbb   :  { %11152 = vmatpush1.bf16.msra.mxu0 %v18045_v45  ;;  %11193 = vmatpush1.bf16.msra.mxu1 %v18047_v39  ;;  %15445 = vtanh.f32 %v18055_v4 }
 0xfbc   :  { %11153 = vmatprep.subr.bf16.mxu0 %v18051_v24  ;;  %11194 = vmatprep.subr.bf16.mxu1 %v18053_v63 }
 0xfbf   :  { %11154 = vmatpush1.bf16.msra.mxu0 %v18059_v38  ;;  %11195 = vmatpush1.bf16.msra.mxu1 %v18061_v42 }
 0xfc0   :  { %11155 = vmatprep.subr.bf16.mxu0 %v18066_v53  ;;  %11196 = vmatprep.subr.bf16.mxu1 %v18068_v41 }
 0xfc3   :  { %11156 = vmatpush1.bf16.msra.mxu0 %v18072_v21  ;;  %11197 = vmatpush1.bf16.msra.mxu1 %v18074_v23 }
 0xfc4   :  { %11491 = vmatprep.subr.bf16.mxu0 %v17870_v56  ;;  %11532 = vmatprep.subr.bf16.mxu1 %v17872_v8 }
 0xfc5   :  { %v15446_v30 = vpop.eup %15445 }
 0xfc6   :  { %v10646_v38 = vmul.f32 %v15446_v30, %v15444_v12 }
 0xfc8   :  { %10648 = vst [vmem:[#allocation5] sm:$0x4] %v10646_v38  ;;  %v10945_v42 = vpack.c.bf16 %v10646_v38, %v10646_v38 }
 0xfca   :  { %v10979_v63 = vrot.slane %v10945_v42, 1 }
 0xfcc   :  { %11174 = vmatmul.mubr.bf16.vlgmr.msra.gmra.mrb[132].mxu0 %v10979_v63  ;;  %11215 = vmatmul.mubr.bf16.vlgmr.msra.gmra.mrb[132].mxu1 %v10979_v63 }
 0xfcd   :  { %11492 = vmatpush1.bf16.msra.mxu0 %v17874_v11  ;;  %11533 = vmatpush1.bf16.msra.mxu1 %v17876_v60 }
 0xfce   :  { %11493 = vmatprep.subr.bf16.mxu0 %v17882_v19  ;;  %11534 = vmatprep.subr.bf16.mxu1 %v17884_v31 }
 0xfcf   :  { %11523 = vmatprep.mubr.bf16.mxu0 %v18441_v37  ;;  %11564 = vmatprep.mubr.bf16.mxu1 %v18441_v37 }
 0xfd1   :  { %11494 = vmatpush1.bf16.msra.mxu0 %v17886_v29  ;;  %11535 = vmatpush1.bf16.msra.mxu1 %v17888_v3 }
 0xfd2   :  { %11495 = vmatprep.subr.bf16.mxu0 %v17894_v14  ;;  %11536 = vmatprep.subr.bf16.mxu1 %v17896_v13 }
 0xfd5   :  { %11496 = vmatpush1.bf16.msra.mxu0 %v17898_v16  ;;  %11537 = vmatpush1.bf16.msra.mxu1 %v17900_v43 }
 0xfd6   :  { %11497 = vmatprep.subr.bf16.mxu0 %v17908_v46  ;;  %11538 = vmatprep.subr.bf16.mxu1 %v17912_v47 }
 0xfd9   :  { %11498 = vmatpush1.bf16.msra.mxu0 %v17906_v44  ;;  %11539 = vmatpush1.bf16.msra.mxu1 %v17910_v35 }
 0xfda   :  { %11499 = vmatprep.subr.bf16.mxu0 %v17914_v15  ;;  %11540 = vmatprep.subr.bf16.mxu1 %v17917_v49 }
 0xfdd   :  { %11500 = vmatpush1.bf16.msra.mxu0 %v17921_v50  ;;  %11541 = vmatpush1.bf16.msra.mxu1 %v17925_v51 }
 0xfde   :  { %11501 = vmatprep.subr.bf16.mxu0 %v17930_v58  ;;  %11542 = vmatprep.subr.bf16.mxu1 %v17932_v28 }
 0xfe1   :  { %11502 = vmatpush1.bf16.msra.mxu0 %v17934_v57  ;;  %11543 = vmatpush1.bf16.msra.mxu1 %v17936_v62 }
 0xfe2   :  { %11503 = vmatprep.subr.bf16.mxu0 %v17942_v18  ;;  %11544 = vmatprep.subr.bf16.mxu1 %v17944_v61 }
 0xfe5   :  { %11504 = vmatpush1.bf16.msra.mxu0 %v17946_v5  ;;  %11545 = vmatpush1.bf16.msra.mxu1 %v17948_v2  ;;  %v11259_v5 = vrot.slane %v17977_v0, 7 }
 0xfe6   :  { %11505 = vmatprep.subr.bf16.mxu0 %v17954_v55  ;;  %11546 = vmatprep.subr.bf16.mxu1 %v17956_v48 }
 0xfe9   :  { %11506 = vmatpush1.bf16.msra.mxu0 %v17958_v40  ;;  %11547 = vmatpush1.bf16.msra.mxu1 %v17960_v32 }
 0xfea   :  { %11786 = vmatprep.subr.bf16.mxu0 %v17966_v34  ;;  %11827 = vmatprep.subr.bf16.mxu1 %v17968_v36 }
0x1079   :  { %v10881_v56 = vpop.f32.mrb[128].mxu0  ;;  %v10922_v8 = vpop.f32.mrb[128].mxu1 }
0x107a   :  { %v10933_v11 = vrot.slane %v10881_v56, 2  ;;  %v10883_v60 = vpop.f32.mrb[129].mxu0  ;;  %v10924_v19 = vpop.f32.mrb[129].mxu1  ;;  %v10935_v15 = vrot.slane %v10922_v8, 2 }
0x107b   :  { %v10934_v31 = vrot.slane %v10883_v60, 2  ;;  %v10885_v29 = vpop.f32.mrb[130].mxu0  ;;  %v10926_v3 = vpop.f32.mrb[130].mxu1  ;;  %v10936_v35 = vrot.slane %v10924_v19, 2 }
0x107c   :  { %v10941_v14 = vadd.f32 %v10933_v11, %v17203_v27  ;;  %v10886_v13 = vpop.f32.mrb[131].mxu0  ;;  %v10927_v16 = vpop.f32.mrb[131].mxu1  ;;  %v10943_v50 = vadd.f32 %v10935_v15, %v17214_v20 }
0x107d   :  { %v10942_v43 = vadd.f32 %v10934_v31, %v17205_v33  ;;  %v10944_v47 = vadd.f32 %v10936_v35, %v17210_v52 }
0x107e   :  { %v13747_v44 = vmul.f32 -1.442695, %v10941_v14 }
0x107f   :  { %v13748_v46 = vmul.f32 -1.442695, %v10942_v43  ;;  %v13749_v49 = vmul.f32 -1.442695, %v10944_v47 }
0x1080   :  { %15447 = vpow2.f32 %v13747_v44 }
0x1081   :  { %15449 = vpow2.f32 %v13748_v46 }
0x1082   :  { %15451 = vpow2.f32 %v13749_v49  ;;  %v18619_v49 = vld [vmem:[#allocation39_spill] sm:$0xff] }
0x1083   :  { %15453 = vtanh.f32 %v10943_v50 }
0x108a   :  { %v15448_v51 = vpop.eup %15447 }
0x108b   :  { %v15450_v58 = vpop.eup %15449  ;;  %v11242_v28 = vadd.f32 1.0, %v15448_v51 }
0x108c   :  { %v11248_v57 = vadd.f32 1.0, %v15450_v58  ;;  %v15452_v62 = vpop.eup %15451 }
0x108d   :  { %15455 = vrcp.f32 %v11242_v28  ;;  %v15454_v18 = vpop.eup %15453  ;;  %v11255_v48 = vadd.f32 1.0, %v15452_v62  ;;  %v18620_v28 = vld [vmem:[#allocation40_spill] sm:$0xff]  ;;  %v18625_v62 = vld [vmem:[#allocation26_spill] sm:$0xff] }
0x108e   :  { %15457 = vrcp.f32 %v11248_v57  ;;  %v18624_v57 = vld [vmem:[#allocation25_spill] sm:$0xff] }
0x108f   :  { %15459 = vrcp.f32 %v11255_v48  ;;  %v18630_v48 = vld [vmem:[#allocation31_spill] sm:$0xff] }
0x1097   :  { %v15456_v61 = vpop.eup %15455 }
0x1098   :  { %v15458_v2 = vpop.eup %15457  ;;  %v11262_v55 = vmul.f32 %v15456_v61, %v15454_v18  ;;  %v18626_v18 = vld [vmem:[#allocation27_spill] sm:$0xff]  ;;  %v18627_v61 = vld [vmem:[#allocation28_spill] sm:$0xff] }
0x1099   :  { %v11261_v40 = vmul.f32 %v15458_v2, %v11259_v5  ;;  %v15460_v3 = vpop.eup %15459  ;;  %v18628_v5 = vld [vmem:[#allocation29_spill] sm:$0xff]  ;;  %v18629_v2 = vld [vmem:[#allocation30_spill] sm:$0xff] }
0x109b   :  { %v18121_v32 = vadd.f32 %v11262_v55, %v11261_v40  ;;  %v18631_v40 = vld [vmem:[#allocation32_spill] sm:$0xff] }
0x109d   :  { %15461 = vtanh.f32 %v18121_v32 }
0x109f   :  { %v11175_v34 = vpop.f32.mrb[132].mxu0  ;;  %v11216_v36 = vpop.f32.mrb[132].mxu1 }
0x10a0   :  { %v11227_v63 = vrot.slane %v11175_v34, 7  ;;  %v11177_v38 = vpop.f32.mrb[133].mxu0  ;;  %v11218_v42 = vpop.f32.mrb[133].mxu1  ;;  %v11229_v43 = vrot.slane %v11216_v36, 7  ;;  %v11286_v36 = vrot.slane %v18055_v4, 1  ;;  %v18632_v4 = vld [vmem:[#allocation33_spill] sm:$0xff] }
0x10a1   :  { %v11228_v12 = vrot.slane %v11177_v38, 7  ;;  %v11179_v30 = vpop.f32.mrb[134].mxu0  ;;  %v11220_v56 = vpop.f32.mrb[134].mxu1  ;;  %v11230_v29 = vrot.slane %v11218_v42, 7 }
0x10a2   :  { %v11235_v8 = vadd.f32 %v11227_v63, %v17224_v6  ;;  %v11180_v0 = vpop.f32.mrb[135].mxu0  ;;  %v11221_v11 = vpop.f32.mrb[135].mxu1  ;;  %v11237_v47 = vadd.f32 %v11229_v43, %v17238_v10  ;;  %v14967_v56 = vld [vmem:[%s18313_s7 + $0x40] sm:$0xff]  }
0x10a3   :  { %v11236_v60 = vadd.f32 %v11228_v12, %v17226_v17  ;;  %v11238_v16 = vadd.f32 %v11230_v29, %v17233_v54  ;;  %v14973_v0 = vld [vmem:[%s18313_s7 + $0x8] sm:$0xff]   ;;  %v14978_v29 = vld [vmem:[%s18315_s9 + $0x10] sm:$0xff]   ;;  %v14983_v43 = vld [vmem:[%s18313_s7 + $0x60] sm:$0xff]  }
0x10a4   :  { %v13750_v19 = vmul.f32 -1.442695, %v11235_v8  ;;  %v14972_v8 = vld [vmem:[%s18315_s9 + $0x48] sm:$0xff]  }
0x10a5   :  { %v13751_v31 = vmul.f32 -1.442695, %v11236_v60  ;;  %v13752_v35 = vmul.f32 -1.442695, %v11238_v16  ;;  %v14974_v11 = vld [vmem:[%s18315_s9 + $0x8] sm:$0xff]   ;;  %v14975_v60 = vld [vmem:[%s18313_s7 + $0x50] sm:$0xff]  }
0x10a6   :  { %15463 = vpow2.f32 %v13750_v19  ;;  %v14976_v19 = vld [vmem:[%s18315_s9 + $0x50] sm:$0xff]   ;;  %v14982_v16 = vld [vmem:[%s18315_s9 + $0x18] sm:$0xff]  }
0x10a7   :  { %v15462_v14 = vpop.eup %15461  ;;  %15465 = vpow2.f32 %v13751_v31  ;;  %v14977_v31 = vld [vmem:[%s18313_s7 + $0x10] sm:$0xff]  }
0x10a8   :  { %v11265_v13 = vmul.f32 %v15462_v14, %v15460_v3  ;;  %15467 = vpow2.f32 %v13752_v35  ;;  %v14979_v3 = vld [vmem:[%s18313_s7 + $0x58] sm:$0xff]   ;;  %v14986_v35 = vld [vmem:[%s18315_s9 + $0x20] sm:$0xff]  }
0x10a9   :  { %15469 = vtanh.f32 %v11237_v47  ;;  %v14980_v14 = vld [vmem:[%s18315_s9 + $0x58] sm:$0xff]   ;;  %v14987_v47 = vld [vmem:[%s18313_s7 + $0x68] sm:$0xff]  }
0x10aa   :  { %11293 = vst [vmem:[#allocation4] sm:$0x40] %v11265_v13  ;;  %v11295_v44 = vpack.c.bf16 %v11265_v13, %v11265_v13  ;;  %v14981_v13 = vld [vmem:[%s18313_s7 + $0x18] sm:$0xff]  }
0x10ac   :  { %v11329_v46 = vrot.slane %v11295_v44, 3  ;;  %v14984_v44 = vld [vmem:[%s18315_s9 + $0x60] sm:$0xff]  }
0x10ae   :  { %11524 = vmatmul.mubr.bf16.vlgmr.msra.gmra.mrb[136].mxu0 %v11329_v46  ;;  %11565 = vmatmul.mubr.bf16.vlgmr.msra.gmra.mrb[136].mxu1 %v11329_v46  ;;  %v14985_v46 = vld [vmem:[%s18313_s7 + $0x20] sm:$0xff]  }
0x10af   :  { %11787 = vmatpush1.bf16.msra.mxu0 %v17983_v25  ;;  %11828 = vmatpush1.bf16.msra.mxu1 %v17985_v7  ;;  %v18621_v25 = vld [vmem:[#allocation22_spill] sm:$0xff]  ;;  %v18622_v7 = vld [vmem:[#allocation23_spill] sm:$0xff] }
0x10b0   :  { %v15464_v15 = vpop.eup %15463  ;;  %11788 = vmatprep.subr.bf16.mxu0 %v17987_v59  ;;  %11829 = vmatprep.subr.bf16.mxu1 %v18619_v49  ;;  %v18623_v59 = vld [vmem:[#allocation24_spill] sm:$0xff] }
0x10b1   :  { %v15466_v50 = vpop.eup %15465  ;;  %v11269_v51 = vadd.f32 1.0, %v15464_v15  ;;  %11818 = vmatprep.mubr.bf16.mxu0 %v18441_v37  ;;  %11859 = vmatprep.mubr.bf16.mxu1 %v18441_v37  ;;  %v14988_v15 = vld [vmem:[%s18315_s9 + $0x68] sm:$0xff]  }
0x10b2   :  { %v11275_v58 = vadd.f32 1.0, %v15466_v50  ;;  %v15468_v37 = vpop.eup %15467  ;;  %v14989_v49 = vld [vmem:[%s18313_s7 + $0x28] sm:$0xff]  }
0x10b3   :  { %15471 = vrcp.f32 %v11269_v51  ;;  %11789 = vmatpush1.bf16.msra.mxu0 %v18620_v28  ;;  %11830 = vmatpush1.bf16.msra.mxu1 %v18621_v25  ;;  %v15470_v55 = vpop.eup %15469  ;;  %v11282_v42 = vadd.f32 1.0, %v15468_v37  ;;  %v14990_v50 = vld [vmem:[%s18315_s9 + $0x28] sm:$0xff]   ;;  %v14991_v51 = vld [vmem:[%s18313_s7 + $0x70] sm:$0xff]  }
0x10b4   :  { %15473 = vrcp.f32 %v11275_v58  ;;  %11790 = vmatprep.subr.bf16.mxu0 %v18622_v7  ;;  %11831 = vmatprep.subr.bf16.mxu1 %v18623_v59  ;;  %v14992_v58 = vld [vmem:[%s18315_s9 + $0x70] sm:$0xff]   ;;  %v14995_v7 = vld [vmem:[%s18313_s7 + $0x78] sm:$0xff]  }
0x10b5   :  { %15475 = vrcp.f32 %v11282_v42  ;;  %v14993_v28 = vld [vmem:[%s18313_s7 + $0x30] sm:$0xff]   ;;  %v14996_v59 = vld [vmem:[%s18315_s9 + $0x78] sm:$0xff]  }
0x10b6   :  { %v14994_v25 = vld [vmem:[%s18315_s9 + $0x30] sm:$0xff]  }
0x10b7   :  { %11791 = vmatpush1.bf16.msra.mxu0 %v18624_v57  ;;  %11832 = vmatpush1.bf16.msra.mxu1 %v18625_v62  ;;  %v14997_v57 = vld [vmem:[%s18313_s7 + $0x38] sm:$0xff]  }
0x10b8   :  { %11792 = vmatprep.subr.bf16.mxu0 %v18626_v18  ;;  %11833 = vmatprep.subr.bf16.mxu1 %v18627_v61  ;;  %v14998_v62 = vld [vmem:[%s18315_s9 + $0x38] sm:$0xff]  }
0x10bb   :  { %11793 = vmatpush1.bf16.msra.mxu0 %v18628_v5  ;;  %11834 = vmatpush1.bf16.msra.mxu1 %v18629_v2 }
0x10bc   :  { %11794 = vmatprep.subr.bf16.mxu0 %v18630_v48  ;;  %11835 = vmatprep.subr.bf16.mxu1 %v18631_v40 }
0x10bd   :  { %v15472_v34 = vpop.eup %15471 }
0x10be   :  { %v15474_v63 = vpop.eup %15473  ;;  %v11289_v38 = vmul.f32 %v15472_v34, %v15470_v55 }
0x10bf   :  { %v11288_v12 = vmul.f32 %v15474_v63, %v11286_v36  ;;  %11795 = vmatpush1.bf16.msra.mxu0 %v18032_v22  ;;  %11836 = vmatpush1.bf16.msra.mxu1 %v18034_v26  ;;  %v18633_v22 = vld [vmem:[#allocation34_spill] sm:$0xff]  ;;  %v18634_v26 = vld [vmem:[#allocation35_spill] sm:$0xff] }
0x10c0   :  { %11796 = vmatprep.subr.bf16.mxu0 %v18038_v1  ;;  %11837 = vmatprep.subr.bf16.mxu1 %v18040_v9 }
0x10c1   :  { %v18151_v30 = vadd.f32 %v11289_v38, %v11288_v12 }
0x10c3   :  { %11797 = vmatpush1.bf16.msra.mxu0 %v18045_v45  ;;  %11838 = vmatpush1.bf16.msra.mxu1 %v18047_v39  ;;  %15477 = vtanh.f32 %v18151_v30  ;;  %v15476_v45 = vpop.eup %15475 }
0x10c4   :  { %11798 = vmatprep.subr.bf16.mxu0 %v18051_v24  ;;  %11839 = vmatprep.subr.bf16.mxu1 %v18632_v4 }
0x10c7   :  { %11799 = vmatpush1.bf16.msra.mxu0 %v18633_v22  ;;  %11840 = vmatpush1.bf16.msra.mxu1 %v18634_v26 }
0x10c8   :  { %11800 = vmatprep.subr.bf16.mxu0 %v18066_v53  ;;  %11841 = vmatprep.subr.bf16.mxu1 %v18068_v41  ;;  %v14968_v53 = vld [vmem:[%s18315_s9 + $0x40] sm:$0xff]  }
0x10c9   :  { %v14969_v41 = vld [vmem:[%s18313_s7] sm:$0xff]  }
0x10cb   :  { %11801 = vmatpush1.bf16.msra.mxu0 %v18072_v21  ;;  %11842 = vmatpush1.bf16.msra.mxu1 %v18074_v23  ;;  %v14970_v21 = vld [vmem:[%s18315_s9] sm:$0xff]   ;;  %v14971_v23 = vld [vmem:[%s18313_s7 + $0x48] sm:$0xff]  }
0x10cc   :  { %13858 = vmatprep.subr.bf16.mxu0 %v14967_v56  ;;  %13880 = vmatprep.subr.bf16.mxu1 %v14968_v53 }
0x10cd   :  { %v15478_v1 = vpop.eup %15477 }
0x10ce   :  { %v11292_v9 = vmul.f32 %v15478_v1, %v15476_v45 }
0x10d0   :  { %11294 = vst [vmem:[#allocation5] sm:$0x2] %v11292_v9  ;;  %v11589_v39 = vpack.c.bf16 %v11292_v9, %v11292_v9 }
0x10d2   :  { %v11623_v24 = vshrl.u32 %v11589_v39, 16 }
0x10d4   :  { %11819 = vmatmul.mubr.bf16.vlgmr.msra.gmra.mrb[140].mxu0 %v11623_v24  ;;  %11860 = vmatmul.mubr.bf16.vlgmr.msra.gmra.mrb[140].mxu1 %v11623_v24 }
0x10d5   :  { %13859 = vmatpush3.bf16.msra.mxu0 %v14969_v41  ;;  %13881 = vmatpush3.bf16.msra.mxu1 %v14970_v21  ;;  %v11892_v41 = vrot.slane %v18121_v32, 7 }
0x10d6   :  { %13860 = vmatprep.subr.bf16.mxu0 %v14971_v23  ;;  %13882 = vmatprep.subr.bf16.mxu1 %v14972_v8 }
0x10d9   :  { %13861 = vmatpush3.bf16.msra.mxu0 %v14973_v0  ;;  %13883 = vmatpush3.bf16.msra.mxu1 %v14974_v11 }
0x10da   :  { %13862 = vmatprep.subr.bf16.mxu0 %v14975_v60  ;;  %13884 = vmatprep.subr.bf16.mxu1 %v14976_v19 }
0x10dd   :  { %13863 = vmatpush3.bf16.msra.mxu0 %v14977_v31  ;;  %13885 = vmatpush3.bf16.msra.mxu1 %v14978_v29 }
0x10de   :  { %13864 = vmatprep.subr.bf16.mxu0 %v14979_v3  ;;  %13886 = vmatprep.subr.bf16.mxu1 %v14980_v14 }
0x10e1   :  { %13865 = vmatpush3.bf16.msra.mxu0 %v14981_v13  ;;  %13887 = vmatpush3.bf16.msra.mxu1 %v14982_v16 }
0x10e2   :  { %13866 = vmatprep.subr.bf16.mxu0 %v14983_v43  ;;  %13888 = vmatprep.subr.bf16.mxu1 %v14984_v44 }
0x10e5   :  { %13867 = vmatpush3.bf16.msra.mxu0 %v14985_v46  ;;  %13889 = vmatpush3.bf16.msra.mxu1 %v14986_v35 }
0x10e6   :  { %13868 = vmatprep.subr.bf16.mxu0 %v14987_v47  ;;  %13890 = vmatprep.subr.bf16.mxu1 %v14988_v15 }
0x10e9   :  { %13869 = vmatpush3.bf16.msra.mxu0 %v14989_v49  ;;  %13891 = vmatpush3.bf16.msra.mxu1 %v14990_v50 }
0x10ea   :  { %13870 = vmatprep.subr.bf16.mxu0 %v14991_v51  ;;  %13892 = vmatprep.subr.bf16.mxu1 %v14992_v58 }
0x10ed   :  { %13871 = vmatpush3.bf16.msra.mxu0 %v14993_v28  ;;  %13893 = vmatpush3.bf16.msra.mxu1 %v14994_v25 }
0x10ee   :  { %13872 = vmatprep.subr.bf16.mxu0 %v14995_v7  ;;  %13894 = vmatprep.subr.bf16.mxu1 %v14996_v59  ;;  %v11919_v7 = vrot.slane %v18151_v30, 1  ;;  %v15682_v30 = vmov 1966171168  }
0x10f1   :  { %13873 = vmatpush3.bf16.msra.mxu0 %v14997_v57  ;;  %13895 = vmatpush3.bf16.msra.mxu1 %v14998_v62 }
0x1181   :  { %v11525_v18 = vpop.f32.mrb[136].mxu0  ;;  %v11566_v61 = vpop.f32.mrb[136].mxu1 }
0x1182   :  { %v11577_v37 = vrot.slane %v11525_v18, 1  ;;  %v11527_v5 = vpop.f32.mrb[137].mxu0  ;;  %v11568_v2 = vpop.f32.mrb[137].mxu1  ;;  %v11579_v26 = vrot.slane %v11566_v61, 1 }
0x1183   :  { %v11578_v55 = vrot.slane %v11527_v5, 1  ;;  %v11529_v48 = vpop.f32.mrb[138].mxu0  ;;  %v11570_v40 = vpop.f32.mrb[138].mxu1  ;;  %v11580_v4 = vrot.slane %v11568_v2, 1 }
0x1184   :  { %v11585_v34 = vadd.f32 %v11577_v37, %v17203_v27  ;;  %v11530_v36 = vpop.f32.mrb[139].mxu0  ;;  %v11571_v63 = vpop.f32.mrb[139].mxu1  ;;  %v11587_v1 = vadd.f32 %v11579_v26, %v17214_v20  ;;  %v12285_v40 = vunpack.c.l.s4 %v15682_v30 }
0x1185   :  { %v11586_v38 = vadd.f32 %v11578_v55, %v17205_v33  ;;  %v11588_v22 = vadd.f32 %v11580_v4, %v17210_v52 }
0x1186   :  { %v13817_v42 = vmul.f32 -1.442695, %v11585_v34  ;;  %v12286_v34 = vunpack.c.0.s8 %v12285_v40 }
0x1187   :  { %v13818_v12 = vmul.f32 -1.442695, %v11586_v38  ;;  %v13819_v45 = vmul.f32 -1.442695, %v11588_v22  ;;  %v13823_v38 = vld [vmem:[%s18314_s8] ss:$0 sm:$0xff] }
0x1188   :  { %15479 = vpow2.f32 %v13817_v42  ;;  %v18635_v22 = vld [vmem:[#allocation20_spill] sm:$0xff] }
0x1189   :  { %15481 = vpow2.f32 %v13818_v12  ;;  %v12289_v26 = vsub.s32 %v12286_v34, %v18635_v22  ;;  %v18637_v34 = vlaneseq }
0x118a   :  { %15483 = vpow2.f32 %v13819_v45 }
0x118b   :  { %15485 = vtanh.f32 %v11587_v1 }
0x1192   :  { %v15480_v9 = vpop.eup %15479 }
0x1193   :  { %v15482_v39 = vpop.eup %15481  ;;  %v11875_v24 = vadd.f32 1.0, %v15480_v9 }
0x1194   :  { %v11881_v27 = vadd.f32 1.0, %v15482_v39  ;;  %v15484_v33 = vpop.eup %15483 }
0x1195   :  { %15487 = vrcp.f32 %v11875_v24  ;;  %v15486_v56 = vpop.eup %15485  ;;  %v11888_v52 = vadd.f32 1.0, %v15484_v33 }
0x1196   :  { %15489 = vrcp.f32 %v11881_v27 }
0x1197   :  { %15491 = vrcp.f32 %v11888_v52 }
0x119f   :  { %v15488_v53 = vpop.eup %15487 }
0x11a0   :  { %v15490_v21 = vpop.eup %15489  ;;  %v11895_v23 = vmul.f32 %v15488_v53, %v15486_v56 }
0x11a1   :  { %v11894_v8 = vmul.f32 %v15490_v21, %v11892_v41  ;;  %v15492_v44 = vpop.eup %15491 }
0x11a3   :  { %v11896_v0 = vadd.f32 %v11895_v23, %v11894_v8  ;;  %v13840_v23 = vld [vmem:[%s18316_s10] ss:$0 sm:$0xff] }
0x11a5   :  { %15493 = vtanh.f32 %v11896_v0 }
0x11a7   :  { %v11820_v20 = vpop.f32.mrb[140].mxu0  ;;  %v11861_v11 = vpop.f32.mrb[140].mxu1 }
0x11a8   :  { %v11868_v60 = vadd.f32 %v11820_v20, %v17224_v6  ;;  %v11822_v19 = vpop.f32.mrb[141].mxu0  ;;  %v11863_v31 = vpop.f32.mrb[141].mxu1  ;;  %v11870_v6 = vadd.f32 %v11861_v11, %v17238_v10  ;;  %v18636_v11 = vld [vmem:[#allocation21_spill] sm:$0xff] }
0x11a9   :  { %v11869_v29 = vadd.f32 %v11822_v19, %v17226_v17  ;;  %v11824_v3 = vpop.f32.mrb[142].mxu0  ;;  %v11865_v14 = vpop.f32.mrb[142].mxu1  ;;  %v11871_v35 = vadd.f32 %v11863_v31, %v17233_v54 }
0x11aa   :  { %v13820_v13 = vmul.f32 -1.442695, %v11868_v60  ;;  %v11825_v16 = vpop.f32.mrb[143].mxu0  ;;  %v11866_v32 = vpop.f32.mrb[143].mxu1 }
0x11ab   :  { %v13821_v43 = vmul.f32 -1.442695, %v11869_v29  ;;  %v13822_v15 = vmul.f32 -1.442695, %v11871_v35 }
0x11ac   :  { %15495 = vpow2.f32 %v13820_v13 }
0x11ad   :  { %15497 = vpow2.f32 %v13821_v43 }
0x11ae   :  { %15499 = vpow2.f32 %v13822_v15 }
0x11af   :  { %v15494_v46 = vpop.eup %15493  ;;  %15501 = vtanh.f32 %v11870_v6 }
0x11b0   :  { %v11898_v47 = vmul.f32 %v15494_v46, %v15492_v44 }
0x11b2   :  { %11926 = vst [vmem:[#allocation4] sm:$0x80] %v11898_v47 }
0x11b6   :  { %v15496_v49 = vpop.eup %15495 }
0x11b7   :  { %v15498_v50 = vpop.eup %15497  ;;  %v11902_v17 = vadd.f32 1.0, %v15496_v49 }
0x11b8   :  { %v11908_v51 = vadd.f32 1.0, %v15498_v50  ;;  %v15500_v58 = vpop.eup %15499 }
0x11b9   :  { %15503 = vrcp.f32 %v11902_v17  ;;  %v15502_v28 = vpop.eup %15501  ;;  %v11915_v57 = vadd.f32 1.0, %v15500_v58  ;;  %v11928_v5 = vld [vmem:[#allocation4] sm:$0xff] }
0x11ba   :  { %15505 = vrcp.f32 %v11908_v51  ;;  %v11930_v48 = vpack.c.bf16 %v11928_v5, %v11928_v5 }
0x11bb   :  { %15507 = vrcp.f32 %v11915_v57 }
0x11c3   :  { %v15504_v25 = vpop.eup %15503 }
0x11c4   :  { %v15506_v59 = vpop.eup %15505  ;;  %v11922_v54 = vmul.f32 %v15504_v25, %v15502_v28  ;;  %v13857_v28 = vld [vmem:[%s18317_s11] ss:$0 sm:$0xff] }
0x11c5   :  { %v11921_v62 = vmul.f32 %v15506_v59, %v11919_v7  ;;  %v15508_v10 = vpop.eup %15507 }
0x11c7   :  { %v11923_v18 = vadd.f32 %v11922_v54, %v11921_v62 }
0x11c9   :  { %15509 = vtanh.f32 %v11923_v18 }
0x11d3   :  { %v15510_v61 = vpop.eup %15509 }
0x11d4   :  { %v11925_v37 = vmul.f32 %v15510_v61, %v15508_v10 }
0x11d6   :  { %11927 = vst [vmem:[#allocation5] sm:$0x1] %v11925_v37 }
0x11dd   :  { %v11929_v2 = vld [vmem:[#allocation5] sm:$0xff] }
0x11de   :  { %v11931_v55 = vpack.c.bf16 %v11929_v2, %v11929_v2 }
0x11e0   :  { %12099 = vmatprep.mubr.bf16.mxu0 %v11931_v55  ;;  %12274 = vmatprep.mubr.bf16.mxu1 %v11931_v55 }
0x11e1   :  { %12100 = vmatmul.mubr.bf16.vlgmr.msra.gmra.mrb[144].mxu0 %v11930_v48  ;;  %12275 = vmatmul.mubr.bf16.vlgmr.msra.gmra.mrb[144].mxu1 %v11930_v48 }
0x12b4   :  { %v13874_v36 = vpop.f32.mrb[144].mxu0  ;;  %v13896_v63 = vpop.f32.mrb[144].mxu1 }
0x12b5   :  { %v13875_v42 = vpop.f32.mrb[145].mxu0  ;;  %v13897_v12 = vpop.f32.mrb[145].mxu1 }
0x12b6   :  { %v13876_v4 = vadd.f32 %v13875_v42, %v13874_v36  ;;  %v13898_v45 = vadd.f32 %v13897_v12, %v13896_v63  ;;  %v13877_v1 = vpop.f32.mrb[146].mxu0  ;;  %v13899_v9 = vpop.f32.mrb[146].mxu1  ;;  %v12432_v36 = vand.u32 127, %v18637_v34  ;;  %v12420_v63 = vstv %s18318_s12  ;;  %s15683_s12 = smov [#allocation15]  }
0x12b7   :  { %v13878_v39 = vpop.f32.mrb[147].mxu0  ;;  %v13900_v24 = vpop.f32.mrb[147].mxu1  ;;  %s12498_s27 = sshll.u32 %s15683_s12, 4  ;;  %s12499_s27 = int_to_ptr.vmem [resolvable:$true] %s12498_s27 }
0x12b8   :  { %v12102_v27 = vadd.f32 %v13876_v4, %v13823_v38  ;;  %v12277_v19 = vadd.f32 %v13898_v45, %v13840_v23  ;;  %v12444_v12 = vsub.s32 %v12432_v36, %v18635_v22  ;;  %vm12433_vm7 = vcmp.eq.s32.totalorder %v18635_v22, %v12432_v36  ;;  %s15645_s3 = scalar_lea.vmem %s12499_s27, 128  ;;  %p15650_p5 = scmp.lt.s32.totalorder %s12499_s27, %s12499_s27 }
0x12b9   :  { %p15646_p4 = scmp.ne.s32.totalorder %s12499_s27, %s15645_s3  ;;  %p15651_p6 = scmp.lt.s32.totalorder %s15645_s3, %s15645_s3 }
0x12ba   :  { %v12283_v33 = vcombine.high %v12102_v27, %v12102_v27  ;;  %v12290_v56 = vrot.slane %v12102_v27, %v12289_v26 }
0x12bb   :  { %p15652_p7 = por %p15651_p6, %p15650_p5 }
0x12bc   :  { %v12297_v53 = vrot.slane %v12283_v33, %v12289_v26  ;;  %v12298_v41 = vcombine.high %v12290_v56, %v12290_v56  ;;  %v12306_v21 = vrot.slane %v12290_v56, %v12289_v26 }
0x12bd   :  { %p15653_p8 = pnand %p15652_p7, %p15646_p4 }
0x12be   :  { %v12299_v52 = vcombine.high %v12297_v53, %v12297_v53  ;;  %v12313_v8 = vrot.slane %v12297_v53, %v12289_v26  ;;  %v12320_v0 = vrot.slane %v12298_v41, %v12289_v26  ;;  %v12328_v20 = vcombine.high %v12306_v21, %v12306_v21 }
0x12bf   :  { %v12335_v60 = vrot.slane %v12306_v21, %v18636_v11 }
0x12c0   :  { %v12327_v31 = vrot.slane %v12299_v52, %v12289_v26  ;;  %v12329_v29 = vcombine.high %v12313_v8, %v12313_v8  ;;  %v12330_v3 = vcombine.high %v12320_v0, %v12320_v0  ;;  %v12339_v14 = vrot.slane %v12320_v0, %v18636_v11 }
0x12c1   :  { %v12343_v13 = vrot.slane %v12328_v20, %v18636_v11  ;;  %v12351_v16 = vrot.slane %v12313_v8, %v18636_v11  ;;  %v12372_v32 = vadd.f32 %v12335_v60, %v12277_v19 }
0x12c2   :  { %v12331_v43 = vcombine.high %v12327_v31, %v12327_v31  ;;  %v12347_v44 = vrot.slane %v12330_v3, %v18636_v11  ;;  %v12355_v46 = vrot.slane %v12327_v31, %v18636_v11  ;;  %v12359_v35 = vrot.slane %v12329_v29, %v18636_v11 }
0x12c3   :  { %15511 = vtanh.f32 %v12372_v32  ;;  %v12374_v47 = vadd.f32 %v12343_v13, %v12277_v19  ;;  %v12373_v15 = vadd.f32 %v12339_v14, %v12277_v19  ;;  %v12376_v6 = vadd.f32 %v12351_v16, %v12277_v19 }
0x12c4   :  { %v12363_v49 = vrot.slane %v12331_v43, %v18636_v11  ;;  %v12375_v50 = vadd.f32 %v12347_v44, %v12277_v19  ;;  %v12377_v17 = vadd.f32 %v12355_v46, %v12277_v19  ;;  %v12378_v51 = vadd.f32 %v12359_v35, %v12277_v19 }
0x12c5   :  { %15513 = vtanh.f32 %v12374_v47 }
0x12c6   :  { %15515 = vtanh.f32 %v12373_v15  ;;  %v12379_v58 = vadd.f32 %v12363_v49, %v12277_v19 }
0x12c7   :  { %15517 = vtanh.f32 %v12375_v50 }
0x12c8   :  { %15519 = vtanh.f32 %v12376_v6 }
0x12c9   :  { %15521 = vtanh.f32 %v12377_v17 }
0x12ca   :  { %15523 = vtanh.f32 %v12378_v51 }
0x12cb   :  { %15525 = vtanh.f32 %v12379_v58 }
0x12cd   :  { %v15512_v25 = vpop.eup %15511 }
0x12ce   :  { %v12395_v7 = vmul.f32 %v15512_v25, %v13857_v28 }
0x12cf   :  { %v15514_v59 = vpop.eup %15513 }
0x12d0   :  { %v15516_v54 = vpop.eup %15515  ;;  %12403 = vadd.xlane.f32.xlu0 %v12395_v7  ;;  %v12397_v57 = vmul.f32 %v15514_v59, %v13857_v28 }
0x12d1   :  { %v15518_v62 = vpop.eup %15517  ;;  %v12396_v18 = vmul.f32 %v15516_v54, %v13857_v28 }
0x12d2   :  { %12407 = vadd.xlane.f32.xlu1 %v12397_v57  ;;  %v15520_v10 = vpop.eup %15519  ;;  %v12398_v61 = vmul.f32 %v15518_v62, %v13857_v28 }
0x12d3   :  { %v15522_v37 = vpop.eup %15521  ;;  %v12399_v5 = vmul.f32 %v15520_v10, %v13857_v28 }
0x12d4   :  { %12405 = vadd.xlane.f32.xlu0 %v12396_v18  ;;  %v15524_v2 = vpop.eup %15523  ;;  %v12400_v55 = vmul.f32 %v15522_v37, %v13857_v28 }
0x12d5   :  { %v15526_v48 = vpop.eup %15525  ;;  %v12401_v30 = vmul.f32 %v15524_v2, %v13857_v28 }
0x12d6   :  { %12409 = vadd.xlane.f32.xlu1 %v12398_v61  ;;  %v12402_v40 = vmul.f32 %v15526_v48, %v13857_v28 }
0x12d8   :  { %12411 = vadd.xlane.f32.xlu0 %v12399_v5 }
0x12da   :  { %12413 = vadd.xlane.f32.xlu1 %v12400_v55 }
0x12dc   :  { %12415 = vadd.xlane.f32.xlu0 %v12401_v30 }
0x12de   :  { %12417 = vadd.xlane.f32.xlu1 %v12402_v40 }
0x135d   :  { %v12404_v38 = vpop.xlane.xlu0 %12403 }
0x135e   :  { %v12421_v4 = vadd.f32 %v12420_v63, %v12404_v38 }
0x135f   :  { %v12408_v42 = vpop.xlane.xlu1 %12407 }
0x1360   :  { %v12423_v26 = vadd.f32 %v12420_v63, %v12408_v42  ;;  %v12445_v39 = vrot.slane %v12421_v4, %v12444_v12 }
0x1361   :  { %v12406_v45 = vpop.xlane.xlu0 %12405 }
0x1362   :  { %v12422_v1 = vadd.f32 %v12420_v63, %v12406_v45  ;;  %v12453_v33 = vrot.slane %v12423_v26, %v12444_v12 }
0x1363   :  { %v12410_v9 = vpop.xlane.xlu1 %12409 }
0x1364   :  { %v12449_v24 = vrot.slane %v12422_v1, %v12444_v12  ;;  %v12424_v27 = vadd.f32 %v12420_v63, %v12410_v9 }
0x1365   :  { %v12412_v56 = vpop.xlane.xlu0 %12411 }
0x1366   :  { %v12475_v53 = vsel %vm12474_vm0, %v12449_v24, %v12445_v39  ;;  %v12457_v41 = vrot.slane %v12424_v27, %v12444_v12  ;;  %v12425_v21 = vadd.f32 %v12420_v63, %v12412_v56 }
0x1367   :  { %v12477_v23 = vsel %vm12476_vm1, %v12453_v33, %v12475_v53  ;;  %v12414_v52 = vpop.xlane.xlu1 %12413 }
0x1368   :  { %v12479_v8 = vsel %vm12478_vm2, %v12457_v41, %v12477_v23  ;;  %v12461_v0 = vrot.slane %v12425_v21, %v12444_v12  ;;  %v12426_v20 = vadd.f32 %v12420_v63, %v12414_v52 }
0x1369   :  { %v12416_v11 = vpop.xlane.xlu0 %12415 }
0x136a   :  { %v12481_v60 = vsel %vm12480_vm3, %v12461_v0, %v12479_v8  ;;  %v12465_v19 = vrot.slane %v12426_v20, %v12444_v12  ;;  %v12427_v31 = vadd.f32 %v12420_v63, %v12416_v11 }
0x136b   :  { %v12418_v29 = vpop.xlane.xlu1 %12417 }
0x136c   :  { %v12483_v3 = vsel %vm12482_vm4, %v12465_v19, %v12481_v60  ;;  %v12469_v14 = vrot.slane %v12427_v31, %v12444_v12  ;;  %v12428_v13 = vadd.f32 %v12420_v63, %v12418_v29 }
0x136e   :  { %v12485_v16 = vsel %vm12484_vm5, %v12469_v14, %v12483_v3  ;;  %v12473_v32 = vrot.slane %v12428_v13, %v12444_v12 }
0x1370   :  { %v12487_v43 = vsel %vm12486_vm6, %v12473_v32, %v12485_v16 }
0x1371   :  { %v12489_v44 = vsel %vm12433_vm7, -inf, %v12487_v43 }
0x1372   :  { %12491 = vst.msk [vmem:[#allocation15] sm:$0xff] %vm12490_vm8, %v12489_v44 }
0x1373   :  { %15656 = shalt.err (!%p15653_p8)
}
0x1374   :  { %s15657_s14 = scalar_lea.hbm %s18319_s13, 128 }
0x1375   :  { %p15658_p9 = scmp.ne.s32.totalorder %s18319_s13, %s15657_s14  ;;  %p15661_p10 = scmp.lt.u32.totalorder %s15657_s14, %s18319_s13 }
0x1377   :  { %p15663_p11 = pnand %p15661_p10, %p15658_p9 }
0x1379   :  { %15666 = shalt.err (!%p15663_p11)
}
0x137a   :  { %12501 = dma.vmem_to_hbm [thread:$0]  %s12499_s27, 128, %s18319_s13, [#allocation9]  }
0x137b   :  { %15673 = dma.done.wait [#allocation9], 128  }
0x137c   :  { %15674 = vsyncadd [#allocation9], 4294967168 }
0x137d   :  { %12505 = vsyncpa [#allocation8], 1 }
0x137e   :  { %12506 = vsyncpa [#allocation11], 1 }
0x137f   :  { %12507 = vsyncpa [#allocation14], 1 }
0x1380   :  { %12508 = vsyncpa [#allocation9], 1 }

</bundles_post_ra>
